<compile_context>
chip_gen: v6e
topology: v6e:2x2x1
jax: 0.10.0
libtpu: 0.0.40
codegen_flags: <defaults>
</compile_context>

<pallas_src>
import math
import functools

import numpy as np
import jax
import jax.numpy as jnp
from jax import lax
from jax.experimental import pallas as pl
from jax.experimental.pallas import tpu as pltpu

NEG_INF = -1e9
LN_EPS = 1e-6


# ----------------------------------------------------------------------------
# In-kernel helpers (traced inside the fused kernels)
# ----------------------------------------------------------------------------
def _layer_norm(x, g, b, eps):
    # torch reference semantics: gamma * (x - mean) / (unbiased_std + eps) + beta
    n = x.shape[-1]
    mean = jnp.mean(x, axis=-1, keepdims=True)
    var = jnp.sum((x - mean) ** 2, axis=-1, keepdims=True) / (n - 1)
    return g * (x - mean) / (jnp.sqrt(var) + eps) + b


def _dot_t(a, b):
    # a @ b.T without materializing a transpose: contract the last dims of both.
    return lax.dot_general(a, b, (((a.ndim - 1,), (b.ndim - 1,)), ((), ())),
                           preferred_element_type=jnp.float32)


def _mha(q, k, v, keep, wo, bo, heads, d_k):
    """q:(Sq,D) k,v:(Sk,D) bf16; keep:(...,Sk) bool; wo:(D,D) bf16; bo:(1,D) f32.

    Output projection folded per head:
      concat_h(o_h) @ Wo == sum_h o_h @ Wo[h*dk:(h+1)*dk].
    """
    scale = 1.0 / math.sqrt(d_k)
    acc = None
    for h in range(heads):
        sl = slice(h * d_k, (h + 1) * d_k)
        s = _dot_t(q[:, sl], k[:, sl]) * scale           # f32 (Sq, Sk)
        s = jnp.where(keep, s, NEG_INF)                  # masked_fill semantics
        m = jnp.max(s, axis=-1, keepdims=True)
        e = jnp.exp(s - m)
        p = e * pl.reciprocal(jnp.sum(e, axis=-1, keepdims=True), approx=True)
        oh = jnp.dot(p.astype(jnp.bfloat16), v[:, sl],
                     preferred_element_type=jnp.float32)
        term = jnp.dot(oh.astype(jnp.bfloat16), wo[sl, :],
                       preferred_element_type=jnp.float32)
        acc = term if acc is None else acc + term
    return acc + bo


# ----------------------------------------------------------------------------
# Fused encoder stack: ONE pallas_call, grid = (batch, layers)
# ----------------------------------------------------------------------------
def _encoder_stack_kernel(x_ref, mask_ref,
                          ln1g, ln1b, ln2g, ln2b,
                          wqkv, bqkv, wo, bo,
                          w1, b1, w2, b2,
                          o_ref, act_ref, *, heads, d_k, d_model, eps):
    D = d_model
    l = pl.program_id(1)

    @pl.when(l == 0)
    def _():
        act_ref[...] = x_ref[0]                      # load activation once per batch

    x = act_ref[...]                                 # (S, D) f32, carried over layers
    keep = mask_ref[0] != 0                          # (1, S) bool

    # pre-LN self-attention with fused QKV projection
    xn = _layer_norm(x, ln1g[0], ln1b[0], eps)
    qkv = jnp.dot(xn.astype(jnp.bfloat16), wqkv[0],
                  preferred_element_type=jnp.float32) + bqkv[0]
    qkv_b = qkv.astype(jnp.bfloat16)
    attn = _mha(qkv_b[:, :D], qkv_b[:, D:2 * D], qkv_b[:, 2 * D:],
                keep, wo[0], bo[0], heads, d_k)
    x = x + attn

    # feed-forward; (S, d_ff) intermediate never leaves VMEM
    xn2 = _layer_norm(x, ln2g[0], ln2b[0], eps)
    h = jnp.dot(xn2.astype(jnp.bfloat16), w1[0],
                preferred_element_type=jnp.float32) + b1[0]
    h = jnp.maximum(h, 0.0)
    ff = jnp.dot(h.astype(jnp.bfloat16), w2[0],
                 preferred_element_type=jnp.float32) + b2[0]
    x = x + ff

    act_ref[...] = x

    @pl.when(l == pl.num_programs(1) - 1)
    def _():
        o_ref[0] = x                                 # single HBM writeback per batch


def encoder_stack(p, x, src_mask, heads):
    bs, S, D = x.shape
    L = p["w_qkv"].shape[0]
    d_k = D // heads

    def wspec(a):
        nd = a.ndim
        return pl.BlockSpec((1,) + a.shape[1:], lambda b, l: (l,) + (0,) * (nd - 1))

    names = ["ln1_g", "ln1_b", "ln2_g", "ln2_b",
             "w_qkv", "b_qkv", "w_o", "b_o",
             "w1", "b1", "w2", "b2"]
    weights = [p[n] for n in names]

    return pl.pallas_call(
        functools.partial(_encoder_stack_kernel, heads=heads, d_k=d_k,
                          d_model=D, eps=LN_EPS),
        out_shape=jax.ShapeDtypeStruct((bs, S, D), jnp.float32),
        grid=(bs, L),
        in_specs=[pl.BlockSpec((1, S, D), lambda b, l: (b, 0, 0)),
                  pl.BlockSpec((1, 1, S), lambda b, l: (b, 0, 0))]
                 + [wspec(a) for a in weights],
        out_specs=pl.BlockSpec((1, S, D), lambda b, l: (b, 0, 0)),
        scratch_shapes=[pltpu.VMEM((S, D), jnp.float32)],
        compiler_params=pltpu.CompilerParams(
            dimension_semantics=("parallel", "arbitrary")),
    )(x, src_mask, *weights)


# ----------------------------------------------------------------------------
# Fused decoder stack + ReWritter head: ONE pallas_call, grid = (batch, layers)
# ----------------------------------------------------------------------------
def _decoder_stack_kernel(tgt_ref, src_ref, smask_ref, tmask_ref, seg_ref, tm_ref,
                          ln1g, ln1b, ln2g, ln2b, ln3g, ln3b, ln4g, ln4b,
                          wqkv1, bqkv1, wo1, bo1,
                          wqhu, bqhu, wkvhu, bkvhu,
                          woh, boh, wou, bou,
                          w1h, w1u, b1, w2, b2,
                          wd, wh, wu,
                          o_ref, act_ref, *, heads, d_k, d_model, eps):
    D = d_model
    l = pl.program_id(1)

    @pl.when(l == 0)
    def _():
        act_ref[...] = tgt_ref[0]

    q_in = act_ref[...]                              # (T, D)
    src = src_ref[0]                                 # (S, D)
    smask = smask_ref[0]                             # (1, S) int32
    tmask = tmask_ref[0]                             # (T, T) int32
    seg = seg_ref[0]                                 # (1, S) int32

    # masked self-attention (pre-LN, fused QKV)
    qn = _layer_norm(q_in, ln1g[0], ln1b[0], eps)
    qkv = jnp.dot(qn.astype(jnp.bfloat16), wqkv1[0],
                  preferred_element_type=jnp.float32) + bqkv1[0]
    qkv_b = qkv.astype(jnp.bfloat16)
    attn1 = _mha(qkv_b[:, :D], qkv_b[:, D:2 * D], qkv_b[:, 2 * D:],
                 tmask != 0, wo1[0], bo1[0], heads, d_k)
    m = q_in + attn1
    mn = _layer_norm(m, ln2g[0], ln2b[0], eps)

    # fused cross projections: Q for both branches from mn, K/V for both from src
    q_hu = jnp.dot(mn.astype(jnp.bfloat16), wqhu[0],
                   preferred_element_type=jnp.float32) + bqhu[0]      # (T, 2D)
    kv_hu = jnp.dot(src.astype(jnp.bfloat16), wkvhu[0],
                    preferred_element_type=jnp.float32) + bkvhu[0]    # (S, 4D)
    q_hu_b = q_hu.astype(jnp.bfloat16)
    kv_hu_b = kv_hu.astype(jnp.bfloat16)

    keep_h = jnp.logical_and(smask != 0, seg == 0)
    attn_h = _mha(q_hu_b[:, :D], kv_hu_b[:, :D], kv_hu_b[:, D:2 * D],
                  keep_h, woh[0], boh[0], heads, d_k)
    c_h = _layer_norm(m + attn_h, ln3g[0], ln3b[0], eps)

    keep_u = jnp.logical_and(smask != 0, seg == 1)
    attn_u = _mha(q_hu_b[:, D:], kv_hu_b[:, 2 * D:3 * D], kv_hu_b[:, 3 * D:],
                  keep_u, wou[0], bou[0], heads, d_k)
    c_u = _layer_norm(m + attn_u, ln4g[0], ln4b[0], eps)

    # FeedForward over concat([c_h, c_u], -1) without materializing the concat
    h = (jnp.dot(c_h.astype(jnp.bfloat16), w1h[0], preferred_element_type=jnp.float32)
         + jnp.dot(c_u.astype(jnp.bfloat16), w1u[0], preferred_element_type=jnp.float32)
         + b1[0])
    h = jnp.maximum(h, 0.0)
    d_out = jnp.dot(h.astype(jnp.bfloat16), w2[0],
                    preferred_element_type=jnp.float32) + b2[0]

    act_ref[...] = d_out

    # ReWritter head fused into the last layer's grid step
    @pl.when(l == pl.num_programs(1) - 1)
    def _():
        r_pre = (jnp.dot(d_out, wd[...], preferred_element_type=jnp.float32)
                 + jnp.dot(c_h, wh[...], preferred_element_type=jnp.float32)
                 + jnp.dot(c_u, wu[...], preferred_element_type=jnp.float32))   # (T, 1)
        ratio = pl.reciprocal(1.0 + jnp.exp(-r_pre), approx=True)                # sigmoid
        scores = _dot_t(d_out, src)                                              # (T, S)
        flag_h = (seg == 0).astype(jnp.float32)                                  # (1, S)
        flag_u = (seg == 1).astype(jnp.float32)
        # bmm((T,1),(1,S)) is an outer product == broadcast multiply
        mix = ratio * flag_h + (1.0 - ratio) * flag_u                            # (T, S)
        o_ref[0] = jnp.dot(mix * scores, tm_ref[0],
                           preferred_element_type=jnp.float32)


def decoder_stack_and_head(p, head_p, tgt, src, src_mask, tgt_mask, seg3,
                           transform_matrix, heads):
    bs, T, D = tgt.shape
    S = src.shape[1]
    L = p["w_qkv1"].shape[0]
    d_k = D // heads

    def wspec(a):
        nd = a.ndim
        return pl.BlockSpec((1,) + a.shape[1:], lambda b, l: (l,) + (0,) * (nd - 1))

    def cspec(a):  # grid-invariant small head weights
        nd = a.ndim
        return pl.BlockSpec(a.shape, lambda b, l: (0,) * nd)

    names = ["ln1_g", "ln1_b", "ln2_g", "ln2_b", "ln3_g", "ln3_b", "ln4_g", "ln4_b",
             "w_qkv1", "b_qkv1", "w_o1", "b_o1",
             "w_q_hu", "b_q_hu", "w_kv_hu", "b_kv_hu",
             "w_o_h", "b_o_h", "w_o_u", "b_o_u",
             "w1_h", "w1_u", "b1", "w2", "b2"]
    weights = [p[n] for n in names]
    head_w = [head_p["w_d"], head_p["w_h"], head_p["w_u"]]

    return pl.pallas_call(
        functools.partial(_decoder_stack_kernel, heads=heads, d_k=d_k,
                          d_model=D, eps=LN_EPS),
        out_shape=jax.ShapeDtypeStruct((bs, T, S), jnp.float32),
        grid=(bs, L),
        in_specs=[pl.BlockSpec((1, T, D), lambda b, l: (b, 0, 0)),      # tgt
                  pl.BlockSpec((1, S, D), lambda b, l: (b, 0, 0)),      # src (enc out)
                  pl.BlockSpec((1, 1, S), lambda b, l: (b, 0, 0)),      # src_mask
                  pl.BlockSpec((1, T, T), lambda b, l: (b, 0, 0)),      # tgt_mask
                  pl.BlockSpec((1, 1, S), lambda b, l: (b, 0, 0)),      # segment_type
                  pl.BlockSpec((1, S, S), lambda b, l: (b, 0, 0))]      # transform_matrix
                 + [wspec(a) for a in weights]
                 + [cspec(a) for a in head_w],
        out_specs=pl.BlockSpec((1, T, S), lambda b, l: (b, 0, 0)),
        scratch_shapes=[pltpu.VMEM((T, D), jnp.float32)],
        compiler_params=pltpu.CompilerParams(
            dimension_semantics=("parallel", "arbitrary")),
    )(tgt, src, src_mask, tgt_mask, seg3, transform_matrix, *weights, *head_w)


# ----------------------------------------------------------------------------
# Embedding + masks (plain JAX glue)
# ----------------------------------------------------------------------------
def make_positional_encoding(d_model, max_seq_len=100):
    pe = np.zeros((max_seq_len, d_model), dtype=np.float32)
    for pos in range(max_seq_len):
        for i in range(0, d_model, 2):
            pe[pos, i] = math.sin(pos / 10000 ** (2 * i / d_model))
            pe[pos, i + 1] = math.cos(pos / 10000 ** (2 * (i + 1) / d_model))
    return jnp.asarray(pe)


def embed(params, ids, turns):
    # TODO(synk): token/turn embedding lookups are data-dependent gathers with no clean
    # BlockSpec form at this size; they run in plain JAX, everything downstream is Pallas.
    d_model = params["tok_emb"].shape[1]
    seq_len = ids.shape[1]
    e1 = jnp.take(params["tok_emb"], ids, axis=0) * math.sqrt(d_model)
    e1 = e1 + params["pe"][:seq_len][None, :, :]
    e2 = jnp.take(params["turn_emb"], turns, axis=0)
    return e1 + e2


def compute_masks(src_seqs, tgt_seqs):
    src_mask = (src_seqs != 0)[:, None, :].astype(jnp.int32)                    # (B, 1, S)
    T = tgt_seqs.shape[1]
    nopeak = jnp.tril(jnp.ones((T, T), dtype=jnp.int32))                         # triu(k=1)==0
    tgt_mask = (tgt_seqs != 0)[:, None, :].astype(jnp.int32) * nopeak[None, :, :]  # (B, T, T)
    return src_mask, tgt_mask


# ----------------------------------------------------------------------------
# Full forward
# ----------------------------------------------------------------------------
def rewritter_forward(params, src_seqs, tgt_seqs, src_turns, tgt_turns,
                      segment_type, transform_matrix, heads):
    src = embed(params, src_seqs, src_turns)
    tgt = embed(params, tgt_seqs, tgt_turns)
    src_mask, tgt_mask = compute_masks(src_seqs, tgt_seqs)
    seg3 = segment_type[:, None, :].astype(jnp.int32)                            # (B, 1, S)

    src = encoder_stack(params["encoders"], src, src_mask, heads)
    logits = decoder_stack_and_head(params["decoders"], params, tgt, src,
                                    src_mask, tgt_mask, seg3, transform_matrix, heads)
    return logits


# ----------------------------------------------------------------------------
# Deterministic parameter initialization (PyTorch Linear-style uniform init),
# with fused / pre-split / bf16-cast weights built once at init time and the
# per-layer dicts stacked along a leading layer axis for the fused stacks.
# ----------------------------------------------------------------------------
def init_linear(key, d_in, d_out):
    k1, k2 = jax.random.split(key)
    bound = 1.0 / math.sqrt(d_in)
    w = jax.random.uniform(k1, (d_in, d_out), jnp.float32, -bound, bound)
    b = jax.random.uniform(k2, (1, d_out), jnp.float32, -bound, bound)
    return w, b


def _ln_params(d):
    return jnp.ones((1, d), jnp.float32), jnp.zeros((1, d), jnp.float32)


def _bf16(w):
    return w.astype(jnp.bfloat16)


def init_encoder_layer(key, d_model, d_ff):
    ks = jax.random.split(key, 6)
    wq, bq = init_linear(ks[0], d_model, d_model)
    wk, bk = init_linear(ks[1], d_model, d_model)
    wv, bv = init_linear(ks[2], d_model, d_model)
    wo, bo = init_linear(ks[3], d_model, d_model)
    w1, b1 = init_linear(ks[4], d_model, d_ff)
    w2, b2 = init_linear(ks[5], d_ff, d_model)
    g1, be1 = _ln_params(d_model)
    g2, be2 = _ln_params(d_model)
    return dict(
        ln1_g=g1, ln1_b=be1, ln2_g=g2, ln2_b=be2,
        w_qkv=_bf16(jnp.concatenate([wq, wk, wv], axis=1)),
        b_qkv=jnp.concatenate([bq, bk, bv], axis=1),
        w_o=_bf16(wo), b_o=bo,
        w1=_bf16(w1), b1=b1, w2=_bf16(w2), b2=b2,
    )


def init_decoder_layer(key, d_model, d_ff):
    ks = jax.random.split(key, 14)
    wq1, bq1 = init_linear(ks[0], d_model, d_model)
    wk1, bk1 = init_linear(ks[1], d_model, d_model)
    wv1, bv1 = init_linear(ks[2], d_model, d_model)
    wo1, bo1 = init_linear(ks[3], d_model, d_model)
    wqh, bqh = init_linear(ks[4], d_model, d_model)
    wkh, bkh = init_linear(ks[5], d_model, d_model)
    wvh, bvh = init_linear(ks[6], d_model, d_model)
    woh, boh = init_linear(ks[7], d_model, d_model)
    wqu, bqu = init_linear(ks[8], d_model, d_model)
    wku, bku = init_linear(ks[9], d_model, d_model)
    wvu, bvu = init_linear(ks[10], d_model, d_model)
    wou, bou = init_linear(ks[11], d_model, d_model)
    w1, b1 = init_linear(ks[12], 2 * d_model, d_ff)
    w2, b2 = init_linear(ks[13], d_ff, d_model)
    g1, be1 = _ln_params(d_model)
    g2, be2 = _ln_params(d_model)
    g3, be3 = _ln_params(d_model)
    g4, be4 = _ln_params(d_model)
    return dict(
        ln1_g=g1, ln1_b=be1, ln2_g=g2, ln2_b=be2,
        ln3_g=g3, ln3_b=be3, ln4_g=g4, ln4_b=be4,
        w_qkv1=_bf16(jnp.concatenate([wq1, wk1, wv1], axis=1)),
        b_qkv1=jnp.concatenate([bq1, bk1, bv1], axis=1),
        w_o1=_bf16(wo1), b_o1=bo1,
        w_q_hu=_bf16(jnp.concatenate([wqh, wqu], axis=1)),
        b_q_hu=jnp.concatenate([bqh, bqu], axis=1),
        w_kv_hu=_bf16(jnp.concatenate([wkh, wvh, wku, wvu], axis=1)),   # (D, 4D) lane-dense
        b_kv_hu=jnp.concatenate([bkh, bvh, bku, bvu], axis=1),
        w_o_h=_bf16(woh), b_o_h=boh, w_o_u=_bf16(wou), b_o_u=bou,
        w1_h=_bf16(w1[:d_model, :]), w1_u=_bf16(w1[d_model:, :]), b1=b1,
        w2=_bf16(w2), b2=b2,
    )


def _stack_layers(layer_dicts):
    return jax.tree_util.tree_map(lambda *xs: jnp.stack(xs, axis=0), *layer_dicts)


def init_model(key, vocab_size, d_model, layers, d_ff=2048, max_seq_len=100):
    ks = jax.random.split(key, 2 * layers + 5)
    init_range = 0.5 / d_model
    tok = jax.random.uniform(ks[0], (vocab_size, d_model), jnp.float32, -init_range, init_range)
    # matches the reference's Embedding init verbatim (upper bound 0.5 / init_range)
    turn = jax.random.uniform(ks[1], (4, d_model), jnp.float32, -init_range, 0.5 / init_range)
    w_d = jax.random.normal(ks[2], (d_model, 1), jnp.float32)
    w_h = jax.random.normal(ks[3], (d_model, 1), jnp.float32)
    w_u = jax.random.normal(ks[4], (d_model, 1), jnp.float32)
    encs = _stack_layers([init_encoder_layer(ks[5 + i], d_model, d_ff) for i in range(layers)])
    decs = _stack_layers([init_decoder_layer(ks[5 + layers + i], d_model, d_ff)
                          for i in range(layers)])
    return dict(tok_emb=tok, turn_emb=turn,
                pe=make_positional_encoding(d_model, max_seq_len),
                w_d=w_d, w_h=w_h, w_u=w_u,
                encoders=encs, decoders=decs)


# ----------------------------------------------------------------------------
if __name__ == "__main__":
    vocab_size, d_model, heads, layers = 50, 32, 4, 2
    bs, S, T = 2, 8, 8
    d_ff = 2048  # FeedForward default inside the module

    root = jax.random.PRNGKey(0)
    kp, k1, k2, k3, k4, k5 = jax.random.split(root, 6)

    params = init_model(kp, vocab_size, d_model, layers, d_ff)

    src_seqs = jax.random.randint(k1, (bs, S), 1, vocab_size)
    src_seqs = src_seqs.at[1, -1].set(0)          # one padded position in batch 1
    tgt_seqs = jax.random.randint(k2, (bs, T), 1, vocab_size)
    tgt_seqs = tgt_seqs.at[1, -1].set(0)
    src_turns = jax.random.randint(k3, (bs, S), 0, 4)
    tgt_turns = jax.random.randint(k4, (bs, T), 0, 4)
    segment_type = jnp.tile(jnp.array([0, 1], jnp.int32), S // 2)[None].repeat(bs, axis=0)
    transform_matrix = jax.random.normal(k5, (bs, S, S), jnp.float32)

    fwd = jax.jit(functools.partial(rewritter_forward, heads=heads))
    logits = fwd(params, src_seqs, tgt_seqs, src_turns, tgt_turns,
                 segment_type, transform_matrix)
    jax.block_until_ready(logits)

    assert logits.shape == (bs, T, S)
    assert bool(jnp.all(jnp.isfinite(logits)))
    print("KERNEL_OK")
</pallas_src>

<mosaic_0001>
module attributes {stable_mosaic.version = 11 : i64} {
  func.func @_encoder_stack_kernel(%arg0: i32, %arg1: i32, %arg2: memref<1x8x32xf32, #tpu.memory_space<vmem>>, %arg3: memref<1x1x8xi32, #tpu.memory_space<vmem>>, %arg4: memref<1x1x32xf32, #tpu.memory_space<vmem>>, %arg5: memref<1x1x32xf32, #tpu.memory_space<vmem>>, %arg6: memref<1x1x32xf32, #tpu.memory_space<vmem>>, %arg7: memref<1x1x32xf32, #tpu.memory_space<vmem>>, %arg8: memref<1x32x96xbf16, #tpu.memory_space<vmem>>, %arg9: memref<1x1x96xf32, #tpu.memory_space<vmem>>, %arg10: memref<1x32x32xbf16, #tpu.memory_space<vmem>>, %arg11: memref<1x1x32xf32, #tpu.memory_space<vmem>>, %arg12: memref<1x32x2048xbf16, #tpu.memory_space<vmem>>, %arg13: memref<1x1x2048xf32, #tpu.memory_space<vmem>>, %arg14: memref<1x2048x32xbf16, #tpu.memory_space<vmem>>, %arg15: memref<1x1x32xf32, #tpu.memory_space<vmem>>, %arg16: memref<1x8x32xf32, #tpu.memory_space<vmem>>, %arg17: memref<8x32xf32, #tpu.memory_space<vmem>>) attributes {dimension_semantics = [#tpu.dimension_semantics<parallel>, #tpu.dimension_semantics<arbitrary>], iteration_bounds = array<i64: 2, 2>, scalar_prefetch = 0 : i64, scratch_operands = 1 : i64, tpu.core_type = #tpu.core_type<tc>, window_params = [{transform_indices = @transform_0, window_bounds = array<i64: 1, 8, 32>}, {transform_indices = @transform_1, window_bounds = array<i64: 1, 1, 8>}, {transform_indices = @transform_2, window_bounds = array<i64: 1, 1, 32>}, {transform_indices = @transform_3, window_bounds = array<i64: 1, 1, 32>}, {transform_indices = @transform_4, window_bounds = array<i64: 1, 1, 32>}, {transform_indices = @transform_5, window_bounds = array<i64: 1, 1, 32>}, {transform_indices = @transform_6, window_bounds = array<i64: 1, 32, 96>}, {transform_indices = @transform_7, window_bounds = array<i64: 1, 1, 96>}, {transform_indices = @transform_8, window_bounds = array<i64: 1, 32, 32>}, {transform_indices = @transform_9, window_bounds = array<i64: 1, 1, 32>}, {transform_indices = @transform_10, window_bounds = array<i64: 1, 32, 2048>}, {transform_indices = @transform_11, window_bounds = array<i64: 1, 1, 2048>}, {transform_indices = @transform_12, window_bounds = array<i64: 1, 2048, 32>}, {transform_indices = @transform_13, window_bounds = array<i64: 1, 1, 32>}, {transform_indices = @transform_14, window_bounds = array<i64: 1, 8, 32>}]} {
    %c0_i32 = arith.constant 0 : i32
    %0 = arith.cmpi eq, %arg1, %c0_i32 : i32
    %1 = arith.extui %0 : i1 to i32
    %c0_i32_0 = arith.constant 0 : i32
    %2 = arith.cmpi ne, %1, %c0_i32_0 : i32
    scf.if %2 {
      %c0_86 = arith.constant 0 : index
      %c0_87 = arith.constant 0 : index
      %c0_88 = arith.constant 0 : index
      %205 = vector.load %arg2[%c0_86, %c0_87, %c0_88] : memref<1x8x32xf32, #tpu.memory_space<vmem>>, vector<1x8x32xf32>
      %206 = vector.shape_cast %205 : vector<1x8x32xf32> to vector<8x32xf32>
      %c0_89 = arith.constant 0 : index
      %c0_90 = arith.constant 0 : index
      %207 = vector.load %arg17[%c0_89, %c0_90] : memref<8x32xf32, #tpu.memory_space<vmem>>, vector<8x32xf32>
      tpu.vector_store %arg17[%c0_89, %c0_90], %206 {strides = array<i32>} : memref<8x32xf32, #tpu.memory_space<vmem>>, vector<8x32xf32>,
    } else {
    }
    %c0 = arith.constant 0 : index
    %c0_1 = arith.constant 0 : index
    %3 = vector.load %arg17[%c0, %c0_1] : memref<8x32xf32, #tpu.memory_space<vmem>>, vector<8x32xf32>
    %c0_2 = arith.constant 0 : index
    %c0_3 = arith.constant 0 : index
    %c0_4 = arith.constant 0 : index
    %4 = vector.load %arg3[%c0_2, %c0_3, %c0_4] : memref<1x1x8xi32, #tpu.memory_space<vmem>>, vector<1x1x8xi32>
    %5 = vector.shape_cast %4 : vector<1x1x8xi32> to vector<1x8xi32>
    %c0_i32_5 = arith.constant 0 : i32
    %6 = vector.broadcast %c0_i32_5 : i32 to vector<1x8xi32>
    %7 = arith.cmpi ne, %5, %6 : vector<1x8xi32>
    %c0_6 = arith.constant 0 : index
    %c0_7 = arith.constant 0 : index
    %c0_8 = arith.constant 0 : index
    %8 = vector.load %arg4[%c0_6, %c0_7, %c0_8] : memref<1x1x32xf32, #tpu.memory_space<vmem>>, vector<1x1x32xf32>
    %9 = vector.shape_cast %8 : vector<1x1x32xf32> to vector<1x32xf32>
    %c0_9 = arith.constant 0 : index
    %c0_10 = arith.constant 0 : index
    %c0_11 = arith.constant 0 : index
    %10 = vector.load %arg5[%c0_9, %c0_10, %c0_11] : memref<1x1x32xf32, #tpu.memory_space<vmem>>, vector<1x1x32xf32>
    %11 = vector.shape_cast %10 : vector<1x1x32xf32> to vector<1x32xf32>
    %cst = arith.constant dense<0.000000e+00> : vector<8xf32>
    %12 = vector.multi_reduction <add>, %3, %cst [1] : vector<8x32xf32> to vector<8xf32>
    %13 = vector.shape_cast %12 : vector<8xf32> to vector<8x1xf32>
    %cst_12 = arith.constant 3.200000e+01 : f32
    %14 = vector.broadcast %cst_12 : f32 to vector<8x1xf32>
    %15 = arith.divf %13, %14 : vector<8x1xf32>
    %16 = vector.broadcast %15 : vector<8x1xf32> to vector<8x32xf32>
    %17 = arith.subf %3, %16 : vector<8x32xf32>
    %18 = arith.mulf %17, %17 : vector<8x32xf32>
    %cst_13 = arith.constant dense<0.000000e+00> : vector<8xf32>
    %19 = vector.multi_reduction <add>, %18, %cst_13 [1] : vector<8x32xf32> to vector<8xf32>
    %20 = vector.shape_cast %19 : vector<8xf32> to vector<8x1xf32>
    %cst_14 = arith.constant 3.100000e+01 : f32
    %21 = vector.broadcast %cst_14 : f32 to vector<8x1xf32>
    %22 = arith.divf %20, %21 : vector<8x1xf32>
    %23 = vector.broadcast %15 : vector<8x1xf32> to vector<8x32xf32>
    %24 = arith.subf %3, %23 : vector<8x32xf32>
    %25 = vector.broadcast %9 : vector<1x32xf32> to vector<8x32xf32>
    %26 = arith.mulf %25, %24 : vector<8x32xf32>
    %27 = math.sqrt %22 : vector<8x1xf32>
    %cst_15 = arith.constant 9.99999997E-7 : f32
    %28 = vector.broadcast %cst_15 : f32 to vector<8x1xf32>
    %29 = arith.addf %27, %28 : vector<8x1xf32>
    %30 = vector.broadcast %29 : vector<8x1xf32> to vector<8x32xf32>
    %31 = arith.divf %26, %30 : vector<8x32xf32>
    %32 = vector.broadcast %11 : vector<1x32xf32> to vector<8x32xf32>
    %33 = arith.addf %31, %32 : vector<8x32xf32>
    %34 = arith.truncf %33 : vector<8x32xf32> to vector<8x32xbf16>
    %c0_16 = arith.constant 0 : index
    %c0_17 = arith.constant 0 : index
    %c0_18 = arith.constant 0 : index
    %35 = vector.load %arg8[%c0_16, %c0_17, %c0_18] : memref<1x32x96xbf16, #tpu.memory_space<vmem>>, vector<1x32x96xbf16>
    %36 = vector.shape_cast %35 : vector<1x32x96xbf16> to vector<32x96xbf16>
    %cst_19 = arith.constant dense<0.000000e+00> : vector<8x96xf32>
    %37 = tpu.matmul %34, %36, %cst_19 {dimension_numbers = #tpu.dot_dimension_numbers<[1], [0], [0], [1], [0, 0, 1, 1], [], []>} : vector<8x32xbf16>, vector<32x96xbf16>, vector<8x96xf32> -> vector<8x96xf32>
    %c0_20 = arith.constant 0 : index
    %c0_21 = arith.constant 0 : index
    %c0_22 = arith.constant 0 : index
    %38 = vector.load %arg9[%c0_20, %c0_21, %c0_22] : memref<1x1x96xf32, #tpu.memory_space<vmem>>, vector<1x1x96xf32>
    %39 = vector.shape_cast %38 : vector<1x1x96xf32> to vector<1x96xf32>
    %40 = vector.broadcast %39 : vector<1x96xf32> to vector<8x96xf32>
    %41 = arith.addf %37, %40 : vector<8x96xf32>
    %42 = arith.truncf %41 : vector<8x96xf32> to vector<8x96xbf16>
    %43 = vector.extract_strided_slice %42 {offsets = [0, 0], sizes = [8, 32], strides = [1, 1]} : vector<8x96xbf16> to vector<8x32xbf16>
    %44 = vector.extract_strided_slice %42 {offsets = [0, 32], sizes = [8, 32], strides = [1, 1]} : vector<8x96xbf16> to vector<8x32xbf16>
    %45 = vector.extract_strided_slice %42 {offsets = [0, 64], sizes = [8, 32], strides = [1, 1]} : vector<8x96xbf16> to vector<8x32xbf16>
    %c0_23 = arith.constant 0 : index
    %c0_24 = arith.constant 0 : index
    %c0_25 = arith.constant 0 : index
    %46 = vector.load %arg10[%c0_23, %c0_24, %c0_25] : memref<1x32x32xbf16, #tpu.memory_space<vmem>>, vector<1x32x32xbf16>
    %47 = vector.shape_cast %46 : vector<1x32x32xbf16> to vector<32x32xbf16>
    %c0_26 = arith.constant 0 : index
    %c0_27 = arith.constant 0 : index
    %c0_28 = arith.constant 0 : index
    %48 = vector.load %arg11[%c0_26, %c0_27, %c0_28] : memref<1x1x32xf32, #tpu.memory_space<vmem>>, vector<1x1x32xf32>
    %49 = vector.shape_cast %48 : vector<1x1x32xf32> to vector<1x32xf32>
    %50 = vector.extract_strided_slice %43 {offsets = [0, 0], sizes = [8, 8], strides = [1, 1]} : vector<8x32xbf16> to vector<8x8xbf16>
    %51 = vector.extract_strided_slice %44 {offsets = [0, 0], sizes = [8, 8], strides = [1, 1]} : vector<8x32xbf16> to vector<8x8xbf16>
    %cst_29 = arith.constant dense<0.000000e+00> : vector<8x8xf32>
    %52 = tpu.matmul %50, %51, %cst_29 {dimension_numbers = #tpu.dot_dimension_numbers<[1], [1], [0], [0], [0, 0, 1, 0], [], []>} : vector<8x8xbf16>, vector<8x8xbf16>, vector<8x8xf32> -> vector<8x8xf32>
    %cst_30 = arith.constant 0.353553385 : f32
    %53 = vector.broadcast %cst_30 : f32 to vector<8x8xf32>
    %54 = arith.mulf %52, %53 : vector<8x8xf32>
    %cst_31 = arith.constant -1.000000e+09 : f32
    %55 = vector.shape_cast %7 : vector<1x8xi1> to vector<1x8xi1>
    %56 = vector.broadcast %55 : vector<1x8xi1> to vector<8x8xi1>
    %57 = vector.broadcast %cst_31 : f32 to vector<8x8xf32>
    %58 = arith.select %56, %54, %57 : vector<8x8xi1>, vector<8x8xf32>
    %cst_32 = arith.constant dense<0xFF800000> : vector<8xf32>
    %59 = vector.multi_reduction <maximumf>, %58, %cst_32 [1] : vector<8x8xf32> to vector<8xf32>
    %60 = vector.shape_cast %59 : vector<8xf32> to vector<8x1xf32>
    %61 = vector.broadcast %60 : vector<8x1xf32> to vector<8x8xf32>
    %62 = arith.subf %58, %61 : vector<8x8xf32>
    %63 = math.exp %62 : vector<8x8xf32>
    %cst_33 = arith.constant dense<0.000000e+00> : vector<8xf32>
    %64 = vector.multi_reduction <add>, %63, %cst_33 [1] : vector<8x8xf32> to vector<8xf32>
    %65 = vector.shape_cast %64 : vector<8xf32> to vector<8x1xf32>
    %66 = tpu.reciprocal %65 {approx = true} : vector<8x1xf32> -> vector<8x1xf32>
    %67 = vector.broadcast %66 : vector<8x1xf32> to vector<8x8xf32>
    %68 = arith.mulf %63, %67 : vector<8x8xf32>
    %69 = arith.truncf %68 : vector<8x8xf32> to vector<8x8xbf16>
    %70 = vector.extract_strided_slice %45 {offsets = [0, 0], sizes = [8, 8], strides = [1, 1]} : vector<8x32xbf16> to vector<8x8xbf16>
    %cst_34 = arith.constant dense<0.000000e+00> : vector<8x8xf32>
    %71 = tpu.matmul %69, %70, %cst_34 {dimension_numbers = #tpu.dot_dimension_numbers<[1], [0], [0], [1], [0, 0, 1, 1], [], []>} : vector<8x8xbf16>, vector<8x8xbf16>, vector<8x8xf32> -> vector<8x8xf32>
    %72 = arith.truncf %71 : vector<8x8xf32> to vector<8x8xbf16>
    %73 = vector.extract_strided_slice %47 {offsets = [0, 0], sizes = [8, 32], strides = [1, 1]} : vector<32x32xbf16> to vector<8x32xbf16>
    %cst_35 = arith.constant dense<0.000000e+00> : vector<8x32xf32>
    %74 = tpu.matmul %72, %73, %cst_35 {dimension_numbers = #tpu.dot_dimension_numbers<[1], [0], [0], [1], [0, 0, 1, 1], [], []>} : vector<8x8xbf16>, vector<8x32xbf16>, vector<8x32xf32> -> vector<8x32xf32>
    %75 = vector.extract_strided_slice %43 {offsets = [0, 8], sizes = [8, 8], strides = [1, 1]} : vector<8x32xbf16> to vector<8x8xbf16>
    %76 = vector.extract_strided_slice %44 {offsets = [0, 8], sizes = [8, 8], strides = [1, 1]} : vector<8x32xbf16> to vector<8x8xbf16>
    %cst_36 = arith.constant dense<0.000000e+00> : vector<8x8xf32>
    %77 = tpu.matmul %75, %76, %cst_36 {dimension_numbers = #tpu.dot_dimension_numbers<[1], [1], [0], [0], [0, 0, 1, 0], [], []>} : vector<8x8xbf16>, vector<8x8xbf16>, vector<8x8xf32> -> vector<8x8xf32>
    %cst_37 = arith.constant 0.353553385 : f32
    %78 = vector.broadcast %cst_37 : f32 to vector<8x8xf32>
    %79 = arith.mulf %77, %78 : vector<8x8xf32>
    %cst_38 = arith.constant -1.000000e+09 : f32
    %80 = vector.shape_cast %7 : vector<1x8xi1> to vector<1x8xi1>
    %81 = vector.broadcast %80 : vector<1x8xi1> to vector<8x8xi1>
    %82 = vector.broadcast %cst_38 : f32 to vector<8x8xf32>
    %83 = arith.select %81, %79, %82 : vector<8x8xi1>, vector<8x8xf32>
    %cst_39 = arith.constant dense<0xFF800000> : vector<8xf32>
    %84 = vector.multi_reduction <maximumf>, %83, %cst_39 [1] : vector<8x8xf32> to vector<8xf32>
    %85 = vector.shape_cast %84 : vector<8xf32> to vector<8x1xf32>
    %86 = vector.broadcast %85 : vector<8x1xf32> to vector<8x8xf32>
    %87 = arith.subf %83, %86 : vector<8x8xf32>
    %88 = math.exp %87 : vector<8x8xf32>
    %cst_40 = arith.constant dense<0.000000e+00> : vector<8xf32>
    %89 = vector.multi_reduction <add>, %88, %cst_40 [1] : vector<8x8xf32> to vector<8xf32>
    %90 = vector.shape_cast %89 : vector<8xf32> to vector<8x1xf32>
    %91 = tpu.reciprocal %90 {approx = true} : vector<8x1xf32> -> vector<8x1xf32>
    %92 = vector.broadcast %91 : vector<8x1xf32> to vector<8x8xf32>
    %93 = arith.mulf %88, %92 : vector<8x8xf32>
    %94 = arith.truncf %93 : vector<8x8xf32> to vector<8x8xbf16>
    %95 = vector.extract_strided_slice %45 {offsets = [0, 8], sizes = [8, 8], strides = [1, 1]} : vector<8x32xbf16> to vector<8x8xbf16>
    %cst_41 = arith.constant dense<0.000000e+00> : vector<8x8xf32>
    %96 = tpu.matmul %94, %95, %cst_41 {dimension_numbers = #tpu.dot_dimension_numbers<[1], [0], [0], [1], [0, 0, 1, 1], [], []>} : vector<8x8xbf16>, vector<8x8xbf16>, vector<8x8xf32> -> vector<8x8xf32>
    %97 = arith.truncf %96 : vector<8x8xf32> to vector<8x8xbf16>
    %98 = vector.extract_strided_slice %47 {offsets = [8, 0], sizes = [8, 32], strides = [1, 1]} : vector<32x32xbf16> to vector<8x32xbf16>
    %cst_42 = arith.constant dense<0.000000e+00> : vector<8x32xf32>
    %99 = tpu.matmul %97, %98, %cst_42 {dimension_numbers = #tpu.dot_dimension_numbers<[1], [0], [0], [1], [0, 0, 1, 1], [], []>} : vector<8x8xbf16>, vector<8x32xbf16>, vector<8x32xf32> -> vector<8x32xf32>
    %100 = arith.addf %74, %99 : vector<8x32xf32>
    %101 = vector.extract_strided_slice %43 {offsets = [0, 16], sizes = [8, 8], strides = [1, 1]} : vector<8x32xbf16> to vector<8x8xbf16>
    %102 = vector.extract_strided_slice %44 {offsets = [0, 16], sizes = [8, 8], strides = [1, 1]} : vector<8x32xbf16> to vector<8x8xbf16>
    %cst_43 = arith.constant dense<0.000000e+00> : vector<8x8xf32>
    %103 = tpu.matmul %101, %102, %cst_43 {dimension_numbers = #tpu.dot_dimension_numbers<[1], [1], [0], [0], [0, 0, 1, 0], [], []>} : vector<8x8xbf16>, vector<8x8xbf16>, vector<8x8xf32> -> vector<8x8xf32>
    %cst_44 = arith.constant 0.353553385 : f32
    %104 = vector.broadcast %cst_44 : f32 to vector<8x8xf32>
    %105 = arith.mulf %103, %104 : vector<8x8xf32>
    %cst_45 = arith.constant -1.000000e+09 : f32
    %106 = vector.shape_cast %7 : vector<1x8xi1> to vector<1x8xi1>
    %107 = vector.broadcast %106 : vector<1x8xi1> to vector<8x8xi1>
    %108 = vector.broadcast %cst_45 : f32 to vector<8x8xf32>
    %109 = arith.select %107, %105, %108 : vector<8x8xi1>, vector<8x8xf32>
    %cst_46 = arith.constant dense<0xFF800000> : vector<8xf32>
    %110 = vector.multi_reduction <maximumf>, %109, %cst_46 [1] : vector<8x8xf32> to vector<8xf32>
    %111 = vector.shape_cast %110 : vector<8xf32> to vector<8x1xf32>
    %112 = vector.broadcast %111 : vector<8x1xf32> to vector<8x8xf32>
    %113 = arith.subf %109, %112 : vector<8x8xf32>
    %114 = math.exp %113 : vector<8x8xf32>
    %cst_47 = arith.constant dense<0.000000e+00> : vector<8xf32>
    %115 = vector.multi_reduction <add>, %114, %cst_47 [1] : vector<8x8xf32> to vector<8xf32>
    %116 = vector.shape_cast %115 : vector<8xf32> to vector<8x1xf32>
    %117 = tpu.reciprocal %116 {approx = true} : vector<8x1xf32> -> vector<8x1xf32>
    %118 = vector.broadcast %117 : vector<8x1xf32> to vector<8x8xf32>
    %119 = arith.mulf %114, %118 : vector<8x8xf32>
    %120 = arith.truncf %119 : vector<8x8xf32> to vector<8x8xbf16>
    %121 = vector.extract_strided_slice %45 {offsets = [0, 16], sizes = [8, 8], strides = [1, 1]} : vector<8x32xbf16> to vector<8x8xbf16>
    %cst_48 = arith.constant dense<0.000000e+00> : vector<8x8xf32>
    %122 = tpu.matmul %120, %121, %cst_48 {dimension_numbers = #tpu.dot_dimension_numbers<[1], [0], [0], [1], [0, 0, 1, 1], [], []>} : vector<8x8xbf16>, vector<8x8xbf16>, vector<8x8xf32> -> vector<8x8xf32>
    %123 = arith.truncf %122 : vector<8x8xf32> to vector<8x8xbf16>
    %124 = vector.extract_strided_slice %47 {offsets = [16, 0], sizes = [8, 32], strides = [1, 1]} : vector<32x32xbf16> to vector<8x32xbf16>
    %cst_49 = arith.constant dense<0.000000e+00> : vector<8x32xf32>
    %125 = tpu.matmul %123, %124, %cst_49 {dimension_numbers = #tpu.dot_dimension_numbers<[1], [0], [0], [1], [0, 0, 1, 1], [], []>} : vector<8x8xbf16>, vector<8x32xbf16>, vector<8x32xf32> -> vector<8x32xf32>
    %126 = arith.addf %100, %125 : vector<8x32xf32>
    %127 = vector.extract_strided_slice %43 {offsets = [0, 24], sizes = [8, 8], strides = [1, 1]} : vector<8x32xbf16> to vector<8x8xbf16>
    %128 = vector.extract_strided_slice %44 {offsets = [0, 24], sizes = [8, 8], strides = [1, 1]} : vector<8x32xbf16> to vector<8x8xbf16>
    %cst_50 = arith.constant dense<0.000000e+00> : vector<8x8xf32>
    %129 = tpu.matmul %127, %128, %cst_50 {dimension_numbers = #tpu.dot_dimension_numbers<[1], [1], [0], [0], [0, 0, 1, 0], [], []>} : vector<8x8xbf16>, vector<8x8xbf16>, vector<8x8xf32> -> vector<8x8xf32>
    %cst_51 = arith.constant 0.353553385 : f32
    %130 = vector.broadcast %cst_51 : f32 to vector<8x8xf32>
    %131 = arith.mulf %129, %130 : vector<8x8xf32>
    %cst_52 = arith.constant -1.000000e+09 : f32
    %132 = vector.shape_cast %7 : vector<1x8xi1> to vector<1x8xi1>
    %133 = vector.broadcast %132 : vector<1x8xi1> to vector<8x8xi1>
    %134 = vector.broadcast %cst_52 : f32 to vector<8x8xf32>
    %135 = arith.select %133, %131, %134 : vector<8x8xi1>, vector<8x8xf32>
    %cst_53 = arith.constant dense<0xFF800000> : vector<8xf32>
    %136 = vector.multi_reduction <maximumf>, %135, %cst_53 [1] : vector<8x8xf32> to vector<8xf32>
    %137 = vector.shape_cast %136 : vector<8xf32> to vector<8x1xf32>
    %138 = vector.broadcast %137 : vector<8x1xf32> to vector<8x8xf32>
    %139 = arith.subf %135, %138 : vector<8x8xf32>
    %140 = math.exp %139 : vector<8x8xf32>
    %cst_54 = arith.constant dense<0.000000e+00> : vector<8xf32>
    %141 = vector.multi_reduction <add>, %140, %cst_54 [1] : vector<8x8xf32> to vector<8xf32>
    %142 = vector.shape_cast %141 : vector<8xf32> to vector<8x1xf32>
    %143 = tpu.reciprocal %142 {approx = true} : vector<8x1xf32> -> vector<8x1xf32>
    %144 = vector.broadcast %143 : vector<8x1xf32> to vector<8x8xf32>
    %145 = arith.mulf %140, %144 : vector<8x8xf32>
    %146 = arith.truncf %145 : vector<8x8xf32> to vector<8x8xbf16>
    %147 = vector.extract_strided_slice %45 {offsets = [0, 24], sizes = [8, 8], strides = [1, 1]} : vector<8x32xbf16> to vector<8x8xbf16>
    %cst_55 = arith.constant dense<0.000000e+00> : vector<8x8xf32>
    %148 = tpu.matmul %146, %147, %cst_55 {dimension_numbers = #tpu.dot_dimension_numbers<[1], [0], [0], [1], [0, 0, 1, 1], [], []>} : vector<8x8xbf16>, vector<8x8xbf16>, vector<8x8xf32> -> vector<8x8xf32>
    %149 = arith.truncf %148 : vector<8x8xf32> to vector<8x8xbf16>
    %150 = vector.extract_strided_slice %47 {offsets = [24, 0], sizes = [8, 32], strides = [1, 1]} : vector<32x32xbf16> to vector<8x32xbf16>
    %cst_56 = arith.constant dense<0.000000e+00> : vector<8x32xf32>
    %151 = tpu.matmul %149, %150, %cst_56 {dimension_numbers = #tpu.dot_dimension_numbers<[1], [0], [0], [1], [0, 0, 1, 1], [], []>} : vector<8x8xbf16>, vector<8x32xbf16>, vector<8x32xf32> -> vector<8x32xf32>
    %152 = arith.addf %126, %151 : vector<8x32xf32>
    %153 = vector.broadcast %49 : vector<1x32xf32> to vector<8x32xf32>
    %154 = arith.addf %152, %153 : vector<8x32xf32>
    %155 = arith.addf %3, %154 : vector<8x32xf32>
    %c0_57 = arith.constant 0 : index
    %c0_58 = arith.constant 0 : index
    %c0_59 = arith.constant 0 : index
    %156 = vector.load %arg6[%c0_57, %c0_58, %c0_59] : memref<1x1x32xf32, #tpu.memory_space<vmem>>, vector<1x1x32xf32>
    %157 = vector.shape_cast %156 : vector<1x1x32xf32> to vector<1x32xf32>
    %c0_60 = arith.constant 0 : index
    %c0_61 = arith.constant 0 : index
    %c0_62 = arith.constant 0 : index
    %158 = vector.load %arg7[%c0_60, %c0_61, %c0_62] : memref<1x1x32xf32, #tpu.memory_space<vmem>>, vector<1x1x32xf32>
    %159 = vector.shape_cast %158 : vector<1x1x32xf32> to vector<1x32xf32>
    %cst_63 = arith.constant dense<0.000000e+00> : vector<8xf32>
    %160 = vector.multi_reduction <add>, %155, %cst_63 [1] : vector<8x32xf32> to vector<8xf32>
    %161 = vector.shape_cast %160 : vector<8xf32> to vector<8x1xf32>
    %cst_64 = arith.constant 3.200000e+01 : f32
    %162 = vector.broadcast %cst_64 : f32 to vector<8x1xf32>
    %163 = arith.divf %161, %162 : vector<8x1xf32>
    %164 = vector.broadcast %163 : vector<8x1xf32> to vector<8x32xf32>
    %165 = arith.subf %155, %164 : vector<8x32xf32>
    %166 = arith.mulf %165, %165 : vector<8x32xf32>
    %cst_65 = arith.constant dense<0.000000e+00> : vector<8xf32>
    %167 = vector.multi_reduction <add>, %166, %cst_65 [1] : vector<8x32xf32> to vector<8xf32>
    %168 = vector.shape_cast %167 : vector<8xf32> to vector<8x1xf32>
    %cst_66 = arith.constant 3.100000e+01 : f32
    %169 = vector.broadcast %cst_66 : f32 to vector<8x1xf32>
    %170 = arith.divf %168, %169 : vector<8x1xf32>
    %171 = vector.broadcast %163 : vector<8x1xf32> to vector<8x32xf32>
    %172 = arith.subf %155, %171 : vector<8x32xf32>
    %173 = vector.broadcast %157 : vector<1x32xf32> to vector<8x32xf32>
    %174 = arith.mulf %173, %172 : vector<8x32xf32>
    %175 = math.sqrt %170 : vector<8x1xf32>
    %cst_67 = arith.constant 9.99999997E-7 : f32
    %176 = vector.broadcast %cst_67 : f32 to vector<8x1xf32>
    %177 = arith.addf %175, %176 : vector<8x1xf32>
    %178 = vector.broadcast %177 : vector<8x1xf32> to vector<8x32xf32>
    %179 = arith.divf %174, %178 : vector<8x32xf32>
    %180 = vector.broadcast %159 : vector<1x32xf32> to vector<8x32xf32>
    %181 = arith.addf %179, %180 : vector<8x32xf32>
    %182 = arith.truncf %181 : vector<8x32xf32> to vector<8x32xbf16>
    %c0_68 = arith.constant 0 : index
    %c0_69 = arith.constant 0 : index
    %c0_70 = arith.constant 0 : index
    %183 = vector.load %arg12[%c0_68, %c0_69, %c0_70] : memref<1x32x2048xbf16, #tpu.memory_space<vmem>>, vector<1x32x2048xbf16>
    %184 = vector.shape_cast %183 : vector<1x32x2048xbf16> to vector<32x2048xbf16>
    %cst_71 = arith.constant dense<0.000000e+00> : vector<8x2048xf32>
    %185 = tpu.matmul %182, %184, %cst_71 {dimension_numbers = #tpu.dot_dimension_numbers<[1], [0], [0], [1], [0, 0, 1, 1], [], []>} : vector<8x32xbf16>, vector<32x2048xbf16>, vector<8x2048xf32> -> vector<8x2048xf32>
    %c0_72 = arith.constant 0 : index
    %c0_73 = arith.constant 0 : index
    %c0_74 = arith.constant 0 : index
    %186 = vector.load %arg13[%c0_72, %c0_73, %c0_74] : memref<1x1x2048xf32, #tpu.memory_space<vmem>>, vector<1x1x2048xf32>
    %187 = vector.shape_cast %186 : vector<1x1x2048xf32> to vector<1x2048xf32>
    %188 = vector.broadcast %187 : vector<1x2048xf32> to vector<8x2048xf32>
    %189 = arith.addf %185, %188 : vector<8x2048xf32>
    %cst_75 = arith.constant 0.000000e+00 : f32
    %190 = vector.broadcast %cst_75 : f32 to vector<8x2048xf32>
    %191 = arith.maximumf %189, %190 : vector<8x2048xf32>
    %192 = arith.truncf %191 : vector<8x2048xf32> to vector<8x2048xbf16>
    %c0_76 = arith.constant 0 : index
    %c0_77 = arith.constant 0 : index
    %c0_78 = arith.constant 0 : index
    %193 = vector.load %arg14[%c0_76, %c0_77, %c0_78] : memref<1x2048x32xbf16, #tpu.memory_space<vmem>>, vector<1x2048x32xbf16>
    %194 = vector.shape_cast %193 : vector<1x2048x32xbf16> to vector<2048x32xbf16>
    %cst_79 = arith.constant dense<0.000000e+00> : vector<8x32xf32>
    %195 = tpu.matmul %192, %194, %cst_79 {dimension_numbers = #tpu.dot_dimension_numbers<[1], [0], [0], [1], [0, 0, 1, 1], [], []>} : vector<8x2048xbf16>, vector<2048x32xbf16>, vector<8x32xf32> -> vector<8x32xf32>
    %c0_80 = arith.constant 0 : index
    %c0_81 = arith.constant 0 : index
    %c0_82 = arith.constant 0 : index
    %196 = vector.load %arg15[%c0_80, %c0_81, %c0_82] : memref<1x1x32xf32, #tpu.memory_space<vmem>>, vector<1x1x32xf32>
    %197 = vector.shape_cast %196 : vector<1x1x32xf32> to vector<1x32xf32>
    %198 = vector.broadcast %197 : vector<1x32xf32> to vector<8x32xf32>
    %199 = arith.addf %195, %198 : vector<8x32xf32>
    %200 = arith.addf %155, %199 : vector<8x32xf32>
    %c0_83 = arith.constant 0 : index
    %c0_84 = arith.constant 0 : index
    %201 = vector.load %arg17[%c0_83, %c0_84] : memref<8x32xf32, #tpu.memory_space<vmem>>, vector<8x32xf32>
    tpu.vector_store %arg17[%c0_83, %c0_84], %200 {strides = array<i32>} : memref<8x32xf32, #tpu.memory_space<vmem>>, vector<8x32xf32>,
    %c1_i32 = arith.constant 1 : i32
    %202 = arith.cmpi eq, %arg1, %c1_i32 : i32
    %203 = arith.extui %202 : i1 to i32
    %c0_i32_85 = arith.constant 0 : i32
    %204 = arith.cmpi ne, %203, %c0_i32_85 : i32
    scf.if %204 {
      %c0_86 = arith.constant 0 : index
      %c0_87 = arith.constant 0 : index
      %c0_88 = arith.constant 0 : index
      %205 = vector.load %arg16[%c0_86, %c0_87, %c0_88] : memref<1x8x32xf32, #tpu.memory_space<vmem>>, vector<1x8x32xf32>
      %206 = vector.shape_cast %205 : vector<1x8x32xf32> to vector<8x32xf32>
      %207 = vector.shape_cast %200 : vector<8x32xf32> to vector<1x8x32xf32>
      tpu.vector_store %arg16[%c0_86, %c0_87, %c0_88], %207 {strides = array<i32>} : memref<1x8x32xf32, #tpu.memory_space<vmem>>, vector<1x8x32xf32>,
    } else {
    }
    return
  }
  func.func @transform_0(%arg0: i32, %arg1: i32) -> (i32, i32, i32) {
    %c0_i32 = arith.constant 0 : i32
    %c0_i32_0 = arith.constant 0 : i32
    %c0_i32_1 = arith.constant 0 : i32
    return %arg0, %c0_i32, %c0_i32_0 : i32, i32, i32
  }
  func.func @transform_1(%arg0: i32, %arg1: i32) -> (i32, i32, i32) {
    %c0_i32 = arith.constant 0 : i32
    %c0_i32_0 = arith.constant 0 : i32
    %c0_i32_1 = arith.constant 0 : i32
    return %arg0, %c0_i32, %c0_i32_0 : i32, i32, i32
  }
  func.func @transform_2(%arg0: i32, %arg1: i32) -> (i32, i32, i32) {
    %c0_i32 = arith.constant 0 : i32
    %c0_i32_0 = arith.constant 0 : i32
    %c0_i32_1 = arith.constant 0 : i32
    return %arg1, %c0_i32, %c0_i32_0 : i32, i32, i32
  }
  func.func @transform_3(%arg0: i32, %arg1: i32) -> (i32, i32, i32) {
    %c0_i32 = arith.constant 0 : i32
    %c0_i32_0 = arith.constant 0 : i32
    %c0_i32_1 = arith.constant 0 : i32
    return %arg1, %c0_i32, %c0_i32_0 : i32, i32, i32
  }
  func.func @transform_4(%arg0: i32, %arg1: i32) -> (i32, i32, i32) {
    %c0_i32 = arith.constant 0 : i32
    %c0_i32_0 = arith.constant 0 : i32
    %c0_i32_1 = arith.constant 0 : i32
    return %arg1, %c0_i32, %c0_i32_0 : i32, i32, i32
  }
  func.func @transform_5(%arg0: i32, %arg1: i32) -> (i32, i32, i32) {
    %c0_i32 = arith.constant 0 : i32
    %c0_i32_0 = arith.constant 0 : i32
    %c0_i32_1 = arith.constant 0 : i32
    return %arg1, %c0_i32, %c0_i32_0 : i32, i32, i32
  }
  func.func @transform_6(%arg0: i32, %arg1: i32) -> (i32, i32, i32) {
    %c0_i32 = arith.constant 0 : i32
    %c0_i32_0 = arith.constant 0 : i32
    %c0_i32_1 = arith.constant 0 : i32
    return %arg1, %c0_i32, %c0_i32_0 : i32, i32, i32
  }
  func.func @transform_7(%arg0: i32, %arg1: i32) -> (i32, i32, i32) {
    %c0_i32 = arith.constant 0 : i32
    %c0_i32_0 = arith.constant 0 : i32
    %c0_i32_1 = arith.constant 0 : i32
    return %arg1, %c0_i32, %c0_i32_0 : i32, i32, i32
  }
  func.func @transform_8(%arg0: i32, %arg1: i32) -> (i32, i32, i32) {
    %c0_i32 = arith.constant 0 : i32
    %c0_i32_0 = arith.constant 0 : i32
    %c0_i32_1 = arith.constant 0 : i32
    return %arg1, %c0_i32, %c0_i32_0 : i32, i32, i32
  }
  func.func @transform_9(%arg0: i32, %arg1: i32) -> (i32, i32, i32) {
    %c0_i32 = arith.constant 0 : i32
    %c0_i32_0 = arith.constant 0 : i32
    %c0_i32_1 = arith.constant 0 : i32
    return %arg1, %c0_i32, %c0_i32_0 : i32, i32, i32
  }
  func.func @transform_10(%arg0: i32, %arg1: i32) -> (i32, i32, i32) {
    %c0_i32 = arith.constant 0 : i32
    %c0_i32_0 = arith.constant 0 : i32
    %c0_i32_1 = arith.constant 0 : i32
    return %arg1, %c0_i32, %c0_i32_0 : i32, i32, i32
  }
  func.func @transform_11(%arg0: i32, %arg1: i32) -> (i32, i32, i32) {
    %c0_i32 = arith.constant 0 : i32
    %c0_i32_0 = arith.constant 0 : i32
    %c0_i32_1 = arith.constant 0 : i32
    return %arg1, %c0_i32, %c0_i32_0 : i32, i32, i32
  }
  func.func @transform_12(%arg0: i32, %arg1: i32) -> (i32, i32, i32) {
    %c0_i32 = arith.constant 0 : i32
    %c0_i32_0 = arith.constant 0 : i32
    %c0_i32_1 = arith.constant 0 : i32
    return %arg1, %c0_i32, %c0_i32_0 : i32, i32, i32
  }
  func.func @transform_13(%arg0: i32, %arg1: i32) -> (i32, i32, i32) {
    %c0_i32 = arith.constant 0 : i32
    %c0_i32_0 = arith.constant 0 : i32
    %c0_i32_1 = arith.constant 0 : i32
    return %arg1, %c0_i32, %c0_i32_0 : i32, i32, i32
  }
  func.func @transform_14(%arg0: i32, %arg1: i32) -> (i32, i32, i32) {
    %c0_i32 = arith.constant 0 : i32
    %c0_i32_0 = arith.constant 0 : i32
    %c0_i32_1 = arith.constant 0 : i32
    return %arg0, %c0_i32, %c0_i32_0 : i32, i32, i32
  }
}

module attributes {stable_mosaic.version = 11 : i64} {
  func.func @_decoder_stack_kernel(%arg0: i32, %arg1: i32, %arg2: memref<1x8x32xf32, #tpu.memory_space<vmem>>, %arg3: memref<1x8x32xf32, #tpu.memory_space<vmem>>, %arg4: memref<1x1x8xi32, #tpu.memory_space<vmem>>, %arg5: memref<1x8x8xi32, #tpu.memory_space<vmem>>, %arg6: memref<1x1x8xi32, #tpu.memory_space<vmem>>, %arg7: memref<1x8x8xf32, #tpu.memory_space<vmem>>, %arg8: memref<1x1x32xf32, #tpu.memory_space<vmem>>, %arg9: memref<1x1x32xf32, #tpu.memory_space<vmem>>, %arg10: memref<1x1x32xf32, #tpu.memory_space<vmem>>, %arg11: memref<1x1x32xf32, #tpu.memory_space<vmem>>, %arg12: memref<1x1x32xf32, #tpu.memory_space<vmem>>, %arg13: memref<1x1x32xf32, #tpu.memory_space<vmem>>, %arg14: memref<1x1x32xf32, #tpu.memory_space<vmem>>, %arg15: memref<1x1x32xf32, #tpu.memory_space<vmem>>, %arg16: memref<1x32x96xbf16, #tpu.memory_space<vmem>>, %arg17: memref<1x1x96xf32, #tpu.memory_space<vmem>>, %arg18: memref<1x32x32xbf16, #tpu.memory_space<vmem>>, %arg19: memref<1x1x32xf32, #tpu.memory_space<vmem>>, %arg20: memref<1x32x64xbf16, #tpu.memory_space<vmem>>, %arg21: memref<1x1x64xf32, #tpu.memory_space<vmem>>, %arg22: memref<1x32x128xbf16, #tpu.memory_space<vmem>>, %arg23: memref<1x1x128xf32, #tpu.memory_space<vmem>>, %arg24: memref<1x32x32xbf16, #tpu.memory_space<vmem>>, %arg25: memref<1x1x32xf32, #tpu.memory_space<vmem>>, %arg26: memref<1x32x32xbf16, #tpu.memory_space<vmem>>, %arg27: memref<1x1x32xf32, #tpu.memory_space<vmem>>, %arg28: memref<1x32x2048xbf16, #tpu.memory_space<vmem>>, %arg29: memref<1x32x2048xbf16, #tpu.memory_space<vmem>>, %arg30: memref<1x1x2048xf32, #tpu.memory_space<vmem>>, %arg31: memref<1x2048x32xbf16, #tpu.memory_space<vmem>>, %arg32: memref<1x1x32xf32, #tpu.memory_space<vmem>>, %arg33: memref<32x1xf32, #tpu.memory_space<vmem>>, %arg34: memref<32x1xf32, #tpu.memory_space<vmem>>, %arg35: memref<32x1xf32, #tpu.memory_space<vmem>>, %arg36: memref<1x8x8xf32, #tpu.memory_space<vmem>>, %arg37: memref<8x32xf32, #tpu.memory_space<vmem>>) attributes {dimension_semantics = [#tpu.dimension_semantics<parallel>, #tpu.dimension_semantics<arbitrary>], iteration_bounds = array<i64: 2, 2>, scalar_prefetch = 0 : i64, scratch_operands = 1 : i64, tpu.core_type = #tpu.core_type<tc>, window_params = [{transform_indices = @transform_0, window_bounds = array<i64: 1, 8, 32>}, {transform_indices = @transform_1, window_bounds = array<i64: 1, 8, 32>}, {transform_indices = @transform_2, window_bounds = array<i64: 1, 1, 8>}, {transform_indices = @transform_3, window_bounds = array<i64: 1, 8, 8>}, {transform_indices = @transform_4, window_bounds = array<i64: 1, 1, 8>}, {transform_indices = @transform_5, window_bounds = array<i64: 1, 8, 8>}, {transform_indices = @transform_6, window_bounds = array<i64: 1, 1, 32>}, {transform_indices = @transform_7, window_bounds = array<i64: 1, 1, 32>}, {transform_indices = @transform_8, window_bounds = array<i64: 1, 1, 32>}, {transform_indices = @transform_9, window_bounds = array<i64: 1, 1, 32>}, {transform_indices = @transform_10, window_bounds = array<i64: 1, 1, 32>}, {transform_indices = @transform_11, window_bounds = array<i64: 1, 1, 32>}, {transform_indices = @transform_12, window_bounds = array<i64: 1, 1, 32>}, {transform_indices = @transform_13, window_bounds = array<i64: 1, 1, 32>}, {transform_indices = @transform_14, window_bounds = array<i64: 1, 32, 96>}, {transform_indices = @transform_15, window_bounds = array<i64: 1, 1, 96>}, {transform_indices = @transform_16, window_bounds = array<i64: 1, 32, 32>}, {transform_indices = @transform_17, window_bounds = array<i64: 1, 1, 32>}, {transform_indices = @transform_18, window_bounds = array<i64: 1, 32, 64>}, {transform_indices = @transform_19, window_bounds = array<i64: 1, 1, 64>}, {transform_indices = @transform_20, window_bounds = array<i64: 1, 32, 128>}, {transform_indices = @transform_21, window_bounds = array<i64: 1, 1, 128>}, {transform_indices = @transform_22, window_bounds = array<i64: 1, 32, 32>}, {transform_indices = @transform_23, window_bounds = array<i64: 1, 1, 32>}, {transform_indices = @transform_24, window_bounds = array<i64: 1, 32, 32>}, {transform_indices = @transform_25, window_bounds = array<i64: 1, 1, 32>}, {transform_indices = @transform_26, window_bounds = array<i64: 1, 32, 2048>}, {transform_indices = @transform_27, window_bounds = array<i64: 1, 32, 2048>}, {transform_indices = @transform_28, window_bounds = array<i64: 1, 1, 2048>}, {transform_indices = @transform_29, window_bounds = array<i64: 1, 2048, 32>}, {transform_indices = @transform_30, window_bounds = array<i64: 1, 1, 32>}, {pipeline_mode = #tpu.pipeline_mode<synchronous>, transform_indices = @transform_31, window_bounds = array<i64: 32, 1>}, {pipeline_mode = #tpu.pipeline_mode<synchronous>, transform_indices = @transform_32, window_bounds = array<i64: 32, 1>}, {pipeline_mode = #tpu.pipeline_mode<synchronous>, transform_indices = @transform_33, window_bounds = array<i64: 32, 1>}, {transform_indices = @transform_34, window_bounds = array<i64: 1, 8, 8>}]} {
    %c0_i32 = arith.constant 0 : i32
    %0 = arith.cmpi eq, %arg1, %c0_i32 : i32
    %1 = arith.extui %0 : i1 to i32
    %c0_i32_0 = arith.constant 0 : i32
    %2 = arith.cmpi ne, %1, %c0_i32_0 : i32
    scf.if %2 {
      %c0_207 = arith.constant 0 : index
      %c0_208 = arith.constant 0 : index
      %c0_209 = arith.constant 0 : index
      %513 = vector.load %arg2[%c0_207, %c0_208, %c0_209] : memref<1x8x32xf32, #tpu.memory_space<vmem>>, vector<1x8x32xf32>
      %514 = vector.shape_cast %513 : vector<1x8x32xf32> to vector<8x32xf32>
      %c0_210 = arith.constant 0 : index
      %c0_211 = arith.constant 0 : index
      %515 = vector.load %arg37[%c0_210, %c0_211] : memref<8x32xf32, #tpu.memory_space<vmem>>, vector<8x32xf32>
      tpu.vector_store %arg37[%c0_210, %c0_211], %514 {strides = array<i32>} : memref<8x32xf32, #tpu.memory_space<vmem>>, vector<8x32xf32>,
    } else {
    }
    %c0 = arith.constant 0 : index
    %c0_1 = arith.constant 0 : index
    %3 = vector.load %arg37[%c0, %c0_1] : memref<8x32xf32, #tpu.memory_space<vmem>>, vector<8x32xf32>
    %c0_2 = arith.constant 0 : index
    %c0_3 = arith.constant 0 : index
    %c0_4 = arith.constant 0 : index
    %4 = vector.load %arg3[%c0_2, %c0_3, %c0_4] : memref<1x8x32xf32, #tpu.memory_space<vmem>>, vector<1x8x32xf32>
    %5 = vector.shape_cast %4 : vector<1x8x32xf32> to vector<8x32xf32>
    %c0_5 = arith.constant 0 : index
    %c0_6 = arith.constant 0 : index
    %c0_7 = arith.constant 0 : index
    %6 = vector.load %arg4[%c0_5, %c0_6, %c0_7] : memref<1x1x8xi32, #tpu.memory_space<vmem>>, vector<1x1x8xi32>
    %7 = vector.shape_cast %6 : vector<1x1x8xi32> to vector<1x8xi32>
    %c0_8 = arith.constant 0 : index
    %c0_9 = arith.constant 0 : index
    %c0_10 = arith.constant 0 : index
    %8 = vector.load %arg5[%c0_8, %c0_9, %c0_10] : memref<1x8x8xi32, #tpu.memory_space<vmem>>, vector<1x8x8xi32>
    %9 = vector.shape_cast %8 : vector<1x8x8xi32> to vector<8x8xi32>
    %c0_11 = arith.constant 0 : index
    %c0_12 = arith.constant 0 : index
    %c0_13 = arith.constant 0 : index
    %10 = vector.load %arg6[%c0_11, %c0_12, %c0_13] : memref<1x1x8xi32, #tpu.memory_space<vmem>>, vector<1x1x8xi32>
    %11 = vector.shape_cast %10 : vector<1x1x8xi32> to vector<1x8xi32>
    %c0_14 = arith.constant 0 : index
    %c0_15 = arith.constant 0 : index
    %c0_16 = arith.constant 0 : index
    %12 = vector.load %arg8[%c0_14, %c0_15, %c0_16] : memref<1x1x32xf32, #tpu.memory_space<vmem>>, vector<1x1x32xf32>
    %13 = vector.shape_cast %12 : vector<1x1x32xf32> to vector<1x32xf32>
    %c0_17 = arith.constant 0 : index
    %c0_18 = arith.constant 0 : index
    %c0_19 = arith.constant 0 : index
    %14 = vector.load %arg9[%c0_17, %c0_18, %c0_19] : memref<1x1x32xf32, #tpu.memory_space<vmem>>, vector<1x1x32xf32>
    %15 = vector.shape_cast %14 : vector<1x1x32xf32> to vector<1x32xf32>
    %cst = arith.constant dense<0.000000e+00> : vector<8xf32>
    %16 = vector.multi_reduction <add>, %3, %cst [1] : vector<8x32xf32> to vector<8xf32>
    %17 = vector.shape_cast %16 : vector<8xf32> to vector<8x1xf32>
    %cst_20 = arith.constant 3.200000e+01 : f32
    %18 = vector.broadcast %cst_20 : f32 to vector<8x1xf32>
    %19 = arith.divf %17, %18 : vector<8x1xf32>
    %20 = vector.broadcast %19 : vector<8x1xf32> to vector<8x32xf32>
    %21 = arith.subf %3, %20 : vector<8x32xf32>
    %22 = arith.mulf %21, %21 : vector<8x32xf32>
    %cst_21 = arith.constant dense<0.000000e+00> : vector<8xf32>
    %23 = vector.multi_reduction <add>, %22, %cst_21 [1] : vector<8x32xf32> to vector<8xf32>
    %24 = vector.shape_cast %23 : vector<8xf32> to vector<8x1xf32>
    %cst_22 = arith.constant 3.100000e+01 : f32
    %25 = vector.broadcast %cst_22 : f32 to vector<8x1xf32>
    %26 = arith.divf %24, %25 : vector<8x1xf32>
    %27 = vector.broadcast %19 : vector<8x1xf32> to vector<8x32xf32>
    %28 = arith.subf %3, %27 : vector<8x32xf32>
    %29 = vector.broadcast %13 : vector<1x32xf32> to vector<8x32xf32>
    %30 = arith.mulf %29, %28 : vector<8x32xf32>
    %31 = math.sqrt %26 : vector<8x1xf32>
    %cst_23 = arith.constant 9.99999997E-7 : f32
    %32 = vector.broadcast %cst_23 : f32 to vector<8x1xf32>
    %33 = arith.addf %31, %32 : vector<8x1xf32>
    %34 = vector.broadcast %33 : vector<8x1xf32> to vector<8x32xf32>
    %35 = arith.divf %30, %34 : vector<8x32xf32>
    %36 = vector.broadcast %15 : vector<1x32xf32> to vector<8x32xf32>
    %37 = arith.addf %35, %36 : vector<8x32xf32>
    %38 = arith.truncf %37 : vector<8x32xf32> to vector<8x32xbf16>
    %c0_24 = arith.constant 0 : index
    %c0_25 = arith.constant 0 : index
    %c0_26 = arith.constant 0 : index
    %39 = vector.load %arg16[%c0_24, %c0_25, %c0_26] : memref<1x32x96xbf16, #tpu.memory_space<vmem>>, vector<1x32x96xbf16>
    %40 = vector.shape_cast %39 : vector<1x32x96xbf16> to vector<32x96xbf16>
    %cst_27 = arith.constant dense<0.000000e+00> : vector<8x96xf32>
    %41 = tpu.matmul %38, %40, %cst_27 {dimension_numbers = #tpu.dot_dimension_numbers<[1], [0], [0], [1], [0, 0, 1, 1], [], []>} : vector<8x32xbf16>, vector<32x96xbf16>, vector<8x96xf32> -> vector<8x96xf32>
    %c0_28 = arith.constant 0 : index
    %c0_29 = arith.constant 0 : index
    %c0_30 = arith.constant 0 : index
    %42 = vector.load %arg17[%c0_28, %c0_29, %c0_30] : memref<1x1x96xf32, #tpu.memory_space<vmem>>, vector<1x1x96xf32>
    %43 = vector.shape_cast %42 : vector<1x1x96xf32> to vector<1x96xf32>
    %44 = vector.broadcast %43 : vector<1x96xf32> to vector<8x96xf32>
    %45 = arith.addf %41, %44 : vector<8x96xf32>
    %46 = arith.truncf %45 : vector<8x96xf32> to vector<8x96xbf16>
    %47 = vector.extract_strided_slice %46 {offsets = [0, 0], sizes = [8, 32], strides = [1, 1]} : vector<8x96xbf16> to vector<8x32xbf16>
    %48 = vector.extract_strided_slice %46 {offsets = [0, 32], sizes = [8, 32], strides = [1, 1]} : vector<8x96xbf16> to vector<8x32xbf16>
    %49 = vector.extract_strided_slice %46 {offsets = [0, 64], sizes = [8, 32], strides = [1, 1]} : vector<8x96xbf16> to vector<8x32xbf16>
    %c0_i32_31 = arith.constant 0 : i32
    %50 = vector.broadcast %c0_i32_31 : i32 to vector<8x8xi32>
    %51 = arith.cmpi ne, %9, %50 : vector<8x8xi32>
    %c0_32 = arith.constant 0 : index
    %c0_33 = arith.constant 0 : index
    %c0_34 = arith.constant 0 : index
    %52 = vector.load %arg18[%c0_32, %c0_33, %c0_34] : memref<1x32x32xbf16, #tpu.memory_space<vmem>>, vector<1x32x32xbf16>
    %53 = vector.shape_cast %52 : vector<1x32x32xbf16> to vector<32x32xbf16>
    %c0_35 = arith.constant 0 : index
    %c0_36 = arith.constant 0 : index
    %c0_37 = arith.constant 0 : index
    %54 = vector.load %arg19[%c0_35, %c0_36, %c0_37] : memref<1x1x32xf32, #tpu.memory_space<vmem>>, vector<1x1x32xf32>
    %55 = vector.shape_cast %54 : vector<1x1x32xf32> to vector<1x32xf32>
    %56 = vector.extract_strided_slice %47 {offsets = [0, 0], sizes = [8, 8], strides = [1, 1]} : vector<8x32xbf16> to vector<8x8xbf16>
    %57 = vector.extract_strided_slice %48 {offsets = [0, 0], sizes = [8, 8], strides = [1, 1]} : vector<8x32xbf16> to vector<8x8xbf16>
    %cst_38 = arith.constant dense<0.000000e+00> : vector<8x8xf32>
    %58 = tpu.matmul %56, %57, %cst_38 {dimension_numbers = #tpu.dot_dimension_numbers<[1], [1], [0], [0], [0, 0, 1, 0], [], []>} : vector<8x8xbf16>, vector<8x8xbf16>, vector<8x8xf32> -> vector<8x8xf32>
    %cst_39 = arith.constant 0.353553385 : f32
    %59 = vector.broadcast %cst_39 : f32 to vector<8x8xf32>
    %60 = arith.mulf %58, %59 : vector<8x8xf32>
    %cst_40 = arith.constant -1.000000e+09 : f32
    %61 = vector.broadcast %cst_40 : f32 to vector<8x8xf32>
    %62 = arith.select %51, %60, %61 : vector<8x8xi1>, vector<8x8xf32>
    %cst_41 = arith.constant dense<0xFF800000> : vector<8xf32>
    %63 = vector.multi_reduction <maximumf>, %62, %cst_41 [1] : vector<8x8xf32> to vector<8xf32>
    %64 = vector.shape_cast %63 : vector<8xf32> to vector<8x1xf32>
    %65 = vector.broadcast %64 : vector<8x1xf32> to vector<8x8xf32>
    %66 = arith.subf %62, %65 : vector<8x8xf32>
    %67 = math.exp %66 : vector<8x8xf32>
    %cst_42 = arith.constant dense<0.000000e+00> : vector<8xf32>
    %68 = vector.multi_reduction <add>, %67, %cst_42 [1] : vector<8x8xf32> to vector<8xf32>
    %69 = vector.shape_cast %68 : vector<8xf32> to vector<8x1xf32>
    %70 = tpu.reciprocal %69 {approx = true} : vector<8x1xf32> -> vector<8x1xf32>
    %71 = vector.broadcast %70 : vector<8x1xf32> to vector<8x8xf32>
    %72 = arith.mulf %67, %71 : vector<8x8xf32>
    %73 = arith.truncf %72 : vector<8x8xf32> to vector<8x8xbf16>
    %74 = vector.extract_strided_slice %49 {offsets = [0, 0], sizes = [8, 8], strides = [1, 1]} : vector<8x32xbf16> to vector<8x8xbf16>
    %cst_43 = arith.constant dense<0.000000e+00> : vector<8x8xf32>
    %75 = tpu.matmul %73, %74, %cst_43 {dimension_numbers = #tpu.dot_dimension_numbers<[1], [0], [0], [1], [0, 0, 1, 1], [], []>} : vector<8x8xbf16>, vector<8x8xbf16>, vector<8x8xf32> -> vector<8x8xf32>
    %76 = arith.truncf %75 : vector<8x8xf32> to vector<8x8xbf16>
    %77 = vector.extract_strided_slice %53 {offsets = [0, 0], sizes = [8, 32], strides = [1, 1]} : vector<32x32xbf16> to vector<8x32xbf16>
    %cst_44 = arith.constant dense<0.000000e+00> : vector<8x32xf32>
    %78 = tpu.matmul %76, %77, %cst_44 {dimension_numbers = #tpu.dot_dimension_numbers<[1], [0], [0], [1], [0, 0, 1, 1], [], []>} : vector<8x8xbf16>, vector<8x32xbf16>, vector<8x32xf32> -> vector<8x32xf32>
    %79 = vector.extract_strided_slice %47 {offsets = [0, 8], sizes = [8, 8], strides = [1, 1]} : vector<8x32xbf16> to vector<8x8xbf16>
    %80 = vector.extract_strided_slice %48 {offsets = [0, 8], sizes = [8, 8], strides = [1, 1]} : vector<8x32xbf16> to vector<8x8xbf16>
    %cst_45 = arith.constant dense<0.000000e+00> : vector<8x8xf32>
    %81 = tpu.matmul %79, %80, %cst_45 {dimension_numbers = #tpu.dot_dimension_numbers<[1], [1], [0], [0], [0, 0, 1, 0], [], []>} : vector<8x8xbf16>, vector<8x8xbf16>, vector<8x8xf32> -> vector<8x8xf32>
    %cst_46 = arith.constant 0.353553385 : f32
    %82 = vector.broadcast %cst_46 : f32 to vector<8x8xf32>
    %83 = arith.mulf %81, %82 : vector<8x8xf32>
    %cst_47 = arith.constant -1.000000e+09 : f32
    %84 = vector.broadcast %cst_47 : f32 to vector<8x8xf32>
    %85 = arith.select %51, %83, %84 : vector<8x8xi1>, vector<8x8xf32>
    %cst_48 = arith.constant dense<0xFF800000> : vector<8xf32>
    %86 = vector.multi_reduction <maximumf>, %85, %cst_48 [1] : vector<8x8xf32> to vector<8xf32>
    %87 = vector.shape_cast %86 : vector<8xf32> to vector<8x1xf32>
    %88 = vector.broadcast %87 : vector<8x1xf32> to vector<8x8xf32>
    %89 = arith.subf %85, %88 : vector<8x8xf32>
    %90 = math.exp %89 : vector<8x8xf32>
    %cst_49 = arith.constant dense<0.000000e+00> : vector<8xf32>
    %91 = vector.multi_reduction <add>, %90, %cst_49 [1] : vector<8x8xf32> to vector<8xf32>
    %92 = vector.shape_cast %91 : vector<8xf32> to vector<8x1xf32>
    %93 = tpu.reciprocal %92 {approx = true} : vector<8x1xf32> -> vector<8x1xf32>
    %94 = vector.broadcast %93 : vector<8x1xf32> to vector<8x8xf32>
    %95 = arith.mulf %90, %94 : vector<8x8xf32>
    %96 = arith.truncf %95 : vector<8x8xf32> to vector<8x8xbf16>
    %97 = vector.extract_strided_slice %49 {offsets = [0, 8], sizes = [8, 8], strides = [1, 1]} : vector<8x32xbf16> to vector<8x8xbf16>
    %cst_50 = arith.constant dense<0.000000e+00> : vector<8x8xf32>
    %98 = tpu.matmul %96, %97, %cst_50 {dimension_numbers = #tpu.dot_dimension_numbers<[1], [0], [0], [1], [0, 0, 1, 1], [], []>} : vector<8x8xbf16>, vector<8x8xbf16>, vector<8x8xf32> -> vector<8x8xf32>
    %99 = arith.truncf %98 : vector<8x8xf32> to vector<8x8xbf16>
    %100 = vector.extract_strided_slice %53 {offsets = [8, 0], sizes = [8, 32], strides = [1, 1]} : vector<32x32xbf16> to vector<8x32xbf16>
    %cst_51 = arith.constant dense<0.000000e+00> : vector<8x32xf32>
    %101 = tpu.matmul %99, %100, %cst_51 {dimension_numbers = #tpu.dot_dimension_numbers<[1], [0], [0], [1], [0, 0, 1, 1], [], []>} : vector<8x8xbf16>, vector<8x32xbf16>, vector<8x32xf32> -> vector<8x32xf32>
    %102 = arith.addf %78, %101 : vector<8x32xf32>
    %103 = vector.extract_strided_slice %47 {offsets = [0, 16], sizes = [8, 8], strides = [1, 1]} : vector<8x32xbf16> to vector<8x8xbf16>
    %104 = vector.extract_strided_slice %48 {offsets = [0, 16], sizes = [8, 8], strides = [1, 1]} : vector<8x32xbf16> to vector<8x8xbf16>
    %cst_52 = arith.constant dense<0.000000e+00> : vector<8x8xf32>
    %105 = tpu.matmul %103, %104, %cst_52 {dimension_numbers = #tpu.dot_dimension_numbers<[1], [1], [0], [0], [0, 0, 1, 0], [], []>} : vector<8x8xbf16>, vector<8x8xbf16>, vector<8x8xf32> -> vector<8x8xf32>
    %cst_53 = arith.constant 0.353553385 : f32
    %106 = vector.broadcast %cst_53 : f32 to vector<8x8xf32>
    %107 = arith.mulf %105, %106 : vector<8x8xf32>
    %cst_54 = arith.constant -1.000000e+09 : f32
    %108 = vector.broadcast %cst_54 : f32 to vector<8x8xf32>
    %109 = arith.select %51, %107, %108 : vector<8x8xi1>, vector<8x8xf32>
    %cst_55 = arith.constant dense<0xFF800000> : vector<8xf32>
    %110 = vector.multi_reduction <maximumf>, %109, %cst_55 [1] : vector<8x8xf32> to vector<8xf32>
    %111 = vector.shape_cast %110 : vector<8xf32> to vector<8x1xf32>
    %112 = vector.broadcast %111 : vector<8x1xf32> to vector<8x8xf32>
    %113 = arith.subf %109, %112 : vector<8x8xf32>
    %114 = math.exp %113 : vector<8x8xf32>
    %cst_56 = arith.constant dense<0.000000e+00> : vector<8xf32>
    %115 = vector.multi_reduction <add>, %114, %cst_56 [1] : vector<8x8xf32> to vector<8xf32>
    %116 = vector.shape_cast %115 : vector<8xf32> to vector<8x1xf32>
    %117 = tpu.reciprocal %116 {approx = true} : vector<8x1xf32> -> vector<8x1xf32>
    %118 = vector.broadcast %117 : vector<8x1xf32> to vector<8x8xf32>
    %119 = arith.mulf %114, %118 : vector<8x8xf32>
    %120 = arith.truncf %119 : vector<8x8xf32> to vector<8x8xbf16>
    %121 = vector.extract_strided_slice %49 {offsets = [0, 16], sizes = [8, 8], strides = [1, 1]} : vector<8x32xbf16> to vector<8x8xbf16>
    %cst_57 = arith.constant dense<0.000000e+00> : vector<8x8xf32>
    %122 = tpu.matmul %120, %121, %cst_57 {dimension_numbers = #tpu.dot_dimension_numbers<[1], [0], [0], [1], [0, 0, 1, 1], [], []>} : vector<8x8xbf16>, vector<8x8xbf16>, vector<8x8xf32> -> vector<8x8xf32>
    %123 = arith.truncf %122 : vector<8x8xf32> to vector<8x8xbf16>
    %124 = vector.extract_strided_slice %53 {offsets = [16, 0], sizes = [8, 32], strides = [1, 1]} : vector<32x32xbf16> to vector<8x32xbf16>
    %cst_58 = arith.constant dense<0.000000e+00> : vector<8x32xf32>
    %125 = tpu.matmul %123, %124, %cst_58 {dimension_numbers = #tpu.dot_dimension_numbers<[1], [0], [0], [1], [0, 0, 1, 1], [], []>} : vector<8x8xbf16>, vector<8x32xbf16>, vector<8x32xf32> -> vector<8x32xf32>
    %126 = arith.addf %102, %125 : vector<8x32xf32>
    %127 = vector.extract_strided_slice %47 {offsets = [0, 24], sizes = [8, 8], strides = [1, 1]} : vector<8x32xbf16> to vector<8x8xbf16>
    %128 = vector.extract_strided_slice %48 {offsets = [0, 24], sizes = [8, 8], strides = [1, 1]} : vector<8x32xbf16> to vector<8x8xbf16>
    %cst_59 = arith.constant dense<0.000000e+00> : vector<8x8xf32>
    %129 = tpu.matmul %127, %128, %cst_59 {dimension_numbers = #tpu.dot_dimension_numbers<[1], [1], [0], [0], [0, 0, 1, 0], [], []>} : vector<8x8xbf16>, vector<8x8xbf16>, vector<8x8xf32> -> vector<8x8xf32>
    %cst_60 = arith.constant 0.353553385 : f32
    %130 = vector.broadcast %cst_60 : f32 to vector<8x8xf32>
    %131 = arith.mulf %129, %130 : vector<8x8xf32>
    %cst_61 = arith.constant -1.000000e+09 : f32
    %132 = vector.broadcast %cst_61 : f32 to vector<8x8xf32>
    %133 = arith.select %51, %131, %132 : vector<8x8xi1>, vector<8x8xf32>
    %cst_62 = arith.constant dense<0xFF800000> : vector<8xf32>
    %134 = vector.multi_reduction <maximumf>, %133, %cst_62 [1] : vector<8x8xf32> to vector<8xf32>
    %135 = vector.shape_cast %134 : vector<8xf32> to vector<8x1xf32>
    %136 = vector.broadcast %135 : vector<8x1xf32> to vector<8x8xf32>
    %137 = arith.subf %133, %136 : vector<8x8xf32>
    %138 = math.exp %137 : vector<8x8xf32>
    %cst_63 = arith.constant dense<0.000000e+00> : vector<8xf32>
    %139 = vector.multi_reduction <add>, %138, %cst_63 [1] : vector<8x8xf32> to vector<8xf32>
    %140 = vector.shape_cast %139 : vector<8xf32> to vector<8x1xf32>
    %141 = tpu.reciprocal %140 {approx = true} : vector<8x1xf32> -> vector<8x1xf32>
    %142 = vector.broadcast %141 : vector<8x1xf32> to vector<8x8xf32>
    %143 = arith.mulf %138, %142 : vector<8x8xf32>
    %144 = arith.truncf %143 : vector<8x8xf32> to vector<8x8xbf16>
    %145 = vector.extract_strided_slice %49 {offsets = [0, 24], sizes = [8, 8], strides = [1, 1]} : vector<8x32xbf16> to vector<8x8xbf16>
    %cst_64 = arith.constant dense<0.000000e+00> : vector<8x8xf32>
    %146 = tpu.matmul %144, %145, %cst_64 {dimension_numbers = #tpu.dot_dimension_numbers<[1], [0], [0], [1], [0, 0, 1, 1], [], []>} : vector<8x8xbf16>, vector<8x8xbf16>, vector<8x8xf32> -> vector<8x8xf32>
    %147 = arith.truncf %146 : vector<8x8xf32> to vector<8x8xbf16>
    %148 = vector.extract_strided_slice %53 {offsets = [24, 0], sizes = [8, 32], strides = [1, 1]} : vector<32x32xbf16> to vector<8x32xbf16>
    %cst_65 = arith.constant dense<0.000000e+00> : vector<8x32xf32>
    %149 = tpu.matmul %147, %148, %cst_65 {dimension_numbers = #tpu.dot_dimension_numbers<[1], [0], [0], [1], [0, 0, 1, 1], [], []>} : vector<8x8xbf16>, vector<8x32xbf16>, vector<8x32xf32> -> vector<8x32xf32>
    %150 = arith.addf %126, %149 : vector<8x32xf32>
    %151 = vector.broadcast %55 : vector<1x32xf32> to vector<8x32xf32>
    %152 = arith.addf %150, %151 : vector<8x32xf32>
    %153 = arith.addf %3, %152 : vector<8x32xf32>
    %c0_66 = arith.constant 0 : index
    %c0_67 = arith.constant 0 : index
    %c0_68 = arith.constant 0 : index
    %154 = vector.load %arg10[%c0_66, %c0_67, %c0_68] : memref<1x1x32xf32, #tpu.memory_space<vmem>>, vector<1x1x32xf32>
    %155 = vector.shape_cast %154 : vector<1x1x32xf32> to vector<1x32xf32>
    %c0_69 = arith.constant 0 : index
    %c0_70 = arith.constant 0 : index
    %c0_71 = arith.constant 0 : index
    %156 = vector.load %arg11[%c0_69, %c0_70, %c0_71] : memref<1x1x32xf32, #tpu.memory_space<vmem>>, vector<1x1x32xf32>
    %157 = vector.shape_cast %156 : vector<1x1x32xf32> to vector<1x32xf32>
    %cst_72 = arith.constant dense<0.000000e+00> : vector<8xf32>
    %158 = vector.multi_reduction <add>, %153, %cst_72 [1] : vector<8x32xf32> to vector<8xf32>
    %159 = vector.shape_cast %158 : vector<8xf32> to vector<8x1xf32>
    %cst_73 = arith.constant 3.200000e+01 : f32
    %160 = vector.broadcast %cst_73 : f32 to vector<8x1xf32>
    %161 = arith.divf %159, %160 : vector<8x1xf32>
    %162 = vector.broadcast %161 : vector<8x1xf32> to vector<8x32xf32>
    %163 = arith.subf %153, %162 : vector<8x32xf32>
    %164 = arith.mulf %163, %163 : vector<8x32xf32>
    %cst_74 = arith.constant dense<0.000000e+00> : vector<8xf32>
    %165 = vector.multi_reduction <add>, %164, %cst_74 [1] : vector<8x32xf32> to vector<8xf32>
    %166 = vector.shape_cast %165 : vector<8xf32> to vector<8x1xf32>
    %cst_75 = arith.constant 3.100000e+01 : f32
    %167 = vector.broadcast %cst_75 : f32 to vector<8x1xf32>
    %168 = arith.divf %166, %167 : vector<8x1xf32>
    %169 = vector.broadcast %161 : vector<8x1xf32> to vector<8x32xf32>
    %170 = arith.subf %153, %169 : vector<8x32xf32>
    %171 = vector.broadcast %155 : vector<1x32xf32> to vector<8x32xf32>
    %172 = arith.mulf %171, %170 : vector<8x32xf32>
    %173 = math.sqrt %168 : vector<8x1xf32>
    %cst_76 = arith.constant 9.99999997E-7 : f32
    %174 = vector.broadcast %cst_76 : f32 to vector<8x1xf32>
    %175 = arith.addf %173, %174 : vector<8x1xf32>
    %176 = vector.broadcast %175 : vector<8x1xf32> to vector<8x32xf32>
    %177 = arith.divf %172, %176 : vector<8x32xf32>
    %178 = vector.broadcast %157 : vector<1x32xf32> to vector<8x32xf32>
    %179 = arith.addf %177, %178 : vector<8x32xf32>
    %180 = arith.truncf %179 : vector<8x32xf32> to vector<8x32xbf16>
    %c0_77 = arith.constant 0 : index
    %c0_78 = arith.constant 0 : index
    %c0_79 = arith.constant 0 : index
    %181 = vector.load %arg20[%c0_77, %c0_78, %c0_79] : memref<1x32x64xbf16, #tpu.memory_space<vmem>>, vector<1x32x64xbf16>
    %182 = vector.shape_cast %181 : vector<1x32x64xbf16> to vector<32x64xbf16>
    %cst_80 = arith.constant dense<0.000000e+00> : vector<8x64xf32>
    %183 = tpu.matmul %180, %182, %cst_80 {dimension_numbers = #tpu.dot_dimension_numbers<[1], [0], [0], [1], [0, 0, 1, 1], [], []>} : vector<8x32xbf16>, vector<32x64xbf16>, vector<8x64xf32> -> vector<8x64xf32>
    %c0_81 = arith.constant 0 : index
    %c0_82 = arith.constant 0 : index
    %c0_83 = arith.constant 0 : index
    %184 = vector.load %arg21[%c0_81, %c0_82, %c0_83] : memref<1x1x64xf32, #tpu.memory_space<vmem>>, vector<1x1x64xf32>
    %185 = vector.shape_cast %184 : vector<1x1x64xf32> to vector<1x64xf32>
    %186 = vector.broadcast %185 : vector<1x64xf32> to vector<8x64xf32>
    %187 = arith.addf %183, %186 : vector<8x64xf32>
    %188 = arith.truncf %5 : vector<8x32xf32> to vector<8x32xbf16>
    %c0_84 = arith.constant 0 : index
    %c0_85 = arith.constant 0 : index
    %c0_86 = arith.constant 0 : index
    %189 = vector.load %arg22[%c0_84, %c0_85, %c0_86] : memref<1x32x128xbf16, #tpu.memory_space<vmem>>, vector<1x32x128xbf16>
    %190 = vector.shape_cast %189 : vector<1x32x128xbf16> to vector<32x128xbf16>
    %cst_87 = arith.constant dense<0.000000e+00> : vector<8x128xf32>
    %191 = tpu.matmul %188, %190, %cst_87 {dimension_numbers = #tpu.dot_dimension_numbers<[1], [0], [0], [1], [0, 0, 1, 1], [], []>} : vector<8x32xbf16>, vector<32x128xbf16>, vector<8x128xf32> -> vector<8x128xf32>
    %c0_88 = arith.constant 0 : index
    %c0_89 = arith.constant 0 : index
    %c0_90 = arith.constant 0 : index
    %192 = vector.load %arg23[%c0_88, %c0_89, %c0_90] : memref<1x1x128xf32, #tpu.memory_space<vmem>>, vector<1x1x128xf32>
    %193 = vector.shape_cast %192 : vector<1x1x128xf32> to vector<1x128xf32>
    %194 = vector.broadcast %193 : vector<1x128xf32> to vector<8x128xf32>
    %195 = arith.addf %191, %194 : vector<8x128xf32>
    %196 = arith.truncf %187 : vector<8x64xf32> to vector<8x64xbf16>
    %197 = arith.truncf %195 : vector<8x128xf32> to vector<8x128xbf16>
    %c0_i32_91 = arith.constant 0 : i32
    %198 = vector.broadcast %c0_i32_91 : i32 to vector<1x8xi32>
    %199 = arith.cmpi ne, %7, %198 : vector<1x8xi32>
    %c0_i32_92 = arith.constant 0 : i32
    %200 = vector.broadcast %c0_i32_92 : i32 to vector<1x8xi32>
    %201 = arith.cmpi eq, %11, %200 : vector<1x8xi32>
    %202 = arith.andi %199, %201 : vector<1x8xi1>
    %203 = vector.extract_strided_slice %196 {offsets = [0, 0], sizes = [8, 32], strides = [1, 1]} : vector<8x64xbf16> to vector<8x32xbf16>
    %204 = vector.extract_strided_slice %197 {offsets = [0, 0], sizes = [8, 32], strides = [1, 1]} : vector<8x128xbf16> to vector<8x32xbf16>
    %205 = vector.extract_strided_slice %197 {offsets = [0, 32], sizes = [8, 32], strides = [1, 1]} : vector<8x128xbf16> to vector<8x32xbf16>
    %c0_93 = arith.constant 0 : index
    %c0_94 = arith.constant 0 : index
    %c0_95 = arith.constant 0 : index
    %206 = vector.load %arg24[%c0_93, %c0_94, %c0_95] : memref<1x32x32xbf16, #tpu.memory_space<vmem>>, vector<1x32x32xbf16>
    %207 = vector.shape_cast %206 : vector<1x32x32xbf16> to vector<32x32xbf16>
    %c0_96 = arith.constant 0 : index
    %c0_97 = arith.constant 0 : index
    %c0_98 = arith.constant 0 : index
    %208 = vector.load %arg25[%c0_96, %c0_97, %c0_98] : memref<1x1x32xf32, #tpu.memory_space<vmem>>, vector<1x1x32xf32>
    %209 = vector.shape_cast %208 : vector<1x1x32xf32> to vector<1x32xf32>
    %210 = vector.extract_strided_slice %203 {offsets = [0, 0], sizes = [8, 8], strides = [1, 1]} : vector<8x32xbf16> to vector<8x8xbf16>
    %211 = vector.extract_strided_slice %204 {offsets = [0, 0], sizes = [8, 8], strides = [1, 1]} : vector<8x32xbf16> to vector<8x8xbf16>
    %cst_99 = arith.constant dense<0.000000e+00> : vector<8x8xf32>
    %212 = tpu.matmul %210, %211, %cst_99 {dimension_numbers = #tpu.dot_dimension_numbers<[1], [1], [0], [0], [0, 0, 1, 0], [], []>} : vector<8x8xbf16>, vector<8x8xbf16>, vector<8x8xf32> -> vector<8x8xf32>
    %cst_100 = arith.constant 0.353553385 : f32
    %213 = vector.broadcast %cst_100 : f32 to vector<8x8xf32>
    %214 = arith.mulf %212, %213 : vector<8x8xf32>
    %cst_101 = arith.constant -1.000000e+09 : f32
    %215 = vector.shape_cast %202 : vector<1x8xi1> to vector<1x8xi1>
    %216 = vector.broadcast %215 : vector<1x8xi1> to vector<8x8xi1>
    %217 = vector.broadcast %cst_101 : f32 to vector<8x8xf32>
    %218 = arith.select %216, %214, %217 : vector<8x8xi1>, vector<8x8xf32>
    %cst_102 = arith.constant dense<0xFF800000> : vector<8xf32>
    %219 = vector.multi_reduction <maximumf>, %218, %cst_102 [1] : vector<8x8xf32> to vector<8xf32>
    %220 = vector.shape_cast %219 : vector<8xf32> to vector<8x1xf32>
    %221 = vector.broadcast %220 : vector<8x1xf32> to vector<8x8xf32>
    %222 = arith.subf %218, %221 : vector<8x8xf32>
    %223 = math.exp %222 : vector<8x8xf32>
    %cst_103 = arith.constant dense<0.000000e+00> : vector<8xf32>
    %224 = vector.multi_reduction <add>, %223, %cst_103 [1] : vector<8x8xf32> to vector<8xf32>
    %225 = vector.shape_cast %224 : vector<8xf32> to vector<8x1xf32>
    %226 = tpu.reciprocal %225 {approx = true} : vector<8x1xf32> -> vector<8x1xf32>
    %227 = vector.broadcast %226 : vector<8x1xf32> to vector<8x8xf32>
    %228 = arith.mulf %223, %227 : vector<8x8xf32>
    %229 = arith.truncf %228 : vector<8x8xf32> to vector<8x8xbf16>
    %230 = vector.extract_strided_slice %205 {offsets = [0, 0], sizes = [8, 8], strides = [1, 1]} : vector<8x32xbf16> to vector<8x8xbf16>
    %cst_104 = arith.constant dense<0.000000e+00> : vector<8x8xf32>
    %231 = tpu.matmul %229, %230, %cst_104 {dimension_numbers = #tpu.dot_dimension_numbers<[1], [0], [0], [1], [0, 0, 1, 1], [], []>} : vector<8x8xbf16>, vector<8x8xbf16>, vector<8x8xf32> -> vector<8x8xf32>
    %232 = arith.truncf %231 : vector<8x8xf32> to vector<8x8xbf16>
    %233 = vector.extract_strided_slice %207 {offsets = [0, 0], sizes = [8, 32], strides = [1, 1]} : vector<32x32xbf16> to vector<8x32xbf16>
    %cst_105 = arith.constant dense<0.000000e+00> : vector<8x32xf32>
    %234 = tpu.matmul %232, %233, %cst_105 {dimension_numbers = #tpu.dot_dimension_numbers<[1], [0], [0], [1], [0, 0, 1, 1], [], []>} : vector<8x8xbf16>, vector<8x32xbf16>, vector<8x32xf32> -> vector<8x32xf32>
    %235 = vector.extract_strided_slice %203 {offsets = [0, 8], sizes = [8, 8], strides = [1, 1]} : vector<8x32xbf16> to vector<8x8xbf16>
    %236 = vector.extract_strided_slice %204 {offsets = [0, 8], sizes = [8, 8], strides = [1, 1]} : vector<8x32xbf16> to vector<8x8xbf16>
    %cst_106 = arith.constant dense<0.000000e+00> : vector<8x8xf32>
    %237 = tpu.matmul %235, %236, %cst_106 {dimension_numbers = #tpu.dot_dimension_numbers<[1], [1], [0], [0], [0, 0, 1, 0], [], []>} : vector<8x8xbf16>, vector<8x8xbf16>, vector<8x8xf32> -> vector<8x8xf32>
    %cst_107 = arith.constant 0.353553385 : f32
    %238 = vector.broadcast %cst_107 : f32 to vector<8x8xf32>
    %239 = arith.mulf %237, %238 : vector<8x8xf32>
    %cst_108 = arith.constant -1.000000e+09 : f32
    %240 = vector.shape_cast %202 : vector<1x8xi1> to vector<1x8xi1>
    %241 = vector.broadcast %240 : vector<1x8xi1> to vector<8x8xi1>
    %242 = vector.broadcast %cst_108 : f32 to vector<8x8xf32>
    %243 = arith.select %241, %239, %242 : vector<8x8xi1>, vector<8x8xf32>
    %cst_109 = arith.constant dense<0xFF800000> : vector<8xf32>
    %244 = vector.multi_reduction <maximumf>, %243, %cst_109 [1] : vector<8x8xf32> to vector<8xf32>
    %245 = vector.shape_cast %244 : vector<8xf32> to vector<8x1xf32>
    %246 = vector.broadcast %245 : vector<8x1xf32> to vector<8x8xf32>
    %247 = arith.subf %243, %246 : vector<8x8xf32>
    %248 = math.exp %247 : vector<8x8xf32>
    %cst_110 = arith.constant dense<0.000000e+00> : vector<8xf32>
    %249 = vector.multi_reduction <add>, %248, %cst_110 [1] : vector<8x8xf32> to vector<8xf32>
    %250 = vector.shape_cast %249 : vector<8xf32> to vector<8x1xf32>
    %251 = tpu.reciprocal %250 {approx = true} : vector<8x1xf32> -> vector<8x1xf32>
    %252 = vector.broadcast %251 : vector<8x1xf32> to vector<8x8xf32>
    %253 = arith.mulf %248, %252 : vector<8x8xf32>
    %254 = arith.truncf %253 : vector<8x8xf32> to vector<8x8xbf16>
    %255 = vector.extract_strided_slice %205 {offsets = [0, 8], sizes = [8, 8], strides = [1, 1]} : vector<8x32xbf16> to vector<8x8xbf16>
    %cst_111 = arith.constant dense<0.000000e+00> : vector<8x8xf32>
    %256 = tpu.matmul %254, %255, %cst_111 {dimension_numbers = #tpu.dot_dimension_numbers<[1], [0], [0], [1], [0, 0, 1, 1], [], []>} : vector<8x8xbf16>, vector<8x8xbf16>, vector<8x8xf32> -> vector<8x8xf32>
    %257 = arith.truncf %256 : vector<8x8xf32> to vector<8x8xbf16>
    %258 = vector.extract_strided_slice %207 {offsets = [8, 0], sizes = [8, 32], strides = [1, 1]} : vector<32x32xbf16> to vector<8x32xbf16>
    %cst_112 = arith.constant dense<0.000000e+00> : vector<8x32xf32>
    %259 = tpu.matmul %257, %258, %cst_112 {dimension_numbers = #tpu.dot_dimension_numbers<[1], [0], [0], [1], [0, 0, 1, 1], [], []>} : vector<8x8xbf16>, vector<8x32xbf16>, vector<8x32xf32> -> vector<8x32xf32>
    %260 = arith.addf %234, %259 : vector<8x32xf32>
    %261 = vector.extract_strided_slice %203 {offsets = [0, 16], sizes = [8, 8], strides = [1, 1]} : vector<8x32xbf16> to vector<8x8xbf16>
    %262 = vector.extract_strided_slice %204 {offsets = [0, 16], sizes = [8, 8], strides = [1, 1]} : vector<8x32xbf16> to vector<8x8xbf16>
    %cst_113 = arith.constant dense<0.000000e+00> : vector<8x8xf32>
    %263 = tpu.matmul %261, %262, %cst_113 {dimension_numbers = #tpu.dot_dimension_numbers<[1], [1], [0], [0], [0, 0, 1, 0], [], []>} : vector<8x8xbf16>, vector<8x8xbf16>, vector<8x8xf32> -> vector<8x8xf32>
    %cst_114 = arith.constant 0.353553385 : f32
    %264 = vector.broadcast %cst_114 : f32 to vector<8x8xf32>
    %265 = arith.mulf %263, %264 : vector<8x8xf32>
    %cst_115 = arith.constant -1.000000e+09 : f32
    %266 = vector.shape_cast %202 : vector<1x8xi1> to vector<1x8xi1>
    %267 = vector.broadcast %266 : vector<1x8xi1> to vector<8x8xi1>
    %268 = vector.broadcast %cst_115 : f32 to vector<8x8xf32>
    %269 = arith.select %267, %265, %268 : vector<8x8xi1>, vector<8x8xf32>
    %cst_116 = arith.constant dense<0xFF800000> : vector<8xf32>
    %270 = vector.multi_reduction <maximumf>, %269, %cst_116 [1] : vector<8x8xf32> to vector<8xf32>
    %271 = vector.shape_cast %270 : vector<8xf32> to vector<8x1xf32>
    %272 = vector.broadcast %271 : vector<8x1xf32> to vector<8x8xf32>
    %273 = arith.subf %269, %272 : vector<8x8xf32>
    %274 = math.exp %273 : vector<8x8xf32>
    %cst_117 = arith.constant dense<0.000000e+00> : vector<8xf32>
    %275 = vector.multi_reduction <add>, %274, %cst_117 [1] : vector<8x8xf32> to vector<8xf32>
    %276 = vector.shape_cast %275 : vector<8xf32> to vector<8x1xf32>
    %277 = tpu.reciprocal %276 {approx = true} : vector<8x1xf32> -> vector<8x1xf32>
    %278 = vector.broadcast %277 : vector<8x1xf32> to vector<8x8xf32>
    %279 = arith.mulf %274, %278 : vector<8x8xf32>
    %280 = arith.truncf %279 : vector<8x8xf32> to vector<8x8xbf16>
    %281 = vector.extract_strided_slice %205 {offsets = [0, 16], sizes = [8, 8], strides = [1, 1]} : vector<8x32xbf16> to vector<8x8xbf16>
    %cst_118 = arith.constant dense<0.000000e+00> : vector<8x8xf32>
    %282 = tpu.matmul %280, %281, %cst_118 {dimension_numbers = #tpu.dot_dimension_numbers<[1], [0], [0], [1], [0, 0, 1, 1], [], []>} : vector<8x8xbf16>, vector<8x8xbf16>, vector<8x8xf32> -> vector<8x8xf32>
    %283 = arith.truncf %282 : vector<8x8xf32> to vector<8x8xbf16>
    %284 = vector.extract_strided_slice %207 {offsets = [16, 0], sizes = [8, 32], strides = [1, 1]} : vector<32x32xbf16> to vector<8x32xbf16>
    %cst_119 = arith.constant dense<0.000000e+00> : vector<8x32xf32>
    %285 = tpu.matmul %283, %284, %cst_119 {dimension_numbers = #tpu.dot_dimension_numbers<[1], [0], [0], [1], [0, 0, 1, 1], [], []>} : vector<8x8xbf16>, vector<8x32xbf16>, vector<8x32xf32> -> vector<8x32xf32>
    %286 = arith.addf %260, %285 : vector<8x32xf32>
    %287 = vector.extract_strided_slice %203 {offsets = [0, 24], sizes = [8, 8], strides = [1, 1]} : vector<8x32xbf16> to vector<8x8xbf16>
    %288 = vector.extract_strided_slice %204 {offsets = [0, 24], sizes = [8, 8], strides = [1, 1]} : vector<8x32xbf16> to vector<8x8xbf16>
    %cst_120 = arith.constant dense<0.000000e+00> : vector<8x8xf32>
    %289 = tpu.matmul %287, %288, %cst_120 {dimension_numbers = #tpu.dot_dimension_numbers<[1], [1], [0], [0], [0, 0, 1, 0], [], []>} : vector<8x8xbf16>, vector<8x8xbf16>, vector<8x8xf32> -> vector<8x8xf32>
    %cst_121 = arith.constant 0.353553385 : f32
    %290 = vector.broadcast %cst_121 : f32 to vector<8x8xf32>
    %291 = arith.mulf %289, %290 : vector<8x8xf32>
    %cst_122 = arith.constant -1.000000e+09 : f32
    %292 = vector.shape_cast %202 : vector<1x8xi1> to vector<1x8xi1>
    %293 = vector.broadcast %292 : vector<1x8xi1> to vector<8x8xi1>
    %294 = vector.broadcast %cst_122 : f32 to vector<8x8xf32>
    %295 = arith.select %293, %291, %294 : vector<8x8xi1>, vector<8x8xf32>
    %cst_123 = arith.constant dense<0xFF800000> : vector<8xf32>
    %296 = vector.multi_reduction <maximumf>, %295, %cst_123 [1] : vector<8x8xf32> to vector<8xf32>
    %297 = vector.shape_cast %296 : vector<8xf32> to vector<8x1xf32>
    %298 = vector.broadcast %297 : vector<8x1xf32> to vector<8x8xf32>
    %299 = arith.subf %295, %298 : vector<8x8xf32>
    %300 = math.exp %299 : vector<8x8xf32>
    %cst_124 = arith.constant dense<0.000000e+00> : vector<8xf32>
    %301 = vector.multi_reduction <add>, %300, %cst_124 [1] : vector<8x8xf32> to vector<8xf32>
    %302 = vector.shape_cast %301 : vector<8xf32> to vector<8x1xf32>
    %303 = tpu.reciprocal %302 {approx = true} : vector<8x1xf32> -> vector<8x1xf32>
    %304 = vector.broadcast %303 : vector<8x1xf32> to vector<8x8xf32>
    %305 = arith.mulf %300, %304 : vector<8x8xf32>
    %306 = arith.truncf %305 : vector<8x8xf32> to vector<8x8xbf16>
    %307 = vector.extract_strided_slice %205 {offsets = [0, 24], sizes = [8, 8], strides = [1, 1]} : vector<8x32xbf16> to vector<8x8xbf16>
    %cst_125 = arith.constant dense<0.000000e+00> : vector<8x8xf32>
    %308 = tpu.matmul %306, %307, %cst_125 {dimension_numbers = #tpu.dot_dimension_numbers<[1], [0], [0], [1], [0, 0, 1, 1], [], []>} : vector<8x8xbf16>, vector<8x8xbf16>, vector<8x8xf32> -> vector<8x8xf32>
    %309 = arith.truncf %308 : vector<8x8xf32> to vector<8x8xbf16>
    %310 = vector.extract_strided_slice %207 {offsets = [24, 0], sizes = [8, 32], strides = [1, 1]} : vector<32x32xbf16> to vector<8x32xbf16>
    %cst_126 = arith.constant dense<0.000000e+00> : vector<8x32xf32>
    %311 = tpu.matmul %309, %310, %cst_126 {dimension_numbers = #tpu.dot_dimension_numbers<[1], [0], [0], [1], [0, 0, 1, 1], [], []>} : vector<8x8xbf16>, vector<8x32xbf16>, vector<8x32xf32> -> vector<8x32xf32>
    %312 = arith.addf %286, %311 : vector<8x32xf32>
    %313 = vector.broadcast %209 : vector<1x32xf32> to vector<8x32xf32>
    %314 = arith.addf %312, %313 : vector<8x32xf32>
    %315 = arith.addf %153, %314 : vector<8x32xf32>
    %c0_127 = arith.constant 0 : index
    %c0_128 = arith.constant 0 : index
    %c0_129 = arith.constant 0 : index
    %316 = vector.load %arg12[%c0_127, %c0_128, %c0_129] : memref<1x1x32xf32, #tpu.memory_space<vmem>>, vector<1x1x32xf32>
    %317 = vector.shape_cast %316 : vector<1x1x32xf32> to vector<1x32xf32>
    %c0_130 = arith.constant 0 : index
    %c0_131 = arith.constant 0 : index
    %c0_132 = arith.constant 0 : index
    %318 = vector.load %arg13[%c0_130, %c0_131, %c0_132] : memref<1x1x32xf32, #tpu.memory_space<vmem>>, vector<1x1x32xf32>
    %319 = vector.shape_cast %318 : vector<1x1x32xf32> to vector<1x32xf32>
    %cst_133 = arith.constant dense<0.000000e+00> : vector<8xf32>
    %320 = vector.multi_reduction <add>, %315, %cst_133 [1] : vector<8x32xf32> to vector<8xf32>
    %321 = vector.shape_cast %320 : vector<8xf32> to vector<8x1xf32>
    %cst_134 = arith.constant 3.200000e+01 : f32
    %322 = vector.broadcast %cst_134 : f32 to vector<8x1xf32>
    %323 = arith.divf %321, %322 : vector<8x1xf32>
    %324 = vector.broadcast %323 : vector<8x1xf32> to vector<8x32xf32>
    %325 = arith.subf %315, %324 : vector<8x32xf32>
    %326 = arith.mulf %325, %325 : vector<8x32xf32>
    %cst_135 = arith.constant dense<0.000000e+00> : vector<8xf32>
    %327 = vector.multi_reduction <add>, %326, %cst_135 [1] : vector<8x32xf32> to vector<8xf32>
    %328 = vector.shape_cast %327 : vector<8xf32> to vector<8x1xf32>
    %cst_136 = arith.constant 3.100000e+01 : f32
    %329 = vector.broadcast %cst_136 : f32 to vector<8x1xf32>
    %330 = arith.divf %328, %329 : vector<8x1xf32>
    %331 = vector.broadcast %323 : vector<8x1xf32> to vector<8x32xf32>
    %332 = arith.subf %315, %331 : vector<8x32xf32>
    %333 = vector.broadcast %317 : vector<1x32xf32> to vector<8x32xf32>
    %334 = arith.mulf %333, %332 : vector<8x32xf32>
    %335 = math.sqrt %330 : vector<8x1xf32>
    %cst_137 = arith.constant 9.99999997E-7 : f32
    %336 = vector.broadcast %cst_137 : f32 to vector<8x1xf32>
    %337 = arith.addf %335, %336 : vector<8x1xf32>
    %338 = vector.broadcast %337 : vector<8x1xf32> to vector<8x32xf32>
    %339 = arith.divf %334, %338 : vector<8x32xf32>
    %340 = vector.broadcast %319 : vector<1x32xf32> to vector<8x32xf32>
    %341 = arith.addf %339, %340 : vector<8x32xf32>
    %c0_i32_138 = arith.constant 0 : i32
    %342 = vector.broadcast %c0_i32_138 : i32 to vector<1x8xi32>
    %343 = arith.cmpi ne, %7, %342 : vector<1x8xi32>
    %c1_i32 = arith.constant 1 : i32
    %344 = vector.broadcast %c1_i32 : i32 to vector<1x8xi32>
    %345 = arith.cmpi eq, %11, %344 : vector<1x8xi32>
    %346 = arith.andi %343, %345 : vector<1x8xi1>
    %347 = vector.extract_strided_slice %196 {offsets = [0, 32], sizes = [8, 32], strides = [1, 1]} : vector<8x64xbf16> to vector<8x32xbf16>
    %348 = vector.extract_strided_slice %197 {offsets = [0, 64], sizes = [8, 32], strides = [1, 1]} : vector<8x128xbf16> to vector<8x32xbf16>
    %349 = vector.extract_strided_slice %197 {offsets = [0, 96], sizes = [8, 32], strides = [1, 1]} : vector<8x128xbf16> to vector<8x32xbf16>
    %c0_139 = arith.constant 0 : index
    %c0_140 = arith.constant 0 : index
    %c0_141 = arith.constant 0 : index
    %350 = vector.load %arg26[%c0_139, %c0_140, %c0_141] : memref<1x32x32xbf16, #tpu.memory_space<vmem>>, vector<1x32x32xbf16>
    %351 = vector.shape_cast %350 : vector<1x32x32xbf16> to vector<32x32xbf16>
    %c0_142 = arith.constant 0 : index
    %c0_143 = arith.constant 0 : index
    %c0_144 = arith.constant 0 : index
    %352 = vector.load %arg27[%c0_142, %c0_143, %c0_144] : memref<1x1x32xf32, #tpu.memory_space<vmem>>, vector<1x1x32xf32>
    %353 = vector.shape_cast %352 : vector<1x1x32xf32> to vector<1x32xf32>
    %354 = vector.extract_strided_slice %347 {offsets = [0, 0], sizes = [8, 8], strides = [1, 1]} : vector<8x32xbf16> to vector<8x8xbf16>
    %355 = vector.extract_strided_slice %348 {offsets = [0, 0], sizes = [8, 8], strides = [1, 1]} : vector<8x32xbf16> to vector<8x8xbf16>
    %cst_145 = arith.constant dense<0.000000e+00> : vector<8x8xf32>
    %356 = tpu.matmul %354, %355, %cst_145 {dimension_numbers = #tpu.dot_dimension_numbers<[1], [1], [0], [0], [0, 0, 1, 0], [], []>} : vector<8x8xbf16>, vector<8x8xbf16>, vector<8x8xf32> -> vector<8x8xf32>
    %cst_146 = arith.constant 0.353553385 : f32
    %357 = vector.broadcast %cst_146 : f32 to vector<8x8xf32>
    %358 = arith.mulf %356, %357 : vector<8x8xf32>
    %cst_147 = arith.constant -1.000000e+09 : f32
    %359 = vector.shape_cast %346 : vector<1x8xi1> to vector<1x8xi1>
    %360 = vector.broadcast %359 : vector<1x8xi1> to vector<8x8xi1>
    %361 = vector.broadcast %cst_147 : f32 to vector<8x8xf32>
    %362 = arith.select %360, %358, %361 : vector<8x8xi1>, vector<8x8xf32>
    %cst_148 = arith.constant dense<0xFF800000> : vector<8xf32>
    %363 = vector.multi_reduction <maximumf>, %362, %cst_148 [1] : vector<8x8xf32> to vector<8xf32>
    %364 = vector.shape_cast %363 : vector<8xf32> to vector<8x1xf32>
    %365 = vector.broadcast %364 : vector<8x1xf32> to vector<8x8xf32>
    %366 = arith.subf %362, %365 : vector<8x8xf32>
    %367 = math.exp %366 : vector<8x8xf32>
    %cst_149 = arith.constant dense<0.000000e+00> : vector<8xf32>
    %368 = vector.multi_reduction <add>, %367, %cst_149 [1] : vector<8x8xf32> to vector<8xf32>
    %369 = vector.shape_cast %368 : vector<8xf32> to vector<8x1xf32>
    %370 = tpu.reciprocal %369 {approx = true} : vector<8x1xf32> -> vector<8x1xf32>
    %371 = vector.broadcast %370 : vector<8x1xf32> to vector<8x8xf32>
    %372 = arith.mulf %367, %371 : vector<8x8xf32>
    %373 = arith.truncf %372 : vector<8x8xf32> to vector<8x8xbf16>
    %374 = vector.extract_strided_slice %349 {offsets = [0, 0], sizes = [8, 8], strides = [1, 1]} : vector<8x32xbf16> to vector<8x8xbf16>
    %cst_150 = arith.constant dense<0.000000e+00> : vector<8x8xf32>
    %375 = tpu.matmul %373, %374, %cst_150 {dimension_numbers = #tpu.dot_dimension_numbers<[1], [0], [0], [1], [0, 0, 1, 1], [], []>} : vector<8x8xbf16>, vector<8x8xbf16>, vector<8x8xf32> -> vector<8x8xf32>
    %376 = arith.truncf %375 : vector<8x8xf32> to vector<8x8xbf16>
    %377 = vector.extract_strided_slice %351 {offsets = [0, 0], sizes = [8, 32], strides = [1, 1]} : vector<32x32xbf16> to vector<8x32xbf16>
    %cst_151 = arith.constant dense<0.000000e+00> : vector<8x32xf32>
    %378 = tpu.matmul %376, %377, %cst_151 {dimension_numbers = #tpu.dot_dimension_numbers<[1], [0], [0], [1], [0, 0, 1, 1], [], []>} : vector<8x8xbf16>, vector<8x32xbf16>, vector<8x32xf32> -> vector<8x32xf32>
    %379 = vector.extract_strided_slice %347 {offsets = [0, 8], sizes = [8, 8], strides = [1, 1]} : vector<8x32xbf16> to vector<8x8xbf16>
    %380 = vector.extract_strided_slice %348 {offsets = [0, 8], sizes = [8, 8], strides = [1, 1]} : vector<8x32xbf16> to vector<8x8xbf16>
    %cst_152 = arith.constant dense<0.000000e+00> : vector<8x8xf32>
    %381 = tpu.matmul %379, %380, %cst_152 {dimension_numbers = #tpu.dot_dimension_numbers<[1], [1], [0], [0], [0, 0, 1, 0], [], []>} : vector<8x8xbf16>, vector<8x8xbf16>, vector<8x8xf32> -> vector<8x8xf32>
    %cst_153 = arith.constant 0.353553385 : f32
    %382 = vector.broadcast %cst_153 : f32 to vector<8x8xf32>
    %383 = arith.mulf %381, %382 : vector<8x8xf32>
    %cst_154 = arith.constant -1.000000e+09 : f32
    %384 = vector.shape_cast %346 : vector<1x8xi1> to vector<1x8xi1>
    %385 = vector.broadcast %384 : vector<1x8xi1> to vector<8x8xi1>
    %386 = vector.broadcast %cst_154 : f32 to vector<8x8xf32>
    %387 = arith.select %385, %383, %386 : vector<8x8xi1>, vector<8x8xf32>
    %cst_155 = arith.constant dense<0xFF800000> : vector<8xf32>
    %388 = vector.multi_reduction <maximumf>, %387, %cst_155 [1] : vector<8x8xf32> to vector<8xf32>
    %389 = vector.shape_cast %388 : vector<8xf32> to vector<8x1xf32>
    %390 = vector.broadcast %389 : vector<8x1xf32> to vector<8x8xf32>
    %391 = arith.subf %387, %390 : vector<8x8xf32>
    %392 = math.exp %391 : vector<8x8xf32>
    %cst_156 = arith.constant dense<0.000000e+00> : vector<8xf32>
    %393 = vector.multi_reduction <add>, %392, %cst_156 [1] : vector<8x8xf32> to vector<8xf32>
    %394 = vector.shape_cast %393 : vector<8xf32> to vector<8x1xf32>
    %395 = tpu.reciprocal %394 {approx = true} : vector<8x1xf32> -> vector<8x1xf32>
    %396 = vector.broadcast %395 : vector<8x1xf32> to vector<8x8xf32>
    %397 = arith.mulf %392, %396 : vector<8x8xf32>
    %398 = arith.truncf %397 : vector<8x8xf32> to vector<8x8xbf16>
    %399 = vector.extract_strided_slice %349 {offsets = [0, 8], sizes = [8, 8], strides = [1, 1]} : vector<8x32xbf16> to vector<8x8xbf16>
    %cst_157 = arith.constant dense<0.000000e+00> : vector<8x8xf32>
    %400 = tpu.matmul %398, %399, %cst_157 {dimension_numbers = #tpu.dot_dimension_numbers<[1], [0], [0], [1], [0, 0, 1, 1], [], []>} : vector<8x8xbf16>, vector<8x8xbf16>, vector<8x8xf32> -> vector<8x8xf32>
    %401 = arith.truncf %400 : vector<8x8xf32> to vector<8x8xbf16>
    %402 = vector.extract_strided_slice %351 {offsets = [8, 0], sizes = [8, 32], strides = [1, 1]} : vector<32x32xbf16> to vector<8x32xbf16>
    %cst_158 = arith.constant dense<0.000000e+00> : vector<8x32xf32>
    %403 = tpu.matmul %401, %402, %cst_158 {dimension_numbers = #tpu.dot_dimension_numbers<[1], [0], [0], [1], [0, 0, 1, 1], [], []>} : vector<8x8xbf16>, vector<8x32xbf16>, vector<8x32xf32> -> vector<8x32xf32>
    %404 = arith.addf %378, %403 : vector<8x32xf32>
    %405 = vector.extract_strided_slice %347 {offsets = [0, 16], sizes = [8, 8], strides = [1, 1]} : vector<8x32xbf16> to vector<8x8xbf16>
    %406 = vector.extract_strided_slice %348 {offsets = [0, 16], sizes = [8, 8], strides = [1, 1]} : vector<8x32xbf16> to vector<8x8xbf16>
    %cst_159 = arith.constant dense<0.000000e+00> : vector<8x8xf32>
    %407 = tpu.matmul %405, %406, %cst_159 {dimension_numbers = #tpu.dot_dimension_numbers<[1], [1], [0], [0], [0, 0, 1, 0], [], []>} : vector<8x8xbf16>, vector<8x8xbf16>, vector<8x8xf32> -> vector<8x8xf32>
    %cst_160 = arith.constant 0.353553385 : f32
    %408 = vector.broadcast %cst_160 : f32 to vector<8x8xf32>
    %409 = arith.mulf %407, %408 : vector<8x8xf32>
    %cst_161 = arith.constant -1.000000e+09 : f32
    %410 = vector.shape_cast %346 : vector<1x8xi1> to vector<1x8xi1>
    %411 = vector.broadcast %410 : vector<1x8xi1> to vector<8x8xi1>
    %412 = vector.broadcast %cst_161 : f32 to vector<8x8xf32>
    %413 = arith.select %411, %409, %412 : vector<8x8xi1>, vector<8x8xf32>
    %cst_162 = arith.constant dense<0xFF800000> : vector<8xf32>
    %414 = vector.multi_reduction <maximumf>, %413, %cst_162 [1] : vector<8x8xf32> to vector<8xf32>
    %415 = vector.shape_cast %414 : vector<8xf32> to vector<8x1xf32>
    %416 = vector.broadcast %415 : vector<8x1xf32> to vector<8x8xf32>
    %417 = arith.subf %413, %416 : vector<8x8xf32>
    %418 = math.exp %417 : vector<8x8xf32>
    %cst_163 = arith.constant dense<0.000000e+00> : vector<8xf32>
    %419 = vector.multi_reduction <add>, %418, %cst_163 [1] : vector<8x8xf32> to vector<8xf32>
    %420 = vector.shape_cast %419 : vector<8xf32> to vector<8x1xf32>
    %421 = tpu.reciprocal %420 {approx = true} : vector<8x1xf32> -> vector<8x1xf32>
    %422 = vector.broadcast %421 : vector<8x1xf32> to vector<8x8xf32>
    %423 = arith.mulf %418, %422 : vector<8x8xf32>
    %424 = arith.truncf %423 : vector<8x8xf32> to vector<8x8xbf16>
    %425 = vector.extract_strided_slice %349 {offsets = [0, 16], sizes = [8, 8], strides = [1, 1]} : vector<8x32xbf16> to vector<8x8xbf16>
    %cst_164 = arith.constant dense<0.000000e+00> : vector<8x8xf32>
    %426 = tpu.matmul %424, %425, %cst_164 {dimension_numbers = #tpu.dot_dimension_numbers<[1], [0], [0], [1], [0, 0, 1, 1], [], []>} : vector<8x8xbf16>, vector<8x8xbf16>, vector<8x8xf32> -> vector<8x8xf32>
    %427 = arith.truncf %426 : vector<8x8xf32> to vector<8x8xbf16>
    %428 = vector.extract_strided_slice %351 {offsets = [16, 0], sizes = [8, 32], strides = [1, 1]} : vector<32x32xbf16> to vector<8x32xbf16>
    %cst_165 = arith.constant dense<0.000000e+00> : vector<8x32xf32>
    %429 = tpu.matmul %427, %428, %cst_165 {dimension_numbers = #tpu.dot_dimension_numbers<[1], [0], [0], [1], [0, 0, 1, 1], [], []>} : vector<8x8xbf16>, vector<8x32xbf16>, vector<8x32xf32> -> vector<8x32xf32>
    %430 = arith.addf %404, %429 : vector<8x32xf32>
    %431 = vector.extract_strided_slice %347 {offsets = [0, 24], sizes = [8, 8], strides = [1, 1]} : vector<8x32xbf16> to vector<8x8xbf16>
    %432 = vector.extract_strided_slice %348 {offsets = [0, 24], sizes = [8, 8], strides = [1, 1]} : vector<8x32xbf16> to vector<8x8xbf16>
    %cst_166 = arith.constant dense<0.000000e+00> : vector<8x8xf32>
    %433 = tpu.matmul %431, %432, %cst_166 {dimension_numbers = #tpu.dot_dimension_numbers<[1], [1], [0], [0], [0, 0, 1, 0], [], []>} : vector<8x8xbf16>, vector<8x8xbf16>, vector<8x8xf32> -> vector<8x8xf32>
    %cst_167 = arith.constant 0.353553385 : f32
    %434 = vector.broadcast %cst_167 : f32 to vector<8x8xf32>
    %435 = arith.mulf %433, %434 : vector<8x8xf32>
    %cst_168 = arith.constant -1.000000e+09 : f32
    %436 = vector.shape_cast %346 : vector<1x8xi1> to vector<1x8xi1>
    %437 = vector.broadcast %436 : vector<1x8xi1> to vector<8x8xi1>
    %438 = vector.broadcast %cst_168 : f32 to vector<8x8xf32>
    %439 = arith.select %437, %435, %438 : vector<8x8xi1>, vector<8x8xf32>
    %cst_169 = arith.constant dense<0xFF800000> : vector<8xf32>
    %440 = vector.multi_reduction <maximumf>, %439, %cst_169 [1] : vector<8x8xf32> to vector<8xf32>
    %441 = vector.shape_cast %440 : vector<8xf32> to vector<8x1xf32>
    %442 = vector.broadcast %441 : vector<8x1xf32> to vector<8x8xf32>
    %443 = arith.subf %439, %442 : vector<8x8xf32>
    %444 = math.exp %443 : vector<8x8xf32>
    %cst_170 = arith.constant dense<0.000000e+00> : vector<8xf32>
    %445 = vector.multi_reduction <add>, %444, %cst_170 [1] : vector<8x8xf32> to vector<8xf32>
    %446 = vector.shape_cast %445 : vector<8xf32> to vector<8x1xf32>
    %447 = tpu.reciprocal %446 {approx = true} : vector<8x1xf32> -> vector<8x1xf32>
    %448 = vector.broadcast %447 : vector<8x1xf32> to vector<8x8xf32>
    %449 = arith.mulf %444, %448 : vector<8x8xf32>
    %450 = arith.truncf %449 : vector<8x8xf32> to vector<8x8xbf16>
    %451 = vector.extract_strided_slice %349 {offsets = [0, 24], sizes = [8, 8], strides = [1, 1]} : vector<8x32xbf16> to vector<8x8xbf16>
    %cst_171 = arith.constant dense<0.000000e+00> : vector<8x8xf32>
    %452 = tpu.matmul %450, %451, %cst_171 {dimension_numbers = #tpu.dot_dimension_numbers<[1], [0], [0], [1], [0, 0, 1, 1], [], []>} : vector<8x8xbf16>, vector<8x8xbf16>, vector<8x8xf32> -> vector<8x8xf32>
    %453 = arith.truncf %452 : vector<8x8xf32> to vector<8x8xbf16>
    %454 = vector.extract_strided_slice %351 {offsets = [24, 0], sizes = [8, 32], strides = [1, 1]} : vector<32x32xbf16> to vector<8x32xbf16>
    %cst_172 = arith.constant dense<0.000000e+00> : vector<8x32xf32>
    %455 = tpu.matmul %453, %454, %cst_172 {dimension_numbers = #tpu.dot_dimension_numbers<[1], [0], [0], [1], [0, 0, 1, 1], [], []>} : vector<8x8xbf16>, vector<8x32xbf16>, vector<8x32xf32> -> vector<8x32xf32>
    %456 = arith.addf %430, %455 : vector<8x32xf32>
    %457 = vector.broadcast %353 : vector<1x32xf32> to vector<8x32xf32>
    %458 = arith.addf %456, %457 : vector<8x32xf32>
    %459 = arith.addf %153, %458 : vector<8x32xf32>
    %c0_173 = arith.constant 0 : index
    %c0_174 = arith.constant 0 : index
    %c0_175 = arith.constant 0 : index
    %460 = vector.load %arg14[%c0_173, %c0_174, %c0_175] : memref<1x1x32xf32, #tpu.memory_space<vmem>>, vector<1x1x32xf32>
    %461 = vector.shape_cast %460 : vector<1x1x32xf32> to vector<1x32xf32>
    %c0_176 = arith.constant 0 : index
    %c0_177 = arith.constant 0 : index
    %c0_178 = arith.constant 0 : index
    %462 = vector.load %arg15[%c0_176, %c0_177, %c0_178] : memref<1x1x32xf32, #tpu.memory_space<vmem>>, vector<1x1x32xf32>
    %463 = vector.shape_cast %462 : vector<1x1x32xf32> to vector<1x32xf32>
    %cst_179 = arith.constant dense<0.000000e+00> : vector<8xf32>
    %464 = vector.multi_reduction <add>, %459, %cst_179 [1] : vector<8x32xf32> to vector<8xf32>
    %465 = vector.shape_cast %464 : vector<8xf32> to vector<8x1xf32>
    %cst_180 = arith.constant 3.200000e+01 : f32
    %466 = vector.broadcast %cst_180 : f32 to vector<8x1xf32>
    %467 = arith.divf %465, %466 : vector<8x1xf32>
    %468 = vector.broadcast %467 : vector<8x1xf32> to vector<8x32xf32>
    %469 = arith.subf %459, %468 : vector<8x32xf32>
    %470 = arith.mulf %469, %469 : vector<8x32xf32>
    %cst_181 = arith.constant dense<0.000000e+00> : vector<8xf32>
    %471 = vector.multi_reduction <add>, %470, %cst_181 [1] : vector<8x32xf32> to vector<8xf32>
    %472 = vector.shape_cast %471 : vector<8xf32> to vector<8x1xf32>
    %cst_182 = arith.constant 3.100000e+01 : f32
    %473 = vector.broadcast %cst_182 : f32 to vector<8x1xf32>
    %474 = arith.divf %472, %473 : vector<8x1xf32>
    %475 = vector.broadcast %467 : vector<8x1xf32> to vector<8x32xf32>
    %476 = arith.subf %459, %475 : vector<8x32xf32>
    %477 = vector.broadcast %461 : vector<1x32xf32> to vector<8x32xf32>
    %478 = arith.mulf %477, %476 : vector<8x32xf32>
    %479 = math.sqrt %474 : vector<8x1xf32>
    %cst_183 = arith.constant 9.99999997E-7 : f32
    %480 = vector.broadcast %cst_183 : f32 to vector<8x1xf32>
    %481 = arith.addf %479, %480 : vector<8x1xf32>
    %482 = vector.broadcast %481 : vector<8x1xf32> to vector<8x32xf32>
    %483 = arith.divf %478, %482 : vector<8x32xf32>
    %484 = vector.broadcast %463 : vector<1x32xf32> to vector<8x32xf32>
    %485 = arith.addf %483, %484 : vector<8x32xf32>
    %486 = arith.truncf %341 : vector<8x32xf32> to vector<8x32xbf16>
    %c0_184 = arith.constant 0 : index
    %c0_185 = arith.constant 0 : index
    %c0_186 = arith.constant 0 : index
    %487 = vector.load %arg28[%c0_184, %c0_185, %c0_186] : memref<1x32x2048xbf16, #tpu.memory_space<vmem>>, vector<1x32x2048xbf16>
    %488 = vector.shape_cast %487 : vector<1x32x2048xbf16> to vector<32x2048xbf16>
    %cst_187 = arith.constant dense<0.000000e+00> : vector<8x2048xf32>
    %489 = tpu.matmul %486, %488, %cst_187 {dimension_numbers = #tpu.dot_dimension_numbers<[1], [0], [0], [1], [0, 0, 1, 1], [], []>} : vector<8x32xbf16>, vector<32x2048xbf16>, vector<8x2048xf32> -> vector<8x2048xf32>
    %490 = arith.truncf %485 : vector<8x32xf32> to vector<8x32xbf16>
    %c0_188 = arith.constant 0 : index
    %c0_189 = arith.constant 0 : index
    %c0_190 = arith.constant 0 : index
    %491 = vector.load %arg29[%c0_188, %c0_189, %c0_190] : memref<1x32x2048xbf16, #tpu.memory_space<vmem>>, vector<1x32x2048xbf16>
    %492 = vector.shape_cast %491 : vector<1x32x2048xbf16> to vector<32x2048xbf16>
    %cst_191 = arith.constant dense<0.000000e+00> : vector<8x2048xf32>
    %493 = tpu.matmul %490, %492, %cst_191 {dimension_numbers = #tpu.dot_dimension_numbers<[1], [0], [0], [1], [0, 0, 1, 1], [], []>} : vector<8x32xbf16>, vector<32x2048xbf16>, vector<8x2048xf32> -> vector<8x2048xf32>
    %494 = arith.addf %489, %493 : vector<8x2048xf32>
    %c0_192 = arith.constant 0 : index
    %c0_193 = arith.constant 0 : index
    %c0_194 = arith.constant 0 : index
    %495 = vector.load %arg30[%c0_192, %c0_193, %c0_194] : memref<1x1x2048xf32, #tpu.memory_space<vmem>>, vector<1x1x2048xf32>
    %496 = vector.shape_cast %495 : vector<1x1x2048xf32> to vector<1x2048xf32>
    %497 = vector.broadcast %496 : vector<1x2048xf32> to vector<8x2048xf32>
    %498 = arith.addf %494, %497 : vector<8x2048xf32>
    %cst_195 = arith.constant 0.000000e+00 : f32
    %499 = vector.broadcast %cst_195 : f32 to vector<8x2048xf32>
    %500 = arith.maximumf %498, %499 : vector<8x2048xf32>
    %501 = arith.truncf %500 : vector<8x2048xf32> to vector<8x2048xbf16>
    %c0_196 = arith.constant 0 : index
    %c0_197 = arith.constant 0 : index
    %c0_198 = arith.constant 0 : index
    %502 = vector.load %arg31[%c0_196, %c0_197, %c0_198] : memref<1x2048x32xbf16, #tpu.memory_space<vmem>>, vector<1x2048x32xbf16>
    %503 = vector.shape_cast %502 : vector<1x2048x32xbf16> to vector<2048x32xbf16>
    %cst_199 = arith.constant dense<0.000000e+00> : vector<8x32xf32>
    %504 = tpu.matmul %501, %503, %cst_199 {dimension_numbers = #tpu.dot_dimension_numbers<[1], [0], [0], [1], [0, 0, 1, 1], [], []>} : vector<8x2048xbf16>, vector<2048x32xbf16>, vector<8x32xf32> -> vector<8x32xf32>
    %c0_200 = arith.constant 0 : index
    %c0_201 = arith.constant 0 : index
    %c0_202 = arith.constant 0 : index
    %505 = vector.load %arg32[%c0_200, %c0_201, %c0_202] : memref<1x1x32xf32, #tpu.memory_space<vmem>>, vector<1x1x32xf32>
    %506 = vector.shape_cast %505 : vector<1x1x32xf32> to vector<1x32xf32>
    %507 = vector.broadcast %506 : vector<1x32xf32> to vector<8x32xf32>
    %508 = arith.addf %504, %507 : vector<8x32xf32>
    %c0_203 = arith.constant 0 : index
    %c0_204 = arith.constant 0 : index
    %509 = vector.load %arg37[%c0_203, %c0_204] : memref<8x32xf32, #tpu.memory_space<vmem>>, vector<8x32xf32>
    tpu.vector_store %arg37[%c0_203, %c0_204], %508 {strides = array<i32>} : memref<8x32xf32, #tpu.memory_space<vmem>>, vector<8x32xf32>,
    %c1_i32_205 = arith.constant 1 : i32
    %510 = arith.cmpi eq, %arg1, %c1_i32_205 : i32
    %511 = arith.extui %510 : i1 to i32
    %c0_i32_206 = arith.constant 0 : i32
    %512 = arith.cmpi ne, %511, %c0_i32_206 : i32
    scf.if %512 {
      %c0_207 = arith.constant 0 : index
      %c0_208 = arith.constant 0 : index
      %513 = vector.load %arg33[%c0_207, %c0_208] : memref<32x1xf32, #tpu.memory_space<vmem>>, vector<32x1xf32>
      %cst_209 = arith.constant dense<0.000000e+00> : vector<8x1xf32>
      %514 = tpu.matmul %508, %513, %cst_209 {dimension_numbers = #tpu.dot_dimension_numbers<[1], [0], [0], [1], [0, 0, 1, 1], [], []>} : vector<8x32xf32>, vector<32x1xf32>, vector<8x1xf32> -> vector<8x1xf32>
      %c0_210 = arith.constant 0 : index
      %c0_211 = arith.constant 0 : index
      %515 = vector.load %arg34[%c0_210, %c0_211] : memref<32x1xf32, #tpu.memory_space<vmem>>, vector<32x1xf32>
      %cst_212 = arith.constant dense<0.000000e+00> : vector<8x1xf32>
      %516 = tpu.matmul %341, %515, %cst_212 {dimension_numbers = #tpu.dot_dimension_numbers<[1], [0], [0], [1], [0, 0, 1, 1], [], []>} : vector<8x32xf32>, vector<32x1xf32>, vector<8x1xf32> -> vector<8x1xf32>
      %517 = arith.addf %514, %516 : vector<8x1xf32>
      %c0_213 = arith.constant 0 : index
      %c0_214 = arith.constant 0 : index
      %518 = vector.load %arg35[%c0_213, %c0_214] : memref<32x1xf32, #tpu.memory_space<vmem>>, vector<32x1xf32>
      %cst_215 = arith.constant dense<0.000000e+00> : vector<8x1xf32>
      %519 = tpu.matmul %485, %518, %cst_215 {dimension_numbers = #tpu.dot_dimension_numbers<[1], [0], [0], [1], [0, 0, 1, 1], [], []>} : vector<8x32xf32>, vector<32x1xf32>, vector<8x1xf32> -> vector<8x1xf32>
      %520 = arith.addf %517, %519 : vector<8x1xf32>
      %cst_216 = arith.constant 0.000000e+00 : f32
      %521 = vector.broadcast %cst_216 : f32 to vector<8x1xf32>
      %522 = arith.subf %521, %520 : vector<8x1xf32>
      %523 = math.exp %522 : vector<8x1xf32>
      %cst_217 = arith.constant 1.000000e+00 : f32
      %524 = vector.broadcast %cst_217 : f32 to vector<8x1xf32>
      %525 = arith.addf %524, %523 : vector<8x1xf32>
      %526 = tpu.reciprocal %525 {approx = true} : vector<8x1xf32> -> vector<8x1xf32>
      %cst_218 = arith.constant dense<0.000000e+00> : vector<8x8xf32>
      %527 = tpu.matmul %508, %5, %cst_218 {dimension_numbers = #tpu.dot_dimension_numbers<[1], [1], [0], [0], [0, 0, 1, 0], [], []>} : vector<8x32xf32>, vector<8x32xf32>, vector<8x8xf32> -> vector<8x8xf32>
      %c0_i32_219 = arith.constant 0 : i32
      %528 = vector.broadcast %c0_i32_219 : i32 to vector<1x8xi32>
      %529 = arith.cmpi eq, %11, %528 : vector<1x8xi32>
      %530 = arith.extui %529 : vector<1x8xi1> to vector<1x8xi32>
      %531 = arith.sitofp %530 : vector<1x8xi32> to vector<1x8xf32>
      %c1_i32_220 = arith.constant 1 : i32
      %532 = vector.broadcast %c1_i32_220 : i32 to vector<1x8xi32>
      %533 = arith.cmpi eq, %11, %532 : vector<1x8xi32>
      %534 = arith.extui %533 : vector<1x8xi1> to vector<1x8xi32>
      %535 = arith.sitofp %534 : vector<1x8xi32> to vector<1x8xf32>
      %536 = vector.broadcast %526 : vector<8x1xf32> to vector<8x8xf32>
      %537 = vector.broadcast %531 : vector<1x8xf32> to vector<8x8xf32>
      %538 = arith.mulf %536, %537 : vector<8x8xf32>
      %cst_221 = arith.constant 1.000000e+00 : f32
      %539 = vector.broadcast %cst_221 : f32 to vector<8x1xf32>
      %540 = arith.subf %539, %526 : vector<8x1xf32>
      %541 = vector.broadcast %540 : vector<8x1xf32> to vector<8x8xf32>
      %542 = vector.broadcast %535 : vector<1x8xf32> to vector<8x8xf32>
      %543 = arith.mulf %541, %542 : vector<8x8xf32>
      %544 = arith.addf %538, %543 : vector<8x8xf32>
      %545 = arith.mulf %544, %527 : vector<8x8xf32>
      %c0_222 = arith.constant 0 : index
      %c0_223 = arith.constant 0 : index
      %c0_224 = arith.constant 0 : index
      %546 = vector.load %arg7[%c0_222, %c0_223, %c0_224] : memref<1x8x8xf32, #tpu.memory_space<vmem>>, vector<1x8x8xf32>
      %547 = vector.shape_cast %546 : vector<1x8x8xf32> to vector<8x8xf32>
      %cst_225 = arith.constant dense<0.000000e+00> : vector<8x8xf32>
      %548 = tpu.matmul %545, %547, %cst_225 {dimension_numbers = #tpu.dot_dimension_numbers<[1], [0], [0], [1], [0, 0, 1, 1], [], []>} : vector<8x8xf32>, vector<8x8xf32>, vector<8x8xf32> -> vector<8x8xf32>
      %c0_226 = arith.constant 0 : index
      %c0_227 = arith.constant 0 : index
      %c0_228 = arith.constant 0 : index
      %549 = vector.load %arg36[%c0_226, %c0_227, %c0_228] : memref<1x8x8xf32, #tpu.memory_space<vmem>>, vector<1x8x8xf32>
      %550 = vector.shape_cast %549 : vector<1x8x8xf32> to vector<8x8xf32>
      %551 = vector.shape_cast %548 : vector<8x8xf32> to vector<1x8x8xf32>
      tpu.vector_store %arg36[%c0_226, %c0_227, %c0_228], %551 {strides = array<i32>} : memref<1x8x8xf32, #tpu.memory_space<vmem>>, vector<1x8x8xf32>,
    } else {
    }
    return
  }
  func.func @transform_0(%arg0: i32, %arg1: i32) -> (i32, i32, i32) {
    %c0_i32 = arith.constant 0 : i32
    %c0_i32_0 = arith.constant 0 : i32
    %c0_i32_1 = arith.constant 0 : i32
    return %arg0, %c0_i32, %c0_i32_0 : i32, i32, i32
  }
  func.func @transform_1(%arg0: i32, %arg1: i32) -> (i32, i32, i32) {
    %c0_i32 = arith.constant 0 : i32
    %c0_i32_0 = arith.constant 0 : i32
    %c0_i32_1 = arith.constant 0 : i32
    return %arg0, %c0_i32, %c0_i32_0 : i32, i32, i32
  }
  func.func @transform_2(%arg0: i32, %arg1: i32) -> (i32, i32, i32) {
    %c0_i32 = arith.constant 0 : i32
    %c0_i32_0 = arith.constant 0 : i32
    %c0_i32_1 = arith.constant 0 : i32
    return %arg0, %c0_i32, %c0_i32_0 : i32, i32, i32
  }
  func.func @transform_3(%arg0: i32, %arg1: i32) -> (i32, i32, i32) {
    %c0_i32 = arith.constant 0 : i32
    %c0_i32_0 = arith.constant 0 : i32
    %c0_i32_1 = arith.constant 0 : i32
    return %arg0, %c0_i32, %c0_i32_0 : i32, i32, i32
  }
  func.func @transform_4(%arg0: i32, %arg1: i32) -> (i32, i32, i32) {
    %c0_i32 = arith.constant 0 : i32
    %c0_i32_0 = arith.constant 0 : i32
    %c0_i32_1 = arith.constant 0 : i32
    return %arg0, %c0_i32, %c0_i32_0 : i32, i32, i32
  }
  func.func @transform_5(%arg0: i32, %arg1: i32) -> (i32, i32, i32) {
    %c0_i32 = arith.constant 0 : i32
    %c0_i32_0 = arith.constant 0 : i32
    %c0_i32_1 = arith.constant 0 : i32
    return %arg0, %c0_i32, %c0_i32_0 : i32, i32, i32
  }
  func.func @transform_6(%arg0: i32, %arg1: i32) -> (i32, i32, i32) {
    %c0_i32 = arith.constant 0 : i32
    %c0_i32_0 = arith.constant 0 : i32
    %c0_i32_1 = arith.constant 0 : i32
    return %arg1, %c0_i32, %c0_i32_0 : i32, i32, i32
  }
  func.func @transform_7(%arg0: i32, %arg1: i32) -> (i32, i32, i32) {
    %c0_i32 = arith.constant 0 : i32
    %c0_i32_0 = arith.constant 0 : i32
    %c0_i32_1 = arith.constant 0 : i32
    return %arg1, %c0_i32, %c0_i32_0 : i32, i32, i32
  }
  func.func @transform_8(%arg0: i32, %arg1: i32) -> (i32, i32, i32) {
    %c0_i32 = arith.constant 0 : i32
    %c0_i32_0 = arith.constant 0 : i32
    %c0_i32_1 = arith.constant 0 : i32
    return %arg1, %c0_i32, %c0_i32_0 : i32, i32, i32
  }
  func.func @transform_9(%arg0: i32, %arg1: i32) -> (i32, i32, i32) {
    %c0_i32 = arith.constant 0 : i32
    %c0_i32_0 = arith.constant 0 : i32
    %c0_i32_1 = arith.constant 0 : i32
    return %arg1, %c0_i32, %c0_i32_0 : i32, i32, i32
  }
  func.func @transform_10(%arg0: i32, %arg1: i32) -> (i32, i32, i32) {
    %c0_i32 = arith.constant 0 : i32
    %c0_i32_0 = arith.constant 0 : i32
    %c0_i32_1 = arith.constant 0 : i32
    return %arg1, %c0_i32, %c0_i32_0 : i32, i32, i32
  }
  func.func @transform_11(%arg0: i32, %arg1: i32) -> (i32, i32, i32) {
    %c0_i32 = arith.constant 0 : i32
    %c0_i32_0 = arith.constant 0 : i32
    %c0_i32_1 = arith.constant 0 : i32
    return %arg1, %c0_i32, %c0_i32_0 : i32, i32, i32
  }
  func.func @transform_12(%arg0: i32, %arg1: i32) -> (i32, i32, i32) {
    %c0_i32 = arith.constant 0 : i32
    %c0_i32_0 = arith.constant 0 : i32
    %c0_i32_1 = arith.constant 0 : i32
    return %arg1, %c0_i32, %c0_i32_0 : i32, i32, i32
  }
  func.func @transform_13(%arg0: i32, %arg1: i32) -> (i32, i32, i32) {
    %c0_i32 = arith.constant 0 : i32
    %c0_i32_0 = arith.constant 0 : i32
    %c0_i32_1 = arith.constant 0 : i32
    return %arg1, %c0_i32, %c0_i32_0 : i32, i32, i32
  }
  func.func @transform_14(%arg0: i32, %arg1: i32) -> (i32, i32, i32) {
    %c0_i32 = arith.constant 0 : i32
    %c0_i32_0 = arith.constant 0 : i32
    %c0_i32_1 = arith.constant 0 : i32
    return %arg1, %c0_i32, %c0_i32_0 : i32, i32, i32
  }
  func.func @transform_15(%arg0: i32, %arg1: i32) -> (i32, i32, i32) {
    %c0_i32 = arith.constant 0 : i32
    %c0_i32_0 = arith.constant 0 : i32
    %c0_i32_1 = arith.constant 0 : i32
    return %arg1, %c0_i32, %c0_i32_0 : i32, i32, i32
  }
  func.func @transform_16(%arg0: i32, %arg1: i32) -> (i32, i32, i32) {
    %c0_i32 = arith.constant 0 : i32
    %c0_i32_0 = arith.constant 0 : i32
    %c0_i32_1 = arith.constant 0 : i32
    return %arg1, %c0_i32, %c0_i32_0 : i32, i32, i32
  }
  func.func @transform_17(%arg0: i32, %arg1: i32) -> (i32, i32, i32) {
    %c0_i32 = arith.constant 0 : i32
    %c0_i32_0 = arith.constant 0 : i32
    %c0_i32_1 = arith.constant 0 : i32
    return %arg1, %c0_i32, %c0_i32_0 : i32, i32, i32
  }
  func.func @transform_18(%arg0: i32, %arg1: i32) -> (i32, i32, i32) {
    %c0_i32 = arith.constant 0 : i32
    %c0_i32_0 = arith.constant 0 : i32
    %c0_i32_1 = arith.constant 0 : i32
    return %arg1, %c0_i32, %c0_i32_0 : i32, i32, i32
  }
  func.func @transform_19(%arg0: i32, %arg1: i32) -> (i32, i32, i32) {
    %c0_i32 = arith.constant 0 : i32
    %c0_i32_0 = arith.constant 0 : i32
    %c0_i32_1 = arith.constant 0 : i32
    return %arg1, %c0_i32, %c0_i32_0 : i32, i32, i32
  }
  func.func @transform_20(%arg0: i32, %arg1: i32) -> (i32, i32, i32) {
    %c0_i32 = arith.constant 0 : i32
    %c0_i32_0 = arith.constant 0 : i32
    %c0_i32_1 = arith.constant 0 : i32
    return %arg1, %c0_i32, %c0_i32_0 : i32, i32, i32
  }
  func.func @transform_21(%arg0: i32, %arg1: i32) -> (i32, i32, i32) {
    %c0_i32 = arith.constant 0 : i32
    %c0_i32_0 = arith.constant 0 : i32
    %c0_i32_1 = arith.constant 0 : i32
    return %arg1, %c0_i32, %c0_i32_0 : i32, i32, i32
  }
  func.func @transform_22(%arg0: i32, %arg1: i32) -> (i32, i32, i32) {
    %c0_i32 = arith.constant 0 : i32
    %c0_i32_0 = arith.constant 0 : i32
    %c0_i32_1 = arith.constant 0 : i32
    return %arg1, %c0_i32, %c0_i32_0 : i32, i32, i32
  }
  func.func @transform_23(%arg0: i32, %arg1: i32) -> (i32, i32, i32) {
    %c0_i32 = arith.constant 0 : i32
    %c0_i32_0 = arith.constant 0 : i32
    %c0_i32_1 = arith.constant 0 : i32
    return %arg1, %c0_i32, %c0_i32_0 : i32, i32, i32
  }
  func.func @transform_24(%arg0: i32, %arg1: i32) -> (i32, i32, i32) {
    %c0_i32 = arith.constant 0 : i32
    %c0_i32_0 = arith.constant 0 : i32
    %c0_i32_1 = arith.constant 0 : i32
    return %arg1, %c0_i32, %c0_i32_0 : i32, i32, i32
  }
  func.func @transform_25(%arg0: i32, %arg1: i32) -> (i32, i32, i32) {
    %c0_i32 = arith.constant 0 : i32
    %c0_i32_0 = arith.constant 0 : i32
    %c0_i32_1 = arith.constant 0 : i32
    return %arg1, %c0_i32, %c0_i32_0 : i32, i32, i32
  }
  func.func @transform_26(%arg0: i32, %arg1: i32) -> (i32, i32, i32) {
    %c0_i32 = arith.constant 0 : i32
    %c0_i32_0 = arith.constant 0 : i32
    %c0_i32_1 = arith.constant 0 : i32
    return %arg1, %c0_i32, %c0_i32_0 : i32, i32, i32
  }
  func.func @transform_27(%arg0: i32, %arg1: i32) -> (i32, i32, i32) {
    %c0_i32 = arith.constant 0 : i32
    %c0_i32_0 = arith.constant 0 : i32
    %c0_i32_1 = arith.constant 0 : i32
    return %arg1, %c0_i32, %c0_i32_0 : i32, i32, i32
  }
  func.func @transform_28(%arg0: i32, %arg1: i32) -> (i32, i32, i32) {
    %c0_i32 = arith.constant 0 : i32
    %c0_i32_0 = arith.constant 0 : i32
    %c0_i32_1 = arith.constant 0 : i32
    return %arg1, %c0_i32, %c0_i32_0 : i32, i32, i32
  }
  func.func @transform_29(%arg0: i32, %arg1: i32) -> (i32, i32, i32) {
    %c0_i32 = arith.constant 0 : i32
    %c0_i32_0 = arith.constant 0 : i32
    %c0_i32_1 = arith.constant 0 : i32
    return %arg1, %c0_i32, %c0_i32_0 : i32, i32, i32
  }
  func.func @transform_30(%arg0: i32, %arg1: i32) -> (i32, i32, i32) {
    %c0_i32 = arith.constant 0 : i32
    %c0_i32_0 = arith.constant 0 : i32
    %c0_i32_1 = arith.constant 0 : i32
    return %arg1, %c0_i32, %c0_i32_0 : i32, i32, i32
  }
  func.func @transform_31(%arg0: i32, %arg1: i32) -> (i32, i32) {
    %c0_i32 = arith.constant 0 : i32
    %c0_i32_0 = arith.constant 0 : i32
    %c0_i32_1 = arith.constant 0 : i32
    return %c0_i32, %c0_i32_0 : i32, i32
  }
  func.func @transform_32(%arg0: i32, %arg1: i32) -> (i32, i32) {
    %c0_i32 = arith.constant 0 : i32
    %c0_i32_0 = arith.constant 0 : i32
    %c0_i32_1 = arith.constant 0 : i32
    return %c0_i32, %c0_i32_0 : i32, i32
  }
  func.func @transform_33(%arg0: i32, %arg1: i32) -> (i32, i32) {
    %c0_i32 = arith.constant 0 : i32
    %c0_i32_0 = arith.constant 0 : i32
    %c0_i32_1 = arith.constant 0 : i32
    return %c0_i32, %c0_i32_0 : i32, i32
  }
  func.func @transform_34(%arg0: i32, %arg1: i32) -> (i32, i32, i32) {
    %c0_i32 = arith.constant 0 : i32
    %c0_i32_0 = arith.constant 0 : i32
    %c0_i32_1 = arith.constant 0 : i32
    return %arg0, %c0_i32, %c0_i32_0 : i32, i32, i32
  }
}

</mosaic_0001>

<bundles_post_ra>
// kernel: rewritter_forward.2
= control target key start
LH: loop header
LB: loop body
LE: loop exit
PB: predicated region body
PF: predicated region fallthrough
CT: control target
= control target key end

     0   :  { %s4525_s29 = smov 0   ;;  %s4527_s30 = smov 0   ;;  %s5084_s0 = inlined_call_operand.vmem [shape: f32[2,8,32], index: 0, kind: input, shape index: {}]   ;;  %s5085_s1 = inlined_call_operand.vmem [shape: s32[2,1,8], index: 1, kind: input, shape index: {}]   ;;  %s5086_s2 = inlined_call_operand.vmem [shape: f32[2,1,32], index: 2, kind: input, shape index: {}]   ;;  %s5087_s3 = inlined_call_operand.vmem [shape: f32[2,1,32], index: 3, kind: input, shape index: {}]   ;;  %s5088_s4 = inlined_call_operand.vmem [shape: f32[2,1,32], index: 4, kind: input, shape index: {}]   ;;  %s5089_s5 = inlined_call_operand.vmem [shape: f32[2,1,32], index: 5, kind: input, shape index: {}]   ;;  %s5090_s6 = inlined_call_operand.vmem [shape: bf16[2,32,96], index: 6, kind: input, shape index: {}]   ;;  %s5091_s7 = inlined_call_operand.vmem [shape: f32[2,1,96], index: 7, kind: input, shape index: {}]   ;;  %s5092_s8 = inlined_call_operand.vmem [shape: bf16[2,32,32], index: 8, kind: input, shape index: {}]   ;;  %s5093_s9 = inlined_call_operand.vmem [shape: f32[2,1,32], index: 9, kind: input, shape index: {}]   ;;  %s5094_s10 = inlined_call_operand.vmem [shape: bf16[2,32,2048], index: 10, kind: input, shape index: {}]   ;;  %s5095_s11 = inlined_call_operand.vmem [shape: f32[2,1,2048], index: 11, kind: input, shape index: {}]   ;;  %s5096_s12 = inlined_call_operand.vmem [shape: bf16[2,2048,32], index: 12, kind: input, shape index: {}]   ;;  %s5097_s13 = inlined_call_operand.vmem [shape: f32[2,1,32], index: 13, kind: input, shape index: {}]   ;;  %s5098_s14 = inlined_call_operand.vmem [shape: f32[2,8,32], index: 14, kind: output, shape index: {}]  }
   0x1   :  { %5103 = sst [smem:[#allocation9_spill]] %s5084_s0  ;;  %s4529_s15 = smov 0  }
   0x2   :  { %5104 = sst [smem:[#allocation10_spill]] %s5088_s4  ;;  %s4531_s16 = smov 0  }
   0x3   :  { %5105 = sst [smem:[#allocation11_spill]] %s5089_s5  ;;  %s4533_s17 = smov 0  }
   0x4   :  { %5106 = sst [smem:[#allocation12_spill]] %s5090_s6 }
   0x5   :  { %5107 = sst [smem:[#allocation13_spill]] %s5092_s8 }
   0x6   :  { %5108 = sst [smem:[#allocation14_spill]] %s5093_s9 }
   0x7   :  { %5109 = sst [smem:[#allocation15_spill]] %s5096_s12 }
   0x8   :  { %5110 = sst [smem:[#allocation16_spill]] %s5097_s13 }
   0x9   :  { %5111 = sst [smem:[#allocation17_spill]] %s5098_s14 }
   0xa LB: > { %5112 = sst [smem:[#allocation3_spill]] %s4418_s29  ;;  %s33_s18 = sadd.s32 1, %s4426_s15  ;;  %s4434_s17 = sphi %s4533_s17, %s24_s17   ;;  %s4430_s16 = sphi %s4531_s16, %s5146_s16   ;;  %s4426_s15 = sphi %s4529_s15, %s5145_s15   ;;  %s4422_s30 = sphi %s4527_s30, %s5144_s30   ;;  %s4418_s29 = sphi %s4525_s29, %s5143_s29  }
   0xb   : > { %5113 = sst [smem:[#allocation4_spill]] %s4426_s15  ;;  %s36_s19 = sadd.s32 1, %s4430_s16 }
   0xc   : > { %5114 = sst [smem:[#allocation5_spill]] %s4430_s16  ;;  %p34_p0 = scmp.ge.s32.totalorder %s33_s18, 2 }
   0xd   : > { %5115 = sst [smem:[#allocation6_spill]] %s4434_s17  ;;  %p3694_p1 = scmp.ge.s32.totalorder %s4434_s17, 1 }
   0xe   : > { %p536_p2 = scmp.lt.s32.totalorder %s4434_s17, 5  ;;  %s5148_s18 = smov (%p34_p0, %s33_s18), 0 }
   0xf   : > { %5116 = sst [smem:[#allocation7_spill]] %s5148_s18  ;;  %s5150_s19 = smov (!%p34_p0, %s36_s19), %s4430_s16 }
  0x10   : > { %p537_p3 = pnand %p3694_p1, %p536_p2  ;;  %p38_p4 = scmp.ge.s32.totalorder %s5150_s19, 2 }
  0x11   : > { %p628_p5 = scmp.lt.s32.totalorder (!%p537_p3), %s4422_s30, 1  ;;  %p635_p6 = scmp.lt.s32.totalorder (!%p537_p3), %s4418_s29, 1 }
  0x12   : > { %s5152_s19 = smov (%p38_p4, %s5150_s19), 0  ;;  %540 = sbr.rel (%p537_p3) target bundleno = 3671 (0xe57), region = 76 }
  0x13   : > { %5117 = sst [smem:[#allocation8_spill]] %s5152_s19 }
  0x14   : > { %s5118_s0 = sld [smem:[#allocation9_spill]] (!%p537_p3) }
  0x15   : > { %s5121_s6 = sld [smem:[#allocation12_spill]] (!%p537_p3) }
  0x16   : > { %s5122_s8 = sld [smem:[#allocation13_spill]] (!%p537_p3) }
  0x17   : > { %s5154_s30 = smov (!%p628_p5, %s4422_s30), 1  ;;  %s5124_s16 = sld [smem:[#allocation15_spill]] }
  0x18   : > { %s4561_s20 = scalar_select %p635_p6, %s4418_s29, 1 }
  0x19   : > { %s3695_s21 = sshll.u32 %s5154_s30, 3  ;;  %s5125_s29 = sld [smem:[#allocation16_spill]] }
  0x1a   : > { %s631_s27 = scalar_lea.vmem %s5118_s0, %s3695_s21  ;;  %s3900_s24 = sshll.u32 %s4561_s20, 4 }
  0x1b   : > { %s4591_s0 = scalar_lea.vmem %s5121_s6, %s3900_s24  ;;  %s3902_s22 = sshll.u32 %s4561_s20, 8 }
  0x1c   : > { %s4600_s17 = scalar_lea.vmem %s5122_s8, %s3900_s24  ;;  %s4610_s25 = scalar_lea.vmem %s5095_s11, %s3900_s24 }
  0x1d   : > { %s4615_s19 = scalar_lea.vmem %s5094_s10, %s3902_s22  ;;  %s3903_s28 = sshll.u32 %s4561_s20, 10 }
  0x1e   : > { %s4621_s8 = scalar_lea.vmem %s5124_s16, %s3903_s28  ;;  %s5126_s13 = sld [smem:[#allocation17_spill]] }
  0x1f   : > { %s679_s12 = scalar_lea.vmem %s5125_s29, %s4561_s20  ;;  %s5127_s23 = sld [smem:[#allocation3_spill]] }
  0x24   : > { %s4630_s24 = scalar_lea.vmem %s5126_s13, %s3695_s21 }
  0x25   : > { %p3706_p7 = scmp.ne.s32.totalorder %s5127_s23, 0 }
  0x27   : > { %688 = sbr.rel (%p3706_p7) target bundleno = 46 (0x2e), region = 80 }
  0x2c   : > { %v689_v0 = vld [vmem:[%s631_s27] sm:$0xff]  ;;  %vm690_vm0 = vcmask 261120  }
  0x2d   : > { %691 = vst.msk [vmem:[#allocation2] sm:$0xff] %vm690_vm0, %v689_v0 }
  0x2e PF: > { %vm697_vm1 = vcmask 261120   ;;  %v4241_v8 = vld [vmem:[%s4591_s0 + $0x8] sm:$0xff]   ;;  %v4436_v9 = vmov 0.0   ;;  %vm4437_vm2 = vmmov 0   ;;  %v4242_v10 = vld [vmem:[%s4591_s0] sm:$0xff]   ;;  %s5128_s5 = scalar_lea.vmem %s5086_s2, %s4561_s20  ;;  %s5129_s18 = scalar_lea.vmem %s5087_s3, %s4561_s20  ;;  %vm810_vm5 = vcmask 64512  }
  0x2f   : > { %4107 = vmatprep.subr.bf16.mxu0 %v4436_v9  ;;  %4111 = vmatprep.mubr.msk.bf16.mxu0 %vm4437_vm2, %v4436_v9  ;;  %v3707_v19 = vld [vmem:[%s5128_s5] ss:$0 sm:$0xff]  ;;  %s5130_s22 = scalar_lea.vmem %s5091_s7, %s4561_s20  ;;  %s4438_s26 = smov 120   ;;  %v859_v38 = vlaneseq  ;;  %v4441_v42 = vmov 0   ;;  %vm882_vm8 = vcmask 1043456  }
  0x30   : > { %4108 = vmatpush3.bf16.msra.mxu0 %v4241_v8  ;;  %4115 = vmatprep.subr.bf16.mxu1 %v4436_v9  ;;  %v3708_v22 = vld [vmem:[%s5129_s18] ss:$0 sm:$0xff]  ;;  %s4439_s28 = smov 96   ;;  %s4440_s15 = smov 88  }
  0x31   : > { %4109 = vmatprep.subr.bf16.mxu0 %v4436_v9  ;;  %4117 = vmatprep.mubr.msk.bf16.mxu1 %vm4437_vm2, %v4436_v9  ;;  %v3709_v26 = vld [vmem:[%s5130_s22] ss:$0 sm:$0xff]  ;;  %s5131_s29 = scalar_lea.vmem %s5085_s1, %s5154_s30  ;;  %v4684_v40 = vshrl.u32 %v859_v38, 7  ;;  %s4442_s30 = smov 56  }
  0x32   : > { %v693_v39 = vld [vmem:[%s5131_s29] sm:$0x1]  ;;  %s4443_s13 = smov 64   ;;  %s4444_s23 = smov 80  }
  0x33   : > { %vm694_vm6 = vcmp.ne.s32.totalorder %v693_v39, 0  ;;  %v4687_v41 = vsub.s32 0, %v4684_v40  ;;  %s4445_s0 = smov 112   ;;  %s4446_s4 = smov 48  }
  0x34   : > { %v692_v1 = vld [vmem:[#allocation2] sm:$0xff]  ;;  %4110 = vmatpush3.bf16.msra.mxu0 %v4242_v10  ;;  %v858_v43 = vsel %vm694_vm6, 1, %v4441_v42  ;;  %s4447_s5 = smov 104   ;;  %s4448_s6 = smov 72  }
  0x35   : > { %v698_v2 = vsel %vm697_vm1, %v692_v1, 0.0  ;;  %4121 = vmatprep.subr.bf16.mxu0 %v4436_v9  ;;  %v862_v44 = vrot.slane %v858_v43, %v4687_v41  ;;  %s4449_s9 = smov 40   ;;  %s5134_s21 = sld [smem:[#allocation14_spill]] }
  0x36   : > { %699 = vadd.xlane.f32.xlu0 %v698_v2  ;;  %s5138_s29 = sld [smem:[#allocation11_spill]] }
  0x37   : > { %vm4691_vm7 = vcmp.eq.s32.totalorder %v862_v44, 1 }
  0x3b   : > { %s5135_s27 = scalar_lea.vmem %s5134_s21, %s4561_s20 }
  0xbf   : > { %v700_v3 = vpop.xlane.xlu0 %699 }
  0xc0   : > { %v702_v4 = vmul.f32 0.03125, %v700_v3 }
  0xc2   : > { %v703_v5 = vsub.f32 %v692_v1, %v702_v4 }
  0xc4   : > { %v704_v6 = vmul.f32 %v703_v5, %v703_v5  ;;  %v716_v20 = vmul.f32 %v3707_v19, %v703_v5  ;;  %v802_v19 = vld [vmem:[%s4600_s17] sm:$0xf] }
  0xc6   : > { %v705_v7 = vsel %vm697_vm1, %v704_v6, 0.0 }
  0xc7   : > { %706 = vadd.xlane.f32.xlu0 %v705_v7 }
 0x150   : > { %v707_v11 = vpop.xlane.xlu0 %706 }
 0x151   : > { %v709_v12 = vmul.f32 0.032258064, %v707_v11 }
 0x153   : > { %4371 = vrsqrt.f32 %v709_v12  ;;  %vm719_vm3 = vcmp.eq.f32.partialorder %v709_v12, inf  ;;  %v722_v15 = vand.u32 2147483648, %v709_v12  ;;  %vm721_vm4 = vcmp.eq.f32.partialorder %v709_v12, 0.0 }
 0x160   : > { %v4372_v13 = vpop.eup %4371 }
 0x161   : > { %v718_v14 = vmul.f32 %v4372_v13, %v709_v12 }
 0x163   : > { %v720_v16 = vsel %vm719_vm3, %v709_v12, %v718_v14 }
 0x164   : > { %v723_v17 = vsel %vm721_vm4, %v722_v15, %v720_v16 }
 0x165   : > { %v724_v18 = vadd.f32 1e-06, %v723_v17 }
 0x167   : > { %4373 = vrcp.f32 %v724_v18 }
 0x174   : > { %v4374_v21 = vpop.eup %4373 }
 0x175   : > { %v726_v23 = vmul.f32 %v4374_v21, %v716_v20  ;;  %v1090_v20 = vsel %vm882_vm8, %v802_v19, 0  ;;  %v803_v21 = vld [vmem:[%s4600_s17 + $0x4] sm:$0xf] }
 0x177   : > { %v733_v24 = vadd.f32 %v3708_v22, %v726_v23  ;;  %v1044_v22 = vsel %vm882_vm8, %v803_v21, 0 }
 0x179   : > { %v734_v25 = vpack.c.bf16 %v733_v24, %v733_v24 }
 0x17b   : > { %4112 = vmatmul.mubr.msk.bf16.vlgmr.msra.gmra.mxu0 %vm697_vm1, %v734_v25 }
 0x17c   : > { %4123 = vmatprep.mubr.msk.bf16.mxu0 %vm4437_vm2, %v4436_v9 }
 0x23b   : > { %v795_v27 = vpop.f32.mrf.mxu0 }
 0x23c   : > { %v796_v28 = vadd.f32 %v3709_v26, %v795_v27 }
 0x23d   : > { %v4113_v29 = vpop.f32.mrf.mxu0 }
 0x23e   : > { %v4663_v30 = vpack.c.bf16 %v796_v28, %v796_v28 }
 0x23f   : > { %v798_v31 = vpop.f32.mrf.mxu0 }
 0x240   : > { %927 = vrot.lane.b32.xlu0 %v4663_v30, %s4438_s26  ;;  %808 = vrot.lane.b32.xlu1 %v4663_v30, %s4439_s28  ;;  %s5136_s28 = sld [smem:[#allocation10_spill]] }
 0x241   : > { %v4114_v32 = vpop.f32.mrf.mxu0 }
 0x244   : > { %929 = vrot.lane.b32.xlu1 %v4663_v30, %s4440_s15 }
 0x246   : > { %s5137_s15 = scalar_lea.vmem %s5136_s28, %s4561_s20 }
 0x2b2   : > { %v809_v33 = vpop.permute.xlu1 %808  ;;  %v928_v37 = vpop.permute.xlu0 %927 }
 0x2b3   : > { %v815_v34 = vsel %vm810_vm5, %v809_v33, 0 }
 0x2b4   : > { %4116 = vmatpush3.bf16.xpose.msra.mxu1 %v815_v34 }
 0x2b5   : > { %4127 = vmatprep.subr.bf16.mxu1 %v4436_v9 }
 0x2b6   : > { %v930_v35 = vpop.permute.xlu1 %929 }
 0x2b7   : > { %v935_v36 = vsel %vm810_vm5, %v930_v35, 0 }
 0x2bb   : > { %4118 = vmatmul.mubr.msk.bf16.vlgmr.msra.gmra.mxu1 %vm810_vm5, %v4663_v30 }
 0x2bc   : > { %4128 = vmatpush3.bf16.xpose.msra.mxu1 %v935_v36  ;;  %4129 = vmatprep.mubr.msk.bf16.mxu1 %vm4437_vm2, %v4436_v9 }
 0x2bd   : > { %4139 = vmatprep.subr.bf16.mxu1 %v4436_v9 }
 0x2c3   : > { %4130 = vmatmul.mubr.msk.bf16.vlgmr.msra.gmra.mxu1 %vm810_vm5, %v928_v37 }
 0x2c4   : > { %4141 = vmatprep.mubr.msk.bf16.mxu1 %vm4437_vm2, %v4436_v9  ;;  %4140 = vmatpush3.bf16.msra.mxu1 %v1044_v22 }
 0x2c5   : > { %4151 = vmatprep.subr.bf16.mxu1 %v4436_v9 }
 0x37b   : > { %v851_v45 = vpop.f32.mrf.mxu1 }
 0x37c   : > { %v857_v47 = vmul.f32 0.35355338, %v851_v45 }
 0x37d   : > { %v4119_v48 = vpop.f32.mrf.mxu1 }
 0x37e   : > { %v864_v49 = vsel %vm4691_vm7, %v857_v47, -1e+09 }
 0x37f   : > { %v854_v50 = vpop.f32.mrf.mxu1  ;;  %v865_v51 = vsel %vm810_vm5, %v864_v49, -inf }
 0x380   : > { %866 = vmax.xlane.f32.xlu1 %v865_v51 }
 0x381   : > { %v4120_v52 = vpop.f32.mrf.mxu1 }
 0x383   : > { %v971_v53 = vpop.f32.mrf.mxu1 }
 0x384   : > { %v977_v54 = vmul.f32 0.35355338, %v971_v53 }
 0x385   : > { %v4131_v55 = vpop.f32.mrf.mxu1 }
 0x386   : > { %v978_v56 = vsel %vm4691_vm7, %v977_v54, -1e+09 }
 0x387   : > { %v974_v57 = vpop.f32.mrf.mxu1  ;;  %v979_v58 = vsel %vm810_vm5, %v978_v56, -inf }
 0x388   : > { %980 = vmax.xlane.f32.xlu0 %v979_v58 }
 0x389   : > { %v4132_v59 = vpop.f32.mrf.mxu1 }
 0x39e   : > { %991 = vrot.lane.b32.xlu0 %v4663_v30, %s4442_s30  ;;  %s5139_s30 = scalar_lea.vmem %s5138_s29, %s4561_s20 }
 0x409   : > { %v867_v60 = vpop.xlane.xlu1 %866 }
 0x40a   : > { %v868_v61 = vsub.f32 %v864_v49, %v867_v60 }
 0x40c   : > { %v869_v62 = vmul.f32 1.442695, %v868_v61 }
 0x40e   : > { %4375 = vpow2.f32 %v869_v62 }
 0x411   : > { %v981_v63 = vpop.xlane.xlu0 %980 }
 0x412   : > { %v982_v0 = vsub.f32 %v978_v56, %v981_v63 }
 0x414   : > { %v983_v1 = vmul.f32 1.442695, %v982_v0 }
 0x415   : > { %v992_v13 = vpop.permute.xlu0 %991 }
 0x416   : > { %4377 = vpow2.f32 %v983_v1  ;;  %v997_v15 = vsel %vm882_vm8, %v992_v13, 0 }
 0x41b   : > { %v4376_v2 = vpop.eup %4375 }
 0x41c   : > { %v871_v3 = vsel %vm810_vm5, %v4376_v2, 0.0 }
 0x41d   : > { %872 = vadd.xlane.f32.xlu1 %v871_v3 }
 0x423   : > { %v4378_v4 = vpop.eup %4377 }
 0x424   : > { %v985_v5 = vsel %vm810_vm5, %v4378_v4, 0.0 }
 0x425   : > { %986 = vadd.xlane.f32.xlu1 %v985_v5 }
 0x436   : > { %877 = vrot.lane.b32.xlu1 %v4663_v30, %s4443_s13 }
 0x43a   : > { %1134 = vrot.lane.b32.xlu1 %v4663_v30, %s4444_s23 }
 0x43e   : > { %1132 = vrot.lane.b32.xlu1 %v4663_v30, %s4445_s0 }
 0x4a6   : > { %v873_v6 = vpop.xlane.xlu1 %872 }
 0x4a7   : > { %4379 = vrcp.f32 %v873_v6 }
 0x4ae   : > { %v987_v7 = vpop.xlane.xlu1 %986 }
 0x4af   : > { %4381 = vrcp.f32 %v987_v7  ;;  %v804_v7 = vld [vmem:[%s4600_s17 + $0x8] sm:$0xf] }
 0x4b2   : > { %v878_v8 = vpop.permute.xlu1 %877 }
 0x4b3   : > { %v884_v10 = vsel %vm882_vm8, %v878_v8, 0  ;;  %v1249_v8 = vsel %vm882_vm8, %v804_v7, 0 }
 0x4b4   : > { %v4380_v11 = vpop.eup %4379  ;;  %4122 = vmatpush3.bf16.msra.mxu0 %v884_v10 }
 0x4b5   : > { %4133 = vmatprep.subr.bf16.mxu0 %v4436_v9  ;;  %v875_v12 = vmul.f32 %v4380_v11, %v4376_v2 }
 0x4b6   : > { %v1135_v28 = vpop.permute.xlu1 %1134 }
 0x4b7   : > { %v876_v14 = vpack.c.bf16 %v875_v12, %v875_v12  ;;  %v1140_v33 = vsel %vm810_vm5, %v1135_v28, 0  ;;  %v805_v28 = vld [vmem:[%s4600_s17 + $0xc] sm:$0xf] }
 0x4b9   : > { %4124 = vmatmul.mubr.msk.bf16.vlgmr.msra.gmra.mxu0 %vm810_vm5, %v876_v14 }
 0x4ba   : > { %4134 = vmatpush3.bf16.msra.mxu0 %v997_v15  ;;  %4135 = vmatprep.mubr.msk.bf16.mxu0 %vm4437_vm2, %v4436_v9  ;;  %v1133_v36 = vpop.permute.xlu1 %1132 }
 0x4bb   : > { %4145 = vmatprep.subr.bf16.mxu0 %v4436_v9 }
 0x4bc   : > { %v4382_v16 = vpop.eup %4381 }
 0x4bd   : > { %v989_v17 = vmul.f32 %v4382_v16, %v4378_v4 }
 0x4bf   : > { %v990_v18 = vpack.c.bf16 %v989_v17, %v989_v17 }
 0x4c1   : > { %4136 = vmatmul.mubr.msk.bf16.vlgmr.msra.gmra.mxu0 %vm810_vm5, %v990_v18 }
 0x4c2   : > { %4147 = vmatprep.mubr.msk.bf16.mxu0 %vm4437_vm2, %v4436_v9  ;;  %4146 = vmatpush3.bf16.msra.mxu0 %v1090_v20 }
 0x4c3   : > { %4157 = vmatprep.subr.bf16.mxu0 %v4436_v9 }
 0x579   : > { %v920_v23 = vpop.f32.mrf.mxu0 }
 0x57a   : > { %v926_v24 = vpack.c.bf16 %v920_v23, %v920_v23 }
 0x57b   : > { %v4125_v25 = vpop.f32.mrf.mxu0 }
 0x57c   : > { %4148 = vmatmul.mubr.msk.bf16.vlgmr.msra.gmra.mxu0 %vm810_vm5, %v926_v24 }
 0x57d   : > { %v923_v26 = vpop.f32.mrf.mxu0  ;;  %4159 = vmatprep.mubr.msk.bf16.mxu0 %vm4437_vm2, %v4436_v9 }
 0x57f   : > { %v4126_v27 = vpop.f32.mrf.mxu0 }
 0x581   : > { %v1033_v29 = vpop.f32.mrf.mxu0 }
 0x582   : > { %v1039_v31 = vpack.c.bf16 %v1033_v29, %v1033_v29 }
 0x583   : > { %v4137_v32 = vpop.f32.mrf.mxu0 }
 0x584   : > { %4142 = vmatmul.mubr.msk.bf16.vlgmr.msra.gmra.mxu1 %vm810_vm5, %v1039_v31  ;;  %v1409_v31 = vsel %vm882_vm8, %v805_v28, 0 }
 0x585   : > { %4152 = vmatpush3.bf16.xpose.msra.mxu1 %v1140_v33  ;;  %v1036_v34 = vpop.f32.mrf.mxu0  ;;  %4153 = vmatprep.mubr.msk.bf16.mxu1 %vm4437_vm2, %v4436_v9 }
 0x586   : > { %4163 = vmatprep.subr.bf16.mxu1 %v4436_v9 }
 0x587   : > { %v4138_v35 = vpop.f32.mrf.mxu0 }
 0x58c   : > { %4154 = vmatmul.mubr.msk.bf16.vlgmr.msra.gmra.mxu1 %vm810_vm5, %v1133_v36 }
 0x58d   : > { %4165 = vmatprep.mubr.msk.bf16.mxu1 %vm4437_vm2, %v4436_v9  ;;  %4164 = vmatpush3.bf16.msra.mxu1 %v1249_v8 }
 0x58e   : > { %4175 = vmatprep.subr.bf16.mxu1 %v4436_v9 }
 0x63c   : > { %v1126_v37 = vpop.f32.mrf.mxu0 }
 0x63e   : > { %v4149_v38 = vpop.f32.mrf.mxu0 }
 0x640   : > { %v1129_v39 = vpop.f32.mrf.mxu0 }
 0x642   : > { %v4150_v43 = vpop.f32.mrf.mxu0 }
 0x644   : > { %v1080_v44 = vpop.f32.mrf.mxu1 }
 0x645   : > { %v4734_v45 = vadd.f32 %v1126_v37, %v1080_v44 }
 0x646   : > { %v4143_v47 = vpop.f32.mrf.mxu1 }
 0x647   : > { %v3725_v47 = vld [vmem:[%s5135_s27] ss:$0 sm:$0xff] }
 0x648   : > { %v1083_v48 = vpop.f32.mrf.mxu1 }
 0x64a   : > { %v4144_v49 = vpop.f32.mrf.mxu1 }
 0x64c   : > { %v1176_v50 = vpop.f32.mrf.mxu1 }
 0x64d   : > { %v1182_v51 = vmul.f32 0.35355338, %v1176_v50 }
 0x64e   : > { %v4155_v52 = vpop.f32.mrf.mxu1 }
 0x64f   : > { %v1183_v53 = vsel %vm4691_vm7, %v1182_v51, -1e+09 }
 0x650   : > { %v1179_v54 = vpop.f32.mrf.mxu1  ;;  %v1184_v55 = vsel %vm810_vm5, %v1183_v53, -inf }
 0x651   : > { %1185 = vmax.xlane.f32.xlu1 %v1184_v55 }
 0x652   : > { %v4156_v56 = vpop.f32.mrf.mxu1 }
 0x662   : > { %1196 = vrot.lane.b32.xlu1 %v4663_v30, %s4446_s4 }
 0x666   : > { %1292 = vrot.lane.b32.xlu1 %v4663_v30, %s4447_s5 }
 0x6da   : > { %v1186_v57 = vpop.xlane.xlu1 %1185 }
 0x6db   : > { %v1187_v58 = vsub.f32 %v1183_v53, %v1186_v57  ;;  %v4395_v53 = vld [vmem:[#allocation2] sm:$0xff] }
 0x6dd   : > { %v1188_v59 = vmul.f32 1.442695, %v1187_v58 }
 0x6de   : > { %v1197_v60 = vpop.permute.xlu1 %1196 }
 0x6df   : > { %4383 = vpow2.f32 %v1188_v59  ;;  %v1202_v61 = vsel %vm882_vm8, %v1197_v60, 0 }
 0x6e0   : > { %4158 = vmatpush3.bf16.msra.mxu0 %v1202_v61 }
 0x6e1   : > { %4169 = vmatprep.subr.bf16.mxu0 %v4436_v9 }
 0x6e2   : > { %v1293_v6 = vpop.permute.xlu1 %1292 }
 0x6ec   : > { %v4384_v62 = vpop.eup %4383 }
 0x6ed   : > { %v1190_v63 = vsel %vm810_vm5, %v4384_v62, 0.0 }
 0x6ee   : > { %1191 = vadd.xlane.f32.xlu0 %v1190_v63  ;;  %v1521_v63 = vld [vmem:[%s4615_s19 + $0xc0] sm:$0xff] }
 0x704   : > { %1294 = vrot.lane.b32.xlu0 %v4663_v30, %s4448_s6 }
 0x777   : > { %v1192_v0 = vpop.xlane.xlu0 %1191 }
 0x778   : > { %4385 = vrcp.f32 %v1192_v0  ;;  %v1514_v0 = vld [vmem:[%s4615_s19 + $0x88] sm:$0xff] }
 0x77b   : > { %v1295_v3 = vpop.permute.xlu0 %1294 }
 0x77c   : > { %v1300_v5 = vsel %vm810_vm5, %v1295_v3, 0  ;;  %v1522_v3 = vld [vmem:[%s4615_s19 + $0xc8] sm:$0xff] }
 0x77d   : > { %v3747_v7 = vcombine.high %v1514_v0, %v1522_v3 }
 0x785   : > { %v4386_v1 = vpop.eup %4385 }
 0x786   : > { %v1194_v2 = vmul.f32 %v4386_v1, %v4384_v62  ;;  %v1513_v62 = vld [vmem:[%s4615_s19 + $0x80] sm:$0xff] }
 0x787   : > { %v3744_v1 = vcombine.low %v1513_v62, %v1521_v63 }
 0x788   : > { %v1195_v4 = vpack.c.bf16 %v1194_v2, %v1194_v2  ;;  %v3745_v2 = vcombine.high %v1513_v62, %v1521_v63  ;;  %v1519_v63 = vld [vmem:[%s4615_s19 + $0xb0] sm:$0xff] }
 0x78a   : > { %4160 = vmatmul.mubr.msk.bf16.vlgmr.msra.gmra.mxu0 %vm810_vm5, %v1195_v4  ;;  %v1497_v4 = vld [vmem:[%s4615_s19] sm:$0xff] }
 0x78b   : > { %4170 = vmatpush3.bf16.xpose.msra.mxu0 %v1300_v5  ;;  %4171 = vmatprep.mubr.msk.bf16.mxu0 %vm4437_vm2, %v4436_v9  ;;  %v1505_v5 = vld [vmem:[%s4615_s19 + $0x40] sm:$0xff] }
 0x78c   : > { %4181 = vmatprep.subr.bf16.mxu0 %v4436_v9  ;;  %v3729_v8 = vcombine.high %v1497_v4, %v1505_v5 }
 0x792   : > { %4172 = vmatmul.mubr.msk.bf16.vlgmr.msra.gmra.mxu0 %vm810_vm5, %v1293_v6  ;;  %v3746_v6 = vcombine.low %v1514_v0, %v1522_v3  ;;  %v1527_v0 = vld [vmem:[%s4615_s19 + $0xf0] sm:$0xff] }
 0x793   : > { %4183 = vmatprep.mubr.msk.bf16.mxu0 %vm4437_vm2, %v4436_v9  ;;  %4182 = vmatpush3.bf16.msra.mxu0 %v1409_v31 }
 0x794   : > { %1829 = vmatprep.subr.bf16.mxu0 %v3747_v7  ;;  %v1503_v7 = vld [vmem:[%s4615_s19 + $0x30] sm:$0xff] }
 0x84a   : > { %v1238_v10 = vpop.f32.mrf.mxu0 }
 0x84b   : > { %v1244_v11 = vpack.c.bf16 %v1238_v10, %v1238_v10  ;;  %v1498_v10 = vld [vmem:[%s4615_s19 + $0x8] sm:$0xff] }
 0x84c   : > { %v4161_v12 = vpop.f32.mrf.mxu0 }
 0x84d   : > { %4166 = vmatmul.mubr.msk.bf16.vlgmr.msra.gmra.mxu1 %vm810_vm5, %v1244_v11  ;;  %v1506_v11 = vld [vmem:[%s4615_s19 + $0x48] sm:$0xff] }
 0x84e   : > { %v1241_v13 = vpop.f32.mrf.mxu0  ;;  %4177 = vmatprep.mubr.msk.bf16.mxu1 %vm4437_vm2, %v4436_v9  ;;  %v3731_v12 = vcombine.high %v1498_v10, %v1506_v11 }
 0x84f   : > { %v3728_v13 = vcombine.low %v1497_v4, %v1505_v5  ;;  %v3757_v5 = vcombine.high %v1519_v63, %v1527_v0 }
 0x850   : > { %v4162_v14 = vpop.f32.mrf.mxu0 }
 0x851   : > { %v3730_v14 = vcombine.low %v1498_v10, %v1506_v11  ;;  %v1504_v10 = vld [vmem:[%s4615_s19 + $0x38] sm:$0xff] }
 0x852   : > { %v1336_v15 = vpop.f32.mrf.mxu0  ;;  %v1512_v11 = vld [vmem:[%s4615_s19 + $0x78] sm:$0xff] }
 0x853   : > { %v1342_v16 = vmul.f32 0.35355338, %v1336_v15  ;;  %v1515_v15 = vld [vmem:[%s4615_s19 + $0x90] sm:$0xff] }
 0x854   : > { %v4173_v17 = vpop.f32.mrf.mxu0 }
 0x855   : > { %v1343_v18 = vsel %vm4691_vm7, %v1342_v16, -1e+09  ;;  %v1523_v16 = vld [vmem:[%s4615_s19 + $0xd0] sm:$0xff]  ;;  %v1516_v17 = vld [vmem:[%s4615_s19 + $0x98] sm:$0xff] }
 0x856   : > { %v1339_v19 = vpop.f32.mrf.mxu0  ;;  %v1344_v20 = vsel %vm810_vm5, %v1343_v18, -inf }
 0x857   : > { %1345 = vmax.xlane.f32.xlu1 %v1344_v20  ;;  %v1524_v19 = vld [vmem:[%s4615_s19 + $0xd8] sm:$0xff]  ;;  %v3748_v20 = vcombine.low %v1515_v15, %v1523_v16 }
 0x858   : > { %v4174_v21 = vpop.f32.mrf.mxu0 }
 0x859   : > { %v3750_v21 = vcombine.low %v1516_v17, %v1524_v19 }
 0x8e0   : > { %v1346_v22 = vpop.xlane.xlu1 %1345 }
 0x8e1   : > { %v1347_v23 = vsub.f32 %v1343_v18, %v1346_v22  ;;  %v3749_v18 = vcombine.high %v1515_v15, %v1523_v16  ;;  %v3751_v22 = vcombine.high %v1516_v17, %v1524_v19  ;;  %v3743_v15 = vcombine.high %v1504_v10, %v1512_v11  ;;  %v4244_v19 = vld [vmem:[%s4621_s8 + $0xf8] sm:$0xff]  }
 0x8e2   : > { %v3742_v17 = vcombine.low %v1504_v10, %v1512_v11  ;;  %v1555_v10 = vsub.s32 5, %v4684_v40  ;;  %v1563_v11 = vsub.s32 7, %v4684_v40 }
 0x8e3   : > { %v1348_v24 = vmul.f32 1.442695, %v1347_v23 }
 0x8e5   : > { %4387 = vpow2.f32 %v1348_v24 }
 0x8f2   : > { %v4388_v25 = vpop.eup %4387 }
 0x8f3   : > { %v1350_v9 = vsel %vm810_vm5, %v4388_v25, 0.0 }
 0x8f4   : > { %1351 = vadd.xlane.f32.xlu0 %v1350_v9 }
 0x90a   : > { %1356 = vrot.lane.b32.xlu0 %v4663_v30, %s4449_s9 }
 0x90d   : > { %v1285_v26 = vpop.f32.mrf.mxu1 }
 0x90e   : > { %v1291_v46 = vadd.f32 %v1285_v26, %v4734_v45 }
 0x90f   : > { %v4167_v27 = vpop.f32.mrf.mxu1 }
 0x911   : > { %v1288_v29 = vpop.f32.mrf.mxu1 }
 0x912   : > { %v3726_v29 = vld [vmem:[%s5137_s15] ss:$0 sm:$0xff] }
 0x913   : > { %v4168_v32 = vpop.f32.mrf.mxu1 }
 0x97d   : > { %v1352_v33 = vpop.xlane.xlu0 %1351 }
 0x97e   : > { %4389 = vrcp.f32 %v1352_v33  ;;  %v3727_v33 = vld [vmem:[%s5139_s30] ss:$0 sm:$0xff] }
 0x981   : > { %v1357_v34 = vpop.permute.xlu0 %1356 }
 0x982   : > { %v1362_v35 = vsel %vm882_vm8, %v1357_v34, 0 }
 0x983   : > { %4176 = vmatpush3.bf16.msra.mxu1 %v1362_v35  ;;  %v1499_v35 = vld [vmem:[%s4615_s19 + $0x10] sm:$0xff] }
 0x984   : > { %1788 = vmatprep.subr.bf16.mxu1 %v3745_v2  ;;  %v1528_v2 = vld [vmem:[%s4615_s19 + $0xf8] sm:$0xff] }
 0x98b   : > { %v4390_v36 = vpop.eup %4389 }
 0x98c   : > { %v1354_v37 = vmul.f32 %v4390_v36, %v4388_v25  ;;  %v1507_v36 = vld [vmem:[%s4615_s19 + $0x50] sm:$0xff] }
 0x98e   : > { %v1355_v30 = vpack.c.bf16 %v1354_v37, %v1354_v37  ;;  %v1500_v37 = vld [vmem:[%s4615_s19 + $0x18] sm:$0xff] }
 0x990   : > { %4178 = vmatmul.mubr.msk.bf16.vlgmr.msra.gmra.mxu1 %vm810_vm5, %v1355_v30  ;;  %v1508_v30 = vld [vmem:[%s4615_s19 + $0x58] sm:$0xff] }
 0x991   : > { %1808 = vmatprep.mubr.bf16.mxu1 %v4441_v42  ;;  %1789 = vmatpush1.bf16.msra.mxu1 %v3744_v1  ;;  %v1520_v1 = vld [vmem:[%s4615_s19 + $0xb8] sm:$0xff] }
 0x992   : > { %1790 = vmatprep.subr.bf16.mxu1 %v3729_v8  ;;  %v1511_v8 = vld [vmem:[%s4615_s19 + $0x70] sm:$0xff] }
 0x993   : > { %v3740_v16 = vcombine.low %v1503_v7, %v1511_v8 }
 0x995   : > { %1791 = vmatpush1.bf16.msra.mxu1 %v3728_v13  ;;  %v3758_v13 = vcombine.low %v1520_v1, %v1528_v2 }
 0x996   : > { %1870 = vmatprep.subr.bf16.mxu1 %v3749_v18  ;;  %v4243_v18 = vld [vmem:[%s4621_s8 + $0x78] sm:$0xff]  }
 0xa50   : > { %v1398_v38 = vpop.f32.mrf.mxu1 }
 0xa51   : > { %v1404_v39 = vpack.c.bf16 %v1398_v38, %v1398_v38 }
 0xa52   : > { %v4179_v43 = vpop.f32.mrf.mxu1 }
 0xa53   : > { %4184 = vmatmul.mubr.msk.bf16.vlgmr.msra.gmra.mxu0 %vm810_vm5, %v1404_v39  ;;  %v3733_v43 = vcombine.high %v1499_v35, %v1507_v36 }
 0xa54   : > { %v1401_v44 = vpop.f32.mrf.mxu1  ;;  %1849 = vmatprep.mubr.bf16.mxu0 %v4441_v42  ;;  %1830 = vmatpush1.bf16.msra.mxu0 %v3746_v6  ;;  %v3759_v6 = vcombine.high %v1520_v1, %v1528_v2 }
 0xa55   : > { %1831 = vmatprep.subr.bf16.mxu0 %v3731_v12  ;;  %v3735_v44 = vcombine.high %v1500_v37, %v1508_v30  ;;  %v3756_v12 = vcombine.low %v1519_v63, %v1527_v0 }
 0xa56   : > { %v4180_v45 = vpop.f32.mrf.mxu1 }
 0xa57   : > { %v1517_v45 = vld [vmem:[%s4615_s19 + $0xa0] sm:$0xff] }
 0xa58   : > { %1832 = vmatpush1.bf16.msra.mxu0 %v3730_v14  ;;  %v3741_v14 = vcombine.high %v1503_v7, %v1511_v8 }
 0xa59   : > { %1911 = vmatprep.subr.bf16.mxu0 %v3751_v22  ;;  %v4247_v22 = vld [vmem:[%s4621_s8 + $0x70] sm:$0xff]  }
 0xb13   : > { %v1445_v48 = vpop.f32.mrf.mxu0 }
 0xb14   : > { %v1451_v49 = vadd.f32 %v1445_v48, %v1291_v46  ;;  %v1518_v48 = vld [vmem:[%s4615_s19 + $0xa8] sm:$0xff] }
 0xb15   : > { %v4185_v50 = vpop.f32.mrf.mxu0 }
 0xb16   : > { %v1458_v51 = vadd.f32 %v3725_v47, %v1451_v49  ;;  %v1525_v47 = vld [vmem:[%s4615_s19 + $0xe0] sm:$0xff]  ;;  %v1526_v49 = vld [vmem:[%s4615_s19 + $0xe8] sm:$0xff]  ;;  %v3732_v50 = vcombine.low %v1499_v35, %v1507_v36  ;;  %v4262_v35 = vld [vmem:[%s4621_s8 + $0x98] sm:$0xff]  }
 0xb17   : > { %v1448_v52 = vpop.f32.mrf.mxu0  ;;  %v4263_v36 = vld [vmem:[%s4621_s8 + $0x50] sm:$0xff]  }
 0xb18   : > { %v4777_v54 = vadd.f32 %v4395_v53, %v1458_v51  ;;  %v3734_v51 = vcombine.low %v1500_v37, %v1508_v30  ;;  %v3753_v52 = vcombine.high %v1517_v45, %v1525_v47  ;;  %v3755_v53 = vcombine.high %v1518_v48, %v1526_v49  ;;  %v4264_v37 = vld [vmem:[%s4621_s8 + $0xd0] sm:$0xff]  }
 0xb19   : > { %v4186_v55 = vpop.f32.mrf.mxu0  ;;  %v4265_v30 = vld [vmem:[%s4621_s8 + $0x10] sm:$0xff]  }
 0xb1a   : > { %v1462_v56 = vsel %vm697_vm1, %v4777_v54, 0.0  ;;  %v1501_v55 = vld [vmem:[%s4615_s19 + $0x20] sm:$0xff] }
 0xb1b   : > { %1463 = vadd.xlane.f32.xlu1 %v1462_v56  ;;  %v1509_v56 = vld [vmem:[%s4615_s19 + $0x60] sm:$0xff] }
 0xb1c   : > { %v3736_v3 = vcombine.low %v1501_v55, %v1509_v56 }
 0xba4   : > { %v1464_v57 = vpop.xlane.xlu1 %1463 }
 0xba5   : > { %v1465_v58 = vmul.f32 0.03125, %v1464_v57  ;;  %v1502_v57 = vld [vmem:[%s4615_s19 + $0x28] sm:$0xff] }
 0xba7   : > { %v1466_v59 = vsub.f32 %v4777_v54, %v1465_v58  ;;  %v1510_v58 = vld [vmem:[%s4615_s19 + $0x68] sm:$0xff] }
 0xba8   : > { %v3739_v62 = vcombine.high %v1502_v57, %v1510_v58  ;;  %v3738_v4 = vcombine.low %v1502_v57, %v1510_v58  ;;  %v1543_v57 = vsub.s32 2, %v4684_v40  ;;  %v4894_v58 = vld [vmem:[%s4610_s25] sm:$0xff] }
 0xba9   : > { %v1467_v60 = vmul.f32 %v1466_v59, %v1466_v59  ;;  %v1478_v31 = vmul.f32 %v3726_v29, %v1466_v59  ;;  %v3752_v59 = vcombine.low %v1517_v45, %v1525_v47  ;;  %v4257_v29 = vld [vmem:[%s4621_s8 + $0x20] sm:$0xff]   ;;  %v4270_v45 = vld [vmem:[%s4621_s8 + $0x88] sm:$0xff]  }
 0xbaa   : > { %v4271_v47 = vld [vmem:[%s4621_s8 + $0x40] sm:$0xff]  }
 0xbab   : > { %v1468_v61 = vsel %vm697_vm1, %v1467_v60, 0.0  ;;  %v3754_v60 = vcombine.low %v1518_v48, %v1526_v49  ;;  %v4272_v48 = vld [vmem:[%s4621_s8 + $0xc0] sm:$0xff]  }
 0xbac   : > { %1469 = vadd.xlane.f32.xlu1 %v1468_v61  ;;  %v3737_v61 = vcombine.high %v1501_v55, %v1509_v56  ;;  %v4273_v49 = vld [vmem:[%s4621_s8] sm:$0xff]   ;;  %v4885_v55 = vld [vmem:[%s4610_s25 + $0x8] sm:$0xff] }
 0xc35   : > { %v1470_v23 = vpop.xlane.xlu1 %1469 }
 0xc36   : > { %v1471_v24 = vmul.f32 0.032258064, %v1470_v23  ;;  %v4248_v23 = vld [vmem:[%s4621_s8 + $0xf0] sm:$0xff]  }
 0xc38   : > { %4391 = vrsqrt.f32 %v1471_v24  ;;  %vm1481_vm9 = vcmp.eq.f32.partialorder %v1471_v24, inf  ;;  %v1484_v26 = vand.u32 2147483648, %v1471_v24  ;;  %vm1483_vm10 = vcmp.eq.f32.partialorder %v1471_v24, 0.0 }
 0xc45   : > { %v4392_v25 = vpop.eup %4391 }
 0xc46   : > { %v1480_v9 = vmul.f32 %v4392_v25, %v1471_v24  ;;  %v4251_v25 = vld [vmem:[%s4621_s8 + $0x68] sm:$0xff]  }
 0xc48   : > { %v1482_v46 = vsel %vm1481_vm9, %v1471_v24, %v1480_v9  ;;  %v4250_v24 = vld [vmem:[%s4621_s8 + $0xb0] sm:$0xff]   ;;  %v4252_v9 = vld [vmem:[%s4621_s8 + $0xe8] sm:$0xff]  }
 0xc49   : > { %v1485_v27 = vsel %vm1483_vm10, %v1484_v26, %v1482_v46  ;;  %v4253_v26 = vld [vmem:[%s4621_s8 + $0x28] sm:$0xff]  }
 0xc4a   : > { %v1486_v28 = vadd.f32 1e-06, %v1485_v27  ;;  %v4254_v46 = vld [vmem:[%s4621_s8 + $0xa8] sm:$0xff]   ;;  %v4255_v27 = vld [vmem:[%s4621_s8 + $0x60] sm:$0xff]  }
 0xc4c   : > { %4393 = vrcp.f32 %v1486_v28  ;;  %v4256_v28 = vld [vmem:[%s4621_s8 + $0xe0] sm:$0xff]  }
 0xc59   : > { %v4394_v32 = vpop.eup %4393 }
 0xc5a   : > { %v1488_v34 = vmul.f32 %v4394_v32, %v1478_v31  ;;  %v4258_v31 = vld [vmem:[%s4621_s8 + $0xa0] sm:$0xff]   ;;  %v4259_v32 = vld [vmem:[%s4621_s8 + $0x58] sm:$0xff]  }
 0xc5c   : > { %v1495_v38 = vadd.f32 %v3727_v33, %v1488_v34  ;;  %v4260_v33 = vld [vmem:[%s4621_s8 + $0xd8] sm:$0xff]  }
 0xc5d   : > { %v4261_v34 = vld [vmem:[%s4621_s8 + $0x18] sm:$0xff]  }
 0xc5e   : > { %v4809_v39 = vpack.c.bf16 %v1495_v38, %v1495_v38  ;;  %v4266_v38 = vld [vmem:[%s4621_s8 + $0x90] sm:$0xff]  }
 0xc60   : > { %3760 = vmatmul.mubr.msk.bf16.vlgmr.msra.gmra.mxu1 %vm697_vm1, %v4809_v39  ;;  %3761 = vmatmul.mubr.msk.bf16.vlgmr.msra.gmra.mxu0 %vm697_vm1, %v4809_v39 }
 0xc61   : > { %1871 = vmatpush1.bf16.msra.mxu1 %v3748_v20  ;;  %1912 = vmatpush1.bf16.msra.mxu0 %v3750_v21  ;;  %v4245_v20 = vld [vmem:[%s4621_s8 + $0x38] sm:$0xff]  }
 0xc62   : > { %1872 = vmatprep.subr.bf16.mxu1 %v3733_v43  ;;  %1913 = vmatprep.subr.bf16.mxu0 %v3735_v44  ;;  %v4246_v21 = vld [vmem:[%s4621_s8 + $0xb8] sm:$0xff]   ;;  %v4268_v43 = vld [vmem:[%s4621_s8 + $0xc8] sm:$0xff]  }
 0xc63   : > { %1890 = vmatprep.mubr.bf16.mxu1 %v4441_v42  ;;  %1931 = vmatprep.mubr.bf16.mxu0 %v4441_v42  ;;  %v4269_v44 = vld [vmem:[%s4621_s8 + $0x8] sm:$0xff]  }
 0xc65   : > { %1873 = vmatpush1.bf16.msra.mxu1 %v3732_v50  ;;  %1914 = vmatpush1.bf16.msra.mxu0 %v3734_v51  ;;  %v4274_v50 = vld [vmem:[%s4621_s8 + $0x80] sm:$0xff]   ;;  %v4275_v51 = vld [vmem:[%s4621_s8 + $0x178] sm:$0xff]  }
 0xc66   : > { %1952 = vmatprep.subr.bf16.mxu1 %v3753_v52  ;;  %1993 = vmatprep.subr.bf16.mxu0 %v3755_v53  ;;  %v4276_v52 = vld [vmem:[%s4621_s8 + $0x1f8] sm:$0xff]   ;;  %v1559_v53 = vsub.s32 6, %v4684_v40 }
 0xc68   : > { %3762 = vmatmul.mubr.msk.bf16.vlgmr.msra.gmra.mxu1 %vm697_vm1, %v4809_v39  ;;  %3763 = vmatmul.mubr.msk.bf16.vlgmr.msra.gmra.mxu0 %vm697_vm1, %v4809_v39  ;;  %v4890_v56 = vrot.slane %v4885_v55, %v1559_v53 }
 0xc69   : > { %1953 = vmatpush1.bf16.msra.mxu1 %v3752_v59  ;;  %1994 = vmatpush1.bf16.msra.mxu0 %v3754_v60  ;;  %v1539_v59 = vsub.s32 1, %v4684_v40  ;;  %v1547_v60 = vsub.s32 3, %v4684_v40 }
 0xc6a   : > { %1954 = vmatprep.subr.bf16.mxu1 %v3737_v61  ;;  %1995 = vmatprep.subr.bf16.mxu0 %v3739_v62  ;;  %v1536_v61 = vrot.slane %v4894_v58, %v4687_v41  ;;  %v1544_v62 = vrot.slane %v4894_v58, %v1543_v57 }
 0xc6b   : > { %1972 = vmatprep.mubr.bf16.mxu1 %v4441_v42  ;;  %2013 = vmatprep.mubr.bf16.mxu0 %v4441_v42  ;;  %v1540_v63 = vrot.slane %v4894_v58, %v1539_v59  ;;  %v1548_v0 = vrot.slane %v4894_v58, %v1547_v60 }
 0xc6d   : > { %1955 = vmatpush1.bf16.msra.mxu1 %v3736_v3  ;;  %1996 = vmatpush1.bf16.msra.mxu0 %v3738_v4 }
 0xc6e   : > { %2034 = vmatprep.subr.bf16.mxu1 %v3757_v5  ;;  %2075 = vmatprep.subr.bf16.mxu0 %v3759_v6 }
 0xc70   : > { %3764 = vmatmul.mubr.msk.bf16.vlgmr.msra.gmra.mxu1 %vm697_vm1, %v4809_v39  ;;  %3765 = vmatmul.mubr.msk.bf16.vlgmr.msra.gmra.mxu0 %vm697_vm1, %v4809_v39 }
 0xc71   : > { %2035 = vmatpush1.bf16.msra.mxu1 %v3756_v12  ;;  %2076 = vmatpush1.bf16.msra.mxu0 %v3758_v13 }
 0xc72   : > { %2036 = vmatprep.subr.bf16.mxu1 %v3741_v14  ;;  %2077 = vmatprep.subr.bf16.mxu0 %v3743_v15 }
 0xc73   : > { %2054 = vmatprep.mubr.bf16.mxu1 %v4441_v42  ;;  %2095 = vmatprep.mubr.bf16.mxu0 %v4441_v42  ;;  %v4249_v42 = vld [vmem:[%s4621_s8 + $0x30] sm:$0xff]  }
 0xc75   : > { %2037 = vmatpush1.bf16.msra.mxu1 %v3740_v16  ;;  %2078 = vmatpush1.bf16.msra.mxu0 %v3742_v17 }
 0xc76   : > { %3931 = vmatprep.subr.bf16.mxu1 %v4243_v18  ;;  %3953 = vmatprep.subr.bf16.mxu0 %v4244_v19 }
 0xc78   : > { %3766 = vmatmul.mubr.msk.bf16.vlgmr.msra.gmra.mxu1 %vm697_vm1, %v4809_v39  ;;  %3767 = vmatmul.mubr.msk.bf16.vlgmr.msra.gmra.mxu0 %vm697_vm1, %v4809_v39  ;;  %v4267_v39 = vld [vmem:[%s4621_s8 + $0x48] sm:$0xff]  }
 0xc79   : > { %3932 = vmatpush3.bf16.msra.mxu1 %v4245_v20  ;;  %3954 = vmatpush3.bf16.msra.mxu0 %v4246_v21 }
 0xc7a   : > { %3933 = vmatprep.subr.bf16.mxu1 %v4247_v22  ;;  %3955 = vmatprep.subr.bf16.mxu0 %v4248_v23  ;;  %v1556_v22 = vrot.slane %v4894_v58, %v1555_v10  ;;  %v1564_v23 = vrot.slane %v4894_v58, %v1563_v11 }
 0xc7d   : > { %3934 = vmatpush3.bf16.msra.mxu1 %v4249_v42  ;;  %3956 = vmatpush3.bf16.msra.mxu0 %v4250_v24  ;;  %v4277_v42 = vld [vmem:[%s4621_s8 + $0x138] sm:$0xff]  }
 0xc7e   : > { %3935 = vmatprep.subr.bf16.mxu1 %v4251_v25  ;;  %3957 = vmatprep.subr.bf16.mxu0 %v4252_v9  ;;  %v4278_v24 = vld [vmem:[%s4621_s8 + $0x1b8] sm:$0xff]  }
 0xc81   : > { %3936 = vmatpush3.bf16.msra.mxu1 %v4253_v26  ;;  %3958 = vmatpush3.bf16.msra.mxu0 %v4254_v46 }
 0xc82   : > { %3937 = vmatprep.subr.bf16.mxu1 %v4255_v27  ;;  %3959 = vmatprep.subr.bf16.mxu0 %v4256_v28  ;;  %v4279_v27 = vld [vmem:[%s4621_s8 + $0x170] sm:$0xff]  }
 0xc83   : > { %v4280_v28 = vld [vmem:[%s4621_s8 + $0x1f0] sm:$0xff]  }
 0xc85   : > { %3938 = vmatpush3.bf16.msra.mxu1 %v4257_v29  ;;  %3960 = vmatpush3.bf16.msra.mxu0 %v4258_v31 }
 0xc86   : > { %3939 = vmatprep.subr.bf16.mxu1 %v4259_v32  ;;  %3961 = vmatprep.subr.bf16.mxu0 %v4260_v33 }
 0xc89   : > { %3940 = vmatpush3.bf16.msra.mxu1 %v4261_v34  ;;  %3962 = vmatpush3.bf16.msra.mxu0 %v4262_v35  ;;  %v4281_v34 = vld [vmem:[%s4621_s8 + $0x130] sm:$0xff]  }
 0xc8a   : > { %3941 = vmatprep.subr.bf16.mxu1 %v4263_v36  ;;  %3963 = vmatprep.subr.bf16.mxu0 %v4264_v37  ;;  %v4282_v35 = vld [vmem:[%s4621_s8 + $0x1b0] sm:$0xff]  }
 0xc8d   : > { %3942 = vmatpush3.bf16.msra.mxu1 %v4265_v30  ;;  %3964 = vmatpush3.bf16.msra.mxu0 %v4266_v38  ;;  %v4283_v30 = vld [vmem:[%s4621_s8 + $0x168] sm:$0xff]  }
 0xc8e   : > { %3943 = vmatprep.subr.bf16.mxu1 %v4267_v39  ;;  %3965 = vmatprep.subr.bf16.mxu0 %v4268_v43  ;;  %v4284_v38 = vld [vmem:[%s4621_s8 + $0x1e8] sm:$0xff]  }
 0xc91   : > { %3944 = vmatpush3.bf16.msra.mxu1 %v4269_v44  ;;  %3966 = vmatpush3.bf16.msra.mxu0 %v4270_v45 }
 0xc92   : > { %3945 = vmatprep.subr.bf16.mxu1 %v4271_v47  ;;  %3967 = vmatprep.subr.bf16.mxu0 %v4272_v48 }
 0xc95   : > { %3946 = vmatpush3.bf16.msra.mxu1 %v4273_v49  ;;  %3968 = vmatpush3.bf16.msra.mxu0 %v4274_v50  ;;  %v4285_v49 = vld [vmem:[%s4621_s8 + $0x128] sm:$0xff]  }
 0xc96   : > { %3975 = vmatprep.subr.bf16.mxu1 %v4275_v51  ;;  %3997 = vmatprep.subr.bf16.mxu0 %v4276_v52  ;;  %v4286_v50 = vld [vmem:[%s4621_s8 + $0x1a8] sm:$0xff]  }
 0xd20   : > { %v1810_v1 = vpop.f32.mrf.mxu1  ;;  %v1851_v2 = vpop.f32.mrf.mxu0 }
 0xd21   : > { %v1811_v3 = vadd.f32 %v1810_v1, %v1536_v61  ;;  %v1852_v4 = vadd.f32 %v1851_v2, %v1544_v62  ;;  %v4287_v61 = vld [vmem:[%s4621_s8 + $0x160] sm:$0xff]   ;;  %v1551_v1 = vsub.s32 4, %v4684_v40 }
 0xd22   : > { %v1812_v5 = vpop.f32.mrf.mxu1  ;;  %v1853_v6 = vpop.f32.mrf.mxu0  ;;  %v4288_v62 = vld [vmem:[%s4621_s8 + $0x1e0] sm:$0xff]  }
 0xd23   : > { %v1813_v7 = vadd.f32 %v1812_v5, %v1540_v63  ;;  %v1854_v8 = vadd.f32 %v1853_v6, %v1548_v0  ;;  %v2104_v12 = vmax.f32 %v1811_v3, 0.0  ;;  %v2106_v13 = vmax.f32 %v1852_v4, 0.0  ;;  %v4289_v2 = vld [vmem:[%s4621_s8 + $0x120] sm:$0xff]   ;;  %v4291_v6 = vld [vmem:[%s4621_s8 + $0x158] sm:$0xff]  }
 0xd24   : > { %v1814_v14 = vpop.f32.mrf.mxu1  ;;  %v1855_v15 = vpop.f32.mrf.mxu0  ;;  %v4290_v3 = vld [vmem:[%s4621_s8 + $0x1a0] sm:$0xff]  }
 0xd25   : > { %v2105_v16 = vmax.f32 %v1813_v7, 0.0  ;;  %v2107_v17 = vmax.f32 %v1854_v8, 0.0  ;;  %v2120_v25 = vpack.c.bf16 %v2104_v12, %v2104_v12  ;;  %v2122_v9 = vpack.c.bf16 %v2106_v13, %v2106_v13  ;;  %v4292_v7 = vld [vmem:[%s4621_s8 + $0x1d8] sm:$0xff]  }
 0xd26   : > { %v1815_v18 = vpop.f32.mrf.mxu1  ;;  %v1856_v19 = vpop.f32.mrf.mxu0  ;;  %v1584_v8 = vrot.slane %v4885_v55, %v1551_v1  ;;  %v4293_v14 = vld [vmem:[%s4621_s8 + $0x118] sm:$0xff]  }
 0xd27   : > { %v2121_v20 = vpack.c.bf16 %v2105_v16, %v2105_v16  ;;  %v2123_v21 = vpack.c.bf16 %v2107_v17, %v2107_v17  ;;  %v4294_v15 = vld [vmem:[%s4621_s8 + $0x198] sm:$0xff]   ;;  %v4295_v18 = vld [vmem:[%s4621_s8 + $0x150] sm:$0xff]  }
 0xd28   : > { %v4919_v26 = vpop.f32.mrf.mxu1  ;;  %v4921_v46 = vpop.f32.mrf.mxu0  ;;  %v4296_v19 = vld [vmem:[%s4621_s8 + $0x1d0] sm:$0xff]  }
 0xd29   : > { %3199 = vmatprep.mubr.bf16.mxu1 %v2121_v20  ;;  %3239 = vmatprep.mubr.bf16.mxu0 %v2123_v21 }
 0xd2a   : > { %v1894_v29 = vpop.f32.mrf.mxu1  ;;  %v1935_v31 = vpop.f32.mrf.mxu0  ;;  %3200 = vmatmul.mubr.bf16.vlgmr.msra.gmra.mxu1 %v2120_v25  ;;  %3240 = vmatmul.mubr.bf16.vlgmr.msra.gmra.mxu0 %v2122_v9  ;;  %v1552_v25 = vrot.slane %v4894_v58, %v1551_v1  ;;  %v1560_v9 = vrot.slane %v4894_v58, %v1559_v53  ;;  %v4301_v53 = vld [vmem:[%s4621_s8 + $0x108] sm:$0xff]  }
 0xd2b   : > { %v1895_v32 = vadd.f32 %v1894_v29, %v1556_v22  ;;  %v1936_v33 = vadd.f32 %v1935_v31, %v1564_v23  ;;  %3976 = vmatpush3.bf16.msra.mxu1 %v4277_v42  ;;  %3998 = vmatpush3.bf16.msra.mxu0 %v4278_v24  ;;  %v4297_v42 = vld [vmem:[%s4621_s8 + $0x110] sm:$0xff]   ;;  %v4300_v29 = vld [vmem:[%s4621_s8 + $0x1c8] sm:$0xff]   ;;  %v1572_v31 = vrot.slane %v4885_v55, %v1539_v59  ;;  %v4303_v59 = vld [vmem:[%s4621_s8 + $0x140] sm:$0xff]  }
 0xd2c   : > { %v1896_v36 = vpop.f32.mrf.mxu1  ;;  %v1937_v37 = vpop.f32.mrf.mxu0  ;;  %3977 = vmatprep.subr.bf16.mxu1 %v4279_v27  ;;  %3999 = vmatprep.subr.bf16.mxu0 %v4280_v28  ;;  %v4298_v24 = vld [vmem:[%s4621_s8 + $0x190] sm:$0xff]   ;;  %v4302_v58 = vld [vmem:[%s4621_s8 + $0x188] sm:$0xff]  }
 0xd2d   : > { %v2109_v39 = vmax.f32 %v1895_v32, 0.0  ;;  %v2111_v43 = vmax.f32 %v1936_v33, 0.0  ;;  %v1580_v32 = vrot.slane %v4885_v55, %v1547_v60  ;;  %v1934_v36 = vadd.f32 %v4921_v46, %v1560_v9  ;;  %v4304_v37 = vld [vmem:[%s4621_s8 + $0x1c0] sm:$0xff]   ;;  %v4308_v46 = vld [vmem:[%s4621_s8 + $0x2f8] sm:$0xff]   ;;  %v4330_v9 = vld [vmem:[%s4621_s8 + $0x290] sm:$0xff]  }
 0xd2e   : > { %v1897_v44 = vpop.f32.mrf.mxu1  ;;  %v1938_v45 = vpop.f32.mrf.mxu0 }
 0xd2f   : > { %v2125_v47 = vpack.c.bf16 %v2109_v39, %v2109_v39  ;;  %v2127_v48 = vpack.c.bf16 %v2111_v43, %v2111_v43  ;;  %3978 = vmatpush3.bf16.msra.mxu1 %v4281_v34  ;;  %4000 = vmatpush3.bf16.msra.mxu0 %v4282_v35  ;;  %v1893_v35 = vadd.f32 %v4919_v26, %v1552_v25  ;;  %v4306_v39 = vld [vmem:[%s4621_s8 + $0x180] sm:$0xff]   ;;  %v2110_v44 = vmax.f32 %v1934_v36, 0.0  ;;  %v4307_v26 = vld [vmem:[%s4621_s8 + $0x278] sm:$0xff]  }
 0xd30   : > { %v4931_v51 = vpop.f32.mrf.mxu1  ;;  %v4933_v52 = vpop.f32.mrf.mxu0  ;;  %3979 = vmatprep.subr.bf16.mxu1 %v4283_v30  ;;  %4001 = vmatprep.subr.bf16.mxu0 %v4284_v38  ;;  %v4305_v38 = vld [vmem:[%s4621_s8 + $0x100] sm:$0xff]   ;;  %v1568_v25 = vrot.slane %v4885_v55, %v4687_v41  ;;  %v1596_v41 = vrot.slane %v4885_v55, %v1563_v11 }
 0xd31   : > { %3279 = vmatprep.mubr.bf16.mxu1 %v2125_v47  ;;  %3319 = vmatprep.mubr.bf16.mxu0 %v2127_v48  ;;  %v2108_v43 = vmax.f32 %v1893_v35, 0.0  ;;  %v4309_v48 = vld [vmem:[%s4621_s8 + $0x238] sm:$0xff]  }
 0xd32   : > { %v1976_v63 = vpop.f32.mrf.mxu1  ;;  %v2017_v0 = vpop.f32.mrf.mxu0 }
 0xd33   : > { %3980 = vmatpush3.bf16.msra.mxu1 %v4285_v49  ;;  %4002 = vmatpush3.bf16.msra.mxu0 %v4286_v50  ;;  %v1977_v30 = vadd.f32 %v1976_v63, %v1572_v31  ;;  %v2018_v60 = vadd.f32 %v2017_v0, %v1580_v32  ;;  %v2124_v49 = vpack.c.bf16 %v2108_v43, %v2108_v43  ;;  %v4311_v63 = vld [vmem:[%s4621_s8 + $0x270] sm:$0xff]   ;;  %v4333_v31 = vld [vmem:[%s4621_s8 + $0x208] sm:$0xff]  }
 0xd34   : > { %v1978_v4 = vpop.f32.mrf.mxu1  ;;  %v2019_v5 = vpop.f32.mrf.mxu0  ;;  %3981 = vmatprep.subr.bf16.mxu1 %v4287_v61  ;;  %4003 = vmatprep.subr.bf16.mxu0 %v4288_v62  ;;  %v2126_v50 = vpack.c.bf16 %v2110_v44, %v2110_v44  ;;  %v4310_v61 = vld [vmem:[%s4621_s8 + $0x2b8] sm:$0xff]   ;;  %v4312_v0 = vld [vmem:[%s4621_s8 + $0x2f0] sm:$0xff]   ;;  %v1975_v32 = vadd.f32 %v4931_v51, %v1568_v25  ;;  %v4338_v51 = vld [vmem:[%s4621_s8 + $0x280] sm:$0xff]  }
 0xd35   : > { %v2113_v45 = vmax.f32 %v1977_v30, 0.0  ;;  %v2115_v47 = vmax.f32 %v2018_v60, 0.0  ;;  %v4315_v4 = vld [vmem:[%s4621_s8 + $0x268] sm:$0xff]   ;;  %v4343_v60 = vld [vmem:[%s4621_s8 + $0x370] sm:$0xff]  }
 0xd36   : > { %v1979_v12 = vpop.f32.mrf.mxu1  ;;  %v2020_v13 = vpop.f32.mrf.mxu0  ;;  %v4316_v5 = vld [vmem:[%s4621_s8 + $0x2e8] sm:$0xff]   ;;  %v2112_v11 = vmax.f32 %v1975_v32, 0.0  ;;  %v4345_v44 = vld [vmem:[%s4621_s8 + $0x330] sm:$0xff]  }
 0xd37   : > { %3982 = vmatpush3.bf16.msra.mxu1 %v4289_v2  ;;  %4004 = vmatpush3.bf16.msra.mxu0 %v4290_v3  ;;  %v2129_v62 = vpack.c.bf16 %v2113_v45, %v2113_v45  ;;  %v2131_v1 = vpack.c.bf16 %v2115_v47, %v2115_v47  ;;  %v4313_v2 = vld [vmem:[%s4621_s8 + $0x230] sm:$0xff]   ;;  %v4320_v12 = vld [vmem:[%s4621_s8 + $0x2e0] sm:$0xff]   ;;  %v4348_v45 = vld [vmem:[%s4621_s8 + $0x3e8] sm:$0xff]  }
 0xd38   : > { %v2056_v16 = vpop.f32.mrf.mxu1  ;;  %v2097_v17 = vpop.f32.mrf.mxu0  ;;  %3983 = vmatprep.subr.bf16.mxu1 %v4291_v6  ;;  %4005 = vmatprep.subr.bf16.mxu0 %v4292_v7  ;;  %v4314_v3 = vld [vmem:[%s4621_s8 + $0x2b0] sm:$0xff]   ;;  %v4317_v6 = vld [vmem:[%s4621_s8 + $0x228] sm:$0xff]   ;;  %v4321_v13 = vld [vmem:[%s4621_s8 + $0x220] sm:$0xff]  }
 0xd39   : > { %v4947_v20 = vadd.f32 %v2056_v16, %v1584_v8  ;;  %v4950_v21 = vadd.f32 %v2097_v17, %v4890_v56  ;;  %v4299_v56 = vld [vmem:[%s4621_s8 + $0x148] sm:$0xff]   ;;  %v4319_v8 = vld [vmem:[%s4621_s8 + $0x260] sm:$0xff]   ;;  %v4324_v16 = vld [vmem:[%s4621_s8 + $0x2d8] sm:$0xff]  }
 0xd3a   : > { %v4952_v22 = vpop.f32.mrf.mxu1  ;;  %v4954_v23 = vpop.f32.mrf.mxu0  ;;  %v4318_v7 = vld [vmem:[%s4621_s8 + $0x2a8] sm:$0xff]   ;;  %v4325_v17 = vld [vmem:[%s4621_s8 + $0x218] sm:$0xff]  }
 0xd3b   : > { %3984 = vmatpush3.bf16.msra.mxu1 %v4293_v14  ;;  %4006 = vmatpush3.bf16.msra.mxu0 %v4294_v15  ;;  %v4322_v14 = vld [vmem:[%s4621_s8 + $0x2a0] sm:$0xff]   ;;  %v4323_v15 = vld [vmem:[%s4621_s8 + $0x258] sm:$0xff]   ;;  %v4349_v47 = vld [vmem:[%s4621_s8 + $0x328] sm:$0xff]  }
 0xd3c   : > { %v2060_v27 = vpop.f32.mrf.mxu1  ;;  %v2101_v28 = vpop.f32.mrf.mxu0  ;;  %3985 = vmatprep.subr.bf16.mxu1 %v4295_v18  ;;  %4007 = vmatprep.subr.bf16.mxu0 %v4296_v19  ;;  %v4326_v18 = vld [vmem:[%s4621_s8 + $0x298] sm:$0xff]   ;;  %v4327_v19 = vld [vmem:[%s4621_s8 + $0x250] sm:$0xff]  }
 0xd3d   : > { %v4331_v27 = vld [vmem:[%s4621_s8 + $0x248] sm:$0xff]   ;;  %v1576_v28 = vrot.slane %v4885_v55, %v1543_v57 }
 0xd3e   : > { %v2061_v33 = vpop.f32.mrf.mxu1  ;;  %v2102_v34 = vpop.f32.mrf.mxu0  ;;  %v4334_v57 = vld [vmem:[%s4621_s8 + $0x288] sm:$0xff]  }
 0xd3f   : > { %3986 = vmatpush3.bf16.msra.mxu1 %v4297_v42  ;;  %4008 = vmatpush3.bf16.msra.mxu0 %v4298_v24  ;;  %v4328_v42 = vld [vmem:[%s4621_s8 + $0x2d0] sm:$0xff]   ;;  %v4335_v33 = vld [vmem:[%s4621_s8 + $0x240] sm:$0xff]   ;;  %v2016_v34 = vadd.f32 %v4933_v52, %v1576_v28  ;;  %v4340_v52 = vld [vmem:[%s4621_s8 + $0x3f8] sm:$0xff]  }
 0xd40   : > { %3987 = vmatprep.subr.bf16.mxu1 %v4299_v56  ;;  %4009 = vmatprep.subr.bf16.mxu0 %v4300_v29  ;;  %v4329_v24 = vld [vmem:[%s4621_s8 + $0x210] sm:$0xff]   ;;  %v4332_v56 = vld [vmem:[%s4621_s8 + $0x2c8] sm:$0xff]   ;;  %v1588_v29 = vrot.slane %v4885_v55, %v1555_v10  ;;  %v2100_v55 = vadd.f32 %v4954_v23, %v1596_v41  ;;  %v4337_v10 = vld [vmem:[%s4621_s8 + $0x200] sm:$0xff]  }
 0xd41   : > { %v2114_v35 = vmax.f32 %v2016_v34, 0.0  ;;  %v4342_v23 = vld [vmem:[%s4621_s8 + $0x3b8] sm:$0xff]  }
 0xd42   : > { %v2059_v40 = vadd.f32 %v4952_v22, %v1588_v29  ;;  %v4341_v22 = vld [vmem:[%s4621_s8 + $0x338] sm:$0xff]  }
 0xd43   : > { %3988 = vmatpush3.bf16.msra.mxu1 %v4301_v53  ;;  %4010 = vmatpush3.bf16.msra.mxu0 %v4302_v58  ;;  %v4336_v53 = vld [vmem:[%s4621_s8 + $0x2c0] sm:$0xff]   ;;  %v4339_v58 = vld [vmem:[%s4621_s8 + $0x378] sm:$0xff]   ;;  %v2130_v30 = vpack.c.bf16 %v2114_v35, %v2114_v35 }
 0xd44   : > { %3989 = vmatprep.subr.bf16.mxu1 %v4303_v59  ;;  %4011 = vmatprep.subr.bf16.mxu0 %v4304_v37  ;;  %v2117_v36 = vmax.f32 %v2059_v40, 0.0  ;;  %v2119_v59 = vmax.f32 %v2100_v55, 0.0  ;;  %v2128_v37 = vpack.c.bf16 %v2112_v11, %v2112_v11 }
 0xd46   : > { %v2135_v43 = vpack.c.bf16 %v2119_v59, %v2119_v59 }
 0xd47   : > { %3990 = vmatpush3.bf16.msra.mxu1 %v4305_v38  ;;  %4012 = vmatpush3.bf16.msra.mxu0 %v4306_v39  ;;  %v2133_v38 = vpack.c.bf16 %v2117_v36, %v2117_v36  ;;  %v4344_v39 = vld [vmem:[%s4621_s8 + $0x3f0] sm:$0xff]  }
 0xd48   : > { %4019 = vmatprep.subr.bf16.mxu1 %v4307_v26  ;;  %4041 = vmatprep.subr.bf16.mxu0 %v4308_v46  ;;  %v4346_v26 = vld [vmem:[%s4621_s8 + $0x3b0] sm:$0xff]   ;;  %v4347_v46 = vld [vmem:[%s4621_s8 + $0x368] sm:$0xff]  }
 0xd4a   : > { %3280 = vmatmul.mubr.bf16.vlgmr.msra.gmra.mxu1 %v2124_v49  ;;  %3320 = vmatmul.mubr.bf16.vlgmr.msra.gmra.mxu0 %v2126_v50  ;;  %v4351_v49 = vld [vmem:[%s4621_s8 + $0x360] sm:$0xff]  }
 0xd4b   : > { %4020 = vmatpush3.bf16.msra.mxu1 %v4309_v48  ;;  %3359 = vmatprep.mubr.bf16.mxu1 %v2129_v62  ;;  %v4350_v48 = vld [vmem:[%s4621_s8 + $0x3a8] sm:$0xff]   ;;  %v4352_v50 = vld [vmem:[%s4621_s8 + $0x3e0] sm:$0xff]  }
 0xd4c   : > { %4042 = vmatpush3.bf16.msra.mxu0 %v4310_v61  ;;  %3399 = vmatprep.mubr.bf16.mxu0 %v2131_v1  ;;  %v4353_v61 = vld [vmem:[%s4621_s8 + $0x320] sm:$0xff]   ;;  %v4357_v1 = vld [vmem:[%s4621_s8 + $0x318] sm:$0xff]  }
 0xd4d   : > { %4021 = vmatprep.subr.bf16.mxu1 %v4311_v63  ;;  %4043 = vmatprep.subr.bf16.mxu0 %v4312_v0  ;;  %v4354_v62 = vld [vmem:[%s4621_s8 + $0x3a0] sm:$0xff]   ;;  %v4355_v63 = vld [vmem:[%s4621_s8 + $0x358] sm:$0xff]  }
 0xd4e   : > { %v4356_v0 = vld [vmem:[%s4621_s8 + $0x3d8] sm:$0xff]  }
 0xd4f   : > { %4022 = vmatpush3.bf16.msra.mxu1 %v4313_v2  ;;  %v4358_v2 = vld [vmem:[%s4621_s8 + $0x398] sm:$0xff]  }
 0xd50   : > { %4044 = vmatpush3.bf16.msra.mxu0 %v4314_v3  ;;  %4023 = vmatprep.subr.bf16.mxu1 %v4315_v4  ;;  %v4359_v3 = vld [vmem:[%s4621_s8 + $0x350] sm:$0xff]  }
 0xd51   : > { %4045 = vmatprep.subr.bf16.mxu0 %v4316_v5  ;;  %v4360_v4 = vld [vmem:[%s4621_s8 + $0x3d0] sm:$0xff]  }
 0xd52   : > { %v4361_v5 = vld [vmem:[%s4621_s8 + $0x310] sm:$0xff]  }
 0xd53   : > { %4024 = vmatpush3.bf16.msra.mxu1 %v4317_v6  ;;  %v4362_v6 = vld [vmem:[%s4621_s8 + $0x390] sm:$0xff]  }
 0xd54   : > { %4046 = vmatpush3.bf16.msra.mxu0 %v4318_v7  ;;  %4025 = vmatprep.subr.bf16.mxu1 %v4319_v8  ;;  %v4363_v7 = vld [vmem:[%s4621_s8 + $0x348] sm:$0xff]  }
 0xd55   : > { %4047 = vmatprep.subr.bf16.mxu0 %v4320_v12  ;;  %v4364_v8 = vld [vmem:[%s4621_s8 + $0x3c8] sm:$0xff]  }
 0xd56   : > { %v4365_v12 = vld [vmem:[%s4621_s8 + $0x308] sm:$0xff]  }
 0xd57   : > { %4026 = vmatpush3.bf16.msra.mxu1 %v4321_v13  ;;  %v4366_v13 = vld [vmem:[%s4621_s8 + $0x388] sm:$0xff]  }
 0xd58   : > { %4048 = vmatpush3.bf16.msra.mxu0 %v4322_v14  ;;  %4027 = vmatprep.subr.bf16.mxu1 %v4323_v15  ;;  %v4367_v14 = vld [vmem:[%s4621_s8 + $0x340] sm:$0xff]  }
 0xd59   : > { %4049 = vmatprep.subr.bf16.mxu0 %v4324_v16  ;;  %v4368_v15 = vld [vmem:[%s4621_s8 + $0x3c0] sm:$0xff]  }
 0xd5a   : > { %v4369_v16 = vld [vmem:[%s4621_s8 + $0x300] sm:$0xff]  }
 0xd5b   : > { %4028 = vmatpush3.bf16.msra.mxu1 %v4325_v17  ;;  %v2116_v17 = vmax.f32 %v4947_v20, 0.0 }
 0xd5c   : > { %4050 = vmatpush3.bf16.msra.mxu0 %v4326_v18  ;;  %4029 = vmatprep.subr.bf16.mxu1 %v4327_v19  ;;  %v4370_v18 = vld [vmem:[%s4621_s8 + $0x380] sm:$0xff]   ;;  %v2118_v19 = vmax.f32 %v4950_v21, 0.0  ;;  %s5141_s8 = sld [smem:[#allocation3_spill]] }
 0xd5d   : > { %4051 = vmatprep.subr.bf16.mxu0 %v4328_v42  ;;  %v2132_v42 = vpack.c.bf16 %v2116_v17, %v2116_v17 }
 0xd5f   : > { %4030 = vmatpush3.bf16.msra.mxu1 %v4329_v24  ;;  %v2134_v24 = vpack.c.bf16 %v2118_v19, %v2118_v19 }
 0xd60   : > { %4052 = vmatpush3.bf16.msra.mxu0 %v4330_v9  ;;  %4031 = vmatprep.subr.bf16.mxu1 %v4331_v27  ;;  %v3768_v27 = vld [vmem:[%s679_s12] ss:$0 sm:$0xff] }
 0xd61   : > { %4053 = vmatprep.subr.bf16.mxu0 %v4332_v56 }
 0xd62   : > { %p3897_p8 = scmp.ne.s32.totalorder %s5141_s8, 1 }
 0xd63   : > { %4032 = vmatpush3.bf16.msra.mxu1 %v4333_v31 }
 0xd64   : > { %4054 = vmatpush3.bf16.msra.mxu0 %v4334_v57  ;;  %4033 = vmatprep.subr.bf16.mxu1 %v4335_v33 }
 0xd65   : > { %4055 = vmatprep.subr.bf16.mxu0 %v4336_v53 }
 0xd67   : > { %4034 = vmatpush3.bf16.msra.mxu1 %v4337_v10 }
 0xd68   : > { %4056 = vmatpush3.bf16.msra.mxu0 %v4338_v51  ;;  %4063 = vmatprep.subr.bf16.mxu1 %v4339_v58 }
 0xd69   : > { %4085 = vmatprep.subr.bf16.mxu0 %v4340_v52 }
 0xd6a   : > { %3360 = vmatmul.mubr.bf16.vlgmr.msra.gmra.mxu1 %v2128_v37 }
 0xd6b   : > { %3400 = vmatmul.mubr.bf16.vlgmr.msra.gmra.mxu0 %v2130_v30  ;;  %4064 = vmatpush3.bf16.msra.mxu1 %v4341_v22 }
 0xd6c   : > { %3439 = vmatprep.mubr.bf16.mxu1 %v2133_v38  ;;  %4086 = vmatpush3.bf16.msra.mxu0 %v4342_v23 }
 0xd6d   : > { %3479 = vmatprep.mubr.bf16.mxu0 %v2135_v43  ;;  %4065 = vmatprep.subr.bf16.mxu1 %v4343_v60 }
 0xd6e   : > { %4087 = vmatprep.subr.bf16.mxu0 %v4344_v39 }
 0xd6f   : > { %4066 = vmatpush3.bf16.msra.mxu1 %v4345_v44 }
 0xd70   : > { %4088 = vmatpush3.bf16.msra.mxu0 %v4346_v26  ;;  %4067 = vmatprep.subr.bf16.mxu1 %v4347_v46 }
 0xd71   : > { %4089 = vmatprep.subr.bf16.mxu0 %v4348_v45 }
 0xd73   : > { %4068 = vmatpush3.bf16.msra.mxu1 %v4349_v47 }
 0xd74   : > { %4090 = vmatpush3.bf16.msra.mxu0 %v4350_v48  ;;  %4069 = vmatprep.subr.bf16.mxu1 %v4351_v49 }
 0xd75   : > { %4091 = vmatprep.subr.bf16.mxu0 %v4352_v50 }
 0xd77   : > { %4070 = vmatpush3.bf16.msra.mxu1 %v4353_v61 }
 0xd78   : > { %4092 = vmatpush3.bf16.msra.mxu0 %v4354_v62  ;;  %4071 = vmatprep.subr.bf16.mxu1 %v4355_v63 }
 0xd79   : > { %4093 = vmatprep.subr.bf16.mxu0 %v4356_v0 }
 0xd7b   : > { %4072 = vmatpush3.bf16.msra.mxu1 %v4357_v1 }
 0xd7c   : > { %4094 = vmatpush3.bf16.msra.mxu0 %v4358_v2  ;;  %4073 = vmatprep.subr.bf16.mxu1 %v4359_v3 }
 0xd7d   : > { %4095 = vmatprep.subr.bf16.mxu0 %v4360_v4 }
 0xd7f   : > { %4074 = vmatpush3.bf16.msra.mxu1 %v4361_v5 }
 0xd80   : > { %4096 = vmatpush3.bf16.msra.mxu0 %v4362_v6  ;;  %4075 = vmatprep.subr.bf16.mxu1 %v4363_v7 }
 0xd81   : > { %4097 = vmatprep.subr.bf16.mxu0 %v4364_v8 }
 0xd83   : > { %4076 = vmatpush3.bf16.msra.mxu1 %v4365_v12 }
 0xd84   : > { %4098 = vmatpush3.bf16.msra.mxu0 %v4366_v13  ;;  %4077 = vmatprep.subr.bf16.mxu1 %v4367_v14 }
 0xd85   : > { %4099 = vmatprep.subr.bf16.mxu0 %v4368_v15 }
 0xd87   : > { %4078 = vmatpush3.bf16.msra.mxu1 %v4369_v16 }
 0xd88   : > { %4100 = vmatpush3.bf16.msra.mxu0 %v4370_v18 }
 0xd8a   : > { %3440 = vmatmul.mubr.bf16.vlgmr.msra.gmra.mxu1 %v2132_v42 }
 0xd8b   : > { %3480 = vmatmul.mubr.bf16.vlgmr.msra.gmra.mxu0 %v2134_v24 }
 0xdea   : > { %v3947_v25 = vpop.f32.mrf.mxu1  ;;  %v3969_v9 = vpop.f32.mrf.mxu0 }
 0xdec   : > { %v3948_v20 = vpop.f32.mrf.mxu1  ;;  %v3970_v28 = vpop.f32.mrf.mxu0 }
 0xded   : > { %v3949_v56 = vadd.f32 %v3948_v20, %v3947_v25  ;;  %v3971_v29 = vadd.f32 %v3970_v28, %v3969_v9 }
 0xdee   : > { %v3950_v41 = vpop.f32.mrf.mxu1  ;;  %v3972_v21 = vpop.f32.mrf.mxu0 }
 0xdef   : > { %v3202_v31 = vadd.f32 %v3949_v56, %v3768_v27 }
 0xdf0   : > { %v3951_v32 = vpop.f32.mrf.mxu1  ;;  %v3973_v57 = vpop.f32.mrf.mxu0 }
 0xdf1   : > { %v3242_v33 = vadd.f32 %v3971_v29, %v3202_v31 }
 0xe0a   : > { %v3991_v34 = vpop.f32.mrf.mxu1  ;;  %v4013_v53 = vpop.f32.mrf.mxu0 }
 0xe0c   : > { %v3992_v40 = vpop.f32.mrf.mxu1  ;;  %v4014_v55 = vpop.f32.mrf.mxu0 }
 0xe0d   : > { %v3993_v60 = vadd.f32 %v3992_v40, %v3991_v34  ;;  %v4015_v39 = vadd.f32 %v4014_v55, %v4013_v53 }
 0xe0e   : > { %v3994_v10 = vpop.f32.mrf.mxu1  ;;  %v4016_v11 = vpop.f32.mrf.mxu0 }
 0xe0f   : > { %v3282_v38 = vadd.f32 %v3993_v60, %v3242_v33 }
 0xe10   : > { %v3995_v51 = vpop.f32.mrf.mxu1  ;;  %v4017_v58 = vpop.f32.mrf.mxu0 }
 0xe11   : > { %v3322_v44 = vadd.f32 %v4015_v39, %v3282_v38 }
 0xe2a   : > { %v4035_v35 = vpop.f32.mrf.mxu1 }
 0xe2b   : > { %v4057_v52 = vpop.f32.mrf.mxu0 }
 0xe2c   : > { %v4036_v36 = vpop.f32.mrf.mxu1 }
 0xe2d   : > { %v4058_v59 = vpop.f32.mrf.mxu0  ;;  %v4037_v43 = vadd.f32 %v4036_v36, %v4035_v35 }
 0xe2e   : > { %v4038_v22 = vpop.f32.mrf.mxu1  ;;  %v4059_v45 = vadd.f32 %v4058_v59, %v4057_v52 }
 0xe2f   : > { %v4060_v37 = vpop.f32.mrf.mxu0  ;;  %v3362_v26 = vadd.f32 %v4037_v43, %v3322_v44 }
 0xe30   : > { %v4039_v23 = vpop.f32.mrf.mxu1 }
 0xe31   : > { %v4061_v30 = vpop.f32.mrf.mxu0  ;;  %v3402_v49 = vadd.f32 %v4059_v45, %v3362_v26 }
 0xe4a   : > { %v4079_v46 = vpop.f32.mrf.mxu1 }
 0xe4b   : > { %v4101_v47 = vpop.f32.mrf.mxu0 }
 0xe4c   : > { %v4080_v48 = vpop.f32.mrf.mxu1 }
 0xe4d   : > { %v4081_v50 = vadd.f32 %v4080_v48, %v4079_v46  ;;  %v4102_v61 = vpop.f32.mrf.mxu0 }
 0xe4e   : > { %v4082_v62 = vpop.f32.mrf.mxu1  ;;  %v4103_v0 = vadd.f32 %v4102_v61, %v4101_v47 }
 0xe4f   : > { %v3442_v63 = vadd.f32 %v4081_v50, %v3402_v49  ;;  %v4104_v1 = vpop.f32.mrf.mxu0 }
 0xe50   : > { %v4083_v2 = vpop.f32.mrf.mxu1 }
 0xe51   : > { %v3482_v3 = vadd.f32 %v4103_v0, %v3442_v63  ;;  %v4105_v4 = vpop.f32.mrf.mxu0  ;;  %3492 = sbr.rel (%p3897_p8) target bundleno = 3671 (0xe57), region = 84 }
 0xe53   : > { %v3487_v5 = vadd.f32 %v3482_v3, %v4777_v54 }
 0xe55   : > { %3488 = vst.msk [vmem:[#allocation2] sm:$0xff] %vm697_vm1, %v3487_v5 }
 0xe56   : > { %3493 = vst.msk [vmem:[%s4630_s24] sm:$0xff] %vm697_vm1, %v3487_v5 }
 0xe57 PF: > { %s5142_s20 = sld [smem:[#allocation6_spill]] }
 0xe58   : > { %s5143_s29 = sld [smem:[#allocation4_spill]] }
 0xe59   : > { %s5144_s30 = sld [smem:[#allocation5_spill]] }
 0xe5a   : > { %s5145_s15 = sld [smem:[#allocation7_spill]] }
 0xe5b   : > { %s5146_s16 = sld [smem:[#allocation8_spill]] }
 0xe5d   : > { %s24_s17 = sadd.s32 1, %s5142_s20  }
 0xe5e   : > { %p21_p9 = scmp.ge.s32.totalorder %s24_s17, 6  }
 0xe60   :  { %23 = sbr.rel (!%p21_p9) target bundleno = 10 (0xa), region = 153 }

// kernel: rewritter_forward.3
= control target key start
LH: loop header
LB: loop body
LE: loop exit
PB: predicated region body
PF: predicated region fallthrough
CT: control target
= control target key end

     0   :  { %s8552_s6 = smov 1   ;;  %s8553_s10 = smov 2   ;;  %s9884_s0 = inlined_call_operand.smem [shape: u32[35], index: -1, kind: input, shape index: {}] }
   0x1   :  { %s8616_s5 = sld [smem:[%s9884_s0]]   ;;  %s8554_s14 = smov 3  }
   0x2   :  { %s8621_s9 = sld [smem:[%s9884_s0 + %s8552_s6]]   ;;  %s8555_s18 = smov 4  }
   0x3   :  { %s8626_s13 = sld [smem:[%s9884_s0 + %s8553_s10]]   ;;  %s8556_s22 = smov 5  }
   0x4   :  { %s8631_s17 = sld [smem:[%s9884_s0 + %s8554_s14]]   ;;  %s8557_s26 = smov 6  }
   0x5   :  { %s8636_s21 = sld [smem:[%s9884_s0 + %s8555_s18]]   ;;  %s8558_s30 = smov 7  }
   0x6   :  { %s8641_s25 = sld [smem:[%s9884_s0 + %s8556_s22]]   ;;  %s8559_s4 = smov 8  }
   0x7   :  { %9908 = sst [smem:[#allocation6_spill]] %s8616_s5  ;;  %s8560_s10 = smov 9  }
   0x8   :  { %9909 = sst [smem:[#allocation7_spill]] %s8621_s9  ;;  %s8561_s15 = smov 10  }
   0x9   :  { %9910 = sst [smem:[#allocation8_spill]] %s8626_s13  ;;  %s8562_s20 = smov 11  }
   0xa   :  { %9911 = sst [smem:[#allocation9_spill]] %s8631_s17  ;;  %s8564_s1 = smov 13  }
   0xb   :  { %9912 = sst [smem:[#allocation10_spill]] %s8636_s21  ;;  %s8565_s7 = smov 14  }
   0xc   :  { %9913 = sst [smem:[#allocation11_spill]] %s8641_s25  ;;  %s8567_s22 = smov 16  }
   0xd   :  { %s8646_s29 = sld [smem:[%s9884_s0 + %s8557_s26]]   ;;  %s8563_s26 = smov 12  }
   0xe   :  { %s8651_s3 = sld [smem:[%s9884_s0 + %s8558_s30]]   ;;  %s8568_s28 = smov 17  }
   0xf   :  { %s8656_s8 = sld [smem:[%s9884_s0 + %s8559_s4]]  }
  0x10   :  { %s8661_s14 = sld [smem:[%s9884_s0 + %s8560_s10]]  }
  0x11   :  { %s8666_s19 = sld [smem:[%s9884_s0 + %s8561_s15]]   ;;  %s8566_s15 = smov 15  }
  0x12   :  { %s8671_s24 = sld [smem:[%s9884_s0 + %s8562_s20]]  }
  0x13   :  { %9914 = sst [smem:[#allocation12_spill]] %s8646_s29 }
  0x14   :  { %9915 = sst [smem:[#allocation13_spill]] %s8651_s3 }
  0x15   :  { %9916 = sst [smem:[#allocation14_spill]] %s8656_s8 }
  0x16   :  { %9917 = sst [smem:[#allocation15_spill]] %s8661_s14 }
  0x17   :  { %9918 = sst [smem:[#allocation16_spill]] %s8666_s19 }
  0x18   :  { %9919 = sst [smem:[#allocation17_spill]] %s8671_s24 }
  0x19   :  { %s8676_s30 = sld [smem:[%s9884_s0 + %s8563_s26]]  }
  0x1a   :  { %s8681_s6 = sld [smem:[%s9884_s0 + %s8564_s1]]  }
  0x1b   :  { %s8686_s12 = sld [smem:[%s9884_s0 + %s8565_s7]]   ;;  %s8569_s7 = smov 18  }
  0x1c   :  { %s8691_s20 = sld [smem:[%s9884_s0 + %s8566_s15]]   ;;  %s8570_s15 = smov 19  }
  0x1d   :  { %s8696_s27 = sld [smem:[%s9884_s0 + %s8567_s22]]   ;;  %s8571_s22 = smov 20  }
  0x1e   :  { %s8701_s4 = sld [smem:[%s9884_s0 + %s8568_s28]]   ;;  %s8572_s28 = smov 21  }
  0x1f   :  { %9920 = sst [smem:[#allocation18_spill]] %s8676_s30 }
  0x20   :  { %9921 = sst [smem:[#allocation19_spill]] %s8681_s6 }
  0x21   :  { %9922 = sst [smem:[#allocation20_spill]] %s8686_s12 }
  0x22   :  { %9923 = sst [smem:[#allocation21_spill]] %s8691_s20 }
  0x23   :  { %9924 = sst [smem:[#allocation22_spill]] %s8696_s27 }
  0x24   :  { %9925 = sst [smem:[#allocation23_spill]] %s8701_s4 }
  0x25   :  { %s8706_s12 = sld [smem:[%s9884_s0 + %s8569_s7]]   ;;  %s8573_s7 = smov 22  }
  0x26   :  { %s8711_s20 = sld [smem:[%s9884_s0 + %s8570_s15]]   ;;  %s8574_s15 = smov 23  }
  0x27   :  { %s8716_s27 = sld [smem:[%s9884_s0 + %s8571_s22]]   ;;  %s8575_s22 = smov 24  }
  0x28   :  { %s8721_s4 = sld [smem:[%s9884_s0 + %s8572_s28]]   ;;  %s8576_s28 = smov 25  }
  0x2b   :  { %9926 = sst [smem:[#allocation24_spill]] %s8706_s12 }
  0x2c   :  { %9927 = sst [smem:[#allocation25_spill]] %s8711_s20 }
  0x2d   :  { %9928 = sst [smem:[#allocation26_spill]] %s8716_s27 }
  0x2e   :  { %9929 = sst [smem:[#allocation27_spill]] %s8721_s4 }
  0x2f   :  { %s8726_s12 = sld [smem:[%s9884_s0 + %s8573_s7]]   ;;  %s8577_s7 = smov 26  }
  0x30   :  { %s8731_s20 = sld [smem:[%s9884_s0 + %s8574_s15]]   ;;  %s8578_s15 = smov 27  }
  0x31   :  { %s8736_s27 = sld [smem:[%s9884_s0 + %s8575_s22]]   ;;  %s8579_s22 = smov 28  }
  0x32   :  { %s8741_s4 = sld [smem:[%s9884_s0 + %s8576_s28]]   ;;  %s8580_s28 = smov 29  }
  0x35   :  { %9930 = sst [smem:[#allocation28_spill]] %s8726_s12 }
  0x36   :  { %9931 = sst [smem:[#allocation29_spill]] %s8731_s20 }
  0x37   :  { %9932 = sst [smem:[#allocation30_spill]] %s8736_s27 }
  0x38   :  { %9933 = sst [smem:[#allocation31_spill]] %s8741_s4 }
  0x39   :  { %s8746_s12 = sld [smem:[%s9884_s0 + %s8577_s7]]   ;;  %s8581_s7 = smov 30  }
  0x3a   :  { %s8751_s20 = sld [smem:[%s9884_s0 + %s8578_s15]]   ;;  %s8582_s15 = smov 31  }
  0x3b   :  { %s8756_s27 = sld [smem:[%s9884_s0 + %s8579_s22]]   ;;  %s8583_s22 = smov 32  }
  0x3c   :  { %s8761_s4 = sld [smem:[%s9884_s0 + %s8580_s28]]   ;;  %s8584_s28 = smov 33  }
  0x3f   :  { %9934 = sst [smem:[#allocation32_spill]] %s8746_s12 }
  0x40   :  { %9935 = sst [smem:[#allocation33_spill]] %s8751_s20 }
  0x41   :  { %9936 = sst [smem:[#allocation34_spill]] %s8756_s27 }
  0x42   :  { %9937 = sst [smem:[#allocation35_spill]] %s8761_s4 }
  0x43   :  { %s8766_s12 = sld [smem:[%s9884_s0 + %s8581_s7]]   ;;  %s8585_s7 = smov 34  }
  0x44   :  { %s8771_s20 = sld [smem:[%s9884_s0 + %s8582_s15]]  }
  0x45   :  { %s8776_s27 = sld [smem:[%s9884_s0 + %s8583_s22]]  }
  0x46   :  { %s8781_s4 = sld [smem:[%s9884_s0 + %s8584_s28]]  }
  0x49   :  { %9938 = sst [smem:[#allocation36_spill]] %s8766_s12 }
  0x4a   :  { %9939 = sst [smem:[#allocation37_spill]] %s8771_s20 }
  0x4b   :  { %9940 = sst [smem:[#allocation38_spill]] %s8776_s27 }
  0x4c   :  { %9941 = sst [smem:[#allocation39_spill]] %s8781_s4 }
  0x4d   :  { %s8786_s12 = sld [smem:[%s9884_s0 + %s8585_s7]]  }
  0x53   :  { %9942 = sst [smem:[#allocation40_spill]] %s8786_s12 }
  0x54   :  { %74 = vsyncpa [#allocation4], 0 }
  0x55   :  { %76 = vsyncpa [#allocation4 + $0x1], 0  ;;  %s8788_s15 = smov 0   ;;  %s8790_s16 = smov 0  }
  0x56   :  { %s8792_s18 = smov 0   ;;  %s8794_s22 = smov 0  }
  0x57   :  { %s8796_s23 = smov 0   ;;  %s8798_s26 = smov 0  }
  0x58   :  { %s8800_s28 = smov 0   ;;  %s8802_s1 = smov 0  }
  0x59 LB: > { %9943 = sst [smem:[#allocation41_spill]] %s8522_s15  ;;  %s7249_s0 = sadd.s32 4294967295, %s8550_s1   ;;  %s8550_s1 = sphi %s8802_s1, %s82_s1   ;;  %s8546_s28 = sphi %s8800_s28, %s10063_s28   ;;  %s8542_s26 = sphi %s8798_s26, %s10062_s26   ;;  %s8538_s23 = sphi %s8796_s23, %s10061_s23   ;;  %s8534_s22 = sphi %s8794_s22, %s10060_s22   ;;  %s8530_s18 = sphi %s8792_s18, %s10059_s18   ;;  %s8526_s16 = sphi %s8790_s16, %s10058_s16   ;;  %s8522_s15 = sphi %s8788_s15, %s10057_s15  }
  0x5a   : > { %9944 = sst [smem:[#allocation42_spill]] %s8526_s16  ;;  %s7250_s2 = sadd.s32 4294967294, %s8550_s1  }
  0x5b   : > { %9945 = sst [smem:[#allocation43_spill]] %s8530_s18  ;;  %s91_s7 = sadd.s32 1, %s8542_s26 }
  0x5c   : > { %9946 = sst [smem:[#allocation44_spill]] %s8534_s22  ;;  %p92_p0 = scmp.ge.s32.totalorder %s91_s7, 2 }
  0x5d   : > { %9947 = sst [smem:[#allocation45_spill]] %s8538_s23  ;;  %s94_s10 = sadd.s32 1, %s8546_s28 }
  0x5e   : > { %9948 = sst [smem:[#allocation46_spill]] %s8542_s26  ;;  %p980_p1 = scmp.ne.s32.totalorder %s8530_s18, %s8526_s16 }
  0x5f   : > { %9949 = sst [smem:[#allocation47_spill]] %s8546_s28  ;;  %p981_p2 = scmp.eq.s32.totalorder %s7249_s0, 3 }
  0x60   : > { %9950 = sst [smem:[#allocation48_spill]] %s8550_s1  ;;  %s10065_s7 = smov (%p92_p0, %s91_s7), 0 }
  0x61   : > { %9951 = sst [smem:[#allocation49_spill]] %s10065_s7  ;;  %s10067_s10 = smov (!%p92_p0, %s94_s10), %s8546_s28 }
  0x62   : > { %p8837_p3 = por %p981_p2, %p980_p1  ;;  %p986_p4 = scmp.ne.s32.totalorder %s8526_s16, %s8522_s15 }
  0x63   : > { %p96_p5 = scmp.ge.s32.totalorder %s10067_s10, 2  ;;  %p987_p6 = scmp.eq.s32.totalorder %s7250_s2, 3 }
  0x64   : > { %s9952_s11 = scalar_select %p8837_p3, 1, 0 }
  0x65   : > { %p7253_p7 = scmp.ge.s32.totalorder %s8550_s1, 1  ;;  %p1223_p8 = scmp.lt.s32.totalorder %s8550_s1, 5 }
  0x66   : > { %9953 = sst [smem:[#allocation50_spill]] %s9952_s11  ;;  %s10069_s10 = smov (%p96_p5, %s10067_s10), 0 }
  0x67   : > { %9954 = sst [smem:[#allocation51_spill]] %s10069_s10  ;;  %p8847_p9 = por %p987_p6, %p986_p4 }
  0x68   : > { %p1224_p10 = pnand %p7253_p7, %p1223_p8  ;;  %s967_s0 = ssub.s32 %s8546_s28, %s10069_s10 }
  0x69   : > { %s9955_s26 = scalar_select %p8847_p9, 1, 0 }
  0x6a   : > { %s970_s7 = sadd.s32 1, %s8530_s18  ;;  %p968_p11 = scmp.eq.s32.totalorder %s967_s0, 0 }
  0x6b   : > { %9956 = sst [smem:[#allocation52_spill]] %s9955_s26  ;;  %1227 = sbr.rel (%p1224_p10) target bundleno = 8940 (0x22ec), region = 156 }
  0x6c   : > { %s8855_s12 = scalar_select %p968_p11, %s8530_s18, %s970_s7  }
  0x6e   : > { %9957 = sst [smem:[#allocation53_spill]] %s8855_s12 }
  0x70   : > { %s9888_s2 = sand.u32 1, %s8526_s16   ;;  %p1420_p12 = scmp.lt.s32.totalorder %s8538_s23, 1 }
  0x71   : > { %s8861_s7 = sshll.u32 %s9888_s2, 3  ;;  %p1442_p13 = scmp.lt.s32.totalorder %s8534_s22, 1 }
  0x72   : > { %9969 = sst [smem:[#allocation54_spill]] %s8861_s7 }
  0x73   : > { %s8865_s0 = scalar_select %p1420_p12, %s8538_s23, 1 }
  0x74   : > { %s8868_s10 = scalar_select %p1442_p13, %s8534_s22, 1 }
  0x75   : > { %9972 = sst [smem:[#allocation55_spill]] %s8865_s0  ;;  %s8871_s2 = sshll.u32 %s8865_s0, 3 }
  0x76   : > { %9974 = sst [smem:[#allocation56_spill]] %s8871_s2  ;;  %s7560_s7 = sshll.u32 %s8868_s10, 4 }
  0x77   : > { %s9975_s12 = sld [smem:[#allocation20_spill]]  ;;  %s7566_s26 = sshll.u32 %s8868_s10, 8 }
  0x78   : > { %s9977_s15 = sld [smem:[#allocation22_spill]]  ;;  %s7568_s11 = sshll.u32 %s8868_s10, 10 }
  0x79   : > { %s9979_s23 = sld [smem:[#allocation24_spill]] }
  0x7a   : > { %s9980_s20 = sld [smem:[#allocation25_spill]] }
  0x7b   : > { %s9981_s22 = sld [smem:[#allocation26_spill]] }
  0x7c   : > { %s9982_s13 = sld [smem:[#allocation27_spill]] }
  0x7d   : > { %s9983_s5 = sld [smem:[#allocation28_spill]]  ;;  %s8903_s3 = scalar_lea.vmem %s9975_s12, %s7560_s7 }
  0x7e   : > { %s9984_s1 = sld [smem:[#allocation29_spill]]  ;;  %s8908_s8 = scalar_lea.vmem %s9977_s15, %s7560_s7 }
  0x7f   : > { %s9985_s16 = sld [smem:[#allocation30_spill]]  ;;  %s8913_s14 = scalar_lea.vmem %s9979_s23, %s7560_s7 }
  0x80   : > { %s9986_s0 = sld [smem:[#allocation31_spill]]  ;;  %s1489_s4 = scalar_lea.vmem %s9980_s20, %s8868_s10 }
  0x81   : > { %s9987_s2 = sld [smem:[#allocation34_spill]]  ;;  %s8918_s21 = scalar_lea.vmem %s9981_s22, %s7560_s7 }
  0x82   : > { %s9988_s27 = sld [smem:[#allocation32_spill]]  ;;  %s1497_s25 = scalar_lea.vmem %s9982_s13, %s8868_s10 }
  0x83   : > { %s9989_s29 = sld [smem:[#allocation33_spill]]  ;;  %s8923_s24 = scalar_lea.vmem %s9983_s5, %s7560_s7 }
  0x84   : > { %s9990_s18 = sld [smem:[#allocation36_spill]]  ;;  %s1505_s6 = scalar_lea.vmem %s9984_s1, %s8868_s10 }
  0x85   : > { %9991 = sst [smem:[#allocation57_spill]] %s8908_s8  ;;  %s8928_s12 = scalar_lea.vmem %s9985_s16, %s7560_s7 }
  0x86   : > { %s9992_s9 = sld [smem:[#allocation35_spill]]  ;;  %s1513_s30 = scalar_lea.vmem %s9986_s0, %s8868_s10 }
  0x87   : > { %s9993_s19 = sld [smem:[#allocation54_spill]]  ;;  %s8934_s28 = scalar_lea.vmem %s9987_s2, %s7560_s7 }
  0x88   : > { %s8937_s15 = scalar_lea.vmem %s9988_s27, %s7566_s26  ;;  %s9994_s22 = sld [smem:[#allocation44_spill]] }
  0x89   : > { %s8940_s8 = scalar_lea.vmem %s9989_s29, %s7566_s26 }
  0x8a   : > { %s1535_s23 = scalar_lea.vmem %s9990_s18, %s8868_s10 }
  0x8c   : > { %s8946_s17 = scalar_lea.vmem %s9992_s9, %s7568_s11 }
  0x8d   : > { %s1419_s20 = scalar_lea.vmem [#allocation3], %s9993_s19 }
  0x8e   : > { %p7278_p0 = scmp.ne.s32.totalorder %s9994_s22, 0 }
  0x8f   : > { %s9995_s5 = sld [smem:[#allocation6_spill]] (!%p7278_p0) }
  0x90   : > { %1540 = sbr.rel (%p7278_p0) target bundleno = 153 (0x99), region = 160  ;;  %s9996_s13 = sld [smem:[#allocation56_spill]] (!%p7278_p0) }
  0x95   : > { %vm1542_vm0 = vcmask 261120  }
  0x96   : > { %s9997_s16 = scalar_lea.vmem %s9995_s5, %s9996_s13 }
  0x97   : > { %v1541_v0 = vld [vmem:[%s9997_s16] sm:$0xff] }
  0x98   : > { %1543 = vst.msk [vmem:[#allocation2] sm:$0xff] %vm1542_vm0, %v1541_v0 }
  0x99 PF: > { %vm1551_vm1 = vcmask 261120   ;;  %v8254_v8 = vld [vmem:[%s8903_s3 + $0x8] sm:$0xff]   ;;  %v8586_v9 = vmov 0.0   ;;  %vm8587_vm2 = vmmov 0   ;;  %v8255_v10 = vld [vmem:[%s8903_s3] sm:$0xff]   ;;  %s9998_s9 = sld [smem:[#allocation12_spill]] }
  0x9a   : > { %7845 = vmatprep.subr.bf16.mxu0 %v8586_v9  ;;  %7849 = vmatprep.mubr.msk.bf16.mxu0 %vm8587_vm2, %v8586_v9  ;;  %s9999_s29 = sld [smem:[#allocation13_spill]]  ;;  %s8588_s1 = smov 120   ;;  %vm1665_vm5 = vcmask 64512   ;;  %vm1731_vm7 = vcmask 1043456  }
  0x9b   : > { %7846 = vmatpush3.bf16.msra.mxu0 %v8254_v8  ;;  %7853 = vmatprep.subr.bf16.mxu1 %v8586_v9  ;;  %s10000_s3 = sld [smem:[#allocation21_spill]]  ;;  %s8589_s2 = smov 96  }
  0x9c   : > { %7847 = vmatprep.subr.bf16.mxu0 %v8586_v9  ;;  %7855 = vmatprep.mubr.msk.bf16.mxu1 %vm8587_vm2, %v8586_v9  ;;  %s8590_s7 = smov 88   ;;  %s10004_s0 = sld [smem:[#allocation9_spill]] }
  0x9d   : > { %s10005_s26 = sld [smem:[#allocation56_spill]]  ;;  %s8591_s22 = smov 56  }
  0x9e   : > { %s8592_s5 = smov 64   ;;  %s8593_s13 = smov 80  }
  0x9f   : > { %v1544_v1 = vld [vmem:[#allocation2] sm:$0xff]  ;;  %7848 = vmatpush3.bf16.msra.mxu0 %v8255_v10  ;;  %s10001_s19 = scalar_lea.vmem %s9998_s9, %s8868_s10  ;;  %s8594_s16 = smov 112  }
  0xa0   : > { %v1552_v2 = vsel %vm1551_vm1, %v1544_v1, 0.0  ;;  %7859 = vmatprep.subr.bf16.mxu0 %v8586_v9  ;;  %v7279_v19 = vld [vmem:[%s10001_s19] ss:$0 sm:$0xff]  ;;  %s10002_s27 = scalar_lea.vmem %s9999_s29, %s8868_s10  ;;  %s10007_s9 = sld [smem:[#allocation57_spill]] }
  0xa1   : > { %1553 = vadd.xlane.f32.xlu0 %v1552_v2  ;;  %v7280_v22 = vld [vmem:[%s10002_s27] ss:$0 sm:$0xff]  ;;  %s10003_s18 = scalar_lea.vmem %s10000_s3, %s8868_s10  ;;  %s8595_s29 = smov 48  }
  0xa2   : > { %v7281_v26 = vld [vmem:[%s10003_s18] ss:$0 sm:$0xff]  ;;  %s8596_s3 = smov 104   ;;  %s8597_s19 = smov 72  }
  0xa3   : > { %s10006_s11 = scalar_lea.vmem %s10004_s0, %s10005_s26  ;;  %s8598_s27 = smov 40  }
  0xa4   : > { %v8999_v38 = vld [vmem:[%s10006_s11] sm:$0xff]  ;;  %s10008_s18 = sld [smem:[#allocation23_spill]] }
  0xa5   : > { %vm1656_vm6 = vcmp.ne.s32.totalorder %v8999_v38, 0  ;;  %s10010_s11 = sld [smem:[#allocation7_spill]] }
  0xaa   : > { %s10009_s0 = scalar_lea.vmem %s10008_s18, %s8868_s10  ;;  %s10012_s18 = sld [smem:[#allocation14_spill]] }
 0x12a   : > { %v1554_v3 = vpop.xlane.xlu0 %1553 }
 0x12b   : > { %v1556_v4 = vmul.f32 0.03125, %v1554_v3 }
 0x12d   : > { %v1557_v5 = vsub.f32 %v1544_v1, %v1556_v4 }
 0x12f   : > { %v1558_v6 = vmul.f32 %v1557_v5, %v1557_v5  ;;  %v1570_v20 = vmul.f32 %v7279_v19, %v1557_v5 }
 0x131   : > { %v1559_v7 = vsel %vm1551_vm1, %v1558_v6, 0.0 }
 0x132   : > { %1560 = vadd.xlane.f32.xlu0 %v1559_v7 }
 0x1bb   : > { %v1561_v11 = vpop.xlane.xlu0 %1560 }
 0x1bc   : > { %v1563_v12 = vmul.f32 0.032258064, %v1561_v11 }
 0x1be   : > { %8388 = vrsqrt.f32 %v1563_v12  ;;  %vm1573_vm3 = vcmp.eq.f32.partialorder %v1563_v12, inf  ;;  %v1576_v15 = vand.u32 2147483648, %v1563_v12  ;;  %vm1575_vm4 = vcmp.eq.f32.partialorder %v1563_v12, 0.0 }
 0x1cb   : > { %v8389_v13 = vpop.eup %8388 }
 0x1cc   : > { %v1572_v14 = vmul.f32 %v8389_v13, %v1563_v12 }
 0x1ce   : > { %v1574_v16 = vsel %vm1573_vm3, %v1563_v12, %v1572_v14  ;;  %v1657_v12 = vld [vmem:[%s10007_s9] sm:$0xf]  ;;  %v1658_v14 = vld [vmem:[%s10007_s9 + $0x4] sm:$0xf] }
 0x1cf   : > { %v1577_v17 = vsel %vm1575_vm4, %v1576_v15, %v1574_v16  ;;  %v1939_v13 = vsel %vm1731_vm7, %v1657_v12, 0  ;;  %v1893_v15 = vsel %vm1731_vm7, %v1658_v14, 0 }
 0x1d0   : > { %v1578_v18 = vadd.f32 1e-06, %v1577_v17 }
 0x1d2   : > { %8390 = vrcp.f32 %v1578_v18 }
 0x1df   : > { %v8391_v21 = vpop.eup %8390 }
 0x1e0   : > { %v1580_v23 = vmul.f32 %v8391_v21, %v1570_v20 }
 0x1e2   : > { %v1587_v24 = vadd.f32 %v7280_v22, %v1580_v23 }
 0x1e4   : > { %v1588_v25 = vpack.c.bf16 %v1587_v24, %v1587_v24 }
 0x1e6   : > { %7850 = vmatmul.mubr.msk.bf16.vlgmr.msra.gmra.mxu0 %vm1551_vm1, %v1588_v25 }
 0x1e7   : > { %7861 = vmatprep.mubr.msk.bf16.mxu0 %vm8587_vm2, %v8586_v9 }
 0x2a6   : > { %v1649_v27 = vpop.f32.mrf.mxu0 }
 0x2a7   : > { %v1650_v28 = vadd.f32 %v7281_v26, %v1649_v27 }
 0x2a8   : > { %v7851_v29 = vpop.f32.mrf.mxu0 }
 0x2a9   : > { %v8977_v30 = vpack.c.bf16 %v1650_v28, %v1650_v28 }
 0x2aa   : > { %v1652_v31 = vpop.f32.mrf.mxu0 }
 0x2ab   : > { %1776 = vrot.lane.b32.xlu0 %v8977_v30, %s8588_s1  ;;  %1663 = vrot.lane.b32.xlu1 %v8977_v30, %s8589_s2 }
 0x2ac   : > { %v7852_v32 = vpop.f32.mrf.mxu0 }
 0x2af   : > { %1778 = vrot.lane.b32.xlu1 %v8977_v30, %s8590_s7 }
 0x31d   : > { %v1664_v33 = vpop.permute.xlu1 %1663  ;;  %v1777_v37 = vpop.permute.xlu0 %1776 }
 0x31e   : > { %v1670_v34 = vsel %vm1665_vm5, %v1664_v33, 0 }
 0x31f   : > { %7854 = vmatpush3.bf16.xpose.msra.mxu1 %v1670_v34 }
 0x320   : > { %7865 = vmatprep.subr.bf16.mxu1 %v8586_v9 }
 0x321   : > { %v1779_v35 = vpop.permute.xlu1 %1778 }
 0x322   : > { %v1784_v36 = vsel %vm1665_vm5, %v1779_v35, 0 }
 0x326   : > { %7856 = vmatmul.mubr.msk.bf16.vlgmr.msra.gmra.mxu1 %vm1665_vm5, %v8977_v30 }
 0x327   : > { %7866 = vmatpush3.bf16.xpose.msra.mxu1 %v1784_v36  ;;  %7867 = vmatprep.mubr.msk.bf16.mxu1 %vm8587_vm2, %v8586_v9 }
 0x328   : > { %7877 = vmatprep.subr.bf16.mxu1 %v8586_v9 }
 0x32e   : > { %7868 = vmatmul.mubr.msk.bf16.vlgmr.msra.gmra.mxu1 %vm1665_vm5, %v1777_v37 }
 0x32f   : > { %7879 = vmatprep.mubr.msk.bf16.mxu1 %vm8587_vm2, %v8586_v9  ;;  %7878 = vmatpush3.bf16.msra.mxu1 %v1893_v15 }
 0x330   : > { %7889 = vmatprep.subr.bf16.mxu1 %v8586_v9 }
 0x3e6   : > { %v1706_v39 = vpop.f32.mrf.mxu1 }
 0x3e7   : > { %v1712_v40 = vmul.f32 0.35355338, %v1706_v39 }
 0x3e8   : > { %v7857_v41 = vpop.f32.mrf.mxu1 }
 0x3e9   : > { %v1713_v42 = vsel %vm1656_vm6, %v1712_v40, -1e+09 }
 0x3ea   : > { %v1709_v43 = vpop.f32.mrf.mxu1  ;;  %v1714_v44 = vsel %vm1665_vm5, %v1713_v42, -inf }
 0x3eb   : > { %1715 = vmax.xlane.f32.xlu1 %v1714_v44 }
 0x3ec   : > { %v7858_v45 = vpop.f32.mrf.mxu1 }
 0x3ee   : > { %v1820_v46 = vpop.f32.mrf.mxu1 }
 0x3ef   : > { %v1826_v47 = vmul.f32 0.35355338, %v1820_v46 }
 0x3f0   : > { %v7869_v48 = vpop.f32.mrf.mxu1 }
 0x3f1   : > { %v1827_v49 = vsel %vm1656_vm6, %v1826_v47, -1e+09 }
 0x3f2   : > { %v1823_v50 = vpop.f32.mrf.mxu1  ;;  %v1828_v51 = vsel %vm1665_vm5, %v1827_v49, -inf }
 0x3f3   : > { %1829 = vmax.xlane.f32.xlu0 %v1828_v51 }
 0x3f4   : > { %v7870_v52 = vpop.f32.mrf.mxu1 }
 0x409   : > { %1840 = vrot.lane.b32.xlu0 %v8977_v30, %s8591_s22 }
 0x474   : > { %v1716_v53 = vpop.xlane.xlu1 %1715 }
 0x475   : > { %v1717_v54 = vsub.f32 %v1713_v42, %v1716_v53 }
 0x477   : > { %v1718_v55 = vmul.f32 1.442695, %v1717_v54 }
 0x479   : > { %8392 = vpow2.f32 %v1718_v55 }
 0x47c   : > { %v1830_v56 = vpop.xlane.xlu0 %1829 }
 0x47d   : > { %v1831_v57 = vsub.f32 %v1827_v49, %v1830_v56 }
 0x47f   : > { %v1832_v58 = vmul.f32 1.442695, %v1831_v57 }
 0x480   : > { %v1841_v5 = vpop.permute.xlu0 %1840 }
 0x481   : > { %8394 = vpow2.f32 %v1832_v58  ;;  %v1846_v7 = vsel %vm1731_vm7, %v1841_v5, 0 }
 0x486   : > { %v8393_v59 = vpop.eup %8392 }
 0x487   : > { %v1720_v60 = vsel %vm1665_vm5, %v8393_v59, 0.0 }
 0x488   : > { %1721 = vadd.xlane.f32.xlu1 %v1720_v60 }
 0x48e   : > { %v8395_v61 = vpop.eup %8394 }
 0x48f   : > { %v1834_v62 = vsel %vm1665_vm5, %v8395_v61, 0.0 }
 0x490   : > { %1835 = vadd.xlane.f32.xlu1 %v1834_v62 }
 0x4a1   : > { %1726 = vrot.lane.b32.xlu1 %v8977_v30, %s8592_s5 }
 0x4a5   : > { %1983 = vrot.lane.b32.xlu1 %v8977_v30, %s8593_s13 }
 0x4a9   : > { %1981 = vrot.lane.b32.xlu1 %v8977_v30, %s8594_s16 }
 0x511   : > { %v1722_v63 = vpop.xlane.xlu1 %1721 }
 0x512   : > { %8396 = vrcp.f32 %v1722_v63 }
 0x519   : > { %v1836_v0 = vpop.xlane.xlu1 %1835 }
 0x51a   : > { %8398 = vrcp.f32 %v1836_v0 }
 0x51d   : > { %v1727_v1 = vpop.permute.xlu1 %1726 }
 0x51e   : > { %v1733_v2 = vsel %vm1731_vm7, %v1727_v1, 0 }
 0x51f   : > { %v8397_v3 = vpop.eup %8396  ;;  %7860 = vmatpush3.bf16.msra.mxu0 %v1733_v2 }
 0x520   : > { %7871 = vmatprep.subr.bf16.mxu0 %v8586_v9  ;;  %v1724_v4 = vmul.f32 %v8397_v3, %v8393_v59 }
 0x521   : > { %v1984_v21 = vpop.permute.xlu1 %1983 }
 0x522   : > { %v1725_v6 = vpack.c.bf16 %v1724_v4, %v1724_v4  ;;  %v1989_v25 = vsel %vm1665_vm5, %v1984_v21, 0 }
 0x524   : > { %7862 = vmatmul.mubr.msk.bf16.vlgmr.msra.gmra.mxu0 %vm1665_vm5, %v1725_v6 }
 0x525   : > { %7872 = vmatpush3.bf16.msra.mxu0 %v1846_v7  ;;  %7873 = vmatprep.mubr.msk.bf16.mxu0 %vm8587_vm2, %v8586_v9  ;;  %v1982_v28 = vpop.permute.xlu1 %1981 }
 0x526   : > { %7883 = vmatprep.subr.bf16.mxu0 %v8586_v9 }
 0x527   : > { %v8399_v8 = vpop.eup %8398 }
 0x528   : > { %v1838_v10 = vmul.f32 %v8399_v8, %v8395_v61  ;;  %v1659_v61 = vld [vmem:[%s10007_s9 + $0x8] sm:$0xf] }
 0x529   : > { %v2098_v62 = vsel %vm1731_vm7, %v1659_v61, 0 }
 0x52a   : > { %v1839_v11 = vpack.c.bf16 %v1838_v10, %v1838_v10 }
 0x52c   : > { %7874 = vmatmul.mubr.msk.bf16.vlgmr.msra.gmra.mxu0 %vm1665_vm5, %v1839_v11 }
 0x52d   : > { %7885 = vmatprep.mubr.msk.bf16.mxu0 %vm8587_vm2, %v8586_v9  ;;  %7884 = vmatpush3.bf16.msra.mxu0 %v1939_v13 }
 0x52e   : > { %7895 = vmatprep.subr.bf16.mxu0 %v8586_v9 }
 0x5e4   : > { %v1769_v16 = vpop.f32.mrf.mxu0 }
 0x5e5   : > { %v1775_v17 = vpack.c.bf16 %v1769_v16, %v1769_v16 }
 0x5e6   : > { %v7863_v18 = vpop.f32.mrf.mxu0 }
 0x5e7   : > { %7886 = vmatmul.mubr.msk.bf16.vlgmr.msra.gmra.mxu0 %vm1665_vm5, %v1775_v17 }
 0x5e8   : > { %v1772_v19 = vpop.f32.mrf.mxu0  ;;  %7897 = vmatprep.mubr.msk.bf16.mxu0 %vm8587_vm2, %v8586_v9 }
 0x5e9   : > { %v1660_v19 = vld [vmem:[%s10007_s9 + $0xc] sm:$0xf]  ;;  %s10011_s9 = scalar_lea.vmem %s10010_s11, %s10005_s26  ;;  %s10015_s26 = scalar_lea.vmem %s10012_s18, %s8868_s10 }
 0x5ea   : > { %v7864_v20 = vpop.f32.mrf.mxu0  ;;  %v2258_v21 = vsel %vm1731_vm7, %v1660_v19, 0  ;;  %s10020_s18 = sld [smem:[#allocation10_spill]] }
 0x5ec   : > { %v1882_v22 = vpop.f32.mrf.mxu0 }
 0x5ed   : > { %v1888_v23 = vpack.c.bf16 %v1882_v22, %v1882_v22 }
 0x5ee   : > { %v7875_v24 = vpop.f32.mrf.mxu0 }
 0x5ef   : > { %7880 = vmatmul.mubr.msk.bf16.vlgmr.msra.gmra.mxu1 %vm1665_vm5, %v1888_v23 }
 0x5f0   : > { %7890 = vmatpush3.bf16.xpose.msra.mxu1 %v1989_v25  ;;  %v1885_v26 = vpop.f32.mrf.mxu0  ;;  %7891 = vmatprep.mubr.msk.bf16.mxu1 %vm8587_vm2, %v8586_v9 }
 0x5f1   : > { %7901 = vmatprep.subr.bf16.mxu1 %v8586_v9 }
 0x5f2   : > { %v7876_v27 = vpop.f32.mrf.mxu0 }
 0x5f7   : > { %7892 = vmatmul.mubr.msk.bf16.vlgmr.msra.gmra.mxu1 %vm1665_vm5, %v1982_v28 }
 0x5f8   : > { %7903 = vmatprep.mubr.msk.bf16.mxu1 %vm8587_vm2, %v8586_v9  ;;  %7902 = vmatpush3.bf16.msra.mxu1 %v2098_v62 }
 0x5f9   : > { %7913 = vmatprep.subr.bf16.mxu1 %v8586_v9 }
 0x6a7   : > { %v1975_v29 = vpop.f32.mrf.mxu0 }
 0x6a9   : > { %v7887_v31 = vpop.f32.mrf.mxu0 }
 0x6ab   : > { %v1978_v32 = vpop.f32.mrf.mxu0 }
 0x6ad   : > { %v7888_v33 = vpop.f32.mrf.mxu0 }
 0x6af   : > { %v1929_v34 = vpop.f32.mrf.mxu1 }
 0x6b0   : > { %v9045_v35 = vadd.f32 %v1975_v29, %v1929_v34  ;;  %v7297_v34 = vld [vmem:[%s10009_s0] ss:$0 sm:$0xff] }
 0x6b1   : > { %v7881_v36 = vpop.f32.mrf.mxu1 }
 0x6b3   : > { %v1932_v37 = vpop.f32.mrf.mxu1 }
 0x6b5   : > { %v7882_v39 = vpop.f32.mrf.mxu1 }
 0x6b7   : > { %v2025_v40 = vpop.f32.mrf.mxu1 }
 0x6b8   : > { %v2031_v41 = vmul.f32 0.35355338, %v2025_v40 }
 0x6b9   : > { %v7893_v42 = vpop.f32.mrf.mxu1 }
 0x6ba   : > { %v2032_v43 = vsel %vm1656_vm6, %v2031_v41, -1e+09  ;;  %v8452_v41 = vld [vmem:[#allocation2] sm:$0xff] }
 0x6bb   : > { %v2028_v44 = vpop.f32.mrf.mxu1  ;;  %v2033_v45 = vsel %vm1665_vm5, %v2032_v43, -inf }
 0x6bc   : > { %2034 = vmax.xlane.f32.xlu1 %v2033_v45 }
 0x6bd   : > { %v7894_v46 = vpop.f32.mrf.mxu1 }
 0x6cd   : > { %2045 = vrot.lane.b32.xlu1 %v8977_v30, %s8595_s29 }
 0x6d1   : > { %2141 = vrot.lane.b32.xlu1 %v8977_v30, %s8596_s3 }
 0x745   : > { %v2035_v47 = vpop.xlane.xlu1 %2034 }
 0x746   : > { %v2036_v48 = vsub.f32 %v2032_v43, %v2035_v47 }
 0x748   : > { %v2037_v49 = vmul.f32 1.442695, %v2036_v48 }
 0x749   : > { %v2046_v50 = vpop.permute.xlu1 %2045 }
 0x74a   : > { %8400 = vpow2.f32 %v2037_v49  ;;  %v2051_v51 = vsel %vm1731_vm7, %v2046_v50, 0  ;;  %v8256_v50 = vld [vmem:[%s8918_s21 + $0x8] sm:$0xff]  }
 0x74b   : > { %7896 = vmatpush3.bf16.msra.mxu0 %v2051_v51  ;;  %v8257_v51 = vld [vmem:[%s8918_s21] sm:$0xff]   ;;  %s10013_s21 = sld [smem:[#allocation15_spill]] }
 0x74c   : > { %7907 = vmatprep.subr.bf16.mxu0 %v8586_v9 }
 0x74d   : > { %v2142_v60 = vpop.permute.xlu1 %2141 }
 0x751   : > { %s10016_s0 = scalar_lea.vmem %s10013_s21, %s8868_s10 }
 0x757   : > { %v8401_v52 = vpop.eup %8400 }
 0x758   : > { %v2039_v53 = vsel %vm1665_vm5, %v8401_v52, 0.0 }
 0x759   : > { %2040 = vadd.xlane.f32.xlu0 %v2039_v53  ;;  %v8258_v53 = vld [vmem:[%s8913_s14 + $0x8] sm:$0xff]  }
 0x76f   : > { %2143 = vrot.lane.b32.xlu0 %v8977_v30, %s8597_s19 }
 0x7e2   : > { %v2041_v54 = vpop.xlane.xlu0 %2040 }
 0x7e3   : > { %8402 = vrcp.f32 %v2041_v54  ;;  %v8259_v54 = vld [vmem:[%s8913_s14] sm:$0xff]  }
 0x7e6   : > { %v2144_v57 = vpop.permute.xlu0 %2143 }
 0x7e7   : > { %v2149_v59 = vsel %vm1665_vm5, %v2144_v57, 0 }
 0x7f0   : > { %v8403_v55 = vpop.eup %8402 }
 0x7f1   : > { %v2043_v56 = vmul.f32 %v8403_v55, %v8401_v52  ;;  %v9105_v52 = vld [vmem:[%s10011_s9] sm:$0xff]  ;;  %s10019_s9 = sld [smem:[#allocation55_spill]] }
 0x7f2   : > { %v2412_v55 = vpack.c.bf16 %v9105_v52, %v9105_v52 }
 0x7f3   : > { %v2044_v58 = vpack.c.bf16 %v2043_v56, %v2043_v56 }
 0x7f5   : > { %7898 = vmatmul.mubr.msk.bf16.vlgmr.msra.gmra.mxu0 %vm1665_vm5, %v2044_v58 }
 0x7f6   : > { %7908 = vmatpush3.bf16.xpose.msra.mxu0 %v2149_v59  ;;  %7909 = vmatprep.mubr.msk.bf16.mxu0 %vm8587_vm2, %v8586_v9 }
 0x7f7   : > { %7919 = vmatprep.subr.bf16.mxu0 %v8586_v9 }
 0x7fd   : > { %7910 = vmatmul.mubr.msk.bf16.vlgmr.msra.gmra.mxu0 %vm1665_vm5, %v2142_v60 }
 0x7fe   : > { %7921 = vmatprep.mubr.msk.bf16.mxu0 %vm8587_vm2, %v8586_v9  ;;  %7920 = vmatpush3.bf16.msra.mxu0 %v2258_v21 }
 0x7ff   : > { %7933 = vmatprep.subr.bf16.mxu0 %v8586_v9 }
 0x8b5   : > { %v2087_v63 = vpop.f32.mrf.mxu0 }
 0x8b6   : > { %v2093_v0 = vpack.c.bf16 %v2087_v63, %v2087_v63 }
 0x8b7   : > { %v7899_v1 = vpop.f32.mrf.mxu0 }
 0x8b8   : > { %7904 = vmatmul.mubr.msk.bf16.vlgmr.msra.gmra.mxu1 %vm1665_vm5, %v2093_v0  ;;  %v7298_v0 = vld [vmem:[%s10015_s26] ss:$0 sm:$0xff] }
 0x8b9   : > { %v2090_v2 = vpop.f32.mrf.mxu0  ;;  %7915 = vmatprep.mubr.msk.bf16.mxu1 %vm8587_vm2, %v8586_v9 }
 0x8bb   : > { %v7900_v3 = vpop.f32.mrf.mxu0 }
 0x8bc   : > { %v7299_v3 = vld [vmem:[%s10016_s0] ss:$0 sm:$0xff] }
 0x8bd   : > { %v2185_v4 = vpop.f32.mrf.mxu0 }
 0x8be   : > { %v2191_v5 = vmul.f32 0.35355338, %v2185_v4 }
 0x8bf   : > { %v7911_v6 = vpop.f32.mrf.mxu0 }
 0x8c0   : > { %v2192_v7 = vsel %vm1656_vm6, %v2191_v5, -1e+09 }
 0x8c1   : > { %v2188_v8 = vpop.f32.mrf.mxu0  ;;  %v2193_v10 = vsel %vm1665_vm5, %v2192_v7, -inf }
 0x8c2   : > { %2194 = vmax.xlane.f32.xlu1 %v2193_v10 }
 0x8c3   : > { %v7912_v11 = vpop.f32.mrf.mxu0 }
 0x94b   : > { %v2195_v12 = vpop.xlane.xlu1 %2194 }
 0x94c   : > { %v2196_v13 = vsub.f32 %v2192_v7, %v2195_v12  ;;  %v7304_v7 = vld [vmem:[%s1497_s25] ss:$0 sm:$0xff]  ;;  %s10018_s25 = sld [smem:[#allocation8_spill]] }
 0x94e   : > { %v2197_v14 = vmul.f32 1.442695, %v2196_v13 }
 0x950   : > { %8404 = vpow2.f32 %v2197_v14 }
 0x95d   : > { %v8405_v15 = vpop.eup %8404 }
 0x95e   : > { %v2199_v16 = vsel %vm1665_vm5, %v8405_v15, 0.0 }
 0x95f   : > { %2200 = vadd.xlane.f32.xlu0 %v2199_v16  ;;  %v7300_v16 = vld [vmem:[%s1489_s4] ss:$0 sm:$0xff]  ;;  %s10021_s4 = scalar_lea.vmem %s10018_s25, %s10019_s9 }
 0x975   : > { %2205 = vrot.lane.b32.xlu0 %v8977_v30, %s8598_s27 }
 0x978   : > { %v2134_v38 = vpop.f32.mrf.mxu1 }
 0x979   : > { %v2140_v17 = vadd.f32 %v2134_v38, %v9045_v35 }
 0x97a   : > { %v7905_v18 = vpop.f32.mrf.mxu1 }
 0x97c   : > { %v2137_v20 = vpop.f32.mrf.mxu1 }
 0x97e   : > { %v7906_v22 = vpop.f32.mrf.mxu1 }
 0x9e8   : > { %v2201_v23 = vpop.xlane.xlu0 %2200 }
 0x9e9   : > { %8406 = vrcp.f32 %v2201_v23 }
 0x9ec   : > { %v2206_v24 = vpop.permute.xlu0 %2205 }
 0x9ed   : > { %v2211_v25 = vsel %vm1731_vm7, %v2206_v24, 0 }
 0x9ee   : > { %7914 = vmatpush3.bf16.msra.mxu1 %v2211_v25  ;;  %v9156_v25 = vld [vmem:[%s10021_s4] sm:$0x1] }
 0x9ef   : > { %7925 = vmatprep.subr.bf16.mxu1 %v8586_v9  ;;  %vm2481_vm10 = vcmp.ne.s32.totalorder %v9156_v25, 0 }
 0x9f6   : > { %v8407_v30 = vpop.eup %8406 }
 0x9f7   : > { %v2203_v26 = vmul.f32 %v8407_v30, %v8405_v15 }
 0x9f9   : > { %v2204_v27 = vpack.c.bf16 %v2203_v26, %v2203_v26  ;;  %v2537_v26 = vlaneseq }
 0x9fb   : > { %7916 = vmatmul.mubr.msk.bf16.vlgmr.msra.gmra.mxu1 %vm1665_vm5, %v2204_v27  ;;  %v9165_v27 = vshrl.u32 %v2537_v26, 7 }
 0x9fc   : > { %7929 = vmatprep.mubr.msk.bf16.mxu1 %vm8587_vm2, %v8586_v9  ;;  %7926 = vmatpush3.bf16.msra.mxu1 %v8258_v53 }
 0x9fd   : > { %7927 = vmatprep.subr.bf16.mxu1 %v8586_v9 }
 0xa00   : > { %7928 = vmatpush3.bf16.msra.mxu1 %v8259_v54 }
 0xa01   : > { %7941 = vmatprep.subr.bf16.mxu1 %v8586_v9 }
 0xabb   : > { %v2247_v28 = vpop.f32.mrf.mxu1 }
 0xabc   : > { %v2253_v29 = vpack.c.bf16 %v2247_v28, %v2247_v28  ;;  %v9172_v28 = vsub.s32 0, %v9165_v27 }
 0xabd   : > { %v7917_v31 = vpop.f32.mrf.mxu1 }
 0xabe   : > { %7922 = vmatmul.mubr.msk.bf16.vlgmr.msra.gmra.mxu0 %vm1665_vm5, %v2253_v29  ;;  %v8599_v29 = vmov 0  }
 0xabf   : > { %v2250_v32 = vpop.f32.mrf.mxu1  ;;  %7937 = vmatprep.mubr.msk.bf16.mxu0 %vm8587_vm2, %v8586_v9  ;;  %7934 = vmatpush3.bf16.msra.mxu0 %v8256_v50 }
 0xac0   : > { %7935 = vmatprep.subr.bf16.mxu0 %v8586_v9 }
 0xac1   : > { %v7918_v33 = vpop.f32.mrf.mxu1 }
 0xac3   : > { %7936 = vmatpush3.bf16.msra.mxu0 %v8257_v51 }
 0xac4   : > { %7947 = vmatprep.subr.bf16.mxu0 %v8586_v9 }
 0xac6   : > { %7938 = vmatmul.mubr.msk.bf16.vlgmr.msra.gmra.mxu0 %vm1551_vm1, %v2412_v55 }
 0xac7   : > { %7949 = vmatprep.mubr.msk.bf16.mxu0 %vm8587_vm2, %v8586_v9 }
 0xb7e   : > { %v2294_v35 = vpop.f32.mrf.mxu0 }
 0xb7f   : > { %v2300_v36 = vadd.f32 %v2294_v35, %v2140_v17 }
 0xb80   : > { %v7923_v37 = vpop.f32.mrf.mxu0 }
 0xb81   : > { %v2307_v39 = vadd.f32 %v7297_v34, %v2300_v36 }
 0xb82   : > { %v2297_v40 = vpop.f32.mrf.mxu0 }
 0xb83   : > { %v9094_v42 = vadd.f32 %v8452_v41, %v2307_v39 }
 0xb84   : > { %v7924_v43 = vpop.f32.mrf.mxu0 }
 0xb85   : > { %v2311_v44 = vsel %vm1551_vm1, %v9094_v42, 0.0 }
 0xb86   : > { %2312 = vadd.xlane.f32.xlu1 %v2311_v44  ;;  %v2473_v8 = vpop.f32.mrf.mxu0 }
 0xb87   : > { %v2474_v10 = vadd.f32 %v7304_v7, %v2473_v8 }
 0xb88   : > { %v7939_v11 = vpop.f32.mrf.mxu0 }
 0xb89   : > { %v9130_v12 = vpack.c.bf16 %v2474_v10, %v2474_v10  ;;  %v2484_v10 = vld [vmem:[%s8923_s24] sm:$0xf] }
 0xb8a   : > { %v2476_v13 = vpop.f32.mrf.mxu0 }
 0xb8b   : > { %v2493_v14 = vsel %vm1665_vm5, %v9130_v12, 0 }
 0xb8c   : > { %v7940_v15 = vpop.f32.mrf.mxu0 }
 0xc0f   : > { %v2313_v45 = vpop.xlane.xlu1 %2312 }
 0xc10   : > { %v2314_v46 = vmul.f32 0.03125, %v2313_v45 }
 0xc12   : > { %v2315_v47 = vsub.f32 %v9094_v42, %v2314_v46 }
 0xc14   : > { %v2316_v48 = vmul.f32 %v2315_v47, %v2315_v47  ;;  %v2327_v1 = vmul.f32 %v7298_v0, %v2315_v47 }
 0xc16   : > { %v2317_v49 = vsel %vm1551_vm1, %v2316_v48, 0.0 }
 0xc17   : > { %2318 = vadd.xlane.f32.xlu1 %v2317_v49 }
 0xc28   : > { %2608 = vrot.lane.b32.xlu1 %v9130_v12, %s8588_s1 }
 0xca0   : > { %v2319_v56 = vpop.xlane.xlu1 %2318 }
 0xca1   : > { %v2320_v57 = vmul.f32 0.032258064, %v2319_v56 }
 0xca3   : > { %8408 = vrsqrt.f32 %v2320_v57  ;;  %vm2330_vm8 = vcmp.eq.f32.partialorder %v2320_v57, inf  ;;  %v2333_v60 = vand.u32 2147483648, %v2320_v57  ;;  %vm2332_vm9 = vcmp.eq.f32.partialorder %v2320_v57, 0.0 }
 0xca4   : > { %v2609_v17 = vpop.permute.xlu1 %2608 }
 0xca5   : > { %v2614_v21 = vsel %vm1665_vm5, %v2609_v17, 0 }
 0xcb0   : > { %v8409_v58 = vpop.eup %8408 }
 0xcb1   : > { %v2329_v59 = vmul.f32 %v8409_v58, %v2320_v57 }
 0xcb3   : > { %v2331_v61 = vsel %vm2330_vm8, %v2320_v57, %v2329_v59 }
 0xcb4   : > { %v2334_v62 = vsel %vm2332_vm9, %v2333_v60, %v2331_v61 }
 0xcb5   : > { %v2335_v63 = vadd.f32 1e-06, %v2334_v62 }
 0xcb7   : > { %8410 = vrcp.f32 %v2335_v63 }
 0xcc4   : > { %v8411_v2 = vpop.eup %8410 }
 0xcc5   : > { %v2337_v4 = vmul.f32 %v8411_v2, %v2327_v1 }
 0xcc7   : > { %v2344_v5 = vadd.f32 %v7299_v3, %v2337_v4  ;;  %v2485_v3 = vld [vmem:[%s8923_s24 + $0x4] sm:$0xf] }
 0xcc8   : > { %v2723_v4 = vsel %vm1731_vm7, %v2485_v3, 0 }
 0xcc9   : > { %v2345_v6 = vpack.c.bf16 %v2344_v5, %v2344_v5 }
 0xccb   : > { %7930 = vmatmul.mubr.msk.bf16.vlgmr.msra.gmra.mxu1 %vm1551_vm1, %v2345_v6 }
 0xccc   : > { %7943 = vmatprep.mubr.msk.bf16.mxu1 %vm8587_vm2, %v8586_v9  ;;  %7942 = vmatpush3.bf16.xpose.msra.mxu1 %v2493_v14  ;;  %v2769_v14 = vsel %vm1731_vm7, %v2484_v10, 0 }
 0xccd   : > { %7953 = vmatprep.subr.bf16.mxu1 %v8586_v9 }
 0xd8b   : > { %v2406_v38 = vpop.f32.mrf.mxu1 }
 0xd8c   : > { %v2407_v18 = vadd.f32 %v7300_v16, %v2406_v38 }
 0xd8d   : > { %v7931_v19 = vpop.f32.mrf.mxu1 }
 0xd8e   : > { %v9140_v20 = vpack.c.bf16 %v2407_v18, %v2407_v18 }
 0xd8f   : > { %v2409_v22 = vpop.f32.mrf.mxu1 }
 0xd90   : > { %2606 = vrot.lane.b32.xlu0 %v9140_v20, %s8588_s1  ;;  %7944 = vmatmul.mubr.msk.bf16.vlgmr.msra.gmra.mxu1 %vm1665_vm5, %v9140_v20  ;;  %s10022_s1 = scalar_lea.vmem %s10020_s18, %s10019_s9 }
 0xd91   : > { %v7932_v23 = vpop.f32.mrf.mxu1  ;;  %7954 = vmatpush3.bf16.xpose.msra.mxu1 %v2614_v21  ;;  %7955 = vmatprep.mubr.msk.bf16.mxu1 %vm8587_vm2, %v8586_v9  ;;  %v9161_v30 = vld [vmem:[%s10022_s1] sm:$0x1] }
 0xd92   : > { %7965 = vmatprep.subr.bf16.mxu1 %v8586_v9  ;;  %vm2482_vm11 = vcmp.eq.s32.totalorder %v9161_v30, 0  ;;  %vm3175_vm14 = vcmp.eq.s32.totalorder %v9161_v30, 1 }
 0xd93   : > { %vm2483_vm12 = vmand %vm2481_vm10, %vm2482_vm11 }
 0xd94   : > { %v2536_v31 = vsel %vm2483_vm12, 1, %v8599_v29  ;;  %vm3176_vm15 = vmand %vm2481_vm10, %vm3175_vm14 }
 0xd95   : > { %v2540_v32 = vrot.slane %v2536_v31, %v9172_v28 }
 0xd97   : > { %vm9176_vm13 = vcmp.eq.s32.totalorder %v2540_v32, 1 }
 0xe02   : > { %v2607_v24 = vpop.permute.xlu0 %2606 }
 0xe03   : > { %7956 = vmatmul.mubr.msk.bf16.vlgmr.msra.gmra.mxu1 %vm1665_vm5, %v2607_v24 }
 0xe04   : > { %7967 = vmatprep.mubr.msk.bf16.mxu1 %vm8587_vm2, %v8586_v9  ;;  %7966 = vmatpush3.bf16.msra.mxu1 %v2723_v4 }
 0xe05   : > { %7977 = vmatprep.subr.bf16.mxu1 %v8586_v9 }
 0xe50   : > { %v2529_v33 = vpop.f32.mrf.mxu1 }
 0xe51   : > { %v2535_v35 = vmul.f32 0.35355338, %v2529_v33 }
 0xe52   : > { %v7945_v36 = vpop.f32.mrf.mxu1 }
 0xe53   : > { %v2542_v37 = vsel %vm9176_vm13, %v2535_v35, -1e+09 }
 0xe54   : > { %v2532_v39 = vpop.f32.mrf.mxu1  ;;  %v2543_v40 = vsel %vm1665_vm5, %v2542_v37, -inf }
 0xe55   : > { %2544 = vmax.xlane.f32.xlu0 %v2543_v40 }
 0xe56   : > { %v7946_v41 = vpop.f32.mrf.mxu1 }
 0xec3   : > { %v2650_v43 = vpop.f32.mrf.mxu1 }
 0xec4   : > { %v2656_v44 = vmul.f32 0.35355338, %v2650_v43 }
 0xec5   : > { %v7957_v45 = vpop.f32.mrf.mxu1 }
 0xec6   : > { %v2657_v46 = vsel %vm9176_vm13, %v2656_v44, -1e+09 }
 0xec7   : > { %v2653_v47 = vpop.f32.mrf.mxu1  ;;  %v2658_v48 = vsel %vm1665_vm5, %v2657_v46, -inf }
 0xec8   : > { %2659 = vmax.xlane.f32.xlu1 %v2658_v48 }
 0xec9   : > { %v7958_v49 = vpop.f32.mrf.mxu1 }
 0xed9   : > { %2556 = vrot.lane.b32.xlu1 %v9130_v12, %s8589_s2 }
 0xedd   : > { %2813 = vrot.lane.b32.xlu1 %v9130_v12, %s8594_s16 }
 0xede   : > { %v2545_v50 = vpop.xlane.xlu0 %2544 }
 0xedf   : > { %v2546_v51 = vsub.f32 %v2542_v37, %v2545_v50 }
 0xee1   : > { %v2547_v53 = vmul.f32 1.442695, %v2546_v51  ;;  %2811 = vrot.lane.b32.xlu1 %v9140_v20, %s8594_s16 }
 0xee3   : > { %8412 = vpow2.f32 %v2547_v53 }
 0xef0   : > { %v8413_v54 = vpop.eup %8412 }
 0xef1   : > { %v2549_v55 = vsel %vm1665_vm5, %v8413_v54, 0.0 }
 0xef2   : > { %2550 = vadd.xlane.f32.xlu0 %v2549_v55 }
 0xf51   : > { %v2660_v56 = vpop.xlane.xlu1 %2659 }
 0xf52   : > { %v2661_v57 = vsub.f32 %v2657_v46, %v2660_v56 }
 0xf54   : > { %v2662_v58 = vmul.f32 1.442695, %v2661_v57 }
 0xf55   : > { %v2557_v59 = vpop.permute.xlu1 %2556 }
 0xf56   : > { %8414 = vpow2.f32 %v2662_v58  ;;  %v2562_v60 = vsel %vm1731_vm7, %v2557_v59, 0 }
 0xf57   : > { %7948 = vmatpush3.bf16.msra.mxu0 %v2562_v60 }
 0xf58   : > { %7959 = vmatprep.subr.bf16.mxu0 %v8586_v9 }
 0xf59   : > { %v2814_v19 = vpop.permute.xlu1 %2813 }
 0xf5a   : > { %v2819_v24 = vsel %vm1665_vm5, %v2814_v19, 0 }
 0xf5d   : > { %v2812_v32 = vpop.permute.xlu1 %2811 }
 0xf63   : > { %v8415_v61 = vpop.eup %8414 }
 0xf64   : > { %v2664_v62 = vsel %vm1665_vm5, %v8415_v61, 0.0 }
 0xf65   : > { %2665 = vadd.xlane.f32.xlu0 %v2664_v62 }
 0xf7b   : > { %v2551_v63 = vpop.xlane.xlu0 %2550  ;;  %2670 = vrot.lane.b32.xlu0 %v9130_v12, %s8590_s7 }
 0xf7c   : > { %8416 = vrcp.f32 %v2551_v63 }
 0xf89   : > { %v8417_v0 = vpop.eup %8416 }
 0xf8a   : > { %v2553_v1 = vmul.f32 %v8417_v0, %v8413_v54 }
 0xf8c   : > { %v2554_v2 = vpack.c.bf16 %v2553_v1, %v2553_v1 }
 0xf8e   : > { %7950 = vmatmul.mubr.msk.bf16.vlgmr.msra.gmra.mxu0 %vm1665_vm5, %v2554_v2  ;;  %v2486_v2 = vld [vmem:[%s8923_s24 + $0x8] sm:$0xf] }
 0xf8f   : > { %7961 = vmatprep.mubr.msk.bf16.mxu0 %vm8587_vm2, %v8586_v9  ;;  %v2928_v3 = vsel %vm1731_vm7, %v2486_v2, 0 }
 0xfee   : > { %v2666_v5 = vpop.xlane.xlu0 %2665 }
 0xfef   : > { %8418 = vrcp.f32 %v2666_v5 }
 0xff2   : > { %v2671_v6 = vpop.permute.xlu0 %2670 }
 0xff3   : > { %v2676_v7 = vsel %vm1731_vm7, %v2671_v6, 0 }
 0xff4   : > { %7960 = vmatpush3.bf16.msra.mxu0 %v2676_v7 }
 0xff5   : > { %7971 = vmatprep.subr.bf16.mxu0 %v8586_v9 }
 0xffc   : > { %v8419_v8 = vpop.eup %8418 }
 0xffd   : > { %v2668_v11 = vmul.f32 %v8419_v8, %v8415_v61 }
 0xfff   : > { %v2669_v13 = vpack.c.bf16 %v2668_v11, %v2668_v11 }
0x1001   : > { %7962 = vmatmul.mubr.msk.bf16.vlgmr.msra.gmra.mxu0 %vm1665_vm5, %v2669_v13 }
0x1002   : > { %7972 = vmatpush3.bf16.msra.mxu0 %v2769_v14  ;;  %7973 = vmatprep.mubr.msk.bf16.mxu0 %vm8587_vm2, %v8586_v9 }
0x1003   : > { %7983 = vmatprep.subr.bf16.mxu0 %v8586_v9 }
0x104e   : > { %v2598_v15 = vpop.f32.mrf.mxu0 }
0x104f   : > { %v2604_v16 = vpack.c.bf16 %v2598_v15, %v2598_v15 }
0x1050   : > { %v7951_v38 = vpop.f32.mrf.mxu0 }
0x1051   : > { %7974 = vmatmul.mubr.msk.bf16.vlgmr.msra.gmra.mxu0 %vm1665_vm5, %v2604_v16 }
0x1052   : > { %v2601_v17 = vpop.f32.mrf.mxu0  ;;  %7985 = vmatprep.mubr.msk.bf16.mxu0 %vm8587_vm2, %v8586_v9 }
0x1054   : > { %v7952_v18 = vpop.f32.mrf.mxu0 }
0x10c1   : > { %v2712_v21 = vpop.f32.mrf.mxu0 }
0x10c2   : > { %v2718_v22 = vpack.c.bf16 %v2712_v21, %v2712_v21 }
0x10c3   : > { %v7963_v23 = vpop.f32.mrf.mxu0 }
0x10c4   : > { %7968 = vmatmul.mubr.msk.bf16.vlgmr.msra.gmra.mxu1 %vm1665_vm5, %v2718_v22 }
0x10c5   : > { %7978 = vmatpush3.bf16.xpose.msra.mxu1 %v2819_v24  ;;  %v2715_v26 = vpop.f32.mrf.mxu0  ;;  %7979 = vmatprep.mubr.msk.bf16.mxu1 %vm8587_vm2, %v8586_v9 }
0x10c6   : > { %7989 = vmatprep.subr.bf16.mxu1 %v8586_v9 }
0x10c7   : > { %v7964_v31 = vpop.f32.mrf.mxu0 }
0x10cc   : > { %7980 = vmatmul.mubr.msk.bf16.vlgmr.msra.gmra.mxu1 %vm1665_vm5, %v2812_v32 }
0x10cd   : > { %7991 = vmatprep.mubr.msk.bf16.mxu1 %vm8587_vm2, %v8586_v9  ;;  %7990 = vmatpush3.bf16.msra.mxu1 %v2928_v3 }
0x10ce   : > { %8001 = vmatprep.subr.bf16.mxu1 %v8586_v9 }
0x1111   : > { %v9223_v33 = vpop.f32.mrf.mxu0 }
0x1113   : > { %v7975_v35 = vpop.f32.mrf.mxu0 }
0x1115   : > { %v2808_v36 = vpop.f32.mrf.mxu0 }
0x1117   : > { %v7976_v37 = vpop.f32.mrf.mxu0 }
0x1184   : > { %v9225_v39 = vpop.f32.mrf.mxu1 }
0x1185   : > { %v2806_v22 = vadd.f32 %v9223_v33, %v9225_v39 }
0x1186   : > { %v7969_v40 = vpop.f32.mrf.mxu1 }
0x1188   : > { %v2762_v41 = vpop.f32.mrf.mxu1 }
0x118a   : > { %v7970_v43 = vpop.f32.mrf.mxu1 }
0x118c   : > { %v2855_v44 = vpop.f32.mrf.mxu1 }
0x118d   : > { %v2861_v45 = vmul.f32 0.35355338, %v2855_v44 }
0x118e   : > { %v7981_v46 = vpop.f32.mrf.mxu1 }
0x118f   : > { %v2862_v47 = vsel %vm9176_vm13, %v2861_v45, -1e+09 }
0x1190   : > { %v2858_v48 = vpop.f32.mrf.mxu1  ;;  %v2863_v49 = vsel %vm1665_vm5, %v2862_v47, -inf }
0x1191   : > { %2864 = vmax.xlane.f32.xlu0 %v2863_v49  ;;  %v2487_v48 = vld [vmem:[%s8923_s24 + $0xc] sm:$0xf]  ;;  %s8600_s24 = smov 32  }
0x1192   : > { %v7982_v50 = vpop.f32.mrf.mxu1  ;;  %v3088_v49 = vsel %vm1731_vm7, %v2487_v48, 0 }
0x11a7   : > { %2875 = vrot.lane.b32.xlu0 %v9130_v12, %s8593_s13 }
0x11ab   : > { %2971 = vrot.lane.b32.xlu0 %v9140_v20, %s8596_s3 }
0x121a   : > { %v2865_v51 = vpop.xlane.xlu0 %2864 }
0x121b   : > { %v2866_v53 = vsub.f32 %v2862_v47, %v2865_v51 }
0x121d   : > { %v2867_v54 = vmul.f32 1.442695, %v2866_v53  ;;  %v3233_v53 = vsel %vm3176_vm15, 1, %v8599_v29 }
0x121e   : > { %v2876_v55 = vpop.permute.xlu0 %2875 }
0x121f   : > { %8420 = vpow2.f32 %v2867_v54  ;;  %v2881_v56 = vsel %vm1731_vm7, %v2876_v55, 0 }
0x1220   : > { %7984 = vmatpush3.bf16.msra.mxu0 %v2881_v56  ;;  %v3237_v56 = vrot.slane %v3233_v53, %v9172_v28 }
0x1221   : > { %7995 = vmatprep.subr.bf16.mxu0 %v8586_v9 }
0x1222   : > { %v2972_v1 = vpop.permute.xlu0 %2971  ;;  %vm9299_vm0 = vcmp.eq.s32.totalorder %v3237_v56, 1 }
0x122c   : > { %v8421_v57 = vpop.eup %8420 }
0x122d   : > { %v2869_v58 = vsel %vm1665_vm5, %v8421_v57, 0.0 }
0x122e   : > { %2870 = vadd.xlane.f32.xlu1 %v2869_v58 }
0x123f   : > { %2973 = vrot.lane.b32.xlu1 %v9130_v12, %s8596_s3  ;;  %s10035_s3 = sld [smem:[#allocation17_spill]] }
0x12b7   : > { %v2871_v59 = vpop.xlane.xlu1 %2870 }
0x12b8   : > { %8422 = vrcp.f32 %v2871_v59 }
0x12bb   : > { %v2974_v62 = vpop.permute.xlu1 %2973 }
0x12bc   : > { %v2979_v0 = vsel %vm1665_vm5, %v2974_v62, 0 }
0x12c5   : > { %v8423_v60 = vpop.eup %8422 }
0x12c6   : > { %v2873_v61 = vmul.f32 %v8423_v60, %v8421_v57 }
0x12c8   : > { %v2874_v63 = vpack.c.bf16 %v2873_v61, %v2873_v61 }
0x12ca   : > { %7986 = vmatmul.mubr.msk.bf16.vlgmr.msra.gmra.mxu0 %vm1665_vm5, %v2874_v63 }
0x12cb   : > { %7996 = vmatpush3.bf16.xpose.msra.mxu0 %v2979_v0  ;;  %7997 = vmatprep.mubr.msk.bf16.mxu0 %vm8587_vm2, %v8586_v9 }
0x12cc   : > { %8007 = vmatprep.subr.bf16.mxu0 %v8586_v9 }
0x12d2   : > { %7998 = vmatmul.mubr.msk.bf16.vlgmr.msra.gmra.mxu0 %vm1665_vm5, %v2972_v1 }
0x12d3   : > { %8009 = vmatprep.mubr.msk.bf16.mxu0 %vm8587_vm2, %v8586_v9  ;;  %8008 = vmatpush3.bf16.msra.mxu0 %v3088_v49 }
0x12d4   : > { %8019 = vmatprep.subr.bf16.mxu0 %v8586_v9 }
0x138a   : > { %v2917_v4 = vpop.f32.mrf.mxu0 }
0x138b   : > { %v2923_v5 = vpack.c.bf16 %v2917_v4, %v2917_v4 }
0x138c   : > { %v7987_v6 = vpop.f32.mrf.mxu0 }
0x138d   : > { %7992 = vmatmul.mubr.msk.bf16.vlgmr.msra.gmra.mxu1 %vm1665_vm5, %v2923_v5 }
0x138e   : > { %v2920_v7 = vpop.f32.mrf.mxu0  ;;  %8003 = vmatprep.mubr.msk.bf16.mxu1 %vm8587_vm2, %v8586_v9 }
0x1390   : > { %v7988_v8 = vpop.f32.mrf.mxu0 }
0x1392   : > { %v3015_v10 = vpop.f32.mrf.mxu0 }
0x1393   : > { %v3021_v11 = vmul.f32 0.35355338, %v3015_v10 }
0x1394   : > { %v7999_v13 = vpop.f32.mrf.mxu0 }
0x1395   : > { %v3022_v14 = vsel %vm9176_vm13, %v3021_v11, -1e+09 }
0x1396   : > { %v3018_v15 = vpop.f32.mrf.mxu0  ;;  %v3023_v16 = vsel %vm1665_vm5, %v3022_v14, -inf }
0x1397   : > { %3024 = vmax.xlane.f32.xlu1 %v3023_v16 }
0x1398   : > { %v8000_v38 = vpop.f32.mrf.mxu0 }
0x13a8   : > { %3184 = vrot.lane.b32.xlu1 %v9130_v12, %s8592_s5 }
0x13ac   : > { %3182 = vrot.lane.b32.xlu1 %v9140_v20, %s8589_s2  ;;  %s8601_s2 = smov 24  }
0x13b0   : > { %3301 = vrot.lane.b32.xlu1 %v9140_v20, %s8590_s7  ;;  %s8602_s7 = smov 16  }
0x1420   : > { %v3025_v17 = vpop.xlane.xlu1 %3024 }
0x1421   : > { %v3026_v18 = vsub.f32 %v3022_v14, %v3025_v17 }
0x1423   : > { %v3027_v19 = vmul.f32 1.442695, %v3026_v18 }
0x1424   : > { %v3185_v33 = vpop.permute.xlu1 %3184 }
0x1425   : > { %8424 = vpow2.f32 %v3027_v19  ;;  %v3190_v43 = vsel %vm1665_vm5, %v3185_v33, 0 }
0x1428   : > { %v3183_v45 = vpop.permute.xlu1 %3182 }
0x142c   : > { %v3302_v47 = vpop.permute.xlu1 %3301 }
0x1432   : > { %v8425_v34 = vpop.eup %8424 }
0x1433   : > { %v3029_v21 = vsel %vm1665_vm5, %v8425_v34, 0.0 }
0x1434   : > { %3030 = vadd.xlane.f32.xlu0 %v3029_v21 }
0x144a   : > { %3035 = vrot.lane.b32.xlu0 %v9130_v12, %s8597_s19 }
0x144d   : > { %v2964_v23 = vpop.f32.mrf.mxu1 }
0x144e   : > { %v9267_v24 = vadd.f32 %v2964_v23, %v2806_v22  ;;  %3303 = vrot.lane.b32.xlu0 %v9130_v12, %s8591_s22  ;;  %s8603_s22 = smov 8  }
0x144f   : > { %v7993_v26 = vpop.f32.mrf.mxu1 }
0x1451   : > { %v2967_v31 = vpop.f32.mrf.mxu1 }
0x1453   : > { %v7994_v32 = vpop.f32.mrf.mxu1 }
0x14bd   : > { %v3031_v35 = vpop.xlane.xlu0 %3030 }
0x14be   : > { %8426 = vrcp.f32 %v3031_v35 }
0x14c1   : > { %v3036_v36 = vpop.permute.xlu0 %3035 }
0x14c2   : > { %v3041_v37 = vsel %vm1731_vm7, %v3036_v36, 0 }
0x14c3   : > { %8002 = vmatpush3.bf16.msra.mxu1 %v3041_v37 }
0x14c4   : > { %8013 = vmatprep.subr.bf16.mxu1 %v8586_v9 }
0x14c5   : > { %v3304_v44 = vpop.permute.xlu0 %3303 }
0x14c6   : > { %v3309_v46 = vsel %vm1665_vm5, %v3304_v44, 0  ;;  %v3177_v44 = vld [vmem:[%s8928_s12] sm:$0xf] }
0x14cb   : > { %v8427_v40 = vpop.eup %8426 }
0x14cc   : > { %v3033_v41 = vmul.f32 %v8427_v40, %v8425_v34 }
0x14ce   : > { %v3034_v39 = vpack.c.bf16 %v3033_v41, %v3033_v41 }
0x14d0   : > { %8004 = vmatmul.mubr.msk.bf16.vlgmr.msra.gmra.mxu1 %vm1665_vm5, %v3034_v39 }
0x14d1   : > { %8014 = vmatpush3.bf16.xpose.msra.mxu1 %v3190_v43  ;;  %8015 = vmatprep.mubr.msk.bf16.mxu1 %vm8587_vm2, %v8586_v9 }
0x14d2   : > { %8025 = vmatprep.subr.bf16.mxu1 %v8586_v9 }
0x14d8   : > { %8016 = vmatmul.mubr.msk.bf16.vlgmr.msra.gmra.mxu1 %vm1665_vm5, %v3183_v45  ;;  %v3464_v45 = vsel %vm1731_vm7, %v3177_v44, 0 }
0x14d9   : > { %8026 = vmatpush3.bf16.xpose.msra.mxu1 %v3309_v46  ;;  %8027 = vmatprep.mubr.msk.bf16.mxu1 %vm8587_vm2, %v8586_v9  ;;  %v3178_v46 = vld [vmem:[%s8928_s12 + $0x4] sm:$0xf] }
0x14da   : > { %8037 = vmatprep.subr.bf16.mxu1 %v8586_v9 }
0x14e0   : > { %8028 = vmatmul.mubr.msk.bf16.vlgmr.msra.gmra.mxu1 %vm1665_vm5, %v3302_v47  ;;  %v3418_v47 = vsel %vm1731_vm7, %v3178_v46, 0 }
0x14e1   : > { %8039 = vmatprep.mubr.msk.bf16.mxu1 %vm8587_vm2, %v8586_v9  ;;  %8038 = vmatpush3.bf16.msra.mxu1 %v3418_v47 }
0x14e2   : > { %8049 = vmatprep.subr.bf16.mxu1 %v8586_v9 }
0x1590   : > { %v3077_v50 = vpop.f32.mrf.mxu1 }
0x1591   : > { %v3083_v51 = vpack.c.bf16 %v3077_v50, %v3077_v50 }
0x1592   : > { %v8005_v54 = vpop.f32.mrf.mxu1 }
0x1593   : > { %8010 = vmatmul.mubr.msk.bf16.vlgmr.msra.gmra.mxu0 %vm1665_vm5, %v3083_v51 }
0x1594   : > { %v3080_v55 = vpop.f32.mrf.mxu1  ;;  %8021 = vmatprep.mubr.msk.bf16.mxu0 %vm8587_vm2, %v8586_v9 }
0x1596   : > { %v8006_v57 = vpop.f32.mrf.mxu1 }
0x1598   : > { %v3226_v58 = vpop.f32.mrf.mxu1 }
0x1599   : > { %v3232_v25 = vmul.f32 0.35355338, %v3226_v58 }
0x159a   : > { %v8017_v60 = vpop.f32.mrf.mxu1 }
0x159b   : > { %v3239_v61 = vsel %vm9299_vm0, %v3232_v25, -1e+09 }
0x159c   : > { %v3229_v62 = vpop.f32.mrf.mxu1  ;;  %v3240_v63 = vsel %vm1665_vm5, %v3239_v61, -inf }
0x159d   : > { %3241 = vmax.xlane.f32.xlu0 %v3240_v63 }
0x159e   : > { %v8018_v0 = vpop.f32.mrf.mxu1 }
0x15a0   : > { %v3345_v1 = vpop.f32.mrf.mxu1 }
0x15a1   : > { %v3351_v2 = vmul.f32 0.35355338, %v3345_v1 }
0x15a2   : > { %v8029_v3 = vpop.f32.mrf.mxu1 }
0x15a3   : > { %v3352_v4 = vsel %vm9299_vm0, %v3351_v2, -1e+09 }
0x15a4   : > { %v3348_v5 = vpop.f32.mrf.mxu1  ;;  %v3353_v6 = vsel %vm1665_vm5, %v3352_v4, -inf }
0x15a5   : > { %3354 = vmax.xlane.f32.xlu1 %v3353_v6 }
0x15a6   : > { %v8030_v7 = vpop.f32.mrf.mxu1 }
0x15b6   : > { %3252 = vrot.lane.b32.xlu1 %v9130_v12, %s8600_s24 }
0x15ba   : > { %3508 = vrot.lane.b32.xlu1 %v9130_v12, %s8595_s29  ;;  %s10033_s29 = sld [smem:[#allocation16_spill]] }
0x15be   : > { %3506 = vrot.lane.b32.xlu1 %v9140_v20, %s8593_s13 }
0x1626   : > { %v3242_v8 = vpop.xlane.xlu0 %3241 }
0x1627   : > { %v3243_v10 = vsub.f32 %v3239_v61, %v3242_v8 }
0x1629   : > { %v3244_v11 = vmul.f32 1.442695, %v3243_v10 }
0x162b   : > { %8428 = vpow2.f32 %v3244_v11 }
0x162e   : > { %v3355_v13 = vpop.xlane.xlu1 %3354 }
0x162f   : > { %v3356_v14 = vsub.f32 %v3352_v4, %v3355_v13 }
0x1631   : > { %v3357_v15 = vmul.f32 1.442695, %v3356_v14 }
0x1632   : > { %v3253_v16 = vpop.permute.xlu1 %3252 }
0x1633   : > { %8430 = vpow2.f32 %v3357_v15  ;;  %v3258_v38 = vsel %vm1731_vm7, %v3253_v16, 0 }
0x1634   : > { %8020 = vmatpush3.bf16.msra.mxu0 %v3258_v38 }
0x1635   : > { %8031 = vmatprep.subr.bf16.mxu0 %v8586_v9 }
0x1636   : > { %v3509_v54 = vpop.permute.xlu1 %3508 }
0x1637   : > { %v3514_v58 = vsel %vm1665_vm5, %v3509_v54, 0 }
0x1638   : > { %v8429_v17 = vpop.eup %8428 }
0x1639   : > { %v3246_v18 = vsel %vm1665_vm5, %v8429_v17, 0.0 }
0x163a   : > { %3247 = vadd.xlane.f32.xlu0 %v3246_v18  ;;  %v3507_v61 = vpop.permute.xlu1 %3506 }
0x1640   : > { %v8431_v19 = vpop.eup %8430 }
0x1641   : > { %v3359_v34 = vsel %vm1665_vm5, %v8431_v19, 0.0 }
0x1642   : > { %3360 = vadd.xlane.f32.xlu0 %v3359_v34 }
0x1653   : > { %v3124_v21 = vpop.f32.mrf.mxu0 }
0x1654   : > { %v9319_v22 = vadd.f32 %v3124_v21, %v9267_v24 }
0x1655   : > { %v8011_v23 = vpop.f32.mrf.mxu0 }
0x1657   : > { %v3127_v26 = vpop.f32.mrf.mxu0 }
0x1658   : > { %3365 = vrot.lane.b32.xlu0 %v9130_v12, %s8601_s2 }
0x1659   : > { %v8012_v31 = vpop.f32.mrf.mxu0 }
0x16c3   : > { %v3248_v32 = vpop.xlane.xlu0 %3247 }
0x16c4   : > { %8432 = vrcp.f32 %v3248_v32 }
0x16cb   : > { %v3361_v35 = vpop.xlane.xlu0 %3360 }
0x16cc   : > { %8434 = vrcp.f32 %v3361_v35 }
0x16cf   : > { %v3366_v40 = vpop.permute.xlu0 %3365 }
0x16d0   : > { %v3371_v33 = vsel %vm1731_vm7, %v3366_v40, 0 }
0x16d1   : > { %v8433_v36 = vpop.eup %8432 }
0x16d2   : > { %v3250_v37 = vmul.f32 %v8433_v36, %v8429_v17 }
0x16d4   : > { %v3251_v41 = vpack.c.bf16 %v3250_v37, %v3250_v37  ;;  %v3179_v37 = vld [vmem:[%s8928_s12 + $0x8] sm:$0xf] }
0x16d5   : > { %v3623_v40 = vsel %vm1731_vm7, %v3179_v37, 0 }
0x16d6   : > { %8022 = vmatmul.mubr.msk.bf16.vlgmr.msra.gmra.mxu0 %vm1665_vm5, %v3251_v41 }
0x16d7   : > { %8032 = vmatpush3.bf16.msra.mxu0 %v3371_v33  ;;  %8033 = vmatprep.mubr.msk.bf16.mxu0 %vm8587_vm2, %v8586_v9 }
0x16d8   : > { %8043 = vmatprep.subr.bf16.mxu0 %v8586_v9 }
0x16d9   : > { %v8435_v24 = vpop.eup %8434 }
0x16da   : > { %v3363_v39 = vmul.f32 %v8435_v24, %v8431_v19 }
0x16dc   : > { %v3364_v43 = vpack.c.bf16 %v3363_v39, %v3363_v39 }
0x16de   : > { %8034 = vmatmul.mubr.msk.bf16.vlgmr.msra.gmra.mxu0 %vm1665_vm5, %v3364_v43 }
0x16df   : > { %8045 = vmatprep.mubr.msk.bf16.mxu0 %vm8587_vm2, %v8586_v9  ;;  %8044 = vmatpush3.bf16.msra.mxu0 %v3464_v45 }
0x16e0   : > { %8055 = vmatprep.subr.bf16.mxu0 %v8586_v9 }
0x1796   : > { %v3294_v48 = vpop.f32.mrf.mxu0 }
0x1797   : > { %v3300_v49 = vpack.c.bf16 %v3294_v48, %v3294_v48 }
0x1798   : > { %v8023_v50 = vpop.f32.mrf.mxu0 }
0x1799   : > { %8046 = vmatmul.mubr.msk.bf16.vlgmr.msra.gmra.mxu0 %vm1665_vm5, %v3300_v49 }
0x179a   : > { %v3297_v51 = vpop.f32.mrf.mxu0  ;;  %8057 = vmatprep.mubr.msk.bf16.mxu0 %vm8587_vm2, %v8586_v9 }
0x179c   : > { %v8024_v53 = vpop.f32.mrf.mxu0 }
0x179e   : > { %v3407_v55 = vpop.f32.mrf.mxu0 }
0x179f   : > { %v3413_v56 = vpack.c.bf16 %v3407_v55, %v3407_v55 }
0x17a0   : > { %v8035_v57 = vpop.f32.mrf.mxu0 }
0x17a1   : > { %8040 = vmatmul.mubr.msk.bf16.vlgmr.msra.gmra.mxu1 %vm1665_vm5, %v3413_v56 }
0x17a2   : > { %8050 = vmatpush3.bf16.xpose.msra.mxu1 %v3514_v58  ;;  %v3410_v25 = vpop.f32.mrf.mxu0  ;;  %8051 = vmatprep.mubr.msk.bf16.mxu1 %vm8587_vm2, %v8586_v9  ;;  %v3180_v58 = vld [vmem:[%s8928_s12 + $0xc] sm:$0xf] }
0x17a3   : > { %8061 = vmatprep.subr.bf16.mxu1 %v8586_v9 }
0x17a4   : > { %v8036_v60 = vpop.f32.mrf.mxu0 }
0x17a5   : > { %v3783_v60 = vsel %vm1731_vm7, %v3180_v58, 0 }
0x17a9   : > { %8052 = vmatmul.mubr.msk.bf16.vlgmr.msra.gmra.mxu1 %vm1665_vm5, %v3507_v61 }
0x17aa   : > { %8063 = vmatprep.mubr.msk.bf16.mxu1 %vm8587_vm2, %v8586_v9  ;;  %8062 = vmatpush3.bf16.msra.mxu1 %v3623_v40  ;;  %v3920_v40 = vld [vmem:[%s8940_s8 + $0x80] sm:$0xff] }
0x17ab   : > { %8073 = vmatprep.subr.bf16.mxu1 %v8586_v9 }
0x1859   : > { %v3500_v62 = vpop.f32.mrf.mxu0 }
0x185b   : > { %v8047_v63 = vpop.f32.mrf.mxu0 }
0x185d   : > { %v3503_v0 = vpop.f32.mrf.mxu0 }
0x185f   : > { %v8048_v1 = vpop.f32.mrf.mxu0 }
0x1861   : > { %v3454_v2 = vpop.f32.mrf.mxu1 }
0x1862   : > { %v9347_v3 = vadd.f32 %v3500_v62, %v3454_v2 }
0x1863   : > { %v8041_v4 = vpop.f32.mrf.mxu1 }
0x1865   : > { %v3457_v5 = vpop.f32.mrf.mxu1 }
0x1867   : > { %v8042_v6 = vpop.f32.mrf.mxu1 }
0x1869   : > { %v3550_v7 = vpop.f32.mrf.mxu1 }
0x186a   : > { %v3556_v8 = vmul.f32 0.35355338, %v3550_v7 }
0x186b   : > { %v8053_v10 = vpop.f32.mrf.mxu1 }
0x186c   : > { %v3557_v11 = vsel %vm9299_vm0, %v3556_v8, -1e+09  ;;  %v7320_v8 = vld [vmem:[%s1505_s6] ss:$0 sm:$0xff]  ;;  %s10030_s6 = sld [smem:[#allocation19_spill]] }
0x186d   : > { %v3553_v13 = vpop.f32.mrf.mxu1  ;;  %v3558_v14 = vsel %vm1665_vm5, %v3557_v11, -inf  ;;  %v7335_v10 = vld [vmem:[%s1513_s30] ss:$0 sm:$0xff]  ;;  %s10029_s30 = sld [smem:[#allocation18_spill]] }
0x186e   : > { %3559 = vmax.xlane.f32.xlu0 %v3558_v14 }
0x186f   : > { %v8054_v15 = vpop.f32.mrf.mxu1 }
0x1870   : > { %v3137_v15 = vadd.f32 %v7320_v8, %v9319_v22 }
0x1872   : > { %s10032_s16 = scalar_lea.vmem %s10030_s6, %s8868_s10 }
0x1873   : > { %s10031_s12 = scalar_lea.vmem %s10029_s30, %s8868_s10 }
0x1884   : > { %3570 = vrot.lane.b32.xlu0 %v9130_v12, %s8602_s7 }
0x1888   : > { %3666 = vrot.lane.b32.xlu0 %v9140_v20, %s8597_s19  ;;  %s10036_s19 = scalar_lea.vmem %s10035_s3, %s8868_s10 }
0x18f7   : > { %v3560_v16 = vpop.xlane.xlu0 %3559 }
0x18f8   : > { %v3561_v38 = vsub.f32 %v3557_v11, %v3560_v16 }
0x18fa   : > { %v3562_v17 = vmul.f32 1.442695, %v3561_v38 }
0x18fb   : > { %v3571_v18 = vpop.permute.xlu0 %3570 }
0x18fc   : > { %8436 = vpow2.f32 %v3562_v17  ;;  %v3576_v19 = vsel %vm1731_vm7, %v3571_v18, 0 }
0x18fd   : > { %8056 = vmatpush3.bf16.msra.mxu0 %v3576_v19 }
0x18fe   : > { %8067 = vmatprep.subr.bf16.mxu0 %v8586_v9 }
0x18ff   : > { %v3667_v36 = vpop.permute.xlu0 %3666 }
0x1909   : > { %v8437_v34 = vpop.eup %8436 }
0x190a   : > { %v3564_v21 = vsel %vm1665_vm5, %v8437_v34, 0.0 }
0x190b   : > { %3565 = vadd.xlane.f32.xlu1 %v3564_v21 }
0x191c   : > { %3668 = vrot.lane.b32.xlu1 %v9130_v12, %s8598_s27 }
0x1994   : > { %v3566_v23 = vpop.xlane.xlu1 %3565 }
0x1995   : > { %8438 = vrcp.f32 %v3566_v23 }
0x1998   : > { %v3669_v31 = vpop.permute.xlu1 %3668 }
0x1999   : > { %v3674_v35 = vsel %vm1665_vm5, %v3669_v31, 0 }
0x19a2   : > { %v8439_v20 = vpop.eup %8438 }
0x19a3   : > { %v3568_v26 = vmul.f32 %v8439_v20, %v8437_v34  ;;  %v3138_v34 = vadd.f32 %v3137_v15, %v9094_v42  ;;  %v3906_v15 = vld [vmem:[%s8940_s8 + $0x10] sm:$0xff] }
0x19a5   : > { %v3569_v32 = vpack.c.bf16 %v3568_v26, %v3568_v26  ;;  %v3141_v21 = vsel %vm1551_vm1, %v3138_v34, 0.0 }
0x19a7   : > { %8058 = vmatmul.mubr.msk.bf16.vlgmr.msra.gmra.mxu0 %vm1665_vm5, %v3569_v32 }
0x19a8   : > { %8068 = vmatpush3.bf16.xpose.msra.mxu0 %v3674_v35  ;;  %8069 = vmatprep.mubr.msk.bf16.mxu0 %vm8587_vm2, %v8586_v9 }
0x19a9   : > { %8079 = vmatprep.subr.bf16.mxu0 %v8586_v9 }
0x19af   : > { %8070 = vmatmul.mubr.msk.bf16.vlgmr.msra.gmra.mxu0 %vm1665_vm5, %v3667_v36 }
0x19b0   : > { %8081 = vmatprep.mubr.msk.bf16.mxu0 %vm8587_vm2, %v8586_v9  ;;  %8080 = vmatpush3.bf16.msra.mxu0 %v3783_v60 }
0x1a67   : > { %v3612_v41 = vpop.f32.mrf.mxu0 }
0x1a68   : > { %v3618_v33 = vpack.c.bf16 %v3612_v41, %v3612_v41  ;;  %v3928_v41 = vld [vmem:[%s8940_s8 + $0xc0] sm:$0xff] }
0x1a69   : > { %v8059_v24 = vpop.f32.mrf.mxu0 }
0x1a6a   : > { %8064 = vmatmul.mubr.msk.bf16.vlgmr.msra.gmra.mxu1 %vm1665_vm5, %v3618_v33  ;;  %v3921_v33 = vld [vmem:[%s8940_s8 + $0x88] sm:$0xff]  ;;  %v7354_v24 = vcombine.low %v3920_v40, %v3928_v41 }
0x1a6b   : > { %v3615_v39 = vpop.f32.mrf.mxu0  ;;  %8075 = vmatprep.mubr.msk.bf16.mxu1 %vm8587_vm2, %v8586_v9 }
0x1a6c   : > { %v7355_v39 = vcombine.high %v3920_v40, %v3928_v41 }
0x1a6d   : > { %v8060_v43 = vpop.f32.mrf.mxu0 }
0x1a6e   : > { %v3929_v43 = vld [vmem:[%s8940_s8 + $0xc8] sm:$0xff] }
0x1a6f   : > { %v3710_v44 = vpop.f32.mrf.mxu0 }
0x1a70   : > { %v3716_v45 = vmul.f32 0.35355338, %v3710_v44  ;;  %v3904_v44 = vld [vmem:[%s8940_s8] sm:$0xff] }
0x1a71   : > { %v8071_v46 = vpop.f32.mrf.mxu0 }
0x1a72   : > { %v3717_v47 = vsel %vm9299_vm0, %v3716_v45, -1e+09  ;;  %v3912_v45 = vld [vmem:[%s8940_s8 + $0x40] sm:$0xff]  ;;  %v7356_v46 = vcombine.low %v3921_v33, %v3929_v43 }
0x1a73   : > { %v3713_v48 = vpop.f32.mrf.mxu0  ;;  %v3718_v49 = vsel %vm1665_vm5, %v3717_v47, -inf }
0x1a74   : > { %3719 = vmax.xlane.f32.xlu1 %v3718_v49  ;;  %v7339_v48 = vcombine.high %v3904_v44, %v3912_v45  ;;  %v3905_v49 = vld [vmem:[%s8940_s8 + $0x8] sm:$0xff] }
0x1a75   : > { %v8072_v50 = vpop.f32.mrf.mxu0 }
0x1a76   : > { %v3913_v50 = vld [vmem:[%s8940_s8 + $0x48] sm:$0xff] }
0x1afd   : > { %v3720_v51 = vpop.xlane.xlu1 %3719 }
0x1afe   : > { %v3721_v53 = vsub.f32 %v3717_v47, %v3720_v51  ;;  %v7357_v47 = vcombine.high %v3921_v33, %v3929_v43  ;;  %v7341_v51 = vcombine.high %v3905_v49, %v3913_v50  ;;  %v3909_v43 = vld [vmem:[%s8940_s8 + $0x28] sm:$0xff] }
0x1b00   : > { %v3722_v54 = vmul.f32 1.442695, %v3721_v53  ;;  %4152 = vmatprep.subr.bf16.mxu0 %v7357_v47  ;;  %v7338_v53 = vcombine.low %v3904_v44, %v3912_v45  ;;  %v3917_v44 = vld [vmem:[%s8940_s8 + $0x68] sm:$0xff] }
0x1b02   : > { %8440 = vpow2.f32 %v3722_v54  ;;  %v7340_v54 = vcombine.low %v3905_v49, %v3913_v50  ;;  %v3926_v49 = vld [vmem:[%s8940_s8 + $0xb0] sm:$0xff] }
0x1b03   : > { %v3934_v50 = vld [vmem:[%s8940_s8 + $0xf0] sm:$0xff] }
0x1b0f   : > { %v8441_v55 = vpop.eup %8440 }
0x1b10   : > { %v3724_v9 = vsel %vm1665_vm5, %v8441_v55, 0.0 }
0x1b11   : > { %3725 = vadd.xlane.f32.xlu0 %v3724_v9  ;;  %v3930_v9 = vld [vmem:[%s8940_s8 + $0xd0] sm:$0xff] }
0x1b27   : > { %3730 = vrot.lane.b32.xlu0 %v9130_v12, %s8603_s22 }
0x1b2a   : > { %v3659_v56 = vpop.f32.mrf.mxu1 }
0x1b2b   : > { %v3665_v59 = vadd.f32 %v3659_v56, %v9347_v3  ;;  %v3923_v56 = vld [vmem:[%s8940_s8 + $0x98] sm:$0xff] }
0x1b2c   : > { %v8065_v57 = vpop.f32.mrf.mxu1 }
0x1b2d   : > { %v3931_v57 = vld [vmem:[%s8940_s8 + $0xd8] sm:$0xff] }
0x1b2e   : > { %v3662_v25 = vpop.f32.mrf.mxu1  ;;  %v7361_v60 = vcombine.high %v3923_v56, %v3931_v57 }
0x1b2f   : > { %v7360_v25 = vcombine.low %v3923_v56, %v3931_v57  ;;  %v3918_v57 = vld [vmem:[%s8940_s8 + $0x70] sm:$0xff] }
0x1b30   : > { %v8066_v61 = vpop.f32.mrf.mxu1 }
0x1b9a   : > { %v3726_v62 = vpop.xlane.xlu0 %3725 }
0x1b9b   : > { %8442 = vrcp.f32 %v3726_v62 }
0x1b9e   : > { %v3731_v63 = vpop.permute.xlu0 %3730 }
0x1b9f   : > { %v3736_v0 = vsel %vm1731_vm7, %v3731_v63, 0 }
0x1ba0   : > { %8074 = vmatpush3.bf16.msra.mxu1 %v3736_v0 }
0x1ba1   : > { %4111 = vmatprep.subr.bf16.mxu1 %v7355_v39  ;;  %v3916_v39 = vld [vmem:[%s8940_s8 + $0x60] sm:$0xff] }
0x1ba8   : > { %v8443_v12 = vpop.eup %8442 }
0x1ba9   : > { %v3728_v1 = vmul.f32 %v8443_v12, %v8441_v55  ;;  %v3922_v55 = vld [vmem:[%s8940_s8 + $0x90] sm:$0xff] }
0x1baa   : > { %v7358_v58 = vcombine.low %v3922_v55, %v3930_v9 }
0x1bab   : > { %v3729_v2 = vpack.c.bf16 %v3728_v1, %v3728_v1 }
0x1bad   : > { %8076 = vmatmul.mubr.msk.bf16.vlgmr.msra.gmra.mxu1 %vm1665_vm5, %v3729_v2 }
0x1bae   : > { %4131 = vmatprep.mubr.bf16.mxu1 %v8599_v29  ;;  %4112 = vmatpush1.bf16.msra.mxu1 %v7354_v24  ;;  %v3908_v24 = vld [vmem:[%s8940_s8 + $0x20] sm:$0xff] }
0x1baf   : > { %4113 = vmatprep.subr.bf16.mxu1 %v7339_v48  ;;  %v7347_v47 = vcombine.high %v3908_v24, %v3916_v39  ;;  %v7349_v48 = vcombine.high %v3909_v43, %v3917_v44 }
0x1bb2   : > { %4114 = vmatpush1.bf16.msra.mxu1 %v7338_v53  ;;  %v3935_v53 = vld [vmem:[%s8940_s8 + $0xf8] sm:$0xff] }
0x1c6d   : > { %v3772_v3 = vpop.f32.mrf.mxu1 }
0x1c6e   : > { %v3778_v4 = vpack.c.bf16 %v3772_v3, %v3772_v3 }
0x1c6f   : > { %v8077_v5 = vpop.f32.mrf.mxu1 }
0x1c70   : > { %8082 = vmatmul.mubr.msk.bf16.vlgmr.msra.gmra.mxu0 %vm1665_vm5, %v3778_v4 }
0x1c71   : > { %v3775_v6 = vpop.f32.mrf.mxu1  ;;  %4172 = vmatprep.mubr.bf16.mxu0 %v8599_v29  ;;  %4153 = vmatpush1.bf16.msra.mxu0 %v7356_v46 }
0x1c72   : > { %4154 = vmatprep.subr.bf16.mxu0 %v7341_v51  ;;  %v3927_v51 = vld [vmem:[%s8940_s8 + $0xb8] sm:$0xff] }
0x1c73   : > { %v8078_v7 = vpop.f32.mrf.mxu1  ;;  %v7369_v56 = vcombine.high %v3927_v51, %v3935_v53 }
0x1c74   : > { %v7336_v7 = vld [vmem:[%s10031_s12] ss:$0 sm:$0xff] }
0x1c75   : > { %4155 = vmatpush1.bf16.msra.mxu0 %v7340_v54  ;;  %v7346_v54 = vcombine.low %v3908_v24, %v3916_v39 }
0x1c76   : > { %4234 = vmatprep.subr.bf16.mxu0 %v7361_v60  ;;  %v7366_v60 = vcombine.low %v3926_v49, %v3934_v50 }
0x1d30   : > { %v3819_v11 = vpop.f32.mrf.mxu0 }
0x1d31   : > { %v3825_v13 = vadd.f32 %v3819_v11, %v3665_v59  ;;  %v7359_v59 = vcombine.high %v3922_v55, %v3930_v9  ;;  %v7348_v55 = vcombine.low %v3909_v43, %v3917_v44  ;;  %v7367_v9 = vcombine.high %v3926_v49, %v3934_v50  ;;  %v3900_v49 = vld [vmem:[%s8937_s15 + $0xe8] sm:$0xff] }
0x1d32   : > { %v8083_v14 = vpop.f32.mrf.mxu0 }
0x1d33   : > { %v3832_v16 = vadd.f32 %v7335_v10, %v3825_v13  ;;  %4193 = vmatprep.subr.bf16.mxu1 %v7359_v59  ;;  %v7337_v13 = vld [vmem:[%s10032_s16] ss:$0 sm:$0xff]  ;;  %v3910_v59 = vld [vmem:[%s8940_s8 + $0x30] sm:$0xff] }
0x1d34   : > { %v3822_v38 = vpop.f32.mrf.mxu0 }
0x1d35   : > { %v3833_v17 = vadd.f32 %v3832_v16, %v9094_v42  ;;  %v3914_v16 = vld [vmem:[%s8940_s8 + $0x50] sm:$0xff]  ;;  %v3907_v38 = vld [vmem:[%s8940_s8 + $0x18] sm:$0xff] }
0x1d36   : > { %v8084_v18 = vpop.f32.mrf.mxu0 }
0x1d37   : > { %v3836_v19 = vsel %vm1551_vm1, %v3833_v17, 0.0 }
0x1d38   : > { %3837 = vadd.xlane.f32.xlu1 %v3836_v19 }
0x1d3c   : > { %3142 = vadd.xlane.f32.xlu1 %v3141_v21 }
0x1dc1   : > { %v3838_v23 = vpop.xlane.xlu1 %3837 }
0x1dc2   : > { %v3839_v20 = vmul.f32 0.03125, %v3838_v23  ;;  %v7343_v23 = vcombine.high %v3906_v15, %v3914_v16 }
0x1dc4   : > { %v3840_v22 = vsub.f32 %v3833_v17, %v3839_v20  ;;  %v3915_v17 = vld [vmem:[%s8940_s8 + $0x58] sm:$0xff] }
0x1dc5   : > { %v3143_v26 = vpop.xlane.xlu1 %3142  ;;  %v7345_v20 = vcombine.high %v3907_v38, %v3915_v17 }
0x1dc6   : > { %v3144_v31 = vmul.f32 0.03125, %v3143_v26  ;;  %v3841_v32 = vmul.f32 %v3840_v22, %v3840_v22  ;;  %v3852_v8 = vmul.f32 %v7336_v7, %v3840_v22  ;;  %v3924_v22 = vld [vmem:[%s8940_s8 + $0xa0] sm:$0xff] }
0x1dc8   : > { %v9398_v35 = vsub.f32 %v3138_v34, %v3144_v31  ;;  %v3842_v42 = vsel %vm1551_vm1, %v3841_v32, 0.0  ;;  %v3932_v31 = vld [vmem:[%s8940_s8 + $0xe0] sm:$0xff]  ;;  %v3925_v32 = vld [vmem:[%s8940_s8 + $0xa8] sm:$0xff] }
0x1dc9   : > { %3843 = vadd.xlane.f32.xlu1 %v3842_v42  ;;  %v3933_v42 = vld [vmem:[%s8940_s8 + $0xe8] sm:$0xff]  ;;  %v7363_v41 = vcombine.high %v3924_v22, %v3932_v31  ;;  %v7362_v45 = vcombine.low %v3924_v22, %v3932_v31  ;;  %v3897_v22 = vld [vmem:[%s8937_s15 + $0xd0] sm:$0xff]  ;;  %v3898_v31 = vld [vmem:[%s8937_s15 + $0xd8] sm:$0xff] }
0x1dca   : > { %v3146_v36 = vmul.f32 %v9398_v35, %v9398_v35  ;;  %v7365_v33 = vcombine.high %v3925_v32, %v3933_v42  ;;  %v7364_v46 = vcombine.low %v3925_v32, %v3933_v42 }
0x1dcc   : > { %v3147_v37 = vsel %vm1551_vm1, %v3146_v36, 0.0  ;;  %v7342_v36 = vcombine.low %v3906_v15, %v3914_v16 }
0x1dcd   : > { %3148 = vadd.xlane.f32.xlu1 %v3147_v37  ;;  %v7344_v37 = vcombine.low %v3907_v38, %v3915_v17 }
0x1e52   : > { %v3844_v61 = vpop.xlane.xlu1 %3843 }
0x1e53   : > { %v3845_v62 = vmul.f32 0.032258064, %v3844_v61  ;;  %v7368_v61 = vcombine.low %v3927_v51, %v3935_v53 }
0x1e55   : > { %8444 = vrsqrt.f32 %v3845_v62  ;;  %vm3855_vm2 = vcmp.eq.f32.partialorder %v3845_v62, inf  ;;  %v3858_v2 = vand.u32 2147483648, %v3845_v62  ;;  %vm3857_vm3 = vcmp.eq.f32.partialorder %v3845_v62, 0.0 }
0x1e56   : > { %v3149_v63 = vpop.xlane.xlu1 %3148 }
0x1e57   : > { %v3150_v0 = vmul.f32 0.032258064, %v3149_v63 }
0x1e59   : > { %8446 = vrsqrt.f32 %v3150_v0  ;;  %vm3160_vm4 = vcmp.eq.f32.partialorder %v3150_v0, inf  ;;  %v3163_v34 = vand.u32 2147483648, %v3150_v0  ;;  %vm3162_vm6 = vcmp.eq.f32.partialorder %v3150_v0, 0.0 }
0x1e62   : > { %v8445_v12 = vpop.eup %8444 }
0x1e63   : > { %v3854_v1 = vmul.f32 %v8445_v12, %v3845_v62  ;;  %v3895_v12 = vld [vmem:[%s8937_s15 + $0xc0] sm:$0xff] }
0x1e65   : > { %v3856_v3 = vsel %vm3855_vm2, %v3845_v62, %v3854_v1  ;;  %v7351_v62 = vcombine.high %v3910_v59, %v3918_v57  ;;  %v3888_v1 = vld [vmem:[%s8937_s15 + $0x88] sm:$0xff] }
0x1e66   : > { %v3859_v4 = vsel %vm3857_vm3, %v3858_v2, %v3856_v3  ;;  %v8447_v6 = vpop.eup %8446  ;;  %v3896_v2 = vld [vmem:[%s8937_s15 + $0xc8] sm:$0xff] }
0x1e67   : > { %v3860_v5 = vadd.f32 1e-06, %v3859_v4  ;;  %v3159_v10 = vmul.f32 %v8447_v6, %v3150_v0  ;;  %v7350_v4 = vcombine.low %v3910_v59, %v3918_v57  ;;  %v7397_v7 = vcombine.high %v3888_v1, %v3896_v2  ;;  %v3884_v59 = vld [vmem:[%s8937_s15 + $0x68] sm:$0xff] }
0x1e68   : > { %v7396_v38 = vcombine.low %v3888_v1, %v3896_v2 }
0x1e69   : > { %8448 = vrcp.f32 %v3860_v5  ;;  %v3161_v18 = vsel %vm3160_vm4, %v3150_v0, %v3159_v10  ;;  %v3887_v0 = vld [vmem:[%s8937_s15 + $0x80] sm:$0xff] }
0x1e6a   : > { %v3164_v26 = vsel %vm3162_vm6, %v3163_v34, %v3161_v18  ;;  %v7395_v6 = vcombine.high %v3887_v0, %v3895_v12  ;;  %v7394_v16 = vcombine.low %v3887_v0, %v3895_v12  ;;  %v7322_v34 = vld [vmem:[%s10036_s19] ss:$0 sm:$0xff]  ;;  %v3902_v0 = vld [vmem:[%s8937_s15 + $0xf8] sm:$0xff] }
0x1e6b   : > { %v3165_v40 = vadd.f32 1e-06, %v3164_v26  ;;  %v3890_v26 = vld [vmem:[%s8937_s15 + $0x98] sm:$0xff] }
0x1e6c   : > { %v7400_v39 = vcombine.low %v3890_v26, %v3898_v31 }
0x1e6d   : > { %8450 = vrcp.f32 %v3165_v40  ;;  %v3873_v40 = vld [vmem:[%s8937_s15 + $0x10] sm:$0xff] }
0x1e76   : > { %v8449_v11 = vpop.eup %8448 }
0x1e77   : > { %v3862_v14 = vmul.f32 %v8449_v11, %v3852_v8  ;;  %v3871_v8 = vld [vmem:[%s8937_s15] sm:$0xff] }
0x1e78   : > { %v3879_v11 = vld [vmem:[%s8937_s15 + $0x40] sm:$0xff] }
0x1e79   : > { %v9426_v19 = vadd.f32 %v7337_v13, %v3862_v14  ;;  %v3872_v13 = vld [vmem:[%s8937_s15 + $0x8] sm:$0xff]  ;;  %v7379_v17 = vcombine.high %v3871_v8, %v3879_v11 }
0x1e7a   : > { %v8451_v10 = vpop.eup %8450  ;;  %v3880_v14 = vld [vmem:[%s8937_s15 + $0x48] sm:$0xff] }
0x1e7b   : > { %v9430_v21 = vpack.c.bf16 %v9426_v19, %v9426_v19  ;;  %v7381_v18 = vcombine.high %v3872_v13, %v3880_v14  ;;  %v7380_v32 = vcombine.low %v3872_v13, %v3880_v14 }
0x1e7d   : > { %7370 = vmatmul.mubr.msk.bf16.vlgmr.msra.gmra.mxu1 %vm1551_vm1, %v9430_v21  ;;  %7371 = vmatmul.mubr.msk.bf16.vlgmr.msra.gmra.mxu0 %vm1551_vm1, %v9430_v21 }
0x1e7e   : > { %4194 = vmatpush1.bf16.msra.mxu1 %v7358_v58  ;;  %4235 = vmatpush1.bf16.msra.mxu0 %v7360_v25  ;;  %v3911_v58 = vld [vmem:[%s8940_s8 + $0x38] sm:$0xff] }
0x1e7f   : > { %4195 = vmatprep.subr.bf16.mxu1 %v7343_v23  ;;  %4236 = vmatprep.subr.bf16.mxu0 %v7345_v20  ;;  %v3919_v25 = vld [vmem:[%s8940_s8 + $0x78] sm:$0xff]  ;;  %s10034_s8 = scalar_lea.vmem %s10033_s29, %s8868_s10  ;;  %v3889_v20 = vld [vmem:[%s8937_s15 + $0x90] sm:$0xff] }
0x1e80   : > { %4213 = vmatprep.mubr.bf16.mxu1 %v8599_v29  ;;  %4254 = vmatprep.mubr.bf16.mxu0 %v8599_v29  ;;  %v7353_v63 = vcombine.high %v3911_v58, %v3919_v25  ;;  %v7321_v3 = vld [vmem:[%s10034_s8] ss:$0 sm:$0xff]  ;;  %v7352_v5 = vcombine.low %v3911_v58, %v3919_v25  ;;  %v7398_v24 = vcombine.low %v3889_v20, %v3897_v22 }
0x1e81   : > { %v3157_v15 = vmul.f32 %v7321_v3, %v9398_v35  ;;  %v7378_v35 = vcombine.low %v3871_v8, %v3879_v11 }
0x1e82   : > { %4196 = vmatpush1.bf16.msra.mxu1 %v7342_v36  ;;  %4237 = vmatpush1.bf16.msra.mxu0 %v7344_v37  ;;  %v7399_v36 = vcombine.high %v3889_v20, %v3897_v22  ;;  %v7401_v37 = vcombine.high %v3890_v26, %v3898_v31  ;;  %v8267_v20 = vld [vmem:[%s8946_s17 + $0xb0] sm:$0xff]   ;;  %v8268_v22 = vld [vmem:[%s8946_s17 + $0x68] sm:$0xff]  }
0x1e83   : > { %4275 = vmatprep.subr.bf16.mxu1 %v7363_v41  ;;  %4316 = vmatprep.subr.bf16.mxu0 %v7365_v33  ;;  %v3167_v23 = vmul.f32 %v8451_v10, %v3157_v15  ;;  %v3874_v41 = vld [vmem:[%s8937_s15 + $0x18] sm:$0xff]  ;;  %v8269_v26 = vld [vmem:[%s8946_s17 + $0xe8] sm:$0xff]  }
0x1e84   : > { %v3882_v33 = vld [vmem:[%s8937_s15 + $0x58] sm:$0xff]  ;;  %v8270_v31 = vld [vmem:[%s8946_s17 + $0x28] sm:$0xff]  }
0x1e85   : > { %7372 = vmatmul.mubr.msk.bf16.vlgmr.msra.gmra.mxu1 %vm1551_vm1, %v9430_v21  ;;  %7373 = vmatmul.mubr.msk.bf16.vlgmr.msra.gmra.mxu0 %vm1551_vm1, %v9430_v21  ;;  %v9489_v42 = vadd.f32 %v7322_v34, %v3167_v23  ;;  %v7384_v51 = vcombine.low %v3874_v41, %v3882_v33  ;;  %v8265_v34 = vld [vmem:[%s8946_s17 + $0xf0] sm:$0xff]  }
0x1e86   : > { %4276 = vmatpush1.bf16.msra.mxu1 %v7362_v45  ;;  %4317 = vmatpush1.bf16.msra.mxu0 %v7364_v46  ;;  %v7385_v45 = vcombine.high %v3874_v41, %v3882_v33  ;;  %v3891_v46 = vld [vmem:[%s8937_s15 + $0xa0] sm:$0xff]  ;;  %v8266_v23 = vld [vmem:[%s8946_s17 + $0x30] sm:$0xff]   ;;  %v8277_v41 = vld [vmem:[%s8946_s17 + $0xd8] sm:$0xff]  }
0x1e87   : > { %4277 = vmatprep.subr.bf16.mxu1 %v7347_v47  ;;  %4318 = vmatprep.subr.bf16.mxu0 %v7349_v48  ;;  %v9499_v43 = vpack.c.bf16 %v9489_v42, %v9489_v42  ;;  %v3899_v47 = vld [vmem:[%s8937_s15 + $0xe0] sm:$0xff]  ;;  %v3892_v48 = vld [vmem:[%s8937_s15 + $0xa8] sm:$0xff]  ;;  %v8278_v33 = vld [vmem:[%s8946_s17 + $0x18] sm:$0xff]  }
0x1e88   : > { %4295 = vmatprep.mubr.bf16.mxu1 %v8599_v29  ;;  %4336 = vmatprep.mubr.bf16.mxu0 %v8599_v29  ;;  %v7403_v53 = vcombine.high %v3891_v46, %v3899_v47  ;;  %v7402_v57 = vcombine.low %v3891_v46, %v3899_v47  ;;  %v7404_v58 = vcombine.low %v3892_v48, %v3900_v49  ;;  %v8284_v46 = vld [vmem:[%s8946_s17 + $0x48] sm:$0xff]  }
0x1e89   : > { %v8285_v47 = vld [vmem:[%s8946_s17 + $0xc8] sm:$0xff]  }
0x1e8a   : > { %4278 = vmatpush1.bf16.msra.mxu1 %v7346_v54  ;;  %4319 = vmatpush1.bf16.msra.mxu0 %v7348_v55  ;;  %v7405_v54 = vcombine.high %v3892_v48, %v3900_v49  ;;  %v3875_v55 = vld [vmem:[%s8937_s15 + $0x20] sm:$0xff]  ;;  %v8286_v48 = vld [vmem:[%s8946_s17 + $0x8] sm:$0xff]  }
0x1e8b   : > { %4357 = vmatprep.subr.bf16.mxu1 %v7367_v9  ;;  %4398 = vmatprep.subr.bf16.mxu0 %v7369_v56  ;;  %v3883_v9 = vld [vmem:[%s8937_s15 + $0x60] sm:$0xff]  ;;  %v3876_v56 = vld [vmem:[%s8937_s15 + $0x28] sm:$0xff] }
0x1e8c   : > { %v7387_v25 = vcombine.high %v3875_v55, %v3883_v9  ;;  %v7386_v12 = vcombine.low %v3875_v55, %v3883_v9  ;;  %v7388_v1 = vcombine.low %v3876_v56, %v3884_v59  ;;  %v8287_v49 = vld [vmem:[%s8946_s17 + $0x88] sm:$0xff]   ;;  %v8292_v55 = vld [vmem:[%s8946_s17 + $0x178] sm:$0xff]  }
0x1e8d   : > { %7374 = vmatmul.mubr.msk.bf16.vlgmr.msra.gmra.mxu1 %vm1551_vm1, %v9430_v21  ;;  %7375 = vmatmul.mubr.msk.bf16.vlgmr.msra.gmra.mxu0 %vm1551_vm1, %v9430_v21  ;;  %v8293_v9 = vld [vmem:[%s8946_s17 + $0x1f8] sm:$0xff]  }
0x1e8e   : > { %4358 = vmatpush1.bf16.msra.mxu1 %v7366_v60  ;;  %4399 = vmatpush1.bf16.msra.mxu0 %v7368_v61  ;;  %v7389_v60 = vcombine.high %v3876_v56, %v3884_v59  ;;  %v3893_v61 = vld [vmem:[%s8937_s15 + $0xb0] sm:$0xff] }
0x1e8f   : > { %4359 = vmatprep.subr.bf16.mxu1 %v7351_v62  ;;  %4400 = vmatprep.subr.bf16.mxu0 %v7353_v63  ;;  %v3901_v62 = vld [vmem:[%s8937_s15 + $0xf0] sm:$0xff]  ;;  %v3894_v63 = vld [vmem:[%s8937_s15 + $0xb8] sm:$0xff] }
0x1e90   : > { %4377 = vmatprep.mubr.bf16.mxu1 %v8599_v29  ;;  %4418 = vmatprep.mubr.bf16.mxu0 %v8599_v29  ;;  %v7407_v2 = vcombine.high %v3893_v61, %v3901_v62  ;;  %v7409_v3 = vcombine.high %v3894_v63, %v3902_v0  ;;  %v7406_v8 = vcombine.low %v3893_v61, %v3901_v62 }
0x1e91   : > { %v7408_v10 = vcombine.low %v3894_v63, %v3902_v0 }
0x1e92   : > { %4360 = vmatpush1.bf16.msra.mxu1 %v7350_v4  ;;  %4401 = vmatpush1.bf16.msra.mxu0 %v7352_v5  ;;  %v3877_v4 = vld [vmem:[%s8937_s15 + $0x30] sm:$0xff] }
0x1e93   : > { %4602 = vmatprep.subr.bf16.mxu1 %v7395_v6  ;;  %4643 = vmatprep.subr.bf16.mxu0 %v7397_v7  ;;  %v3885_v5 = vld [vmem:[%s8937_s15 + $0x70] sm:$0xff]  ;;  %v3878_v6 = vld [vmem:[%s8937_s15 + $0x38] sm:$0xff] }
0x1e94   : > { %v3886_v7 = vld [vmem:[%s8937_s15 + $0x78] sm:$0xff]  ;;  %v7391_v11 = vcombine.high %v3877_v4, %v3885_v5  ;;  %v7390_v14 = vcombine.low %v3877_v4, %v3885_v5 }
0x1e95   : > { %7376 = vmatmul.mubr.msk.bf16.vlgmr.msra.gmra.mxu1 %vm1551_vm1, %v9430_v21  ;;  %7377 = vmatmul.mubr.msk.bf16.vlgmr.msra.gmra.mxu0 %vm1551_vm1, %v9430_v21  ;;  %v3881_v21 = vld [vmem:[%s8937_s15 + $0x50] sm:$0xff]  ;;  %v7393_v13 = vcombine.high %v3878_v6, %v3886_v7  ;;  %v7392_v15 = vcombine.low %v3878_v6, %v3886_v7 }
0x1e96   : > { %4603 = vmatpush1.bf16.msra.mxu1 %v7394_v16  ;;  %4644 = vmatpush1.bf16.msra.mxu0 %v7396_v38  ;;  %v7383_v44 = vcombine.high %v3873_v40, %v3881_v21  ;;  %v7382_v50 = vcombine.low %v3873_v40, %v3881_v21  ;;  %v8260_v16 = vld [vmem:[%s8946_s17 + $0x78] sm:$0xff]   ;;  %v8275_v40 = vld [vmem:[%s8946_s17 + $0xa0] sm:$0xff]  }
0x1e97   : > { %4604 = vmatprep.subr.bf16.mxu1 %v7379_v17  ;;  %4645 = vmatprep.subr.bf16.mxu0 %v7381_v18  ;;  %v8261_v38 = vld [vmem:[%s8946_s17 + $0xf8] sm:$0xff]  }
0x1e98   : > { %4622 = vmatprep.mubr.bf16.mxu1 %v8599_v29  ;;  %4663 = vmatprep.mubr.bf16.mxu0 %v8599_v29  ;;  %v8262_v17 = vld [vmem:[%s8946_s17 + $0x38] sm:$0xff]  }
0x1e99   : > { %v8263_v18 = vld [vmem:[%s8946_s17 + $0xb8] sm:$0xff]  }
0x1e9a   : > { %4605 = vmatpush1.bf16.msra.mxu1 %v7378_v35  ;;  %4646 = vmatpush1.bf16.msra.mxu0 %v7380_v32  ;;  %v8271_v35 = vld [vmem:[%s8946_s17 + $0xa8] sm:$0xff]   ;;  %v8272_v32 = vld [vmem:[%s8946_s17 + $0x60] sm:$0xff]   ;;  %v8276_v21 = vld [vmem:[%s8946_s17 + $0x58] sm:$0xff]  }
0x1e9b   : > { %4684 = vmatprep.subr.bf16.mxu1 %v7399_v36  ;;  %4725 = vmatprep.subr.bf16.mxu0 %v7401_v37  ;;  %v8273_v36 = vld [vmem:[%s8946_s17 + $0xe0] sm:$0xff]  }
0x1e9c   : > { %v8274_v37 = vld [vmem:[%s8946_s17 + $0x20] sm:$0xff]  }
0x1e9d   : > { %7410 = vmatmul.mubr.msk.bf16.vlgmr.msra.gmra.mxu1 %vm1551_vm1, %v9499_v43  ;;  %7411 = vmatmul.mubr.msk.bf16.vlgmr.msra.gmra.mxu0 %vm1551_vm1, %v9499_v43 }
0x1e9e   : > { %4685 = vmatpush1.bf16.msra.mxu1 %v7398_v24  ;;  %4726 = vmatpush1.bf16.msra.mxu0 %v7400_v39  ;;  %v8279_v24 = vld [vmem:[%s8946_s17 + $0x98] sm:$0xff]   ;;  %v8280_v39 = vld [vmem:[%s8946_s17 + $0x50] sm:$0xff]  }
0x1e9f   : > { %4686 = vmatprep.subr.bf16.mxu1 %v7383_v44  ;;  %4727 = vmatprep.subr.bf16.mxu0 %v7385_v45  ;;  %v8282_v44 = vld [vmem:[%s8946_s17 + $0x10] sm:$0xff]  }
0x1ea0   : > { %4704 = vmatprep.mubr.bf16.mxu1 %v8599_v29  ;;  %4745 = vmatprep.mubr.bf16.mxu0 %v8599_v29  ;;  %v8283_v45 = vld [vmem:[%s8946_s17 + $0x90] sm:$0xff]  }
0x1ea2   : > { %4687 = vmatpush1.bf16.msra.mxu1 %v7382_v50  ;;  %4728 = vmatpush1.bf16.msra.mxu0 %v7384_v51  ;;  %v8288_v50 = vld [vmem:[%s8946_s17 + $0x40] sm:$0xff]  }
0x1ea3   : > { %4766 = vmatprep.subr.bf16.mxu1 %v7403_v53  ;;  %4807 = vmatprep.subr.bf16.mxu0 %v7405_v54  ;;  %v8289_v51 = vld [vmem:[%s8946_s17 + $0xc0] sm:$0xff]  }
0x1ea4   : > { %v8290_v53 = vld [vmem:[%s8946_s17] sm:$0xff]  }
0x1ea5   : > { %7412 = vmatmul.mubr.msk.bf16.vlgmr.msra.gmra.mxu1 %vm1551_vm1, %v9499_v43  ;;  %7413 = vmatmul.mubr.msk.bf16.vlgmr.msra.gmra.mxu0 %vm1551_vm1, %v9499_v43  ;;  %v8291_v54 = vld [vmem:[%s8946_s17 + $0x80] sm:$0xff]  }
0x1ea6   : > { %4767 = vmatpush1.bf16.msra.mxu1 %v7402_v57  ;;  %4808 = vmatpush1.bf16.msra.mxu0 %v7404_v58 }
0x1ea7   : > { %4768 = vmatprep.subr.bf16.mxu1 %v7387_v25  ;;  %4809 = vmatprep.subr.bf16.mxu0 %v7389_v60 }
0x1ea8   : > { %4786 = vmatprep.mubr.bf16.mxu1 %v8599_v29  ;;  %4827 = vmatprep.mubr.bf16.mxu0 %v8599_v29 }
0x1eaa   : > { %4769 = vmatpush1.bf16.msra.mxu1 %v7386_v12  ;;  %4810 = vmatpush1.bf16.msra.mxu0 %v7388_v1 }
0x1eab   : > { %4848 = vmatprep.subr.bf16.mxu1 %v7407_v2  ;;  %4889 = vmatprep.subr.bf16.mxu0 %v7409_v3 }
0x1ead   : > { %7414 = vmatmul.mubr.msk.bf16.vlgmr.msra.gmra.mxu1 %vm1551_vm1, %v9499_v43  ;;  %7415 = vmatmul.mubr.msk.bf16.vlgmr.msra.gmra.mxu0 %vm1551_vm1, %v9499_v43 }
0x1eae   : > { %4849 = vmatpush1.bf16.msra.mxu1 %v7406_v8  ;;  %4890 = vmatpush1.bf16.msra.mxu0 %v7408_v10 }
0x1eaf   : > { %4850 = vmatprep.subr.bf16.mxu1 %v7391_v11  ;;  %4891 = vmatprep.subr.bf16.mxu0 %v7393_v13 }
0x1eb0   : > { %4868 = vmatprep.mubr.bf16.mxu1 %v8599_v29  ;;  %4909 = vmatprep.mubr.bf16.mxu0 %v8599_v29  ;;  %v8264_v29 = vld [vmem:[%s8946_s17 + $0x70] sm:$0xff]  }
0x1eb2   : > { %4851 = vmatpush1.bf16.msra.mxu1 %v7390_v14  ;;  %4892 = vmatpush1.bf16.msra.mxu0 %v7392_v15 }
0x1eb3   : > { %7650 = vmatprep.subr.bf16.mxu1 %v8260_v16  ;;  %7672 = vmatprep.subr.bf16.mxu0 %v8261_v38 }
0x1eb5   : > { %7416 = vmatmul.mubr.msk.bf16.vlgmr.msra.gmra.mxu1 %vm1551_vm1, %v9499_v43  ;;  %7417 = vmatmul.mubr.msk.bf16.vlgmr.msra.gmra.mxu0 %vm1551_vm1, %v9499_v43  ;;  %v8281_v43 = vld [vmem:[%s8946_s17 + $0xd0] sm:$0xff]  }
0x1eb6   : > { %7651 = vmatpush3.bf16.msra.mxu1 %v8262_v17  ;;  %7673 = vmatpush3.bf16.msra.mxu0 %v8263_v18 }
0x1eb7   : > { %7652 = vmatprep.subr.bf16.mxu1 %v8264_v29  ;;  %7674 = vmatprep.subr.bf16.mxu0 %v8265_v34  ;;  %v4932_v29 = vsub.s32 2, %v9165_v27 }
0x1eba   : > { %7653 = vmatpush3.bf16.msra.mxu1 %v8266_v23  ;;  %7675 = vmatpush3.bf16.msra.mxu0 %v8267_v20  ;;  %v9599_v20 = vld [vmem:[%s8934_s28] sm:$0xff] }
0x1ebb   : > { %7654 = vmatprep.subr.bf16.mxu1 %v8268_v22  ;;  %7676 = vmatprep.subr.bf16.mxu0 %v8269_v26  ;;  %v4928_v22 = vsub.s32 1, %v9165_v27  ;;  %v4936_v26 = vsub.s32 3, %v9165_v27 }
0x1ebe   : > { %7655 = vmatpush3.bf16.msra.mxu1 %v8270_v31  ;;  %7677 = vmatpush3.bf16.msra.mxu0 %v8271_v35 }
0x1ebf   : > { %7656 = vmatprep.subr.bf16.mxu1 %v8272_v32  ;;  %7678 = vmatprep.subr.bf16.mxu0 %v8273_v36  ;;  %v4925_v32 = vrot.slane %v9599_v20, %v9172_v28  ;;  %v4933_v36 = vrot.slane %v9599_v20, %v4932_v29 }
0x1ec2   : > { %7657 = vmatpush3.bf16.msra.mxu1 %v8274_v37  ;;  %7679 = vmatpush3.bf16.msra.mxu0 %v8275_v40 }
0x1ec3   : > { %7658 = vmatprep.subr.bf16.mxu1 %v8276_v21  ;;  %7680 = vmatprep.subr.bf16.mxu0 %v8277_v41 }
0x1ec6   : > { %7659 = vmatpush3.bf16.msra.mxu1 %v8278_v33  ;;  %7681 = vmatpush3.bf16.msra.mxu0 %v8279_v24  ;;  %v4929_v33 = vrot.slane %v9599_v20, %v4928_v22  ;;  %v4937_v24 = vrot.slane %v9599_v20, %v4936_v26 }
0x1ec7   : > { %7660 = vmatprep.subr.bf16.mxu1 %v8280_v39  ;;  %7682 = vmatprep.subr.bf16.mxu0 %v8281_v43 }
0x1eca   : > { %7661 = vmatpush3.bf16.msra.mxu1 %v8282_v44  ;;  %7683 = vmatpush3.bf16.msra.mxu0 %v8283_v45 }
0x1ecb   : > { %7662 = vmatprep.subr.bf16.mxu1 %v8284_v46  ;;  %7684 = vmatprep.subr.bf16.mxu0 %v8285_v47 }
0x1ece   : > { %7663 = vmatpush3.bf16.msra.mxu1 %v8286_v48  ;;  %7685 = vmatpush3.bf16.msra.mxu0 %v8287_v49 }
0x1ecf   : > { %7664 = vmatprep.subr.bf16.mxu1 %v8288_v50  ;;  %7686 = vmatprep.subr.bf16.mxu0 %v8289_v51 }
0x1ed2   : > { %7665 = vmatpush3.bf16.msra.mxu1 %v8290_v53  ;;  %7687 = vmatpush3.bf16.msra.mxu0 %v8291_v54  ;;  %v4944_v53 = vsub.s32 5, %v9165_v27  ;;  %v4952_v54 = vsub.s32 7, %v9165_v27 }
0x1ed3   : > { %7694 = vmatprep.subr.bf16.mxu1 %v8292_v55  ;;  %7716 = vmatprep.subr.bf16.mxu0 %v8293_v9 }
0x1f3d   : > { %v4133_v56 = vpop.f32.mrf.mxu1  ;;  %v4174_v59 = vpop.f32.mrf.mxu0 }
0x1f3f   : > { %v4135_v57 = vpop.f32.mrf.mxu1  ;;  %v4176_v58 = vpop.f32.mrf.mxu0 }
0x1f41   : > { %v4137_v25 = vpop.f32.mrf.mxu1  ;;  %v4178_v60 = vpop.f32.mrf.mxu0 }
0x1f43   : > { %v4138_v61 = vpop.f32.mrf.mxu1  ;;  %v4179_v62 = vpop.f32.mrf.mxu0 }
0x1f45   : > { %v9573_v63 = vpop.f32.mrf.mxu1  ;;  %v9575_v0 = vpop.f32.mrf.mxu0 }
0x1f47   : > { %v9577_v12 = vpop.f32.mrf.mxu1  ;;  %v9579_v1 = vpop.f32.mrf.mxu0 }
0x1f49   : > { %v4219_v2 = vpop.f32.mrf.mxu1  ;;  %v4260_v3 = vpop.f32.mrf.mxu0 }
0x1f4a   : > { %v4945_v2 = vrot.slane %v9599_v20, %v4944_v53  ;;  %v4953_v3 = vrot.slane %v9599_v20, %v4952_v54 }
0x1f4b   : > { %v4220_v4 = vpop.f32.mrf.mxu1  ;;  %v4261_v5 = vpop.f32.mrf.mxu0 }
0x1f4c   : > { %v8294_v4 = vld [vmem:[%s8946_s17 + $0x138] sm:$0xff]  }
0x1f4d   : > { %v9581_v6 = vpop.f32.mrf.mxu1  ;;  %v9583_v7 = vpop.f32.mrf.mxu0 }
0x1f4f   : > { %v9585_v8 = vpop.f32.mrf.mxu1  ;;  %v9587_v10 = vpop.f32.mrf.mxu0 }
0x1f51   : > { %v4301_v11 = vpop.f32.mrf.mxu1  ;;  %v4342_v13 = vpop.f32.mrf.mxu0 }
0x1f53   : > { %v4302_v14 = vpop.f32.mrf.mxu1  ;;  %v4343_v15 = vpop.f32.mrf.mxu0 }
0x1f54   : > { %v8295_v14 = vld [vmem:[%s8946_s17 + $0x1b8] sm:$0xff]   ;;  %v8296_v15 = vld [vmem:[%s8946_s17 + $0x170] sm:$0xff]  }
0x1f55   : > { %v9589_v16 = vpop.f32.mrf.mxu1  ;;  %v9591_v38 = vpop.f32.mrf.mxu0 }
0x1f57   : > { %v9593_v17 = vpop.f32.mrf.mxu1  ;;  %v9595_v18 = vpop.f32.mrf.mxu0 }
0x1f59   : > { %v4383_v34 = vpop.f32.mrf.mxu1  ;;  %v4424_v23 = vpop.f32.mrf.mxu0 }
0x1f5b   : > { %v4384_v31 = vpop.f32.mrf.mxu1  ;;  %v4425_v35 = vpop.f32.mrf.mxu0 }
0x1f5c   : > { %v8297_v35 = vld [vmem:[%s8946_s17 + $0x1f0] sm:$0xff]  }
0x1f5d   : > { %v4624_v37 = vpop.f32.mrf.mxu1  ;;  %v4665_v40 = vpop.f32.mrf.mxu0 }
0x1f5e   : > { %v4625_v21 = vadd.f32 %v4624_v37, %v4133_v56  ;;  %v4666_v41 = vadd.f32 %v4665_v40, %v4174_v59  ;;  %v9633_v37 = vld [vmem:[%s8934_s28 + $0x8] sm:$0xff] }
0x1f5f   : > { %v4626_v39 = vpop.f32.mrf.mxu1  ;;  %v4667_v43 = vpop.f32.mrf.mxu0 }
0x1f60   : > { %v5002_v44 = vadd.f32 %v4925_v32, %v4625_v21  ;;  %v5004_v45 = vadd.f32 %v4933_v36, %v4666_v41  ;;  %v4627_v46 = vadd.f32 %v4626_v39, %v4135_v57  ;;  %v4668_v47 = vadd.f32 %v4667_v43, %v4176_v58  ;;  %v8298_v41 = vld [vmem:[%s8946_s17 + $0x130] sm:$0xff]  }
0x1f61   : > { %v4628_v48 = vpop.f32.mrf.mxu1  ;;  %v4669_v49 = vpop.f32.mrf.mxu0 }
0x1f62   : > { %v5003_v50 = vadd.f32 %v4929_v33, %v4627_v46  ;;  %v5005_v51 = vadd.f32 %v4937_v24, %v4668_v47  ;;  %v5018_v55 = vmax.f32 %v5002_v44, 0.0  ;;  %v5020_v59 = vmax.f32 %v5004_v45, 0.0  ;;  %v8299_v33 = vld [vmem:[%s8946_s17 + $0x1b0] sm:$0xff]   ;;  %v8300_v24 = vld [vmem:[%s8946_s17 + $0x168] sm:$0xff]  }
0x1f63   : > { %v4629_v9 = vpop.f32.mrf.mxu1  ;;  %v4670_v56 = vpop.f32.mrf.mxu0  ;;  %v4965_v44 = vrot.slane %v9633_v37, %v4932_v29  ;;  %v8301_v47 = vld [vmem:[%s8946_s17 + $0x1e8] sm:$0xff]  }
0x1f64   : > { %v5019_v25 = vmax.f32 %v5003_v50, 0.0  ;;  %v5021_v60 = vmax.f32 %v5005_v51, 0.0  ;;  %v5034_v5 = vpack.c.bf16 %v5018_v55, %v5018_v55  ;;  %v5036_v34 = vpack.c.bf16 %v5020_v59, %v5020_v59  ;;  %v8302_v51 = vld [vmem:[%s8946_s17 + $0x128] sm:$0xff]   ;;  %v8304_v59 = vld [vmem:[%s8946_s17 + $0x160] sm:$0xff]  }
0x1f65   : > { %v9616_v61 = vpop.f32.mrf.mxu1  ;;  %v9618_v57 = vpop.f32.mrf.mxu0  ;;  %v8303_v56 = vld [vmem:[%s8946_s17 + $0x1a8] sm:$0xff]  }
0x1f66   : > { %v5035_v58 = vpack.c.bf16 %v5019_v25, %v5019_v25  ;;  %v5037_v62 = vpack.c.bf16 %v5021_v60, %v5021_v60  ;;  %v8305_v25 = vld [vmem:[%s8946_s17 + $0x1e0] sm:$0xff]  }
0x1f67   : > { %v4708_v11 = vpop.f32.mrf.mxu1  ;;  %v4749_v13 = vpop.f32.mrf.mxu0 }
0x1f68   : > { %v4709_v23 = vadd.f32 %v4708_v11, %v9577_v12  ;;  %v4750_v31 = vadd.f32 %v4749_v13, %v9579_v1  ;;  %6113 = vmatprep.mubr.bf16.mxu1 %v5035_v58  ;;  %6153 = vmatprep.mubr.bf16.mxu0 %v5037_v62  ;;  %v4940_v58 = vsub.s32 4, %v9165_v27  ;;  %v4948_v62 = vsub.s32 6, %v9165_v27  ;;  %v8308_v11 = vld [vmem:[%s8946_s17 + $0x158] sm:$0xff]  }
0x1f69   : > { %v4710_v32 = vpop.f32.mrf.mxu1  ;;  %v4751_v36 = vpop.f32.mrf.mxu0  ;;  %6114 = vmatmul.mubr.bf16.vlgmr.msra.gmra.mxu1 %v5034_v5  ;;  %6154 = vmatmul.mubr.bf16.vlgmr.msra.gmra.mxu0 %v5036_v34  ;;  %v8307_v5 = vld [vmem:[%s8946_s17 + $0x1a0] sm:$0xff]  }
0x1f6a   : > { %v5007_v40 = vadd.f32 %v4945_v2, %v4709_v23  ;;  %v5009_v21 = vadd.f32 %v4953_v3, %v4750_v31  ;;  %7695 = vmatpush3.bf16.msra.mxu1 %v8294_v4  ;;  %7717 = vmatpush3.bf16.msra.mxu0 %v8295_v14  ;;  %v8306_v2 = vld [vmem:[%s8946_s17 + $0x120] sm:$0xff]   ;;  %v4973_v13 = vrot.slane %v9633_v37, %v4940_v58  ;;  %v8310_v32 = vld [vmem:[%s8946_s17 + $0x118] sm:$0xff]  }
0x1f6b   : > { %v4711_v12 = vpop.f32.mrf.mxu1  ;;  %v4752_v1 = vpop.f32.mrf.mxu0  ;;  %7696 = vmatprep.subr.bf16.mxu1 %v8296_v15  ;;  %7718 = vmatprep.subr.bf16.mxu0 %v8297_v35  ;;  %v4981_v14 = vrot.slane %v9633_v37, %v4948_v62  ;;  %v8309_v15 = vld [vmem:[%s8946_s17 + $0x1d8] sm:$0xff]  }
0x1f6c   : > { %v5023_v39 = vmax.f32 %v5007_v40, 0.0  ;;  %v5025_v43 = vmax.f32 %v5009_v21, 0.0  ;;  %v8311_v21 = vld [vmem:[%s8946_s17 + $0x198] sm:$0xff]  }
0x1f6d   : > { %v9641_v45 = vpop.f32.mrf.mxu1  ;;  %v4829_v46 = vpop.f32.mrf.mxu0 }
0x1f6e   : > { %v5039_v48 = vpack.c.bf16 %v5023_v39, %v5023_v39  ;;  %v5041_v49 = vpack.c.bf16 %v5025_v43, %v5025_v43  ;;  %v4830_v50 = vadd.f32 %v4829_v46, %v9583_v7  ;;  %7697 = vmatpush3.bf16.msra.mxu1 %v8298_v41  ;;  %7719 = vmatpush3.bf16.msra.mxu0 %v8299_v33  ;;  %v8312_v41 = vld [vmem:[%s8946_s17 + $0x150] sm:$0xff]  }
0x1f6f   : > { %v4790_v55 = vpop.f32.mrf.mxu1  ;;  %v4831_v9 = vpop.f32.mrf.mxu0  ;;  %7698 = vmatprep.subr.bf16.mxu1 %v8300_v24  ;;  %7720 = vmatprep.subr.bf16.mxu0 %v8301_v47  ;;  %v8314_v24 = vld [vmem:[%s8946_s17 + $0x110] sm:$0xff]   ;;  %v4707_v39 = vadd.f32 %v9616_v61, %v9573_v63  ;;  %v4941_v43 = vrot.slane %v9599_v20, %v4940_v58  ;;  %v4961_v61 = vrot.slane %v9633_v37, %v4928_v22  ;;  %v8321_v22 = vld [vmem:[%s8946_s17 + $0x1c0] sm:$0xff]  }
0x1f70   : > { %v9648_v29 = vadd.f32 %v4965_v44, %v4830_v50  ;;  %6193 = vmatprep.mubr.bf16.mxu1 %v5039_v48  ;;  %6233 = vmatprep.mubr.bf16.mxu0 %v5041_v49  ;;  %v8315_v47 = vld [vmem:[%s8946_s17 + $0x190] sm:$0xff]   ;;  %v8316_v48 = vld [vmem:[%s8946_s17 + $0x148] sm:$0xff]   ;;  %v4748_v49 = vadd.f32 %v9618_v57, %v9575_v0  ;;  %v4949_v50 = vrot.slane %v9599_v20, %v4948_v62  ;;  %v8325_v62 = vld [vmem:[%s8946_s17 + $0x2f8] sm:$0xff]  }
0x1f71   : > { %v4792_v60 = vpop.f32.mrf.mxu1  ;;  %v4833_v7 = vpop.f32.mrf.mxu0  ;;  %v4791_v63 = vadd.f32 %v4790_v55, %v9585_v8  ;;  %v8318_v0 = vld [vmem:[%s8946_s17 + $0x108] sm:$0xff]   ;;  %v5006_v20 = vadd.f32 %v4941_v43, %v4707_v39  ;;  %v8320_v8 = vld [vmem:[%s8946_s17 + $0x140] sm:$0xff]   ;;  %v8340_v43 = vld [vmem:[%s8946_s17 + $0x258] sm:$0xff]  }
0x1f72   : > { %7699 = vmatpush3.bf16.msra.mxu1 %v8302_v51  ;;  %7721 = vmatpush3.bf16.msra.mxu0 %v8303_v56  ;;  %v8317_v51 = vld [vmem:[%s8946_s17 + $0x1c8] sm:$0xff]   ;;  %v4832_v56 = vadd.f32 %v4831_v9, %v9587_v10  ;;  %v5008_v55 = vadd.f32 %v4949_v50, %v4748_v49  ;;  %v8322_v9 = vld [vmem:[%s8946_s17 + $0x100] sm:$0xff]   ;;  %v8324_v7 = vld [vmem:[%s8946_s17 + $0x278] sm:$0xff]  }
0x1f73   : > { %v4793_v3 = vpop.f32.mrf.mxu1  ;;  %v4834_v4 = vpop.f32.mrf.mxu0  ;;  %7700 = vmatprep.subr.bf16.mxu1 %v8304_v59  ;;  %7722 = vmatprep.subr.bf16.mxu0 %v8305_v25  ;;  %v4969_v59 = vrot.slane %v9633_v37, %v4936_v26  ;;  %v8319_v57 = vld [vmem:[%s8946_s17 + $0x188] sm:$0xff]   ;;  %v5011_v25 = vadd.f32 %v4961_v61, %v4791_v63  ;;  %v5022_v26 = vmax.f32 %v5006_v20, 0.0  ;;  %v8323_v60 = vld [vmem:[%s8946_s17 + $0x180] sm:$0xff]   ;;  %v8345_v49 = vld [vmem:[%s8946_s17 + $0x2d0] sm:$0xff]   ;;  %v4957_v63 = vrot.slane %v9633_v37, %v9172_v28 }
0x1f74   : > { %v5024_v58 = vmax.f32 %v5008_v55, 0.0  ;;  %v8326_v4 = vld [vmem:[%s8946_s17 + $0x238] sm:$0xff]   ;;  %v8339_v39 = vld [vmem:[%s8946_s17 + $0x2a0] sm:$0xff]   ;;  %v8346_v50 = vld [vmem:[%s8946_s17 + $0x210] sm:$0xff]   ;;  %v4985_v20 = vrot.slane %v9633_v37, %v4952_v54 }
0x1f75   : > { %v4870_v34 = vpop.f32.mrf.mxu1  ;;  %v4911_v23 = vpop.f32.mrf.mxu0  ;;  %v5013_v10 = vadd.f32 %v4969_v59, %v4832_v56  ;;  %v8347_v61 = vld [vmem:[%s8946_s17 + $0x290] sm:$0xff]   ;;  %v8348_v56 = vld [vmem:[%s8946_s17 + $0x248] sm:$0xff]   ;;  %v8353_v55 = vld [vmem:[%s8946_s17 + $0x2c0] sm:$0xff]  }
0x1f76   : > { %v4871_v31 = vadd.f32 %v4870_v34, %v9589_v16  ;;  %v4912_v35 = vadd.f32 %v4911_v23, %v9591_v38  ;;  %7701 = vmatpush3.bf16.msra.mxu1 %v8306_v2  ;;  %7723 = vmatpush3.bf16.msra.mxu0 %v8307_v5  ;;  %v8313_v16 = vld [vmem:[%s8946_s17 + $0x1d0] sm:$0xff]   ;;  %v5027_v2 = vmax.f32 %v5011_v25, 0.0  ;;  %v5038_v5 = vpack.c.bf16 %v5022_v26, %v5022_v26  ;;  %v8349_v59 = vld [vmem:[%s8946_s17 + $0x2c8] sm:$0xff]   ;;  %v8355_v54 = vld [vmem:[%s8946_s17 + $0x280] sm:$0xff]  }
0x1f77   : > { %v9662_v36 = vpop.f32.mrf.mxu1  ;;  %v9664_v40 = vpop.f32.mrf.mxu0  ;;  %7702 = vmatprep.subr.bf16.mxu1 %v8308_v11  ;;  %7724 = vmatprep.subr.bf16.mxu0 %v8309_v15  ;;  %v5029_v3 = vmax.f32 %v5013_v10, 0.0  ;;  %v8327_v11 = vld [vmem:[%s8946_s17 + $0x2b8] sm:$0xff]   ;;  %v8329_v34 = vld [vmem:[%s8946_s17 + $0x2f0] sm:$0xff]  }
0x1f78   : > { %v9668_v12 = vadd.f32 %v4973_v13, %v4871_v31  ;;  %v9670_v1 = vadd.f32 %v4981_v14, %v4912_v35  ;;  %v5040_v13 = vpack.c.bf16 %v5024_v58, %v5024_v58  ;;  %v8328_v14 = vld [vmem:[%s8946_s17 + $0x270] sm:$0xff]   ;;  %v5043_v15 = vpack.c.bf16 %v5027_v2, %v5027_v2  ;;  %v8357_v25 = vld [vmem:[%s8946_s17 + $0x3f8] sm:$0xff]  }
0x1f79   : > { %v4874_v38 = vpop.f32.mrf.mxu1  ;;  %v4915_v33 = vpop.f32.mrf.mxu0  ;;  %v5045_v23 = vpack.c.bf16 %v5029_v3, %v5029_v3  ;;  %v8330_v31 = vld [vmem:[%s8946_s17 + $0x230] sm:$0xff]   ;;  %v8358_v26 = vld [vmem:[%s8946_s17 + $0x338] sm:$0xff]  }
0x1f7a   : > { %7703 = vmatpush3.bf16.msra.mxu1 %v8310_v32  ;;  %7725 = vmatpush3.bf16.msra.mxu0 %v8311_v21  ;;  %v8331_v35 = vld [vmem:[%s8946_s17 + $0x2b0] sm:$0xff]   ;;  %v8332_v32 = vld [vmem:[%s8946_s17 + $0x268] sm:$0xff]   ;;  %v8336_v38 = vld [vmem:[%s8946_s17 + $0x260] sm:$0xff]  }
0x1f7b   : > { %v4875_v44 = vpop.f32.mrf.mxu1  ;;  %v4916_v46 = vpop.f32.mrf.mxu0  ;;  %7704 = vmatprep.subr.bf16.mxu1 %v8312_v41  ;;  %7726 = vmatprep.subr.bf16.mxu0 %v8313_v16  ;;  %v8333_v21 = vld [vmem:[%s8946_s17 + $0x2e8] sm:$0xff]   ;;  %v8337_v33 = vld [vmem:[%s8946_s17 + $0x2e0] sm:$0xff]  }
0x1f7c   : > { %v8334_v41 = vld [vmem:[%s8946_s17 + $0x228] sm:$0xff]   ;;  %v8341_v44 = vld [vmem:[%s8946_s17 + $0x2d8] sm:$0xff]  }
0x1f7d   : > { %v8335_v16 = vld [vmem:[%s8946_s17 + $0x2a8] sm:$0xff]   ;;  %v8342_v46 = vld [vmem:[%s8946_s17 + $0x218] sm:$0xff]  }
0x1f7e   : > { %7705 = vmatpush3.bf16.msra.mxu1 %v8314_v24  ;;  %7727 = vmatpush3.bf16.msra.mxu0 %v8315_v47  ;;  %v8338_v24 = vld [vmem:[%s8946_s17 + $0x220] sm:$0xff]   ;;  %v8343_v47 = vld [vmem:[%s8946_s17 + $0x298] sm:$0xff]  }
0x1f7f   : > { %7706 = vmatprep.subr.bf16.mxu1 %v8316_v48  ;;  %7728 = vmatprep.subr.bf16.mxu0 %v8317_v51  ;;  %v8344_v48 = vld [vmem:[%s8946_s17 + $0x250] sm:$0xff]   ;;  %v4789_v51 = vadd.f32 %v9641_v45, %v9581_v6  ;;  %v4977_v6 = vrot.slane %v9633_v37, %v4944_v53  ;;  %v4914_v45 = vadd.f32 %v9664_v40, %v9595_v18  ;;  %v8354_v18 = vld [vmem:[%s8946_s17 + $0x200] sm:$0xff]   ;;  %v8356_v37 = vld [vmem:[%s8946_s17 + $0x378] sm:$0xff]   ;;  %v5028_v40 = vmax.f32 %v9648_v29, 0.0 }
0x1f80   : > { %v8361_v29 = vld [vmem:[%s8946_s17 + $0x3f0] sm:$0xff]  }
0x1f81   : > { %v5044_v58 = vpack.c.bf16 %v5028_v40, %v5028_v40 }
0x1f82   : > { %7707 = vmatpush3.bf16.msra.mxu1 %v8318_v0  ;;  %7729 = vmatpush3.bf16.msra.mxu0 %v8319_v57  ;;  %v4873_v0 = vadd.f32 %v9662_v36, %v9593_v17  ;;  %v8350_v57 = vld [vmem:[%s8946_s17 + $0x208] sm:$0xff]   ;;  %v8352_v36 = vld [vmem:[%s8946_s17 + $0x240] sm:$0xff]  }
0x1f83   : > { %7708 = vmatprep.subr.bf16.mxu1 %v8320_v8  ;;  %7730 = vmatprep.subr.bf16.mxu0 %v8321_v22  ;;  %v5010_v8 = vadd.f32 %v4957_v63, %v4789_v51  ;;  %v8351_v17 = vld [vmem:[%s8946_s17 + $0x288] sm:$0xff]   ;;  %v5017_v22 = vadd.f32 %v4985_v20, %v4914_v45  ;;  %v5030_v51 = vmax.f32 %v9668_v12, 0.0  ;;  %v8387_v63 = vld [vmem:[%s8946_s17 + $0x380] sm:$0xff]  }
0x1f84   : > { %v5015_v53 = vadd.f32 %v4977_v6, %v4873_v0  ;;  %v7418_v45 = vld [vmem:[%s1535_s23] ss:$0 sm:$0xff] }
0x1f85   : > { %v5026_v27 = vmax.f32 %v5010_v8, 0.0 }
0x1f86   : > { %7709 = vmatpush3.bf16.msra.mxu1 %v8322_v9  ;;  %7731 = vmatpush3.bf16.msra.mxu0 %v8323_v60  ;;  %v5031_v10 = vmax.f32 %v5015_v53, 0.0  ;;  %v5033_v9 = vmax.f32 %v5017_v22, 0.0 }
0x1f87   : > { %7738 = vmatprep.subr.bf16.mxu1 %v8324_v7  ;;  %7760 = vmatprep.subr.bf16.mxu0 %v8325_v62  ;;  %v5042_v60 = vpack.c.bf16 %v5026_v27, %v5026_v27  ;;  %v8359_v7 = vld [vmem:[%s8946_s17 + $0x3b8] sm:$0xff]   ;;  %v8360_v62 = vld [vmem:[%s8946_s17 + $0x370] sm:$0xff]  }
0x1f88   : > { %v5047_v2 = vpack.c.bf16 %v5031_v10, %v5031_v10  ;;  %v5049_v3 = vpack.c.bf16 %v5033_v9, %v5033_v9 }
0x1f89   : > { %6194 = vmatmul.mubr.bf16.vlgmr.msra.gmra.mxu1 %v5038_v5  ;;  %6234 = vmatmul.mubr.bf16.vlgmr.msra.gmra.mxu0 %v5040_v13  ;;  %v8363_v5 = vld [vmem:[%s8946_s17 + $0x3b0] sm:$0xff]   ;;  %v8365_v13 = vld [vmem:[%s8946_s17 + $0x3e8] sm:$0xff]  }
0x1f8a   : > { %7739 = vmatpush3.bf16.msra.mxu1 %v8326_v4  ;;  %6273 = vmatprep.mubr.bf16.mxu1 %v5043_v15  ;;  %v8362_v4 = vld [vmem:[%s8946_s17 + $0x330] sm:$0xff]   ;;  %v8367_v15 = vld [vmem:[%s8946_s17 + $0x3a8] sm:$0xff]  }
0x1f8b   : > { %7761 = vmatpush3.bf16.msra.mxu0 %v8327_v11  ;;  %6313 = vmatprep.mubr.bf16.mxu0 %v5045_v23  ;;  %v8364_v11 = vld [vmem:[%s8946_s17 + $0x368] sm:$0xff]   ;;  %v8369_v23 = vld [vmem:[%s8946_s17 + $0x3e0] sm:$0xff]  }
0x1f8c   : > { %7740 = vmatprep.subr.bf16.mxu1 %v8328_v14  ;;  %7762 = vmatprep.subr.bf16.mxu0 %v8329_v34  ;;  %v8366_v14 = vld [vmem:[%s8946_s17 + $0x328] sm:$0xff]   ;;  %v8368_v34 = vld [vmem:[%s8946_s17 + $0x360] sm:$0xff]  }
0x1f8e   : > { %7741 = vmatpush3.bf16.msra.mxu1 %v8330_v31  ;;  %v8370_v31 = vld [vmem:[%s8946_s17 + $0x320] sm:$0xff]  }
0x1f8f   : > { %7763 = vmatpush3.bf16.msra.mxu0 %v8331_v35  ;;  %7742 = vmatprep.subr.bf16.mxu1 %v8332_v32  ;;  %v8371_v35 = vld [vmem:[%s8946_s17 + $0x3a0] sm:$0xff]   ;;  %v8372_v32 = vld [vmem:[%s8946_s17 + $0x358] sm:$0xff]  }
0x1f90   : > { %7764 = vmatprep.subr.bf16.mxu0 %v8333_v21  ;;  %v8373_v21 = vld [vmem:[%s8946_s17 + $0x3d8] sm:$0xff]  }
0x1f92   : > { %7743 = vmatpush3.bf16.msra.mxu1 %v8334_v41  ;;  %v8374_v41 = vld [vmem:[%s8946_s17 + $0x318] sm:$0xff]  }
0x1f93   : > { %7765 = vmatpush3.bf16.msra.mxu0 %v8335_v16  ;;  %7744 = vmatprep.subr.bf16.mxu1 %v8336_v38  ;;  %v8375_v16 = vld [vmem:[%s8946_s17 + $0x398] sm:$0xff]   ;;  %v8376_v38 = vld [vmem:[%s8946_s17 + $0x350] sm:$0xff]  }
0x1f94   : > { %7766 = vmatprep.subr.bf16.mxu0 %v8337_v33  ;;  %v8377_v33 = vld [vmem:[%s8946_s17 + $0x3d0] sm:$0xff]  }
0x1f96   : > { %7745 = vmatpush3.bf16.msra.mxu1 %v8338_v24  ;;  %v8378_v24 = vld [vmem:[%s8946_s17 + $0x310] sm:$0xff]  }
0x1f97   : > { %7767 = vmatpush3.bf16.msra.mxu0 %v8339_v39  ;;  %7746 = vmatprep.subr.bf16.mxu1 %v8340_v43  ;;  %v8379_v39 = vld [vmem:[%s8946_s17 + $0x390] sm:$0xff]   ;;  %v8380_v43 = vld [vmem:[%s8946_s17 + $0x348] sm:$0xff]  }
0x1f98   : > { %7768 = vmatprep.subr.bf16.mxu0 %v8341_v44  ;;  %v8381_v44 = vld [vmem:[%s8946_s17 + $0x3c8] sm:$0xff]  }
0x1f9a   : > { %7747 = vmatpush3.bf16.msra.mxu1 %v8342_v46  ;;  %v8382_v46 = vld [vmem:[%s8946_s17 + $0x308] sm:$0xff]  }
0x1f9b   : > { %7769 = vmatpush3.bf16.msra.mxu0 %v8343_v47  ;;  %7748 = vmatprep.subr.bf16.mxu1 %v8344_v48  ;;  %v8383_v47 = vld [vmem:[%s8946_s17 + $0x388] sm:$0xff]   ;;  %v8384_v48 = vld [vmem:[%s8946_s17 + $0x340] sm:$0xff]  }
0x1f9c   : > { %7770 = vmatprep.subr.bf16.mxu0 %v8345_v49  ;;  %v8385_v49 = vld [vmem:[%s8946_s17 + $0x3c0] sm:$0xff]  }
0x1f9e   : > { %7749 = vmatpush3.bf16.msra.mxu1 %v8346_v50  ;;  %v8386_v50 = vld [vmem:[%s8946_s17 + $0x300] sm:$0xff]   ;;  %s10038_s17 = sld [smem:[#allocation44_spill]] }
0x1f9f   : > { %7771 = vmatpush3.bf16.msra.mxu0 %v8347_v61  ;;  %7750 = vmatprep.subr.bf16.mxu1 %v8348_v56  ;;  %v5032_v61 = vmax.f32 %v9670_v1, 0.0  ;;  %v5046_v56 = vpack.c.bf16 %v5030_v51, %v5030_v51 }
0x1fa0   : > { %7772 = vmatprep.subr.bf16.mxu0 %v8349_v59 }
0x1fa1   : > { %v5048_v59 = vpack.c.bf16 %v5032_v61, %v5032_v61 }
0x1fa2   : > { %7751 = vmatpush3.bf16.msra.mxu1 %v8350_v57 }
0x1fa3   : > { %7773 = vmatpush3.bf16.msra.mxu0 %v8351_v17  ;;  %7752 = vmatprep.subr.bf16.mxu1 %v8352_v36 }
0x1fa4   : > { %7774 = vmatprep.subr.bf16.mxu0 %v8353_v55  ;;  %p7547_p1 = scmp.ne.s32.totalorder %s10038_s17, 1 }
0x1fa5   : > { %s10039_s10 = sld [smem:[#allocation38_spill]] (!%p7547_p1) }
0x1fa6   : > { %7753 = vmatpush3.bf16.msra.mxu1 %v8354_v18  ;;  %s10040_s15 = sld [smem:[#allocation37_spill]] (!%p7547_p1) }
0x1fa7   : > { %7775 = vmatpush3.bf16.msra.mxu0 %v8355_v54  ;;  %7782 = vmatprep.subr.bf16.mxu1 %v8356_v37  ;;  %s10042_s23 = sld [smem:[#allocation39_spill]] (!%p7547_p1) }
0x1fa8   : > { %7804 = vmatprep.subr.bf16.mxu0 %v8357_v25  ;;  %s10044_s14 = sld [smem:[#allocation11_spill]] (!%p7547_p1) }
0x1fa9   : > { %6274 = vmatmul.mubr.bf16.vlgmr.msra.gmra.mxu1 %v5042_v60  ;;  %s10045_s26 = sld [smem:[#allocation56_spill]] (!%p7547_p1) }
0x1faa   : > { %6314 = vmatmul.mubr.bf16.vlgmr.msra.gmra.mxu0 %v5044_v58  ;;  %7783 = vmatpush3.bf16.msra.mxu1 %v8358_v26 }
0x1fab   : > { %6353 = vmatprep.mubr.bf16.mxu1 %v5047_v2  ;;  %7805 = vmatpush3.bf16.msra.mxu0 %v8359_v7 }
0x1fac   : > { %6393 = vmatprep.mubr.bf16.mxu0 %v5049_v3  ;;  %7784 = vmatprep.subr.bf16.mxu1 %v8360_v62  ;;  %s10041_s27 = smov (!%p7547_p1), %s10040_s15 }
0x1fad   : > { %7806 = vmatprep.subr.bf16.mxu0 %v8361_v29  ;;  %s10043_s21 = smov (!%p7547_p1), %s10042_s23 }
0x1fae   : > { %7785 = vmatpush3.bf16.msra.mxu1 %v8362_v4 }
0x1faf   : > { %7807 = vmatpush3.bf16.msra.mxu0 %v8363_v5  ;;  %7786 = vmatprep.subr.bf16.mxu1 %v8364_v11  ;;  %s10047_s11 = scalar_lea.vmem (!%p7547_p1), %s10044_s14, %s10045_s26 }
0x1fb0   : > { %7808 = vmatprep.subr.bf16.mxu0 %v8365_v13 }
0x1fb2   : > { %7787 = vmatpush3.bf16.msra.mxu1 %v8366_v14 }
0x1fb3   : > { %7809 = vmatpush3.bf16.msra.mxu0 %v8367_v15  ;;  %7788 = vmatprep.subr.bf16.mxu1 %v8368_v34 }
0x1fb4   : > { %7810 = vmatprep.subr.bf16.mxu0 %v8369_v23 }
0x1fb6   : > { %7789 = vmatpush3.bf16.msra.mxu1 %v8370_v31 }
0x1fb7   : > { %7811 = vmatpush3.bf16.msra.mxu0 %v8371_v35  ;;  %7790 = vmatprep.subr.bf16.mxu1 %v8372_v32 }
0x1fb8   : > { %7812 = vmatprep.subr.bf16.mxu0 %v8373_v21 }
0x1fba   : > { %7791 = vmatpush3.bf16.msra.mxu1 %v8374_v41 }
0x1fbb   : > { %7813 = vmatpush3.bf16.msra.mxu0 %v8375_v16  ;;  %7792 = vmatprep.subr.bf16.mxu1 %v8376_v38 }
0x1fbc   : > { %7814 = vmatprep.subr.bf16.mxu0 %v8377_v33 }
0x1fbe   : > { %7793 = vmatpush3.bf16.msra.mxu1 %v8378_v24 }
0x1fbf   : > { %7815 = vmatpush3.bf16.msra.mxu0 %v8379_v39  ;;  %7794 = vmatprep.subr.bf16.mxu1 %v8380_v43 }
0x1fc0   : > { %7816 = vmatprep.subr.bf16.mxu0 %v8381_v44 }
0x1fc2   : > { %7795 = vmatpush3.bf16.msra.mxu1 %v8382_v46 }
0x1fc3   : > { %7817 = vmatpush3.bf16.msra.mxu0 %v8383_v47  ;;  %7796 = vmatprep.subr.bf16.mxu1 %v8384_v48 }
0x1fc4   : > { %7818 = vmatprep.subr.bf16.mxu0 %v8385_v49 }
0x1fc6   : > { %7797 = vmatpush3.bf16.msra.mxu1 %v8386_v50 }
0x1fc7   : > { %7819 = vmatpush3.bf16.msra.mxu0 %v8387_v63 }
0x1fc9   : > { %6354 = vmatmul.mubr.bf16.vlgmr.msra.gmra.mxu1 %v5046_v56 }
0x1fca   : > { %6394 = vmatmul.mubr.bf16.vlgmr.msra.gmra.mxu0 %v5048_v59 }
0x2029   : > { %v7666_v0 = vpop.f32.mrf.mxu1  ;;  %v7688_v6 = vpop.f32.mrf.mxu0 }
0x202b   : > { %v7667_v20 = vpop.f32.mrf.mxu1  ;;  %v7689_v8 = vpop.f32.mrf.mxu0 }
0x202c   : > { %v7668_v57 = vadd.f32 %v7667_v20, %v7666_v0  ;;  %v7690_v12 = vadd.f32 %v7689_v8, %v7688_v6 }
0x202d   : > { %v7669_v17 = vpop.f32.mrf.mxu1  ;;  %v7691_v55 = vpop.f32.mrf.mxu0 }
0x202e   : > { %v6116_v36 = vadd.f32 %v7668_v57, %v7418_v45 }
0x202f   : > { %v7670_v53 = vpop.f32.mrf.mxu1  ;;  %v7692_v22 = vpop.f32.mrf.mxu0 }
0x2030   : > { %v6156_v1 = vadd.f32 %v7690_v12, %v6116_v36 }
0x2049   : > { %v7710_v18 = vpop.f32.mrf.mxu1  ;;  %v7732_v27 = vpop.f32.mrf.mxu0 }
0x204b   : > { %v7711_v54 = vpop.f32.mrf.mxu1  ;;  %v7733_v37 = vpop.f32.mrf.mxu0 }
0x204c   : > { %v7712_v4 = vadd.f32 %v7711_v54, %v7710_v18  ;;  %v7734_v11 = vadd.f32 %v7733_v37, %v7732_v27 }
0x204d   : > { %v7713_v40 = vpop.f32.mrf.mxu1  ;;  %v7735_v25 = vpop.f32.mrf.mxu0 }
0x204e   : > { %v6196_v5 = vadd.f32 %v7712_v4, %v6156_v1 }
0x204f   : > { %v7714_v10 = vpop.f32.mrf.mxu1  ;;  %v7736_v9 = vpop.f32.mrf.mxu0 }
0x2050   : > { %v6236_v14 = vadd.f32 %v7734_v11, %v6196_v5 }
0x2069   : > { %v7754_v26 = vpop.f32.mrf.mxu1 }
0x206a   : > { %v7776_v60 = vpop.f32.mrf.mxu0 }
0x206b   : > { %v7755_v7 = vpop.f32.mrf.mxu1 }
0x206c   : > { %v7777_v58 = vpop.f32.mrf.mxu0  ;;  %v7756_v13 = vadd.f32 %v7755_v7, %v7754_v26 }
0x206d   : > { %v7757_v62 = vpop.f32.mrf.mxu1  ;;  %v7778_v23 = vadd.f32 %v7777_v58, %v7776_v60 }
0x206e   : > { %v7779_v2 = vpop.f32.mrf.mxu0  ;;  %v6276_v15 = vadd.f32 %v7756_v13, %v6236_v14 }
0x206f   : > { %v7758_v29 = vpop.f32.mrf.mxu1 }
0x2070   : > { %v7780_v3 = vpop.f32.mrf.mxu0  ;;  %v6316_v32 = vadd.f32 %v7778_v23, %v6276_v15 }
0x2089   : > { %v7798_v34 = vpop.f32.mrf.mxu1 }
0x208a   : > { %v7820_v31 = vpop.f32.mrf.mxu0 }
0x208b   : > { %v7799_v35 = vpop.f32.mrf.mxu1 }
0x208c   : > { %v7800_v21 = vadd.f32 %v7799_v35, %v7798_v34  ;;  %v7821_v41 = vpop.f32.mrf.mxu0 }
0x208d   : > { %v7801_v16 = vpop.f32.mrf.mxu1  ;;  %v7822_v33 = vadd.f32 %v7821_v41, %v7820_v31 }
0x208e   : > { %v6356_v38 = vadd.f32 %v7800_v21, %v6316_v32  ;;  %v7823_v24 = vpop.f32.mrf.mxu0  ;;  %6405 = sbr.rel (%p7547_p1) target bundleno = 8915 (0x22d3), region = 164 }
0x208f   : > { %v7802_v39 = vpop.f32.mrf.mxu1 }
0x2090   : > { %v6396_v43 = vadd.f32 %v7822_v33, %v6356_v38  ;;  %v7824_v44 = vpop.f32.mrf.mxu0 }
0x2092   : > { %6401 = vst.msk [vmem:[#allocation2] sm:$0xff] %vm1551_vm1, %v6396_v43 }
0x2093   : > { %v6413_v46 = vld [vmem:[%s10039_s10 + $0x18] sm:$0xff]  ;;  %v8604_v48 = vmov 0.0   ;;  %v6412_v49 = vld [vmem:[%s10039_s10 + $0x10] sm:$0xff]  ;;  %v6411_v51 = vld [vmem:[%s10039_s10 + $0x8] sm:$0xff]  ;;  %vm8605_vm7 = vmmov 0   ;;  %v8606_v45 = vmov 0  }
0x2094   : > { %v6409_v47 = vld [vmem:[%s10040_s15 + $0x18] sm:$0xff]  ;;  %8085 = vmatprep.subr.mxu0 %v8604_v48  ;;  %8096 = vmatprep.subr.mxu1 %v8604_v48  ;;  %v6408_v50 = vld [vmem:[%s10041_s27 + $0x10] sm:$0xff]  ;;  %v6407_v63 = vld [vmem:[%s10041_s27 + $0x8] sm:$0xff]  ;;  %v7553_v25 = vsel %vm2482_vm11, 1.0, %v8604_v48  ;;  %v7554_v10 = vsel %vm3175_vm14, 1.0, %v8604_v48 }
0x2095   : > { %8086 = vmatpush3.msra.mxu0 %v6413_v46  ;;  %8097 = vmatpush3.msra.mxu1 %v6409_v47  ;;  %v6410_v61 = vld [vmem:[%s10039_s10] sm:$0xff]  ;;  %v6563_v59 = vld [vmem:[%s10042_s23 + $0x18] sm:$0xff]  ;;  %v6562_v0 = vld [vmem:[%s10043_s21 + $0x10] sm:$0xff]  ;;  %v6729_v26 = vrot.slane %v7553_v25, %v9172_v28  ;;  %v6742_v60 = vrot.slane %v7554_v10, %v9172_v28 }
0x2096   : > { %8087 = vmatprep.subr.mxu0 %v8604_v48  ;;  %8098 = vmatprep.subr.mxu1 %v8604_v48  ;;  %v6406_v56 = vld [vmem:[%s10041_s27] sm:$0xff]  ;;  %v6561_v6 = vld [vmem:[%s10043_s21 + $0x8] sm:$0xff] }
0x2097   : > { %8088 = vmatpush3.msra.mxu0 %v6412_v49  ;;  %8099 = vmatpush3.msra.mxu1 %v6408_v50  ;;  %v6747_v40 = vld [vmem:[%s10047_s11] sm:$0xff] }
0x2098   : > { %8089 = vmatprep.subr.mxu0 %v8604_v48  ;;  %8100 = vmatprep.subr.mxu1 %v8604_v48 }
0x2099   : > { %8090 = vmatpush3.msra.mxu0 %v6411_v51  ;;  %8101 = vmatpush3.msra.mxu1 %v6407_v63 }
0x209a   : > { %8091 = vmatprep.subr.mxu0 %v8604_v48  ;;  %8093 = vmatprep.mubr.msk.f32.mxu0 %vm8605_vm7, %v8604_v48 }
0x209b   : > { %8092 = vmatpush3.msra.mxu0 %v6410_v61  ;;  %8102 = vmatprep.subr.mxu1 %v8604_v48 }
0x209c   : > { %8094 = vmatmul.mubr.msk.f32.vlgmr.msra.gmra.mxu0 %vm1551_vm1, %v9489_v42  ;;  %8103 = vmatpush3.msra.mxu1 %v6406_v56  ;;  %v6560_v42 = vld [vmem:[%s10043_s21] sm:$0xff] }
0x209d   : > { %8104 = vmatprep.mubr.msk.f32.mxu1 %vm8605_vm7, %v8604_v48  ;;  %8107 = vmatprep.subr.mxu0 %v8604_v48 }
0x209e   : > { %8105 = vmatmul.mubr.msk.f32.vlgmr.msra.gmra.mxu1 %vm1551_vm1, %v6396_v43  ;;  %8108 = vmatpush3.msra.mxu0 %v6563_v59 }
0x209f   : > { %8109 = vmatprep.subr.mxu0 %v8604_v48  ;;  %8115 = vmatprep.mubr.msk.f32.mxu0 %vm8605_vm7, %v8604_v48 }
0x20a0   : > { %8110 = vmatpush3.msra.mxu0 %v6562_v0  ;;  %8118 = vmatprep.subr.mxu1 %v8604_v48 }
0x20a1   : > { %8111 = vmatprep.subr.mxu0 %v8604_v48  ;;  %8119 = vmatpush3.xpose.msk.msra.mxu1 %vm1551_vm1, %v9105_v52 }
0x20a2   : > { %8112 = vmatpush3.msra.mxu0 %v6561_v6  ;;  %8120 = vmatprep.mubr.msk.f32.mxu1 %vm8605_vm7, %v8604_v48 }
0x20a3   : > { %8113 = vmatprep.subr.mxu0 %v8604_v48  ;;  %8123 = vmatprep.subr.mxu1 %v8604_v48 }
0x20a4   : > { %8114 = vmatpush3.msra.mxu0 %v6560_v42  ;;  %8121 = vmatmul.mubr.msk.f32.vlgmr.msra.gmra.mxu1 %vm1551_vm1, %v6396_v43 }
0x20a5   : > { %8116 = vmatmul.mubr.msk.f32.vlgmr.msra.gmra.mxu0 %vm1551_vm1, %v9426_v19  ;;  %8125 = vmatprep.mubr.msk.f32.mxu1 %vm8605_vm7, %v8604_v48 }
0x20a6   : > { %8453 = vset.pattern.permute.xlu0 %v8606_v45  ;;  %8124 = vmatpush3.msra.mxu1 %v6747_v40 }
0x215c   : > { %v6483_v52 = vpop.f32.mrf.mxu0 }
0x215e   : > { %v6556_v20 = vpop.f32.mrf.mxu1  ;;  %v8095_v57 = vpop.f32.mrf.mxu0 }
0x215f   : > { %v6557_v12 = vadd.f32 %v6556_v20, %v6483_v52 }
0x2160   : > { %v8106_v8 = vpop.f32.mrf.mxu1 }
0x2164   : > { %v6712_v27 = vpop.f32.mrf.mxu1 }
0x2165   : > { %v6633_v17 = vpop.f32.mrf.mxu0 }
0x2166   : > { %v6637_v36 = vadd.f32 %v6633_v17, %v6557_v12  ;;  %v8122_v37 = vpop.f32.mrf.mxu1 }
0x2167   : > { %v8117_v55 = vpop.f32.mrf.mxu0 }
0x2168   : > { %v6638_v53 = vsub.f32 0.0, %v6637_v36 }
0x216a   : > { %v6639_v1 = vmul.f32 1.442695, %v6638_v53 }
0x216c   : > { %8454 = vpow2.f32 %v6639_v1 }
0x2179   : > { %v8455_v22 = vpop.eup %8454 }
0x217a   : > { %v6641_v19 = vadd.f32 1.0, %v8455_v22 }
0x217c   : > { %8456 = vrcp.f32 %v6641_v19 }
0x2189   : > { %v8457_v18 = vpop.eup %8456 }
0x218a   : > { %6722 = vperm.xlu0 %8453, %v8457_v18   ;;  %v6732_v54 = vsub.f32 1.0, %v8457_v18 }
0x218e   : > { %6735 = vperm.xlu0 %8453, %v6732_v54  }
0x2205   : > { %v6723_v9 = vpop.permute.xlu0 %6722 }
0x2206   : > { %v6731_v58 = vmul.f32 %v6729_v26, %v6723_v9 }
0x2209   : > { %v6736_v7 = vpop.permute.xlu0 %6735 }
0x220a   : > { %v6744_v62 = vmul.f32 %v6742_v60, %v6736_v7 }
0x220c   : > { %v6745_v2 = vadd.f32 %v6744_v62, %v6731_v58 }
0x220e   : > { %v6746_v29 = vmul.f32 %v6745_v2, %v6712_v27 }
0x2210   : > { %8126 = vmatmul.mubr.msk.f32.vlgmr.msra.gmra.mxu1 %vm1665_vm5, %v6746_v29 }
0x22d0   : > { %v6817_v3 = vpop.f32.mrf.mxu1 }
0x22d1   : > { %6821 = vst.msk [vmem:[%s1419_s20] sm:$0xff] %vm1665_vm5, %v6817_v3 }
0x22d2   : > { %v8127_v4 = vpop.f32.mrf.mxu1 }
0x22d3 PF: > { %s10048_s25 = sld [smem:[#allocation45_spill]]  ;;  %s6836_s7 = sshll.u32 %s1419_s20, 4  ;;  %s6837_s7 = int_to_ptr.vmem [resolvable:$true] %s6836_s7 }
0x22d4   : > { %s10049_s9 = sld [smem:[#allocation40_spill]]  ;;  %s8458_s13 = scalar_lea.vmem %s6837_s7, 128 }
0x22d5   : > { %s10051_s4 = sld [smem:[#allocation42_spill]]  ;;  %p8459_p2 = scmp.ne.s32.totalorder %s6837_s7, %s8458_s13 }
0x22d6   : > { %s8607_s30 = smov [#allocation3]  }
0x22d7   : > { %p8460_p4 = pnand %p8459_p2, %p8837_p3  ;;  %s8462_s6 = sshll.u32 %s8607_s30, 4  ;;  %s8463_s6 = int_to_ptr.vmem [resolvable:$false] %s8462_s6 }
0x22d8   : > { %s8464_s12 = scalar_lea.vmem %s8463_s6, 256  ;;  %p8465_p6 = scmp.lt.s32.totalorder %s6837_s7, %s8463_s6 }
0x22d9   : > { %s7557_s24 = sshll.u32 %s10048_s25, 7  ;;  %p8461_p5 = pneg %p8460_p4 }
0x22da   : > { %s6834_s2 = scalar_lea.hbm %s10049_s9, %s7557_s24  ;;  %p8466_p7 = scmp.lt.s32.totalorder %s8464_s12, %s8458_s13 }
0x22db   : > { %s10053_s22 = sand.u32 1, %s10051_s4  }
0x22dc   : > { %s6823_s5 = scalar_lea.sflag [#allocation4], %s10053_s22  ;;  %p8467_p8 = por %p8466_p7, %p8465_p6 }
0x22de   : > { %p8468_p10 = pnand %p8467_p8, %p8461_p5 }
0x22e0   : > { %8471 = shalt.err (!%p8468_p10)
}
0x22e1   : > { %s8472_s16 = scalar_lea.hbm %s6834_s2, 128  ;;  %s8476_s20 = scalar_lea.hbm %s10049_s9, 256 }
0x22e2   : > { %p8473_p11 = scmp.ne.s32.totalorder %s6834_s2, %s8472_s16  ;;  %p8477_p0 = scmp.lt.s32.totalorder %s6834_s2, %s10049_s9 }
0x22e3   : > { %p8478_p1 = scmp.lt.s32.totalorder %s8476_s20, %s8472_s16 }
0x22e4   : > { %p8474_p12 = pnand %p8473_p11, %p8837_p3 }
0x22e5   : > { %p8479_p2 = por %p8478_p1, %p8477_p0 }
0x22e6   : > { %p8475_p13 = pneg %p8474_p12 }
0x22e8   : > { %p8480_p4 = pnand %p8479_p2, %p8475_p13 }
0x22ea   : > { %8483 = shalt.err (!%p8480_p4)
}
0x22eb   : > { %8128 = dma.vmem_to_hbm [thread:$0]  (%p8837_p3), %s6837_s7, 128, %s6834_s2, %s6823_s5  }
0x22ec PF: > { %s10054_s29 = sld [smem:[#allocation48_spill]] }
0x22ed   : > { %s10055_s8 = sld [smem:[#allocation41_spill]] }
0x22f2   : > { %p8134_p5 = scmp.ge.s32.totalorder %s10054_s29, 2 }
0x22f3   : > { %s6848_s19 = sand.u32 1, %s10055_s8  }
0x22f4   : > { %p8131_p6 = pnand %p8134_p5, %p8847_p9  ;;  %s6849_s28 = scalar_lea.sflag [#allocation4], %s6848_s19 }
0x22f6   : > { %p8132_p7 = pneg %p8131_p6 }
0x22f8   : > { %8517 = dma.done.wait (%p8132_p7), %s6849_s28, 128  }
0x22f9   : > { %8519 = vsyncadd (%p8132_p7), %s6849_s28, 4294967168  ;;  %s82_s1 = sadd.s32 1, %s10054_s29   ;;  %s10057_s15 = sld [smem:[#allocation42_spill]] }
0x22fa   : > { %p79_p8 = scmp.ge.s32.totalorder %s82_s1, 6   ;;  %s10058_s16 = sld [smem:[#allocation43_spill]] }
0x22fb   : > { %s10059_s18 = sld [smem:[#allocation53_spill]] }
0x22fc   : > { %s10060_s22 = sld [smem:[#allocation46_spill]]  ;;  %81 = sbr.rel (!%p79_p8) target bundleno = 89 (0x59), region = 323 }
0x22fd   : > { %s10061_s23 = sld [smem:[#allocation47_spill]] }
0x22fe   : > { %s10062_s26 = sld [smem:[#allocation49_spill]] }
0x22ff   : > { %s10063_s28 = sld [smem:[#allocation51_spill]] }
0x2301   :  { %6854 = vsyncpa [#allocation4], 1 }
0x2302   :  { %6856 = vsyncpa [#allocation4 + $0x1], 1 }

</bundles_post_ra>
